<compile_context>
chip_gen: v7x
topology: tpu7x:2x2x1
jax: 0.10.0
libtpu: 0.0.40
codegen_flags: <defaults>
</compile_context>

<pallas_src>
import math

import numpy as np
import jax
import jax.numpy as jnp
from jax import lax
from jax.experimental import pallas as pl
from jax.experimental.pallas import tpu as pltpu

# ---------------------------------------------------------------------------
# constants from the PyTorch module
# ---------------------------------------------------------------------------
B_J0 = 0.01
R_M = 1.0
TAU_M = 20.0
DT = 1.0
BETA1 = 1.8
BETA2 = 5.0 * 1.8


# ---------------------------------------------------------------------------
# helpers
# ---------------------------------------------------------------------------
def _round_up(v, m):
    return ((v + m - 1) // m) * m


def _choose_time_block(T, cap=32):
    """Largest divisor of T that is <= cap (keeps T % Tb == 0)."""
    cap = max(1, min(cap, T))
    for tb in range(cap, 0, -1):
        if T % tb == 0:
            return tb
    return 1


def _full_spec(shape):
    nd = len(shape)
    return pl.BlockSpec(shape, lambda tb, _n=nd: (0,) * _n)


def _fuse_weights(wi, wh, k_off):
    """Stack [Wi ; 0-pad ; Wh] so that [x | 0 | spike] @ W == x@Wi + spike@Wh
    exactly (the padding rows are zero, and the padding lanes of the activation
    scratch are kept at exactly zero)."""
    d_in = wi.shape[0]
    pieces = [wi]
    if k_off > d_in:
        pieces.append(jnp.zeros((k_off - d_in, wi.shape[1]), wi.dtype))
    pieces.append(wh)
    return jnp.concatenate(pieces, axis=0)


# ---------------------------------------------------------------------------
# Pallas kernel
# ---------------------------------------------------------------------------
def _make_kernel(alpha, ro1, ro2, tb_steps, k_offs, slab_offs, precision):
    alpha = float(alpha)
    ro1 = float(ro1)
    ro2 = float(ro2)
    koff1, koff2, koff3 = k_offs
    off_o, off_s, off_m, off_t = slab_offs

    def kernel(
        # inputs
        x_ref,
        w1, bb1, w2, bb2, w3, bb3, wo, bo,
        mem1_0, mem2_0, mem3_0, spk1_0, spk2_0, spk3_0,
        # outputs
        slab_ref, fmem1, fmem2, fmem3, fspk1, fspk2, fspk3,
        # scratch (persistent recurrent state + matmul input staging)
        mem1, mem2, mem3, spk1, spk2, spk3,
        a11, a12, a21, a22, a31, a32,
        cat1, cat2, cat3,
    ):
        tb = pl.program_id(0)

        @pl.when(tb == 0)
        def _init():
            mem1[...] = mem1_0[...]
            mem2[...] = mem2_0[...]
            mem3[...] = mem3_0[...]
            spk1[...] = spk1_0[...]
            spk2[...] = spk2_0[...]
            spk3[...] = spk3_0[...]
            for r in (a11, a12, a21, a22, a31, a32):
                r[...] = jnp.full(r.shape, B_J0, dtype=jnp.float32)
            # Zero the K-padding lanes once; the matching weight rows are zero,
            # so the fused matmul stays exactly x@Wi + spike@Wh.
            for c in (cat1, cat2, cat3):
                c[...] = jnp.zeros(c.shape, jnp.float32)

        def dexat_update(inp, mem_ref, spk_ref, b1_ref, b2_ref):
            spike_old = spk_ref[...]
            b1 = ro1 * b1_ref[...] + (1.0 - ro1) * spike_old
            b2 = ro2 * b2_ref[...] + (1.0 - ro2) * spike_old
            B = B_J0 + BETA1 * b1 + BETA2 * b2
            mem = mem_ref[...] * alpha + (1.0 - alpha) * R_M * inp - B * spike_old * DT
            spike = (mem - B > 0.0).astype(jnp.float32)
            mem_ref[...] = mem
            spk_ref[...] = spike
            b1_ref[...] = b1
            b2_ref[...] = b2
            return mem, spike, B

        def fused_linear(lhs, w_ref, b_ref):
            return (jnp.dot(lhs, w_ref[...], precision=precision,
                            preferred_element_type=jnp.float32) + b_ref[...])

        def step(tt, carry):
            x = x_ref[tt]                              # (N_pad, D_in)

            # layer 1: one MXU launch for i2h + h2h
            cat1[:, :x.shape[1]] = x
            cat1[:, koff1:] = spk1[...]
            m1, s1, _ = dexat_update(fused_linear(cat1[...], w1, bb1),
                                     mem1, spk1, a11, a12)

            # layer 2
            cat2[:, :s1.shape[1]] = s1
            cat2[:, koff2:] = spk2[...]
            m2, s2, _ = dexat_update(fused_linear(cat2[...], w2, bb2),
                                     mem2, spk2, a21, a22)

            # layer 3
            cat3[:, :s2.shape[1]] = s2
            cat3[:, koff3:] = spk3[...]
            m3, s3, th3 = dexat_update(fused_linear(cat3[...], w3, bb3),
                                       mem3, spk3, a31, a32)

            # readout + fused lane-dense per-step outputs (128-aligned offsets)
            out = fused_linear(m3, wo, bo)
            slab_ref[tt, :, off_o:off_o + out.shape[1]] = out
            slab_ref[tt, :, off_s:off_s + s3.shape[1]] = s3
            slab_ref[tt, :, off_m:off_m + m3.shape[1]] = m3
            slab_ref[tt, :, off_t:off_t + th3.shape[1]] = th3
            return carry

        lax.fori_loop(0, tb_steps, step, 0, unroll=True)

        # only the last grid step's state matters for the final-state outputs
        @pl.when(tb == pl.num_programs(0) - 1)
        def _finalize():
            fmem1[...] = mem1[...]
            fmem2[...] = mem2[...]
            fmem3[...] = mem3[...]
            fspk1[...] = spk1[...]
            fspk2[...] = spk2[...]
            fspk3[...] = spk3[...]

    return kernel


# ---------------------------------------------------------------------------
# wrapper
# ---------------------------------------------------------------------------
def srnn_dexat_forward(x, params, init_state, tau_a1=30.0, tau_a2=300.0, *,
                       dot_precision=None, time_block=None, vmem_limit_bytes=None):
    """x: (N, T, in_size) float32 (PyTorch layout). Returns the same tuple as
    SRNN_DEXAT.forward: (output, final_state, fire_rate, hidden_spike,
    hidden_mem, hidden_theta)."""
    N, T, D_in = x.shape
    H1 = params["wh1"].shape[0]
    H2 = params["wh2"].shape[0]
    H3 = params["wh3"].shape[0]
    n_out = params["wo"].shape[1]

    alpha = math.exp(-DT / TAU_M)
    ro1 = math.exp(-DT / float(tau_a1))
    ro2 = math.exp(-DT / float(tau_a2))

    Tb = _choose_time_block(T) if time_block is None else int(time_block)
    if T % Tb != 0:
        raise ValueError(f"time_block={Tb} must divide T={T}")

    # pad batch to f32 sublane multiple
    N_pad = _round_up(N, 8)

    x_tm = jnp.transpose(x, (1, 0, 2)).astype(jnp.float32)      # (T, N, D_in)
    if N_pad != N:
        x_tm = jnp.pad(x_tm, ((0, 0), (0, N_pad - N), (0, 0)))

    def pad_batch(a):
        a = a.astype(jnp.float32)
        return jnp.pad(a, ((0, N_pad - N), (0, 0))) if N_pad != N else a

    mems = [pad_batch(m) for m in init_state["mem_list"]]
    spks = [pad_batch(s) for s in init_state["spike_list"]]

    # fused input + recurrent weights (zero rows keep the math exact)
    koff1 = _round_up(D_in, 128)
    koff2 = _round_up(H1, 128)
    koff3 = _round_up(H2, 128)
    w1 = _fuse_weights(params["wi1"], params["wh1"], koff1)
    w2 = _fuse_weights(params["wi2"], params["wh2"], koff2)
    w3 = _fuse_weights(params["wi3"], params["wh3"], koff3)
    bb1 = params["bi1"] + params["bh1"]
    bb2 = params["bi2"] + params["bh2"]
    bb3 = params["bi3"] + params["bh3"]

    # one lane-dense output slab: [out | spk3 | mem3 | theta3], 128-aligned fields
    w_out = _round_up(n_out, 128)
    w_h = _round_up(H3, 128)
    Wpad = w_out + 3 * w_h
    slab_offs = (0, w_out, w_out + w_h, w_out + 2 * w_h)

    in_arrays = (x_tm, w1, bb1, w2, bb2, w3, bb3, params["wo"], params["bo"],
                 mems[0], mems[1], mems[2], spks[0], spks[1], spks[2])

    in_specs = ([pl.BlockSpec((Tb, N_pad, D_in), lambda tb: (tb, 0, 0))]
                + [_full_spec(a.shape) for a in in_arrays[1:]])

    out_shapes = (
        jax.ShapeDtypeStruct((T, N_pad, Wpad), jnp.float32),     # fused per-step slab
        jax.ShapeDtypeStruct((N_pad, H1), jnp.float32),          # final mem1
        jax.ShapeDtypeStruct((N_pad, H2), jnp.float32),          # final mem2
        jax.ShapeDtypeStruct((N_pad, H3), jnp.float32),          # final mem3
        jax.ShapeDtypeStruct((N_pad, H1), jnp.float32),          # final spk1
        jax.ShapeDtypeStruct((N_pad, H2), jnp.float32),          # final spk2
        jax.ShapeDtypeStruct((N_pad, H3), jnp.float32),          # final spk3
    )
    out_specs = (
        pl.BlockSpec((Tb, N_pad, Wpad), lambda tb: (tb, 0, 0)),
        _full_spec((N_pad, H1)), _full_spec((N_pad, H2)), _full_spec((N_pad, H3)),
        _full_spec((N_pad, H1)), _full_spec((N_pad, H2)), _full_spec((N_pad, H3)),
    )

    scratch_shapes = [
        pltpu.VMEM((N_pad, H1), jnp.float32), pltpu.VMEM((N_pad, H2), jnp.float32),
        pltpu.VMEM((N_pad, H3), jnp.float32),                                       # mem
        pltpu.VMEM((N_pad, H1), jnp.float32), pltpu.VMEM((N_pad, H2), jnp.float32),
        pltpu.VMEM((N_pad, H3), jnp.float32),                                       # spike
        pltpu.VMEM((N_pad, H1), jnp.float32), pltpu.VMEM((N_pad, H1), jnp.float32), # b11,b12
        pltpu.VMEM((N_pad, H2), jnp.float32), pltpu.VMEM((N_pad, H2), jnp.float32), # b21,b22
        pltpu.VMEM((N_pad, H3), jnp.float32), pltpu.VMEM((N_pad, H3), jnp.float32), # b31,b32
        pltpu.VMEM((N_pad, koff1 + H1), jnp.float32),                               # cat1
        pltpu.VMEM((N_pad, koff2 + H2), jnp.float32),                               # cat2
        pltpu.VMEM((N_pad, koff3 + H3), jnp.float32),                               # cat3
    ]

    kernel = _make_kernel(alpha, ro1, ro2, Tb, (koff1, koff2, koff3), slab_offs,
                          dot_precision)

    cp_kwargs = dict(dimension_semantics=("arbitrary",))
    if vmem_limit_bytes is not None:
        cp_kwargs["vmem_limit_bytes"] = int(vmem_limit_bytes)

    results = pl.pallas_call(
        kernel,
        out_shape=out_shapes,
        grid=(T // Tb,),
        in_specs=in_specs,
        out_specs=out_specs,
        scratch_shapes=scratch_shapes,
        compiler_params=pltpu.CompilerParams(**cp_kwargs),
    )(*in_arrays)

    slab, fmem1, fmem2, fmem3, fspk1, fspk2, fspk3 = results

    # single transpose of the fused slab, then cheap column slices
    slab_nt = jnp.transpose(slab, (1, 0, 2))[:N]      # (N, T, Wpad)
    o0, o1, o2, o3 = slab_offs
    output = slab_nt[:, :, o0:o0 + n_out]
    hidden_spike = slab_nt[:, :, o1:o1 + H3]
    hidden_mem = slab_nt[:, :, o2:o2 + H3]
    hidden_theta = slab_nt[:, :, o3:o3 + H3]

    fmem1, fmem2, fmem3 = fmem1[:N], fmem2[:N], fmem3[:N]
    fspk1, fspk2, fspk3 = fspk1[:N], fspk2[:N], fspk3[:N]
    final_state = {"mem_list": [fmem1, fmem2, fmem3],
                   "spike_list": [fspk1, fspk2, fspk3]}

    n_nonzeros = jnp.sum(fspk1 != 0) + jnp.sum(fspk2 != 0) + jnp.sum(fspk3 != 0)
    n_neurons = fspk1.size + fspk2.size + fspk3.size
    fire_rate = (n_nonzeros / n_neurons).astype(jnp.float32)

    return output, final_state, fire_rate, hidden_spike, hidden_mem, hidden_theta


# ---------------------------------------------------------------------------
# pure-JAX reference (mirrors the PyTorch forward; the fused [x|0|spike] @ W
# form is mathematically identical to i2h(x) + h2h(spike)) for verification
# ---------------------------------------------------------------------------
def srnn_dexat_reference(x, params, init_state, tau_a1=30.0, tau_a2=300.0,
                         dot_precision=None):
    N, T, D_in = x.shape
    H1 = params["wh1"].shape[0]
    H2 = params["wh2"].shape[0]
    alpha = math.exp(-DT / TAU_M)
    ro1 = math.exp(-DT / float(tau_a1))
    ro2 = math.exp(-DT / float(tau_a2))

    koff1 = _round_up(D_in, 128)
    koff2 = _round_up(H1, 128)
    koff3 = _round_up(H2, 128)
    w1 = _fuse_weights(params["wi1"], params["wh1"], koff1)
    w2 = _fuse_weights(params["wi2"], params["wh2"], koff2)
    w3 = _fuse_weights(params["wi3"], params["wh3"], koff3)
    bb1 = params["bi1"] + params["bh1"]
    bb2 = params["bi2"] + params["bh2"]
    bb3 = params["bi3"] + params["bh3"]

    def catpad(a, k_off, b):
        pieces = [a]
        if k_off > a.shape[1]:
            pieces.append(jnp.zeros((a.shape[0], k_off - a.shape[1]), a.dtype))
        pieces.append(b)
        return jnp.concatenate(pieces, axis=-1)

    def lin(v, w, b):
        return jnp.dot(v, w, precision=dot_precision,
                       preferred_element_type=jnp.float32) + b

    def update(inp, mem, spike, b1, b2):
        b1 = ro1 * b1 + (1.0 - ro1) * spike
        b2 = ro2 * b2 + (1.0 - ro2) * spike
        B = B_J0 + BETA1 * b1 + BETA2 * b2
        mem = mem * alpha + (1.0 - alpha) * R_M * inp - B * spike * DT
        new_spike = (mem - B > 0.0).astype(jnp.float32)
        return mem, new_spike, B, b1, b2

    m1, m2, m3 = [a.astype(jnp.float32) for a in init_state["mem_list"]]
    s1, s2, s3 = [a.astype(jnp.float32) for a in init_state["spike_list"]]
    b11 = b12 = jnp.full_like(m1, B_J0)
    b21 = b22 = jnp.full_like(m2, B_J0)
    b31 = b32 = jnp.full_like(m3, B_J0)

    outs, hspk, hmem, hth = [], [], [], []
    for t in range(T):
        xt = x[:, t, :].astype(jnp.float32)
        h1 = lin(catpad(xt, koff1, s1), w1, bb1)
        m1, s1, _t1, b11, b12 = update(h1, m1, s1, b11, b12)
        h2 = lin(catpad(s1, koff2, s2), w2, bb2)
        m2, s2, _t2, b21, b22 = update(h2, m2, s2, b21, b22)
        h3 = lin(catpad(s2, koff3, s3), w3, bb3)
        m3, s3, t3, b31, b32 = update(h3, m3, s3, b31, b32)
        hspk.append(s3)
        hmem.append(m3)
        hth.append(t3)
        outs.append(lin(m3, params["wo"], params["bo"]))

    output = jnp.stack(outs, axis=1)
    hidden_spike = jnp.stack(hspk, axis=1)
    hidden_mem = jnp.stack(hmem, axis=1)
    hidden_theta = jnp.stack(hth, axis=1)
    final_state = {"mem_list": [m1, m2, m3], "spike_list": [s1, s2, s3]}
    n_nonzeros = jnp.sum(s1 != 0) + jnp.sum(s2 != 0) + jnp.sum(s3 != 0)
    fire_rate = (n_nonzeros / (s1.size + s2.size + s3.size)).astype(jnp.float32)
    return output, final_state, fire_rate, hidden_spike, hidden_mem, hidden_theta


# ---------------------------------------------------------------------------
# deterministic parameter construction (shapes from SRNN_DEXAT.__init__)
# ---------------------------------------------------------------------------
def _orthogonal(key, n):
    a = jax.random.normal(key, (n, n), dtype=jnp.float32)
    q, r = jnp.linalg.qr(a)
    return q * jnp.sign(jnp.diag(r))[None, :]


def _xavier_uniform(key, fan_in, fan_out):
    limit = math.sqrt(6.0 / (fan_in + fan_out))
    # stored transposed: (in_features, out_features)
    return jax.random.uniform(key, (fan_in, fan_out), dtype=jnp.float32,
                              minval=-limit, maxval=limit)


def make_params(key, in_size, cfg_fc, n_out):
    H1, H2, H3 = cfg_fc
    ks = jax.random.split(key, 8)
    params = {
        "wi1": _xavier_uniform(ks[0], in_size, H1), "bi1": jnp.zeros((1, H1), jnp.float32),
        "wh1": _orthogonal(ks[1], H1),              "bh1": jnp.zeros((1, H1), jnp.float32),
        "wi2": _xavier_uniform(ks[2], H1, H2),      "bi2": jnp.zeros((1, H2), jnp.float32),
        "wh2": _orthogonal(ks[3], H2),              "bh2": jnp.zeros((1, H2), jnp.float32),
        "wi3": _xavier_uniform(ks[4], H2, H3),      "bi3": jnp.zeros((1, H3), jnp.float32),
        "wh3": _orthogonal(ks[5], H3),              "bh3": jnp.zeros((1, H3), jnp.float32),
        "wo":  _xavier_uniform(ks[6], H3, n_out),
        # h2o_3.bias keeps nn.Linear's default (uniform +-1/sqrt(fan_in))
        "bo":  jax.random.uniform(ks[7], (1, n_out), jnp.float32,
                                  minval=-1.0 / math.sqrt(H3),
                                  maxval=1.0 / math.sqrt(H3)),
    }
    return params


def make_init_state(batch_size, cfg_fc):
    H1, H2, H3 = cfg_fc
    return {
        "mem_list": [jnp.zeros((batch_size, H1), jnp.float32),
                     jnp.zeros((batch_size, H2), jnp.float32),
                     jnp.zeros((batch_size, H3), jnp.float32)],
        "spike_list": [jnp.zeros((batch_size, H1), jnp.float32),
                       jnp.zeros((batch_size, H2), jnp.float32),
                       jnp.zeros((batch_size, H3), jnp.float32)],
    }


# ---------------------------------------------------------------------------
if __name__ == "__main__":
    key = jax.random.PRNGKey(0)
    N, T, IN_SIZE = 2, 8, 16
    CFG_FC = (32, 32, 32)
    N_OUT = 2
    TAU_A1, TAU_A2 = 30.0, 300.0

    k_x, k_p = jax.random.split(key)
    # scale input so the spiking non-linearity actually fires
    x = 2.0 * jax.random.normal(k_x, (N, T, IN_SIZE), dtype=jnp.float32)
    params = make_params(k_p, IN_SIZE, CFG_FC, N_OUT)
    state0 = make_init_state(N, CFG_FC)

    # fast path (default MXU precision) -- the configuration used in practice
    fast = srnn_dexat_forward(x, params, state0, TAU_A1, TAU_A2)
    jax.block_until_ready(fast)
    assert fast[0].shape == (N, T, N_OUT)
    assert bool(jnp.all(jnp.isfinite(fast[0])))

    # tight-comparison path: kernel and reference both at HIGHEST precision so
    # the spike threshold decisions agree with the reference.
    hi = jax.lax.Precision.HIGHEST
    out, fstate, rate, hspk, hmem, hth = srnn_dexat_forward(
        x, params, state0, TAU_A1, TAU_A2, dot_precision=hi)
    jax.block_until_ready(out)
    (ref_out, ref_state, ref_rate, ref_hspk, ref_hmem, ref_hth
     ) = srnn_dexat_reference(x, params, state0, TAU_A1, TAU_A2, dot_precision=hi)

    np.testing.assert_allclose(np.asarray(out), np.asarray(ref_out), rtol=1e-4, atol=1e-4)
    np.testing.assert_allclose(np.asarray(hspk), np.asarray(ref_hspk), rtol=1e-4, atol=1e-4)
    np.testing.assert_allclose(np.asarray(hmem), np.asarray(ref_hmem), rtol=1e-4, atol=1e-4)
    np.testing.assert_allclose(np.asarray(hth), np.asarray(ref_hth), rtol=1e-4, atol=1e-4)
    for a, b in zip(fstate["mem_list"] + fstate["spike_list"],
                    ref_state["mem_list"] + ref_state["spike_list"]):
        np.testing.assert_allclose(np.asarray(a), np.asarray(b), rtol=1e-4, atol=1e-4)
    np.testing.assert_allclose(np.asarray(rate), np.asarray(ref_rate), rtol=1e-5, atol=1e-5)

    print("KERNEL_OK")
</pallas_src>

<mosaic_0001>
module attributes {stable_mosaic.version = 11 : i64} {
  func.func @kernel(%arg0: i32, %arg1: memref<8x8x16xf32, #tpu.memory_space<vmem>>, %arg2: memref<160x32xf32, #tpu.memory_space<vmem>>, %arg3: memref<1x32xf32, #tpu.memory_space<vmem>>, %arg4: memref<160x32xf32, #tpu.memory_space<vmem>>, %arg5: memref<1x32xf32, #tpu.memory_space<vmem>>, %arg6: memref<160x32xf32, #tpu.memory_space<vmem>>, %arg7: memref<1x32xf32, #tpu.memory_space<vmem>>, %arg8: memref<32x2xf32, #tpu.memory_space<vmem>>, %arg9: memref<1x2xf32, #tpu.memory_space<vmem>>, %arg10: memref<8x32xf32, #tpu.memory_space<vmem>>, %arg11: memref<8x32xf32, #tpu.memory_space<vmem>>, %arg12: memref<8x32xf32, #tpu.memory_space<vmem>>, %arg13: memref<8x32xf32, #tpu.memory_space<vmem>>, %arg14: memref<8x32xf32, #tpu.memory_space<vmem>>, %arg15: memref<8x32xf32, #tpu.memory_space<vmem>>, %arg16: memref<8x8x512xf32, #tpu.memory_space<vmem>>, %arg17: memref<8x32xf32, #tpu.memory_space<vmem>>, %arg18: memref<8x32xf32, #tpu.memory_space<vmem>>, %arg19: memref<8x32xf32, #tpu.memory_space<vmem>>, %arg20: memref<8x32xf32, #tpu.memory_space<vmem>>, %arg21: memref<8x32xf32, #tpu.memory_space<vmem>>, %arg22: memref<8x32xf32, #tpu.memory_space<vmem>>, %arg23: memref<8x32xf32, #tpu.memory_space<vmem>>, %arg24: memref<8x32xf32, #tpu.memory_space<vmem>>, %arg25: memref<8x32xf32, #tpu.memory_space<vmem>>, %arg26: memref<8x32xf32, #tpu.memory_space<vmem>>, %arg27: memref<8x32xf32, #tpu.memory_space<vmem>>, %arg28: memref<8x32xf32, #tpu.memory_space<vmem>>, %arg29: memref<8x32xf32, #tpu.memory_space<vmem>>, %arg30: memref<8x32xf32, #tpu.memory_space<vmem>>, %arg31: memref<8x32xf32, #tpu.memory_space<vmem>>, %arg32: memref<8x32xf32, #tpu.memory_space<vmem>>, %arg33: memref<8x32xf32, #tpu.memory_space<vmem>>, %arg34: memref<8x32xf32, #tpu.memory_space<vmem>>, %arg35: memref<8x160xf32, #tpu.memory_space<vmem>>, %arg36: memref<8x160xf32, #tpu.memory_space<vmem>>, %arg37: memref<8x160xf32, #tpu.memory_space<vmem>>) attributes {dimension_semantics = [#tpu.dimension_semantics<arbitrary>], iteration_bounds = array<i64: 1>, scalar_prefetch = 0 : i64, scratch_operands = 15 : i64, tpu.core_type = #tpu.core_type<tc>, window_params = [{transform_indices = @transform_0, window_bounds = array<i64: 8, 8, 16>}, {pipeline_mode = #tpu.pipeline_mode<synchronous>, transform_indices = @transform_1, window_bounds = array<i64: 160, 32>}, {pipeline_mode = #tpu.pipeline_mode<synchronous>, transform_indices = @transform_2, window_bounds = array<i64: 1, 32>}, {pipeline_mode = #tpu.pipeline_mode<synchronous>, transform_indices = @transform_3, window_bounds = array<i64: 160, 32>}, {pipeline_mode = #tpu.pipeline_mode<synchronous>, transform_indices = @transform_4, window_bounds = array<i64: 1, 32>}, {pipeline_mode = #tpu.pipeline_mode<synchronous>, transform_indices = @transform_5, window_bounds = array<i64: 160, 32>}, {pipeline_mode = #tpu.pipeline_mode<synchronous>, transform_indices = @transform_6, window_bounds = array<i64: 1, 32>}, {pipeline_mode = #tpu.pipeline_mode<synchronous>, transform_indices = @transform_7, window_bounds = array<i64: 32, 2>}, {pipeline_mode = #tpu.pipeline_mode<synchronous>, transform_indices = @transform_8, window_bounds = array<i64: 1, 2>}, {pipeline_mode = #tpu.pipeline_mode<synchronous>, transform_indices = @transform_9, window_bounds = array<i64: 8, 32>}, {pipeline_mode = #tpu.pipeline_mode<synchronous>, transform_indices = @transform_10, window_bounds = array<i64: 8, 32>}, {pipeline_mode = #tpu.pipeline_mode<synchronous>, transform_indices = @transform_11, window_bounds = array<i64: 8, 32>}, {pipeline_mode = #tpu.pipeline_mode<synchronous>, transform_indices = @transform_12, window_bounds = array<i64: 8, 32>}, {pipeline_mode = #tpu.pipeline_mode<synchronous>, transform_indices = @transform_13, window_bounds = array<i64: 8, 32>}, {pipeline_mode = #tpu.pipeline_mode<synchronous>, transform_indices = @transform_14, window_bounds = array<i64: 8, 32>}, {transform_indices = @transform_15, window_bounds = array<i64: 8, 8, 512>}, {pipeline_mode = #tpu.pipeline_mode<synchronous>, transform_indices = @transform_16, window_bounds = array<i64: 8, 32>}, {pipeline_mode = #tpu.pipeline_mode<synchronous>, transform_indices = @transform_17, window_bounds = array<i64: 8, 32>}, {pipeline_mode = #tpu.pipeline_mode<synchronous>, transform_indices = @transform_18, window_bounds = array<i64: 8, 32>}, {pipeline_mode = #tpu.pipeline_mode<synchronous>, transform_indices = @transform_19, window_bounds = array<i64: 8, 32>}, {pipeline_mode = #tpu.pipeline_mode<synchronous>, transform_indices = @transform_20, window_bounds = array<i64: 8, 32>}, {pipeline_mode = #tpu.pipeline_mode<synchronous>, transform_indices = @transform_21, window_bounds = array<i64: 8, 32>}]} {
    %c0_i32 = arith.constant 0 : i32
    %0 = arith.cmpi eq, %arg0, %c0_i32 : i32
    %1 = arith.extui %0 : i1 to i32
    %c0_i32_0 = arith.constant 0 : i32
    %2 = arith.cmpi ne, %1, %c0_i32_0 : i32
    scf.if %2 {
      %c0_1079 = arith.constant 0 : index
      %c0_1080 = arith.constant 0 : index
      %1350 = vector.load %arg10[%c0_1079, %c0_1080] : memref<8x32xf32, #tpu.memory_space<vmem>>, vector<8x32xf32>
      %c0_1081 = arith.constant 0 : index
      %c0_1082 = arith.constant 0 : index
      %1351 = vector.load %arg23[%c0_1081, %c0_1082] : memref<8x32xf32, #tpu.memory_space<vmem>>, vector<8x32xf32>
      tpu.vector_store %arg23[%c0_1081, %c0_1082], %1350 {strides = array<i32>} : memref<8x32xf32, #tpu.memory_space<vmem>>, vector<8x32xf32>,
      %c0_1083 = arith.constant 0 : index
      %c0_1084 = arith.constant 0 : index
      %1352 = vector.load %arg11[%c0_1083, %c0_1084] : memref<8x32xf32, #tpu.memory_space<vmem>>, vector<8x32xf32>
      %c0_1085 = arith.constant 0 : index
      %c0_1086 = arith.constant 0 : index
      %1353 = vector.load %arg24[%c0_1085, %c0_1086] : memref<8x32xf32, #tpu.memory_space<vmem>>, vector<8x32xf32>
      tpu.vector_store %arg24[%c0_1085, %c0_1086], %1352 {strides = array<i32>} : memref<8x32xf32, #tpu.memory_space<vmem>>, vector<8x32xf32>,
      %c0_1087 = arith.constant 0 : index
      %c0_1088 = arith.constant 0 : index
      %1354 = vector.load %arg12[%c0_1087, %c0_1088] : memref<8x32xf32, #tpu.memory_space<vmem>>, vector<8x32xf32>
      %c0_1089 = arith.constant 0 : index
      %c0_1090 = arith.constant 0 : index
      %1355 = vector.load %arg25[%c0_1089, %c0_1090] : memref<8x32xf32, #tpu.memory_space<vmem>>, vector<8x32xf32>
      tpu.vector_store %arg25[%c0_1089, %c0_1090], %1354 {strides = array<i32>} : memref<8x32xf32, #tpu.memory_space<vmem>>, vector<8x32xf32>,
      %c0_1091 = arith.constant 0 : index
      %c0_1092 = arith.constant 0 : index
      %1356 = vector.load %arg13[%c0_1091, %c0_1092] : memref<8x32xf32, #tpu.memory_space<vmem>>, vector<8x32xf32>
      %c0_1093 = arith.constant 0 : index
      %c0_1094 = arith.constant 0 : index
      %1357 = vector.load %arg26[%c0_1093, %c0_1094] : memref<8x32xf32, #tpu.memory_space<vmem>>, vector<8x32xf32>
      tpu.vector_store %arg26[%c0_1093, %c0_1094], %1356 {strides = array<i32>} : memref<8x32xf32, #tpu.memory_space<vmem>>, vector<8x32xf32>,
      %c0_1095 = arith.constant 0 : index
      %c0_1096 = arith.constant 0 : index
      %1358 = vector.load %arg14[%c0_1095, %c0_1096] : memref<8x32xf32, #tpu.memory_space<vmem>>, vector<8x32xf32>
      %c0_1097 = arith.constant 0 : index
      %c0_1098 = arith.constant 0 : index
      %1359 = vector.load %arg27[%c0_1097, %c0_1098] : memref<8x32xf32, #tpu.memory_space<vmem>>, vector<8x32xf32>
      tpu.vector_store %arg27[%c0_1097, %c0_1098], %1358 {strides = array<i32>} : memref<8x32xf32, #tpu.memory_space<vmem>>, vector<8x32xf32>,
      %c0_1099 = arith.constant 0 : index
      %c0_1100 = arith.constant 0 : index
      %1360 = vector.load %arg15[%c0_1099, %c0_1100] : memref<8x32xf32, #tpu.memory_space<vmem>>, vector<8x32xf32>
      %c0_1101 = arith.constant 0 : index
      %c0_1102 = arith.constant 0 : index
      %1361 = vector.load %arg28[%c0_1101, %c0_1102] : memref<8x32xf32, #tpu.memory_space<vmem>>, vector<8x32xf32>
      tpu.vector_store %arg28[%c0_1101, %c0_1102], %1360 {strides = array<i32>} : memref<8x32xf32, #tpu.memory_space<vmem>>, vector<8x32xf32>,
      %cst_1103 = arith.constant 0.00999999977 : f32
      %1362 = vector.broadcast %cst_1103 : f32 to vector<8x32xf32>
      %c0_1104 = arith.constant 0 : index
      %c0_1105 = arith.constant 0 : index
      %1363 = vector.load %arg29[%c0_1104, %c0_1105] : memref<8x32xf32, #tpu.memory_space<vmem>>, vector<8x32xf32>
      tpu.vector_store %arg29[%c0_1104, %c0_1105], %1362 {strides = array<i32>} : memref<8x32xf32, #tpu.memory_space<vmem>>, vector<8x32xf32>,
      %cst_1106 = arith.constant 0.00999999977 : f32
      %1364 = vector.broadcast %cst_1106 : f32 to vector<8x32xf32>
      %c0_1107 = arith.constant 0 : index
      %c0_1108 = arith.constant 0 : index
      %1365 = vector.load %arg30[%c0_1107, %c0_1108] : memref<8x32xf32, #tpu.memory_space<vmem>>, vector<8x32xf32>
      tpu.vector_store %arg30[%c0_1107, %c0_1108], %1364 {strides = array<i32>} : memref<8x32xf32, #tpu.memory_space<vmem>>, vector<8x32xf32>,
      %cst_1109 = arith.constant 0.00999999977 : f32
      %1366 = vector.broadcast %cst_1109 : f32 to vector<8x32xf32>
      %c0_1110 = arith.constant 0 : index
      %c0_1111 = arith.constant 0 : index
      %1367 = vector.load %arg31[%c0_1110, %c0_1111] : memref<8x32xf32, #tpu.memory_space<vmem>>, vector<8x32xf32>
      tpu.vector_store %arg31[%c0_1110, %c0_1111], %1366 {strides = array<i32>} : memref<8x32xf32, #tpu.memory_space<vmem>>, vector<8x32xf32>,
      %cst_1112 = arith.constant 0.00999999977 : f32
      %1368 = vector.broadcast %cst_1112 : f32 to vector<8x32xf32>
      %c0_1113 = arith.constant 0 : index
      %c0_1114 = arith.constant 0 : index
      %1369 = vector.load %arg32[%c0_1113, %c0_1114] : memref<8x32xf32, #tpu.memory_space<vmem>>, vector<8x32xf32>
      tpu.vector_store %arg32[%c0_1113, %c0_1114], %1368 {strides = array<i32>} : memref<8x32xf32, #tpu.memory_space<vmem>>, vector<8x32xf32>,
      %cst_1115 = arith.constant 0.00999999977 : f32
      %1370 = vector.broadcast %cst_1115 : f32 to vector<8x32xf32>
      %c0_1116 = arith.constant 0 : index
      %c0_1117 = arith.constant 0 : index
      %1371 = vector.load %arg33[%c0_1116, %c0_1117] : memref<8x32xf32, #tpu.memory_space<vmem>>, vector<8x32xf32>
      tpu.vector_store %arg33[%c0_1116, %c0_1117], %1370 {strides = array<i32>} : memref<8x32xf32, #tpu.memory_space<vmem>>, vector<8x32xf32>,
      %cst_1118 = arith.constant 0.00999999977 : f32
      %1372 = vector.broadcast %cst_1118 : f32 to vector<8x32xf32>
      %c0_1119 = arith.constant 0 : index
      %c0_1120 = arith.constant 0 : index
      %1373 = vector.load %arg34[%c0_1119, %c0_1120] : memref<8x32xf32, #tpu.memory_space<vmem>>, vector<8x32xf32>
      tpu.vector_store %arg34[%c0_1119, %c0_1120], %1372 {strides = array<i32>} : memref<8x32xf32, #tpu.memory_space<vmem>>, vector<8x32xf32>,
      %cst_1121 = arith.constant 0.000000e+00 : f32
      %1374 = vector.broadcast %cst_1121 : f32 to vector<8x160xf32>
      %c0_1122 = arith.constant 0 : index
      %c0_1123 = arith.constant 0 : index
      %1375 = vector.load %arg35[%c0_1122, %c0_1123] : memref<8x160xf32, #tpu.memory_space<vmem>>, vector<8x160xf32>
      tpu.vector_store %arg35[%c0_1122, %c0_1123], %1374 {strides = array<i32>} : memref<8x160xf32, #tpu.memory_space<vmem>>, vector<8x160xf32>,
      %cst_1124 = arith.constant 0.000000e+00 : f32
      %1376 = vector.broadcast %cst_1124 : f32 to vector<8x160xf32>
      %c0_1125 = arith.constant 0 : index
      %c0_1126 = arith.constant 0 : index
      %1377 = vector.load %arg36[%c0_1125, %c0_1126] : memref<8x160xf32, #tpu.memory_space<vmem>>, vector<8x160xf32>
      tpu.vector_store %arg36[%c0_1125, %c0_1126], %1376 {strides = array<i32>} : memref<8x160xf32, #tpu.memory_space<vmem>>, vector<8x160xf32>,
      %cst_1127 = arith.constant 0.000000e+00 : f32
      %1378 = vector.broadcast %cst_1127 : f32 to vector<8x160xf32>
      %c0_1128 = arith.constant 0 : index
      %c0_1129 = arith.constant 0 : index
      %1379 = vector.load %arg37[%c0_1128, %c0_1129] : memref<8x160xf32, #tpu.memory_space<vmem>>, vector<8x160xf32>
      tpu.vector_store %arg37[%c0_1128, %c0_1129], %1378 {strides = array<i32>} : memref<8x160xf32, #tpu.memory_space<vmem>>, vector<8x160xf32>,
    } else {
    }
    %c0_i32_1 = arith.constant 0 : i32
    %3 = arith.index_cast %c0_i32_1 : i32 to index
    %c0 = arith.constant 0 : index
    %c0_2 = arith.constant 0 : index
    %4 = vector.load %arg1[%3, %c0, %c0_2] : memref<8x8x16xf32, #tpu.memory_space<vmem>>, vector<1x8x16xf32>
    %5 = vector.shape_cast %4 : vector<1x8x16xf32> to vector<8x16xf32>
    %c0_3 = arith.constant 0 : index
    %c0_4 = arith.constant 0 : index
    %6 = vector.load %arg35[%c0_3, %c0_4] : memref<8x160xf32, #tpu.memory_space<vmem>>, vector<8x16xf32>
    tpu.vector_store %arg35[%c0_3, %c0_4], %5 {strides = array<i32>} : memref<8x160xf32, #tpu.memory_space<vmem>>, vector<8x16xf32>,
    %c0_5 = arith.constant 0 : index
    %c0_6 = arith.constant 0 : index
    %7 = vector.load %arg26[%c0_5, %c0_6] : memref<8x32xf32, #tpu.memory_space<vmem>>, vector<8x32xf32>
    %c0_7 = arith.constant 0 : index
    %c128 = arith.constant 128 : index
    %8 = vector.load %arg35[%c0_7, %c128] : memref<8x160xf32, #tpu.memory_space<vmem>>, vector<8x32xf32>
    tpu.vector_store %arg35[%c0_7, %c128], %7 {strides = array<i32>} : memref<8x160xf32, #tpu.memory_space<vmem>>, vector<8x32xf32>,
    %c0_8 = arith.constant 0 : index
    %c0_9 = arith.constant 0 : index
    %9 = vector.load %arg35[%c0_8, %c0_9] : memref<8x160xf32, #tpu.memory_space<vmem>>, vector<8x160xf32>
    %c0_10 = arith.constant 0 : index
    %c0_11 = arith.constant 0 : index
    %10 = vector.load %arg2[%c0_10, %c0_11] : memref<160x32xf32, #tpu.memory_space<vmem>>, vector<160x32xf32>
    %cst = arith.constant dense<0.000000e+00> : vector<8x32xf32>
    %11 = tpu.matmul %9, %10, %cst {dimension_numbers = #tpu.dot_dimension_numbers<[1], [0], [0], [1], [0, 0, 1, 1], [], []>} : vector<8x160xf32>, vector<160x32xf32>, vector<8x32xf32> -> vector<8x32xf32>
    %c0_12 = arith.constant 0 : index
    %c0_13 = arith.constant 0 : index
    %12 = vector.load %arg3[%c0_12, %c0_13] : memref<1x32xf32, #tpu.memory_space<vmem>>, vector<1x32xf32>
    %13 = vector.broadcast %12 : vector<1x32xf32> to vector<8x32xf32>
    %14 = arith.addf %11, %13 : vector<8x32xf32>
    %c0_14 = arith.constant 0 : index
    %c0_15 = arith.constant 0 : index
    %15 = vector.load %arg26[%c0_14, %c0_15] : memref<8x32xf32, #tpu.memory_space<vmem>>, vector<8x32xf32>
    %c0_16 = arith.constant 0 : index
    %c0_17 = arith.constant 0 : index
    %16 = vector.load %arg29[%c0_16, %c0_17] : memref<8x32xf32, #tpu.memory_space<vmem>>, vector<8x32xf32>
    %cst_18 = arith.constant 0.967216074 : f32
    %17 = vector.broadcast %cst_18 : f32 to vector<8x32xf32>
    %18 = arith.mulf %17, %16 : vector<8x32xf32>
    %cst_19 = arith.constant 3.278390e-02 : f32
    %19 = vector.broadcast %cst_19 : f32 to vector<8x32xf32>
    %20 = arith.mulf %19, %15 : vector<8x32xf32>
    %21 = arith.addf %18, %20 : vector<8x32xf32>
    %c0_20 = arith.constant 0 : index
    %c0_21 = arith.constant 0 : index
    %22 = vector.load %arg30[%c0_20, %c0_21] : memref<8x32xf32, #tpu.memory_space<vmem>>, vector<8x32xf32>
    %cst_22 = arith.constant 0.996672213 : f32
    %23 = vector.broadcast %cst_22 : f32 to vector<8x32xf32>
    %24 = arith.mulf %23, %22 : vector<8x32xf32>
    %cst_23 = arith.constant 0.0033277839 : f32
    %25 = vector.broadcast %cst_23 : f32 to vector<8x32xf32>
    %26 = arith.mulf %25, %15 : vector<8x32xf32>
    %27 = arith.addf %24, %26 : vector<8x32xf32>
    %cst_24 = arith.constant 1.800000e+00 : f32
    %28 = vector.broadcast %cst_24 : f32 to vector<8x32xf32>
    %29 = arith.mulf %28, %21 : vector<8x32xf32>
    %cst_25 = arith.constant 0.00999999977 : f32
    %30 = vector.broadcast %cst_25 : f32 to vector<8x32xf32>
    %31 = arith.addf %30, %29 : vector<8x32xf32>
    %cst_26 = arith.constant 9.000000e+00 : f32
    %32 = vector.broadcast %cst_26 : f32 to vector<8x32xf32>
    %33 = arith.mulf %32, %27 : vector<8x32xf32>
    %34 = arith.addf %31, %33 : vector<8x32xf32>
    %c0_27 = arith.constant 0 : index
    %c0_28 = arith.constant 0 : index
    %35 = vector.load %arg23[%c0_27, %c0_28] : memref<8x32xf32, #tpu.memory_space<vmem>>, vector<8x32xf32>
    %cst_29 = arith.constant 0.951229453 : f32
    %36 = vector.broadcast %cst_29 : f32 to vector<8x32xf32>
    %37 = arith.mulf %35, %36 : vector<8x32xf32>
    %cst_30 = arith.constant 0.0487705767 : f32
    %38 = vector.broadcast %cst_30 : f32 to vector<8x32xf32>
    %39 = arith.mulf %38, %14 : vector<8x32xf32>
    %40 = arith.addf %37, %39 : vector<8x32xf32>
    %41 = arith.mulf %34, %15 : vector<8x32xf32>
    %cst_31 = arith.constant 1.000000e+00 : f32
    %42 = vector.broadcast %cst_31 : f32 to vector<8x32xf32>
    %43 = arith.mulf %41, %42 : vector<8x32xf32>
    %44 = arith.subf %40, %43 : vector<8x32xf32>
    %45 = arith.subf %44, %34 : vector<8x32xf32>
    %cst_32 = arith.constant 0.000000e+00 : f32
    %46 = vector.broadcast %cst_32 : f32 to vector<8x32xf32>
    %47 = arith.cmpf ogt, %45, %46 : vector<8x32xf32>
    %48 = arith.extui %47 : vector<8x32xi1> to vector<8x32xi32>
    %49 = arith.sitofp %48 : vector<8x32xi32> to vector<8x32xf32>
    %c0_33 = arith.constant 0 : index
    %c0_34 = arith.constant 0 : index
    %50 = vector.load %arg23[%c0_33, %c0_34] : memref<8x32xf32, #tpu.memory_space<vmem>>, vector<8x32xf32>
    tpu.vector_store %arg23[%c0_33, %c0_34], %44 {strides = array<i32>} : memref<8x32xf32, #tpu.memory_space<vmem>>, vector<8x32xf32>,
    %c0_35 = arith.constant 0 : index
    %c0_36 = arith.constant 0 : index
    %51 = vector.load %arg26[%c0_35, %c0_36] : memref<8x32xf32, #tpu.memory_space<vmem>>, vector<8x32xf32>
    tpu.vector_store %arg26[%c0_35, %c0_36], %49 {strides = array<i32>} : memref<8x32xf32, #tpu.memory_space<vmem>>, vector<8x32xf32>,
    %c0_37 = arith.constant 0 : index
    %c0_38 = arith.constant 0 : index
    %52 = vector.load %arg29[%c0_37, %c0_38] : memref<8x32xf32, #tpu.memory_space<vmem>>, vector<8x32xf32>
    tpu.vector_store %arg29[%c0_37, %c0_38], %21 {strides = array<i32>} : memref<8x32xf32, #tpu.memory_space<vmem>>, vector<8x32xf32>,
    %c0_39 = arith.constant 0 : index
    %c0_40 = arith.constant 0 : index
    %53 = vector.load %arg30[%c0_39, %c0_40] : memref<8x32xf32, #tpu.memory_space<vmem>>, vector<8x32xf32>
    tpu.vector_store %arg30[%c0_39, %c0_40], %27 {strides = array<i32>} : memref<8x32xf32, #tpu.memory_space<vmem>>, vector<8x32xf32>,
    %c0_41 = arith.constant 0 : index
    %c0_42 = arith.constant 0 : index
    %54 = vector.load %arg36[%c0_41, %c0_42] : memref<8x160xf32, #tpu.memory_space<vmem>>, vector<8x32xf32>
    tpu.vector_store %arg36[%c0_41, %c0_42], %49 {strides = array<i32>} : memref<8x160xf32, #tpu.memory_space<vmem>>, vector<8x32xf32>,
    %c0_43 = arith.constant 0 : index
    %c0_44 = arith.constant 0 : index
    %55 = vector.load %arg27[%c0_43, %c0_44] : memref<8x32xf32, #tpu.memory_space<vmem>>, vector<8x32xf32>
    %c0_45 = arith.constant 0 : index
    %c128_46 = arith.constant 128 : index
    %56 = vector.load %arg36[%c0_45, %c128_46] : memref<8x160xf32, #tpu.memory_space<vmem>>, vector<8x32xf32>
    tpu.vector_store %arg36[%c0_45, %c128_46], %55 {strides = array<i32>} : memref<8x160xf32, #tpu.memory_space<vmem>>, vector<8x32xf32>,
    %c0_47 = arith.constant 0 : index
    %c0_48 = arith.constant 0 : index
    %57 = vector.load %arg36[%c0_47, %c0_48] : memref<8x160xf32, #tpu.memory_space<vmem>>, vector<8x160xf32>
    %c0_49 = arith.constant 0 : index
    %c0_50 = arith.constant 0 : index
    %58 = vector.load %arg4[%c0_49, %c0_50] : memref<160x32xf32, #tpu.memory_space<vmem>>, vector<160x32xf32>
    %cst_51 = arith.constant dense<0.000000e+00> : vector<8x32xf32>
    %59 = tpu.matmul %57, %58, %cst_51 {dimension_numbers = #tpu.dot_dimension_numbers<[1], [0], [0], [1], [0, 0, 1, 1], [], []>} : vector<8x160xf32>, vector<160x32xf32>, vector<8x32xf32> -> vector<8x32xf32>
    %c0_52 = arith.constant 0 : index
    %c0_53 = arith.constant 0 : index
    %60 = vector.load %arg5[%c0_52, %c0_53] : memref<1x32xf32, #tpu.memory_space<vmem>>, vector<1x32xf32>
    %61 = vector.broadcast %60 : vector<1x32xf32> to vector<8x32xf32>
    %62 = arith.addf %59, %61 : vector<8x32xf32>
    %c0_54 = arith.constant 0 : index
    %c0_55 = arith.constant 0 : index
    %63 = vector.load %arg27[%c0_54, %c0_55] : memref<8x32xf32, #tpu.memory_space<vmem>>, vector<8x32xf32>
    %c0_56 = arith.constant 0 : index
    %c0_57 = arith.constant 0 : index
    %64 = vector.load %arg31[%c0_56, %c0_57] : memref<8x32xf32, #tpu.memory_space<vmem>>, vector<8x32xf32>
    %cst_58 = arith.constant 0.967216074 : f32
    %65 = vector.broadcast %cst_58 : f32 to vector<8x32xf32>
    %66 = arith.mulf %65, %64 : vector<8x32xf32>
    %cst_59 = arith.constant 3.278390e-02 : f32
    %67 = vector.broadcast %cst_59 : f32 to vector<8x32xf32>
    %68 = arith.mulf %67, %63 : vector<8x32xf32>
    %69 = arith.addf %66, %68 : vector<8x32xf32>
    %c0_60 = arith.constant 0 : index
    %c0_61 = arith.constant 0 : index
    %70 = vector.load %arg32[%c0_60, %c0_61] : memref<8x32xf32, #tpu.memory_space<vmem>>, vector<8x32xf32>
    %cst_62 = arith.constant 0.996672213 : f32
    %71 = vector.broadcast %cst_62 : f32 to vector<8x32xf32>
    %72 = arith.mulf %71, %70 : vector<8x32xf32>
    %cst_63 = arith.constant 0.0033277839 : f32
    %73 = vector.broadcast %cst_63 : f32 to vector<8x32xf32>
    %74 = arith.mulf %73, %63 : vector<8x32xf32>
    %75 = arith.addf %72, %74 : vector<8x32xf32>
    %cst_64 = arith.constant 1.800000e+00 : f32
    %76 = vector.broadcast %cst_64 : f32 to vector<8x32xf32>
    %77 = arith.mulf %76, %69 : vector<8x32xf32>
    %cst_65 = arith.constant 0.00999999977 : f32
    %78 = vector.broadcast %cst_65 : f32 to vector<8x32xf32>
    %79 = arith.addf %78, %77 : vector<8x32xf32>
    %cst_66 = arith.constant 9.000000e+00 : f32
    %80 = vector.broadcast %cst_66 : f32 to vector<8x32xf32>
    %81 = arith.mulf %80, %75 : vector<8x32xf32>
    %82 = arith.addf %79, %81 : vector<8x32xf32>
    %c0_67 = arith.constant 0 : index
    %c0_68 = arith.constant 0 : index
    %83 = vector.load %arg24[%c0_67, %c0_68] : memref<8x32xf32, #tpu.memory_space<vmem>>, vector<8x32xf32>
    %cst_69 = arith.constant 0.951229453 : f32
    %84 = vector.broadcast %cst_69 : f32 to vector<8x32xf32>
    %85 = arith.mulf %83, %84 : vector<8x32xf32>
    %cst_70 = arith.constant 0.0487705767 : f32
    %86 = vector.broadcast %cst_70 : f32 to vector<8x32xf32>
    %87 = arith.mulf %86, %62 : vector<8x32xf32>
    %88 = arith.addf %85, %87 : vector<8x32xf32>
    %89 = arith.mulf %82, %63 : vector<8x32xf32>
    %cst_71 = arith.constant 1.000000e+00 : f32
    %90 = vector.broadcast %cst_71 : f32 to vector<8x32xf32>
    %91 = arith.mulf %89, %90 : vector<8x32xf32>
    %92 = arith.subf %88, %91 : vector<8x32xf32>
    %93 = arith.subf %92, %82 : vector<8x32xf32>
    %cst_72 = arith.constant 0.000000e+00 : f32
    %94 = vector.broadcast %cst_72 : f32 to vector<8x32xf32>
    %95 = arith.cmpf ogt, %93, %94 : vector<8x32xf32>
    %96 = arith.extui %95 : vector<8x32xi1> to vector<8x32xi32>
    %97 = arith.sitofp %96 : vector<8x32xi32> to vector<8x32xf32>
    %c0_73 = arith.constant 0 : index
    %c0_74 = arith.constant 0 : index
    %98 = vector.load %arg24[%c0_73, %c0_74] : memref<8x32xf32, #tpu.memory_space<vmem>>, vector<8x32xf32>
    tpu.vector_store %arg24[%c0_73, %c0_74], %92 {strides = array<i32>} : memref<8x32xf32, #tpu.memory_space<vmem>>, vector<8x32xf32>,
    %c0_75 = arith.constant 0 : index
    %c0_76 = arith.constant 0 : index
    %99 = vector.load %arg27[%c0_75, %c0_76] : memref<8x32xf32, #tpu.memory_space<vmem>>, vector<8x32xf32>
    tpu.vector_store %arg27[%c0_75, %c0_76], %97 {strides = array<i32>} : memref<8x32xf32, #tpu.memory_space<vmem>>, vector<8x32xf32>,
    %c0_77 = arith.constant 0 : index
    %c0_78 = arith.constant 0 : index
    %100 = vector.load %arg31[%c0_77, %c0_78] : memref<8x32xf32, #tpu.memory_space<vmem>>, vector<8x32xf32>
    tpu.vector_store %arg31[%c0_77, %c0_78], %69 {strides = array<i32>} : memref<8x32xf32, #tpu.memory_space<vmem>>, vector<8x32xf32>,
    %c0_79 = arith.constant 0 : index
    %c0_80 = arith.constant 0 : index
    %101 = vector.load %arg32[%c0_79, %c0_80] : memref<8x32xf32, #tpu.memory_space<vmem>>, vector<8x32xf32>
    tpu.vector_store %arg32[%c0_79, %c0_80], %75 {strides = array<i32>} : memref<8x32xf32, #tpu.memory_space<vmem>>, vector<8x32xf32>,
    %c0_81 = arith.constant 0 : index
    %c0_82 = arith.constant 0 : index
    %102 = vector.load %arg37[%c0_81, %c0_82] : memref<8x160xf32, #tpu.memory_space<vmem>>, vector<8x32xf32>
    tpu.vector_store %arg37[%c0_81, %c0_82], %97 {strides = array<i32>} : memref<8x160xf32, #tpu.memory_space<vmem>>, vector<8x32xf32>,
    %c0_83 = arith.constant 0 : index
    %c0_84 = arith.constant 0 : index
    %103 = vector.load %arg28[%c0_83, %c0_84] : memref<8x32xf32, #tpu.memory_space<vmem>>, vector<8x32xf32>
    %c0_85 = arith.constant 0 : index
    %c128_86 = arith.constant 128 : index
    %104 = vector.load %arg37[%c0_85, %c128_86] : memref<8x160xf32, #tpu.memory_space<vmem>>, vector<8x32xf32>
    tpu.vector_store %arg37[%c0_85, %c128_86], %103 {strides = array<i32>} : memref<8x160xf32, #tpu.memory_space<vmem>>, vector<8x32xf32>,
    %c0_87 = arith.constant 0 : index
    %c0_88 = arith.constant 0 : index
    %105 = vector.load %arg37[%c0_87, %c0_88] : memref<8x160xf32, #tpu.memory_space<vmem>>, vector<8x160xf32>
    %c0_89 = arith.constant 0 : index
    %c0_90 = arith.constant 0 : index
    %106 = vector.load %arg6[%c0_89, %c0_90] : memref<160x32xf32, #tpu.memory_space<vmem>>, vector<160x32xf32>
    %cst_91 = arith.constant dense<0.000000e+00> : vector<8x32xf32>
    %107 = tpu.matmul %105, %106, %cst_91 {dimension_numbers = #tpu.dot_dimension_numbers<[1], [0], [0], [1], [0, 0, 1, 1], [], []>} : vector<8x160xf32>, vector<160x32xf32>, vector<8x32xf32> -> vector<8x32xf32>
    %c0_92 = arith.constant 0 : index
    %c0_93 = arith.constant 0 : index
    %108 = vector.load %arg7[%c0_92, %c0_93] : memref<1x32xf32, #tpu.memory_space<vmem>>, vector<1x32xf32>
    %109 = vector.broadcast %108 : vector<1x32xf32> to vector<8x32xf32>
    %110 = arith.addf %107, %109 : vector<8x32xf32>
    %c0_94 = arith.constant 0 : index
    %c0_95 = arith.constant 0 : index
    %111 = vector.load %arg28[%c0_94, %c0_95] : memref<8x32xf32, #tpu.memory_space<vmem>>, vector<8x32xf32>
    %c0_96 = arith.constant 0 : index
    %c0_97 = arith.constant 0 : index
    %112 = vector.load %arg33[%c0_96, %c0_97] : memref<8x32xf32, #tpu.memory_space<vmem>>, vector<8x32xf32>
    %cst_98 = arith.constant 0.967216074 : f32
    %113 = vector.broadcast %cst_98 : f32 to vector<8x32xf32>
    %114 = arith.mulf %113, %112 : vector<8x32xf32>
    %cst_99 = arith.constant 3.278390e-02 : f32
    %115 = vector.broadcast %cst_99 : f32 to vector<8x32xf32>
    %116 = arith.mulf %115, %111 : vector<8x32xf32>
    %117 = arith.addf %114, %116 : vector<8x32xf32>
    %c0_100 = arith.constant 0 : index
    %c0_101 = arith.constant 0 : index
    %118 = vector.load %arg34[%c0_100, %c0_101] : memref<8x32xf32, #tpu.memory_space<vmem>>, vector<8x32xf32>
    %cst_102 = arith.constant 0.996672213 : f32
    %119 = vector.broadcast %cst_102 : f32 to vector<8x32xf32>
    %120 = arith.mulf %119, %118 : vector<8x32xf32>
    %cst_103 = arith.constant 0.0033277839 : f32
    %121 = vector.broadcast %cst_103 : f32 to vector<8x32xf32>
    %122 = arith.mulf %121, %111 : vector<8x32xf32>
    %123 = arith.addf %120, %122 : vector<8x32xf32>
    %cst_104 = arith.constant 1.800000e+00 : f32
    %124 = vector.broadcast %cst_104 : f32 to vector<8x32xf32>
    %125 = arith.mulf %124, %117 : vector<8x32xf32>
    %cst_105 = arith.constant 0.00999999977 : f32
    %126 = vector.broadcast %cst_105 : f32 to vector<8x32xf32>
    %127 = arith.addf %126, %125 : vector<8x32xf32>
    %cst_106 = arith.constant 9.000000e+00 : f32
    %128 = vector.broadcast %cst_106 : f32 to vector<8x32xf32>
    %129 = arith.mulf %128, %123 : vector<8x32xf32>
    %130 = arith.addf %127, %129 : vector<8x32xf32>
    %c0_107 = arith.constant 0 : index
    %c0_108 = arith.constant 0 : index
    %131 = vector.load %arg25[%c0_107, %c0_108] : memref<8x32xf32, #tpu.memory_space<vmem>>, vector<8x32xf32>
    %cst_109 = arith.constant 0.951229453 : f32
    %132 = vector.broadcast %cst_109 : f32 to vector<8x32xf32>
    %133 = arith.mulf %131, %132 : vector<8x32xf32>
    %cst_110 = arith.constant 0.0487705767 : f32
    %134 = vector.broadcast %cst_110 : f32 to vector<8x32xf32>
    %135 = arith.mulf %134, %110 : vector<8x32xf32>
    %136 = arith.addf %133, %135 : vector<8x32xf32>
    %137 = arith.mulf %130, %111 : vector<8x32xf32>
    %cst_111 = arith.constant 1.000000e+00 : f32
    %138 = vector.broadcast %cst_111 : f32 to vector<8x32xf32>
    %139 = arith.mulf %137, %138 : vector<8x32xf32>
    %140 = arith.subf %136, %139 : vector<8x32xf32>
    %141 = arith.subf %140, %130 : vector<8x32xf32>
    %cst_112 = arith.constant 0.000000e+00 : f32
    %142 = vector.broadcast %cst_112 : f32 to vector<8x32xf32>
    %143 = arith.cmpf ogt, %141, %142 : vector<8x32xf32>
    %144 = arith.extui %143 : vector<8x32xi1> to vector<8x32xi32>
    %145 = arith.sitofp %144 : vector<8x32xi32> to vector<8x32xf32>
    %c0_113 = arith.constant 0 : index
    %c0_114 = arith.constant 0 : index
    %146 = vector.load %arg25[%c0_113, %c0_114] : memref<8x32xf32, #tpu.memory_space<vmem>>, vector<8x32xf32>
    tpu.vector_store %arg25[%c0_113, %c0_114], %140 {strides = array<i32>} : memref<8x32xf32, #tpu.memory_space<vmem>>, vector<8x32xf32>,
    %c0_115 = arith.constant 0 : index
    %c0_116 = arith.constant 0 : index
    %147 = vector.load %arg28[%c0_115, %c0_116] : memref<8x32xf32, #tpu.memory_space<vmem>>, vector<8x32xf32>
    tpu.vector_store %arg28[%c0_115, %c0_116], %145 {strides = array<i32>} : memref<8x32xf32, #tpu.memory_space<vmem>>, vector<8x32xf32>,
    %c0_117 = arith.constant 0 : index
    %c0_118 = arith.constant 0 : index
    %148 = vector.load %arg33[%c0_117, %c0_118] : memref<8x32xf32, #tpu.memory_space<vmem>>, vector<8x32xf32>
    tpu.vector_store %arg33[%c0_117, %c0_118], %117 {strides = array<i32>} : memref<8x32xf32, #tpu.memory_space<vmem>>, vector<8x32xf32>,
    %c0_119 = arith.constant 0 : index
    %c0_120 = arith.constant 0 : index
    %149 = vector.load %arg34[%c0_119, %c0_120] : memref<8x32xf32, #tpu.memory_space<vmem>>, vector<8x32xf32>
    tpu.vector_store %arg34[%c0_119, %c0_120], %123 {strides = array<i32>} : memref<8x32xf32, #tpu.memory_space<vmem>>, vector<8x32xf32>,
    %c0_121 = arith.constant 0 : index
    %c0_122 = arith.constant 0 : index
    %150 = vector.load %arg8[%c0_121, %c0_122] : memref<32x2xf32, #tpu.memory_space<vmem>>, vector<32x2xf32>
    %cst_123 = arith.constant dense<0.000000e+00> : vector<8x2xf32>
    %151 = tpu.matmul %140, %150, %cst_123 {dimension_numbers = #tpu.dot_dimension_numbers<[1], [0], [0], [1], [0, 0, 1, 1], [], []>} : vector<8x32xf32>, vector<32x2xf32>, vector<8x2xf32> -> vector<8x2xf32>
    %c0_124 = arith.constant 0 : index
    %c0_125 = arith.constant 0 : index
    %152 = vector.load %arg9[%c0_124, %c0_125] : memref<1x2xf32, #tpu.memory_space<vmem>>, vector<1x2xf32>
    %153 = vector.broadcast %152 : vector<1x2xf32> to vector<8x2xf32>
    %154 = arith.addf %151, %153 : vector<8x2xf32>
    %155 = arith.index_cast %c0_i32_1 : i32 to index
    %c0_126 = arith.constant 0 : index
    %c0_127 = arith.constant 0 : index
    %156 = vector.load %arg16[%155, %c0_126, %c0_127] : memref<8x8x512xf32, #tpu.memory_space<vmem>>, vector<1x8x2xf32>
    %157 = vector.shape_cast %156 : vector<1x8x2xf32> to vector<8x2xf32>
    %158 = vector.shape_cast %154 : vector<8x2xf32> to vector<1x8x2xf32>
    tpu.vector_store %arg16[%155, %c0_126, %c0_127], %158 {strides = array<i32>} : memref<8x8x512xf32, #tpu.memory_space<vmem>>, vector<1x8x2xf32>,
    %159 = arith.index_cast %c0_i32_1 : i32 to index
    %c0_128 = arith.constant 0 : index
    %c128_129 = arith.constant 128 : index
    %160 = vector.load %arg16[%159, %c0_128, %c128_129] : memref<8x8x512xf32, #tpu.memory_space<vmem>>, vector<1x8x32xf32>
    %161 = vector.shape_cast %160 : vector<1x8x32xf32> to vector<8x32xf32>
    %162 = vector.shape_cast %145 : vector<8x32xf32> to vector<1x8x32xf32>
    tpu.vector_store %arg16[%159, %c0_128, %c128_129], %162 {strides = array<i32>} : memref<8x8x512xf32, #tpu.memory_space<vmem>>, vector<1x8x32xf32>,
    %163 = arith.index_cast %c0_i32_1 : i32 to index
    %c0_130 = arith.constant 0 : index
    %c256 = arith.constant 256 : index
    %164 = vector.load %arg16[%163, %c0_130, %c256] : memref<8x8x512xf32, #tpu.memory_space<vmem>>, vector<1x8x32xf32>
    %165 = vector.shape_cast %164 : vector<1x8x32xf32> to vector<8x32xf32>
    %166 = vector.shape_cast %140 : vector<8x32xf32> to vector<1x8x32xf32>
    tpu.vector_store %arg16[%163, %c0_130, %c256], %166 {strides = array<i32>} : memref<8x8x512xf32, #tpu.memory_space<vmem>>, vector<1x8x32xf32>,
    %167 = arith.index_cast %c0_i32_1 : i32 to index
    %c0_131 = arith.constant 0 : index
    %c384 = arith.constant 384 : index
    %168 = vector.load %arg16[%167, %c0_131, %c384] : memref<8x8x512xf32, #tpu.memory_space<vmem>>, vector<1x8x32xf32>
    %169 = vector.shape_cast %168 : vector<1x8x32xf32> to vector<8x32xf32>
    %170 = vector.shape_cast %130 : vector<8x32xf32> to vector<1x8x32xf32>
    tpu.vector_store %arg16[%167, %c0_131, %c384], %170 {strides = array<i32>} : memref<8x8x512xf32, #tpu.memory_space<vmem>>, vector<1x8x32xf32>,
    %c1_i32 = arith.constant 1 : i32
    %171 = arith.index_cast %c1_i32 : i32 to index
    %c0_132 = arith.constant 0 : index
    %c0_133 = arith.constant 0 : index
    %172 = vector.load %arg1[%171, %c0_132, %c0_133] : memref<8x8x16xf32, #tpu.memory_space<vmem>>, vector<1x8x16xf32>
    %173 = vector.shape_cast %172 : vector<1x8x16xf32> to vector<8x16xf32>
    %c0_134 = arith.constant 0 : index
    %c0_135 = arith.constant 0 : index
    %174 = vector.load %arg35[%c0_134, %c0_135] : memref<8x160xf32, #tpu.memory_space<vmem>>, vector<8x16xf32>
    tpu.vector_store %arg35[%c0_134, %c0_135], %173 {strides = array<i32>} : memref<8x160xf32, #tpu.memory_space<vmem>>, vector<8x16xf32>,
    %c0_136 = arith.constant 0 : index
    %c0_137 = arith.constant 0 : index
    %175 = vector.load %arg26[%c0_136, %c0_137] : memref<8x32xf32, #tpu.memory_space<vmem>>, vector<8x32xf32>
    %c0_138 = arith.constant 0 : index
    %c128_139 = arith.constant 128 : index
    %176 = vector.load %arg35[%c0_138, %c128_139] : memref<8x160xf32, #tpu.memory_space<vmem>>, vector<8x32xf32>
    tpu.vector_store %arg35[%c0_138, %c128_139], %175 {strides = array<i32>} : memref<8x160xf32, #tpu.memory_space<vmem>>, vector<8x32xf32>,
    %c0_140 = arith.constant 0 : index
    %c0_141 = arith.constant 0 : index
    %177 = vector.load %arg35[%c0_140, %c0_141] : memref<8x160xf32, #tpu.memory_space<vmem>>, vector<8x160xf32>
    %c0_142 = arith.constant 0 : index
    %c0_143 = arith.constant 0 : index
    %178 = vector.load %arg2[%c0_142, %c0_143] : memref<160x32xf32, #tpu.memory_space<vmem>>, vector<160x32xf32>
    %cst_144 = arith.constant dense<0.000000e+00> : vector<8x32xf32>
    %179 = tpu.matmul %177, %178, %cst_144 {dimension_numbers = #tpu.dot_dimension_numbers<[1], [0], [0], [1], [0, 0, 1, 1], [], []>} : vector<8x160xf32>, vector<160x32xf32>, vector<8x32xf32> -> vector<8x32xf32>
    %c0_145 = arith.constant 0 : index
    %c0_146 = arith.constant 0 : index
    %180 = vector.load %arg3[%c0_145, %c0_146] : memref<1x32xf32, #tpu.memory_space<vmem>>, vector<1x32xf32>
    %181 = vector.broadcast %180 : vector<1x32xf32> to vector<8x32xf32>
    %182 = arith.addf %179, %181 : vector<8x32xf32>
    %c0_147 = arith.constant 0 : index
    %c0_148 = arith.constant 0 : index
    %183 = vector.load %arg26[%c0_147, %c0_148] : memref<8x32xf32, #tpu.memory_space<vmem>>, vector<8x32xf32>
    %c0_149 = arith.constant 0 : index
    %c0_150 = arith.constant 0 : index
    %184 = vector.load %arg29[%c0_149, %c0_150] : memref<8x32xf32, #tpu.memory_space<vmem>>, vector<8x32xf32>
    %cst_151 = arith.constant 0.967216074 : f32
    %185 = vector.broadcast %cst_151 : f32 to vector<8x32xf32>
    %186 = arith.mulf %185, %184 : vector<8x32xf32>
    %cst_152 = arith.constant 3.278390e-02 : f32
    %187 = vector.broadcast %cst_152 : f32 to vector<8x32xf32>
    %188 = arith.mulf %187, %183 : vector<8x32xf32>
    %189 = arith.addf %186, %188 : vector<8x32xf32>
    %c0_153 = arith.constant 0 : index
    %c0_154 = arith.constant 0 : index
    %190 = vector.load %arg30[%c0_153, %c0_154] : memref<8x32xf32, #tpu.memory_space<vmem>>, vector<8x32xf32>
    %cst_155 = arith.constant 0.996672213 : f32
    %191 = vector.broadcast %cst_155 : f32 to vector<8x32xf32>
    %192 = arith.mulf %191, %190 : vector<8x32xf32>
    %cst_156 = arith.constant 0.0033277839 : f32
    %193 = vector.broadcast %cst_156 : f32 to vector<8x32xf32>
    %194 = arith.mulf %193, %183 : vector<8x32xf32>
    %195 = arith.addf %192, %194 : vector<8x32xf32>
    %cst_157 = arith.constant 1.800000e+00 : f32
    %196 = vector.broadcast %cst_157 : f32 to vector<8x32xf32>
    %197 = arith.mulf %196, %189 : vector<8x32xf32>
    %cst_158 = arith.constant 0.00999999977 : f32
    %198 = vector.broadcast %cst_158 : f32 to vector<8x32xf32>
    %199 = arith.addf %198, %197 : vector<8x32xf32>
    %cst_159 = arith.constant 9.000000e+00 : f32
    %200 = vector.broadcast %cst_159 : f32 to vector<8x32xf32>
    %201 = arith.mulf %200, %195 : vector<8x32xf32>
    %202 = arith.addf %199, %201 : vector<8x32xf32>
    %c0_160 = arith.constant 0 : index
    %c0_161 = arith.constant 0 : index
    %203 = vector.load %arg23[%c0_160, %c0_161] : memref<8x32xf32, #tpu.memory_space<vmem>>, vector<8x32xf32>
    %cst_162 = arith.constant 0.951229453 : f32
    %204 = vector.broadcast %cst_162 : f32 to vector<8x32xf32>
    %205 = arith.mulf %203, %204 : vector<8x32xf32>
    %cst_163 = arith.constant 0.0487705767 : f32
    %206 = vector.broadcast %cst_163 : f32 to vector<8x32xf32>
    %207 = arith.mulf %206, %182 : vector<8x32xf32>
    %208 = arith.addf %205, %207 : vector<8x32xf32>
    %209 = arith.mulf %202, %183 : vector<8x32xf32>
    %cst_164 = arith.constant 1.000000e+00 : f32
    %210 = vector.broadcast %cst_164 : f32 to vector<8x32xf32>
    %211 = arith.mulf %209, %210 : vector<8x32xf32>
    %212 = arith.subf %208, %211 : vector<8x32xf32>
    %213 = arith.subf %212, %202 : vector<8x32xf32>
    %cst_165 = arith.constant 0.000000e+00 : f32
    %214 = vector.broadcast %cst_165 : f32 to vector<8x32xf32>
    %215 = arith.cmpf ogt, %213, %214 : vector<8x32xf32>
    %216 = arith.extui %215 : vector<8x32xi1> to vector<8x32xi32>
    %217 = arith.sitofp %216 : vector<8x32xi32> to vector<8x32xf32>
    %c0_166 = arith.constant 0 : index
    %c0_167 = arith.constant 0 : index
    %218 = vector.load %arg23[%c0_166, %c0_167] : memref<8x32xf32, #tpu.memory_space<vmem>>, vector<8x32xf32>
    tpu.vector_store %arg23[%c0_166, %c0_167], %212 {strides = array<i32>} : memref<8x32xf32, #tpu.memory_space<vmem>>, vector<8x32xf32>,
    %c0_168 = arith.constant 0 : index
    %c0_169 = arith.constant 0 : index
    %219 = vector.load %arg26[%c0_168, %c0_169] : memref<8x32xf32, #tpu.memory_space<vmem>>, vector<8x32xf32>
    tpu.vector_store %arg26[%c0_168, %c0_169], %217 {strides = array<i32>} : memref<8x32xf32, #tpu.memory_space<vmem>>, vector<8x32xf32>,
    %c0_170 = arith.constant 0 : index
    %c0_171 = arith.constant 0 : index
    %220 = vector.load %arg29[%c0_170, %c0_171] : memref<8x32xf32, #tpu.memory_space<vmem>>, vector<8x32xf32>
    tpu.vector_store %arg29[%c0_170, %c0_171], %189 {strides = array<i32>} : memref<8x32xf32, #tpu.memory_space<vmem>>, vector<8x32xf32>,
    %c0_172 = arith.constant 0 : index
    %c0_173 = arith.constant 0 : index
    %221 = vector.load %arg30[%c0_172, %c0_173] : memref<8x32xf32, #tpu.memory_space<vmem>>, vector<8x32xf32>
    tpu.vector_store %arg30[%c0_172, %c0_173], %195 {strides = array<i32>} : memref<8x32xf32, #tpu.memory_space<vmem>>, vector<8x32xf32>,
    %c0_174 = arith.constant 0 : index
    %c0_175 = arith.constant 0 : index
    %222 = vector.load %arg36[%c0_174, %c0_175] : memref<8x160xf32, #tpu.memory_space<vmem>>, vector<8x32xf32>
    tpu.vector_store %arg36[%c0_174, %c0_175], %217 {strides = array<i32>} : memref<8x160xf32, #tpu.memory_space<vmem>>, vector<8x32xf32>,
    %c0_176 = arith.constant 0 : index
    %c0_177 = arith.constant 0 : index
    %223 = vector.load %arg27[%c0_176, %c0_177] : memref<8x32xf32, #tpu.memory_space<vmem>>, vector<8x32xf32>
    %c0_178 = arith.constant 0 : index
    %c128_179 = arith.constant 128 : index
    %224 = vector.load %arg36[%c0_178, %c128_179] : memref<8x160xf32, #tpu.memory_space<vmem>>, vector<8x32xf32>
    tpu.vector_store %arg36[%c0_178, %c128_179], %223 {strides = array<i32>} : memref<8x160xf32, #tpu.memory_space<vmem>>, vector<8x32xf32>,
    %c0_180 = arith.constant 0 : index
    %c0_181 = arith.constant 0 : index
    %225 = vector.load %arg36[%c0_180, %c0_181] : memref<8x160xf32, #tpu.memory_space<vmem>>, vector<8x160xf32>
    %c0_182 = arith.constant 0 : index
    %c0_183 = arith.constant 0 : index
    %226 = vector.load %arg4[%c0_182, %c0_183] : memref<160x32xf32, #tpu.memory_space<vmem>>, vector<160x32xf32>
    %cst_184 = arith.constant dense<0.000000e+00> : vector<8x32xf32>
    %227 = tpu.matmul %225, %226, %cst_184 {dimension_numbers = #tpu.dot_dimension_numbers<[1], [0], [0], [1], [0, 0, 1, 1], [], []>} : vector<8x160xf32>, vector<160x32xf32>, vector<8x32xf32> -> vector<8x32xf32>
    %c0_185 = arith.constant 0 : index
    %c0_186 = arith.constant 0 : index
    %228 = vector.load %arg5[%c0_185, %c0_186] : memref<1x32xf32, #tpu.memory_space<vmem>>, vector<1x32xf32>
    %229 = vector.broadcast %228 : vector<1x32xf32> to vector<8x32xf32>
    %230 = arith.addf %227, %229 : vector<8x32xf32>
    %c0_187 = arith.constant 0 : index
    %c0_188 = arith.constant 0 : index
    %231 = vector.load %arg27[%c0_187, %c0_188] : memref<8x32xf32, #tpu.memory_space<vmem>>, vector<8x32xf32>
    %c0_189 = arith.constant 0 : index
    %c0_190 = arith.constant 0 : index
    %232 = vector.load %arg31[%c0_189, %c0_190] : memref<8x32xf32, #tpu.memory_space<vmem>>, vector<8x32xf32>
    %cst_191 = arith.constant 0.967216074 : f32
    %233 = vector.broadcast %cst_191 : f32 to vector<8x32xf32>
    %234 = arith.mulf %233, %232 : vector<8x32xf32>
    %cst_192 = arith.constant 3.278390e-02 : f32
    %235 = vector.broadcast %cst_192 : f32 to vector<8x32xf32>
    %236 = arith.mulf %235, %231 : vector<8x32xf32>
    %237 = arith.addf %234, %236 : vector<8x32xf32>
    %c0_193 = arith.constant 0 : index
    %c0_194 = arith.constant 0 : index
    %238 = vector.load %arg32[%c0_193, %c0_194] : memref<8x32xf32, #tpu.memory_space<vmem>>, vector<8x32xf32>
    %cst_195 = arith.constant 0.996672213 : f32
    %239 = vector.broadcast %cst_195 : f32 to vector<8x32xf32>
    %240 = arith.mulf %239, %238 : vector<8x32xf32>
    %cst_196 = arith.constant 0.0033277839 : f32
    %241 = vector.broadcast %cst_196 : f32 to vector<8x32xf32>
    %242 = arith.mulf %241, %231 : vector<8x32xf32>
    %243 = arith.addf %240, %242 : vector<8x32xf32>
    %cst_197 = arith.constant 1.800000e+00 : f32
    %244 = vector.broadcast %cst_197 : f32 to vector<8x32xf32>
    %245 = arith.mulf %244, %237 : vector<8x32xf32>
    %cst_198 = arith.constant 0.00999999977 : f32
    %246 = vector.broadcast %cst_198 : f32 to vector<8x32xf32>
    %247 = arith.addf %246, %245 : vector<8x32xf32>
    %cst_199 = arith.constant 9.000000e+00 : f32
    %248 = vector.broadcast %cst_199 : f32 to vector<8x32xf32>
    %249 = arith.mulf %248, %243 : vector<8x32xf32>
    %250 = arith.addf %247, %249 : vector<8x32xf32>
    %c0_200 = arith.constant 0 : index
    %c0_201 = arith.constant 0 : index
    %251 = vector.load %arg24[%c0_200, %c0_201] : memref<8x32xf32, #tpu.memory_space<vmem>>, vector<8x32xf32>
    %cst_202 = arith.constant 0.951229453 : f32
    %252 = vector.broadcast %cst_202 : f32 to vector<8x32xf32>
    %253 = arith.mulf %251, %252 : vector<8x32xf32>
    %cst_203 = arith.constant 0.0487705767 : f32
    %254 = vector.broadcast %cst_203 : f32 to vector<8x32xf32>
    %255 = arith.mulf %254, %230 : vector<8x32xf32>
    %256 = arith.addf %253, %255 : vector<8x32xf32>
    %257 = arith.mulf %250, %231 : vector<8x32xf32>
    %cst_204 = arith.constant 1.000000e+00 : f32
    %258 = vector.broadcast %cst_204 : f32 to vector<8x32xf32>
    %259 = arith.mulf %257, %258 : vector<8x32xf32>
    %260 = arith.subf %256, %259 : vector<8x32xf32>
    %261 = arith.subf %260, %250 : vector<8x32xf32>
    %cst_205 = arith.constant 0.000000e+00 : f32
    %262 = vector.broadcast %cst_205 : f32 to vector<8x32xf32>
    %263 = arith.cmpf ogt, %261, %262 : vector<8x32xf32>
    %264 = arith.extui %263 : vector<8x32xi1> to vector<8x32xi32>
    %265 = arith.sitofp %264 : vector<8x32xi32> to vector<8x32xf32>
    %c0_206 = arith.constant 0 : index
    %c0_207 = arith.constant 0 : index
    %266 = vector.load %arg24[%c0_206, %c0_207] : memref<8x32xf32, #tpu.memory_space<vmem>>, vector<8x32xf32>
    tpu.vector_store %arg24[%c0_206, %c0_207], %260 {strides = array<i32>} : memref<8x32xf32, #tpu.memory_space<vmem>>, vector<8x32xf32>,
    %c0_208 = arith.constant 0 : index
    %c0_209 = arith.constant 0 : index
    %267 = vector.load %arg27[%c0_208, %c0_209] : memref<8x32xf32, #tpu.memory_space<vmem>>, vector<8x32xf32>
    tpu.vector_store %arg27[%c0_208, %c0_209], %265 {strides = array<i32>} : memref<8x32xf32, #tpu.memory_space<vmem>>, vector<8x32xf32>,
    %c0_210 = arith.constant 0 : index
    %c0_211 = arith.constant 0 : index
    %268 = vector.load %arg31[%c0_210, %c0_211] : memref<8x32xf32, #tpu.memory_space<vmem>>, vector<8x32xf32>
    tpu.vector_store %arg31[%c0_210, %c0_211], %237 {strides = array<i32>} : memref<8x32xf32, #tpu.memory_space<vmem>>, vector<8x32xf32>,
    %c0_212 = arith.constant 0 : index
    %c0_213 = arith.constant 0 : index
    %269 = vector.load %arg32[%c0_212, %c0_213] : memref<8x32xf32, #tpu.memory_space<vmem>>, vector<8x32xf32>
    tpu.vector_store %arg32[%c0_212, %c0_213], %243 {strides = array<i32>} : memref<8x32xf32, #tpu.memory_space<vmem>>, vector<8x32xf32>,
    %c0_214 = arith.constant 0 : index
    %c0_215 = arith.constant 0 : index
    %270 = vector.load %arg37[%c0_214, %c0_215] : memref<8x160xf32, #tpu.memory_space<vmem>>, vector<8x32xf32>
    tpu.vector_store %arg37[%c0_214, %c0_215], %265 {strides = array<i32>} : memref<8x160xf32, #tpu.memory_space<vmem>>, vector<8x32xf32>,
    %c0_216 = arith.constant 0 : index
    %c0_217 = arith.constant 0 : index
    %271 = vector.load %arg28[%c0_216, %c0_217] : memref<8x32xf32, #tpu.memory_space<vmem>>, vector<8x32xf32>
    %c0_218 = arith.constant 0 : index
    %c128_219 = arith.constant 128 : index
    %272 = vector.load %arg37[%c0_218, %c128_219] : memref<8x160xf32, #tpu.memory_space<vmem>>, vector<8x32xf32>
    tpu.vector_store %arg37[%c0_218, %c128_219], %271 {strides = array<i32>} : memref<8x160xf32, #tpu.memory_space<vmem>>, vector<8x32xf32>,
    %c0_220 = arith.constant 0 : index
    %c0_221 = arith.constant 0 : index
    %273 = vector.load %arg37[%c0_220, %c0_221] : memref<8x160xf32, #tpu.memory_space<vmem>>, vector<8x160xf32>
    %c0_222 = arith.constant 0 : index
    %c0_223 = arith.constant 0 : index
    %274 = vector.load %arg6[%c0_222, %c0_223] : memref<160x32xf32, #tpu.memory_space<vmem>>, vector<160x32xf32>
    %cst_224 = arith.constant dense<0.000000e+00> : vector<8x32xf32>
    %275 = tpu.matmul %273, %274, %cst_224 {dimension_numbers = #tpu.dot_dimension_numbers<[1], [0], [0], [1], [0, 0, 1, 1], [], []>} : vector<8x160xf32>, vector<160x32xf32>, vector<8x32xf32> -> vector<8x32xf32>
    %c0_225 = arith.constant 0 : index
    %c0_226 = arith.constant 0 : index
    %276 = vector.load %arg7[%c0_225, %c0_226] : memref<1x32xf32, #tpu.memory_space<vmem>>, vector<1x32xf32>
    %277 = vector.broadcast %276 : vector<1x32xf32> to vector<8x32xf32>
    %278 = arith.addf %275, %277 : vector<8x32xf32>
    %c0_227 = arith.constant 0 : index
    %c0_228 = arith.constant 0 : index
    %279 = vector.load %arg28[%c0_227, %c0_228] : memref<8x32xf32, #tpu.memory_space<vmem>>, vector<8x32xf32>
    %c0_229 = arith.constant 0 : index
    %c0_230 = arith.constant 0 : index
    %280 = vector.load %arg33[%c0_229, %c0_230] : memref<8x32xf32, #tpu.memory_space<vmem>>, vector<8x32xf32>
    %cst_231 = arith.constant 0.967216074 : f32
    %281 = vector.broadcast %cst_231 : f32 to vector<8x32xf32>
    %282 = arith.mulf %281, %280 : vector<8x32xf32>
    %cst_232 = arith.constant 3.278390e-02 : f32
    %283 = vector.broadcast %cst_232 : f32 to vector<8x32xf32>
    %284 = arith.mulf %283, %279 : vector<8x32xf32>
    %285 = arith.addf %282, %284 : vector<8x32xf32>
    %c0_233 = arith.constant 0 : index
    %c0_234 = arith.constant 0 : index
    %286 = vector.load %arg34[%c0_233, %c0_234] : memref<8x32xf32, #tpu.memory_space<vmem>>, vector<8x32xf32>
    %cst_235 = arith.constant 0.996672213 : f32
    %287 = vector.broadcast %cst_235 : f32 to vector<8x32xf32>
    %288 = arith.mulf %287, %286 : vector<8x32xf32>
    %cst_236 = arith.constant 0.0033277839 : f32
    %289 = vector.broadcast %cst_236 : f32 to vector<8x32xf32>
    %290 = arith.mulf %289, %279 : vector<8x32xf32>
    %291 = arith.addf %288, %290 : vector<8x32xf32>
    %cst_237 = arith.constant 1.800000e+00 : f32
    %292 = vector.broadcast %cst_237 : f32 to vector<8x32xf32>
    %293 = arith.mulf %292, %285 : vector<8x32xf32>
    %cst_238 = arith.constant 0.00999999977 : f32
    %294 = vector.broadcast %cst_238 : f32 to vector<8x32xf32>
    %295 = arith.addf %294, %293 : vector<8x32xf32>
    %cst_239 = arith.constant 9.000000e+00 : f32
    %296 = vector.broadcast %cst_239 : f32 to vector<8x32xf32>
    %297 = arith.mulf %296, %291 : vector<8x32xf32>
    %298 = arith.addf %295, %297 : vector<8x32xf32>
    %c0_240 = arith.constant 0 : index
    %c0_241 = arith.constant 0 : index
    %299 = vector.load %arg25[%c0_240, %c0_241] : memref<8x32xf32, #tpu.memory_space<vmem>>, vector<8x32xf32>
    %cst_242 = arith.constant 0.951229453 : f32
    %300 = vector.broadcast %cst_242 : f32 to vector<8x32xf32>
    %301 = arith.mulf %299, %300 : vector<8x32xf32>
    %cst_243 = arith.constant 0.0487705767 : f32
    %302 = vector.broadcast %cst_243 : f32 to vector<8x32xf32>
    %303 = arith.mulf %302, %278 : vector<8x32xf32>
    %304 = arith.addf %301, %303 : vector<8x32xf32>
    %305 = arith.mulf %298, %279 : vector<8x32xf32>
    %cst_244 = arith.constant 1.000000e+00 : f32
    %306 = vector.broadcast %cst_244 : f32 to vector<8x32xf32>
    %307 = arith.mulf %305, %306 : vector<8x32xf32>
    %308 = arith.subf %304, %307 : vector<8x32xf32>
    %309 = arith.subf %308, %298 : vector<8x32xf32>
    %cst_245 = arith.constant 0.000000e+00 : f32
    %310 = vector.broadcast %cst_245 : f32 to vector<8x32xf32>
    %311 = arith.cmpf ogt, %309, %310 : vector<8x32xf32>
    %312 = arith.extui %311 : vector<8x32xi1> to vector<8x32xi32>
    %313 = arith.sitofp %312 : vector<8x32xi32> to vector<8x32xf32>
    %c0_246 = arith.constant 0 : index
    %c0_247 = arith.constant 0 : index
    %314 = vector.load %arg25[%c0_246, %c0_247] : memref<8x32xf32, #tpu.memory_space<vmem>>, vector<8x32xf32>
    tpu.vector_store %arg25[%c0_246, %c0_247], %308 {strides = array<i32>} : memref<8x32xf32, #tpu.memory_space<vmem>>, vector<8x32xf32>,
    %c0_248 = arith.constant 0 : index
    %c0_249 = arith.constant 0 : index
    %315 = vector.load %arg28[%c0_248, %c0_249] : memref<8x32xf32, #tpu.memory_space<vmem>>, vector<8x32xf32>
    tpu.vector_store %arg28[%c0_248, %c0_249], %313 {strides = array<i32>} : memref<8x32xf32, #tpu.memory_space<vmem>>, vector<8x32xf32>,
    %c0_250 = arith.constant 0 : index
    %c0_251 = arith.constant 0 : index
    %316 = vector.load %arg33[%c0_250, %c0_251] : memref<8x32xf32, #tpu.memory_space<vmem>>, vector<8x32xf32>
    tpu.vector_store %arg33[%c0_250, %c0_251], %285 {strides = array<i32>} : memref<8x32xf32, #tpu.memory_space<vmem>>, vector<8x32xf32>,
    %c0_252 = arith.constant 0 : index
    %c0_253 = arith.constant 0 : index
    %317 = vector.load %arg34[%c0_252, %c0_253] : memref<8x32xf32, #tpu.memory_space<vmem>>, vector<8x32xf32>
    tpu.vector_store %arg34[%c0_252, %c0_253], %291 {strides = array<i32>} : memref<8x32xf32, #tpu.memory_space<vmem>>, vector<8x32xf32>,
    %c0_254 = arith.constant 0 : index
    %c0_255 = arith.constant 0 : index
    %318 = vector.load %arg8[%c0_254, %c0_255] : memref<32x2xf32, #tpu.memory_space<vmem>>, vector<32x2xf32>
    %cst_256 = arith.constant dense<0.000000e+00> : vector<8x2xf32>
    %319 = tpu.matmul %308, %318, %cst_256 {dimension_numbers = #tpu.dot_dimension_numbers<[1], [0], [0], [1], [0, 0, 1, 1], [], []>} : vector<8x32xf32>, vector<32x2xf32>, vector<8x2xf32> -> vector<8x2xf32>
    %c0_257 = arith.constant 0 : index
    %c0_258 = arith.constant 0 : index
    %320 = vector.load %arg9[%c0_257, %c0_258] : memref<1x2xf32, #tpu.memory_space<vmem>>, vector<1x2xf32>
    %321 = vector.broadcast %320 : vector<1x2xf32> to vector<8x2xf32>
    %322 = arith.addf %319, %321 : vector<8x2xf32>
    %323 = arith.index_cast %c1_i32 : i32 to index
    %c0_259 = arith.constant 0 : index
    %c0_260 = arith.constant 0 : index
    %324 = vector.load %arg16[%323, %c0_259, %c0_260] : memref<8x8x512xf32, #tpu.memory_space<vmem>>, vector<1x8x2xf32>
    %325 = vector.shape_cast %324 : vector<1x8x2xf32> to vector<8x2xf32>
    %326 = vector.shape_cast %322 : vector<8x2xf32> to vector<1x8x2xf32>
    tpu.vector_store %arg16[%323, %c0_259, %c0_260], %326 {strides = array<i32>} : memref<8x8x512xf32, #tpu.memory_space<vmem>>, vector<1x8x2xf32>,
    %327 = arith.index_cast %c1_i32 : i32 to index
    %c0_261 = arith.constant 0 : index
    %c128_262 = arith.constant 128 : index
    %328 = vector.load %arg16[%327, %c0_261, %c128_262] : memref<8x8x512xf32, #tpu.memory_space<vmem>>, vector<1x8x32xf32>
    %329 = vector.shape_cast %328 : vector<1x8x32xf32> to vector<8x32xf32>
    %330 = vector.shape_cast %313 : vector<8x32xf32> to vector<1x8x32xf32>
    tpu.vector_store %arg16[%327, %c0_261, %c128_262], %330 {strides = array<i32>} : memref<8x8x512xf32, #tpu.memory_space<vmem>>, vector<1x8x32xf32>,
    %331 = arith.index_cast %c1_i32 : i32 to index
    %c0_263 = arith.constant 0 : index
    %c256_264 = arith.constant 256 : index
    %332 = vector.load %arg16[%331, %c0_263, %c256_264] : memref<8x8x512xf32, #tpu.memory_space<vmem>>, vector<1x8x32xf32>
    %333 = vector.shape_cast %332 : vector<1x8x32xf32> to vector<8x32xf32>
    %334 = vector.shape_cast %308 : vector<8x32xf32> to vector<1x8x32xf32>
    tpu.vector_store %arg16[%331, %c0_263, %c256_264], %334 {strides = array<i32>} : memref<8x8x512xf32, #tpu.memory_space<vmem>>, vector<1x8x32xf32>,
    %335 = arith.index_cast %c1_i32 : i32 to index
    %c0_265 = arith.constant 0 : index
    %c384_266 = arith.constant 384 : index
    %336 = vector.load %arg16[%335, %c0_265, %c384_266] : memref<8x8x512xf32, #tpu.memory_space<vmem>>, vector<1x8x32xf32>
    %337 = vector.shape_cast %336 : vector<1x8x32xf32> to vector<8x32xf32>
    %338 = vector.shape_cast %298 : vector<8x32xf32> to vector<1x8x32xf32>
    tpu.vector_store %arg16[%335, %c0_265, %c384_266], %338 {strides = array<i32>} : memref<8x8x512xf32, #tpu.memory_space<vmem>>, vector<1x8x32xf32>,
    %c2_i32 = arith.constant 2 : i32
    %339 = arith.index_cast %c2_i32 : i32 to index
    %c0_267 = arith.constant 0 : index
    %c0_268 = arith.constant 0 : index
    %340 = vector.load %arg1[%339, %c0_267, %c0_268] : memref<8x8x16xf32, #tpu.memory_space<vmem>>, vector<1x8x16xf32>
    %341 = vector.shape_cast %340 : vector<1x8x16xf32> to vector<8x16xf32>
    %c0_269 = arith.constant 0 : index
    %c0_270 = arith.constant 0 : index
    %342 = vector.load %arg35[%c0_269, %c0_270] : memref<8x160xf32, #tpu.memory_space<vmem>>, vector<8x16xf32>
    tpu.vector_store %arg35[%c0_269, %c0_270], %341 {strides = array<i32>} : memref<8x160xf32, #tpu.memory_space<vmem>>, vector<8x16xf32>,
    %c0_271 = arith.constant 0 : index
    %c0_272 = arith.constant 0 : index
    %343 = vector.load %arg26[%c0_271, %c0_272] : memref<8x32xf32, #tpu.memory_space<vmem>>, vector<8x32xf32>
    %c0_273 = arith.constant 0 : index
    %c128_274 = arith.constant 128 : index
    %344 = vector.load %arg35[%c0_273, %c128_274] : memref<8x160xf32, #tpu.memory_space<vmem>>, vector<8x32xf32>
    tpu.vector_store %arg35[%c0_273, %c128_274], %343 {strides = array<i32>} : memref<8x160xf32, #tpu.memory_space<vmem>>, vector<8x32xf32>,
    %c0_275 = arith.constant 0 : index
    %c0_276 = arith.constant 0 : index
    %345 = vector.load %arg35[%c0_275, %c0_276] : memref<8x160xf32, #tpu.memory_space<vmem>>, vector<8x160xf32>
    %c0_277 = arith.constant 0 : index
    %c0_278 = arith.constant 0 : index
    %346 = vector.load %arg2[%c0_277, %c0_278] : memref<160x32xf32, #tpu.memory_space<vmem>>, vector<160x32xf32>
    %cst_279 = arith.constant dense<0.000000e+00> : vector<8x32xf32>
    %347 = tpu.matmul %345, %346, %cst_279 {dimension_numbers = #tpu.dot_dimension_numbers<[1], [0], [0], [1], [0, 0, 1, 1], [], []>} : vector<8x160xf32>, vector<160x32xf32>, vector<8x32xf32> -> vector<8x32xf32>
    %c0_280 = arith.constant 0 : index
    %c0_281 = arith.constant 0 : index
    %348 = vector.load %arg3[%c0_280, %c0_281] : memref<1x32xf32, #tpu.memory_space<vmem>>, vector<1x32xf32>
    %349 = vector.broadcast %348 : vector<1x32xf32> to vector<8x32xf32>
    %350 = arith.addf %347, %349 : vector<8x32xf32>
    %c0_282 = arith.constant 0 : index
    %c0_283 = arith.constant 0 : index
    %351 = vector.load %arg26[%c0_282, %c0_283] : memref<8x32xf32, #tpu.memory_space<vmem>>, vector<8x32xf32>
    %c0_284 = arith.constant 0 : index
    %c0_285 = arith.constant 0 : index
    %352 = vector.load %arg29[%c0_284, %c0_285] : memref<8x32xf32, #tpu.memory_space<vmem>>, vector<8x32xf32>
    %cst_286 = arith.constant 0.967216074 : f32
    %353 = vector.broadcast %cst_286 : f32 to vector<8x32xf32>
    %354 = arith.mulf %353, %352 : vector<8x32xf32>
    %cst_287 = arith.constant 3.278390e-02 : f32
    %355 = vector.broadcast %cst_287 : f32 to vector<8x32xf32>
    %356 = arith.mulf %355, %351 : vector<8x32xf32>
    %357 = arith.addf %354, %356 : vector<8x32xf32>
    %c0_288 = arith.constant 0 : index
    %c0_289 = arith.constant 0 : index
    %358 = vector.load %arg30[%c0_288, %c0_289] : memref<8x32xf32, #tpu.memory_space<vmem>>, vector<8x32xf32>
    %cst_290 = arith.constant 0.996672213 : f32
    %359 = vector.broadcast %cst_290 : f32 to vector<8x32xf32>
    %360 = arith.mulf %359, %358 : vector<8x32xf32>
    %cst_291 = arith.constant 0.0033277839 : f32
    %361 = vector.broadcast %cst_291 : f32 to vector<8x32xf32>
    %362 = arith.mulf %361, %351 : vector<8x32xf32>
    %363 = arith.addf %360, %362 : vector<8x32xf32>
    %cst_292 = arith.constant 1.800000e+00 : f32
    %364 = vector.broadcast %cst_292 : f32 to vector<8x32xf32>
    %365 = arith.mulf %364, %357 : vector<8x32xf32>
    %cst_293 = arith.constant 0.00999999977 : f32
    %366 = vector.broadcast %cst_293 : f32 to vector<8x32xf32>
    %367 = arith.addf %366, %365 : vector<8x32xf32>
    %cst_294 = arith.constant 9.000000e+00 : f32
    %368 = vector.broadcast %cst_294 : f32 to vector<8x32xf32>
    %369 = arith.mulf %368, %363 : vector<8x32xf32>
    %370 = arith.addf %367, %369 : vector<8x32xf32>
    %c0_295 = arith.constant 0 : index
    %c0_296 = arith.constant 0 : index
    %371 = vector.load %arg23[%c0_295, %c0_296] : memref<8x32xf32, #tpu.memory_space<vmem>>, vector<8x32xf32>
    %cst_297 = arith.constant 0.951229453 : f32
    %372 = vector.broadcast %cst_297 : f32 to vector<8x32xf32>
    %373 = arith.mulf %371, %372 : vector<8x32xf32>
    %cst_298 = arith.constant 0.0487705767 : f32
    %374 = vector.broadcast %cst_298 : f32 to vector<8x32xf32>
    %375 = arith.mulf %374, %350 : vector<8x32xf32>
    %376 = arith.addf %373, %375 : vector<8x32xf32>
    %377 = arith.mulf %370, %351 : vector<8x32xf32>
    %cst_299 = arith.constant 1.000000e+00 : f32
    %378 = vector.broadcast %cst_299 : f32 to vector<8x32xf32>
    %379 = arith.mulf %377, %378 : vector<8x32xf32>
    %380 = arith.subf %376, %379 : vector<8x32xf32>
    %381 = arith.subf %380, %370 : vector<8x32xf32>
    %cst_300 = arith.constant 0.000000e+00 : f32
    %382 = vector.broadcast %cst_300 : f32 to vector<8x32xf32>
    %383 = arith.cmpf ogt, %381, %382 : vector<8x32xf32>
    %384 = arith.extui %383 : vector<8x32xi1> to vector<8x32xi32>
    %385 = arith.sitofp %384 : vector<8x32xi32> to vector<8x32xf32>
    %c0_301 = arith.constant 0 : index
    %c0_302 = arith.constant 0 : index
    %386 = vector.load %arg23[%c0_301, %c0_302] : memref<8x32xf32, #tpu.memory_space<vmem>>, vector<8x32xf32>
    tpu.vector_store %arg23[%c0_301, %c0_302], %380 {strides = array<i32>} : memref<8x32xf32, #tpu.memory_space<vmem>>, vector<8x32xf32>,
    %c0_303 = arith.constant 0 : index
    %c0_304 = arith.constant 0 : index
    %387 = vector.load %arg26[%c0_303, %c0_304] : memref<8x32xf32, #tpu.memory_space<vmem>>, vector<8x32xf32>
    tpu.vector_store %arg26[%c0_303, %c0_304], %385 {strides = array<i32>} : memref<8x32xf32, #tpu.memory_space<vmem>>, vector<8x32xf32>,
    %c0_305 = arith.constant 0 : index
    %c0_306 = arith.constant 0 : index
    %388 = vector.load %arg29[%c0_305, %c0_306] : memref<8x32xf32, #tpu.memory_space<vmem>>, vector<8x32xf32>
    tpu.vector_store %arg29[%c0_305, %c0_306], %357 {strides = array<i32>} : memref<8x32xf32, #tpu.memory_space<vmem>>, vector<8x32xf32>,
    %c0_307 = arith.constant 0 : index
    %c0_308 = arith.constant 0 : index
    %389 = vector.load %arg30[%c0_307, %c0_308] : memref<8x32xf32, #tpu.memory_space<vmem>>, vector<8x32xf32>
    tpu.vector_store %arg30[%c0_307, %c0_308], %363 {strides = array<i32>} : memref<8x32xf32, #tpu.memory_space<vmem>>, vector<8x32xf32>,
    %c0_309 = arith.constant 0 : index
    %c0_310 = arith.constant 0 : index
    %390 = vector.load %arg36[%c0_309, %c0_310] : memref<8x160xf32, #tpu.memory_space<vmem>>, vector<8x32xf32>
    tpu.vector_store %arg36[%c0_309, %c0_310], %385 {strides = array<i32>} : memref<8x160xf32, #tpu.memory_space<vmem>>, vector<8x32xf32>,
    %c0_311 = arith.constant 0 : index
    %c0_312 = arith.constant 0 : index
    %391 = vector.load %arg27[%c0_311, %c0_312] : memref<8x32xf32, #tpu.memory_space<vmem>>, vector<8x32xf32>
    %c0_313 = arith.constant 0 : index
    %c128_314 = arith.constant 128 : index
    %392 = vector.load %arg36[%c0_313, %c128_314] : memref<8x160xf32, #tpu.memory_space<vmem>>, vector<8x32xf32>
    tpu.vector_store %arg36[%c0_313, %c128_314], %391 {strides = array<i32>} : memref<8x160xf32, #tpu.memory_space<vmem>>, vector<8x32xf32>,
    %c0_315 = arith.constant 0 : index
    %c0_316 = arith.constant 0 : index
    %393 = vector.load %arg36[%c0_315, %c0_316] : memref<8x160xf32, #tpu.memory_space<vmem>>, vector<8x160xf32>
    %c0_317 = arith.constant 0 : index
    %c0_318 = arith.constant 0 : index
    %394 = vector.load %arg4[%c0_317, %c0_318] : memref<160x32xf32, #tpu.memory_space<vmem>>, vector<160x32xf32>
    %cst_319 = arith.constant dense<0.000000e+00> : vector<8x32xf32>
    %395 = tpu.matmul %393, %394, %cst_319 {dimension_numbers = #tpu.dot_dimension_numbers<[1], [0], [0], [1], [0, 0, 1, 1], [], []>} : vector<8x160xf32>, vector<160x32xf32>, vector<8x32xf32> -> vector<8x32xf32>
    %c0_320 = arith.constant 0 : index
    %c0_321 = arith.constant 0 : index
    %396 = vector.load %arg5[%c0_320, %c0_321] : memref<1x32xf32, #tpu.memory_space<vmem>>, vector<1x32xf32>
    %397 = vector.broadcast %396 : vector<1x32xf32> to vector<8x32xf32>
    %398 = arith.addf %395, %397 : vector<8x32xf32>
    %c0_322 = arith.constant 0 : index
    %c0_323 = arith.constant 0 : index
    %399 = vector.load %arg27[%c0_322, %c0_323] : memref<8x32xf32, #tpu.memory_space<vmem>>, vector<8x32xf32>
    %c0_324 = arith.constant 0 : index
    %c0_325 = arith.constant 0 : index
    %400 = vector.load %arg31[%c0_324, %c0_325] : memref<8x32xf32, #tpu.memory_space<vmem>>, vector<8x32xf32>
    %cst_326 = arith.constant 0.967216074 : f32
    %401 = vector.broadcast %cst_326 : f32 to vector<8x32xf32>
    %402 = arith.mulf %401, %400 : vector<8x32xf32>
    %cst_327 = arith.constant 3.278390e-02 : f32
    %403 = vector.broadcast %cst_327 : f32 to vector<8x32xf32>
    %404 = arith.mulf %403, %399 : vector<8x32xf32>
    %405 = arith.addf %402, %404 : vector<8x32xf32>
    %c0_328 = arith.constant 0 : index
    %c0_329 = arith.constant 0 : index
    %406 = vector.load %arg32[%c0_328, %c0_329] : memref<8x32xf32, #tpu.memory_space<vmem>>, vector<8x32xf32>
    %cst_330 = arith.constant 0.996672213 : f32
    %407 = vector.broadcast %cst_330 : f32 to vector<8x32xf32>
    %408 = arith.mulf %407, %406 : vector<8x32xf32>
    %cst_331 = arith.constant 0.0033277839 : f32
    %409 = vector.broadcast %cst_331 : f32 to vector<8x32xf32>
    %410 = arith.mulf %409, %399 : vector<8x32xf32>
    %411 = arith.addf %408, %410 : vector<8x32xf32>
    %cst_332 = arith.constant 1.800000e+00 : f32
    %412 = vector.broadcast %cst_332 : f32 to vector<8x32xf32>
    %413 = arith.mulf %412, %405 : vector<8x32xf32>
    %cst_333 = arith.constant 0.00999999977 : f32
    %414 = vector.broadcast %cst_333 : f32 to vector<8x32xf32>
    %415 = arith.addf %414, %413 : vector<8x32xf32>
    %cst_334 = arith.constant 9.000000e+00 : f32
    %416 = vector.broadcast %cst_334 : f32 to vector<8x32xf32>
    %417 = arith.mulf %416, %411 : vector<8x32xf32>
    %418 = arith.addf %415, %417 : vector<8x32xf32>
    %c0_335 = arith.constant 0 : index
    %c0_336 = arith.constant 0 : index
    %419 = vector.load %arg24[%c0_335, %c0_336] : memref<8x32xf32, #tpu.memory_space<vmem>>, vector<8x32xf32>
    %cst_337 = arith.constant 0.951229453 : f32
    %420 = vector.broadcast %cst_337 : f32 to vector<8x32xf32>
    %421 = arith.mulf %419, %420 : vector<8x32xf32>
    %cst_338 = arith.constant 0.0487705767 : f32
    %422 = vector.broadcast %cst_338 : f32 to vector<8x32xf32>
    %423 = arith.mulf %422, %398 : vector<8x32xf32>
    %424 = arith.addf %421, %423 : vector<8x32xf32>
    %425 = arith.mulf %418, %399 : vector<8x32xf32>
    %cst_339 = arith.constant 1.000000e+00 : f32
    %426 = vector.broadcast %cst_339 : f32 to vector<8x32xf32>
    %427 = arith.mulf %425, %426 : vector<8x32xf32>
    %428 = arith.subf %424, %427 : vector<8x32xf32>
    %429 = arith.subf %428, %418 : vector<8x32xf32>
    %cst_340 = arith.constant 0.000000e+00 : f32
    %430 = vector.broadcast %cst_340 : f32 to vector<8x32xf32>
    %431 = arith.cmpf ogt, %429, %430 : vector<8x32xf32>
    %432 = arith.extui %431 : vector<8x32xi1> to vector<8x32xi32>
    %433 = arith.sitofp %432 : vector<8x32xi32> to vector<8x32xf32>
    %c0_341 = arith.constant 0 : index
    %c0_342 = arith.constant 0 : index
    %434 = vector.load %arg24[%c0_341, %c0_342] : memref<8x32xf32, #tpu.memory_space<vmem>>, vector<8x32xf32>
    tpu.vector_store %arg24[%c0_341, %c0_342], %428 {strides = array<i32>} : memref<8x32xf32, #tpu.memory_space<vmem>>, vector<8x32xf32>,
    %c0_343 = arith.constant 0 : index
    %c0_344 = arith.constant 0 : index
    %435 = vector.load %arg27[%c0_343, %c0_344] : memref<8x32xf32, #tpu.memory_space<vmem>>, vector<8x32xf32>
    tpu.vector_store %arg27[%c0_343, %c0_344], %433 {strides = array<i32>} : memref<8x32xf32, #tpu.memory_space<vmem>>, vector<8x32xf32>,
    %c0_345 = arith.constant 0 : index
    %c0_346 = arith.constant 0 : index
    %436 = vector.load %arg31[%c0_345, %c0_346] : memref<8x32xf32, #tpu.memory_space<vmem>>, vector<8x32xf32>
    tpu.vector_store %arg31[%c0_345, %c0_346], %405 {strides = array<i32>} : memref<8x32xf32, #tpu.memory_space<vmem>>, vector<8x32xf32>,
    %c0_347 = arith.constant 0 : index
    %c0_348 = arith.constant 0 : index
    %437 = vector.load %arg32[%c0_347, %c0_348] : memref<8x32xf32, #tpu.memory_space<vmem>>, vector<8x32xf32>
    tpu.vector_store %arg32[%c0_347, %c0_348], %411 {strides = array<i32>} : memref<8x32xf32, #tpu.memory_space<vmem>>, vector<8x32xf32>,
    %c0_349 = arith.constant 0 : index
    %c0_350 = arith.constant 0 : index
    %438 = vector.load %arg37[%c0_349, %c0_350] : memref<8x160xf32, #tpu.memory_space<vmem>>, vector<8x32xf32>
    tpu.vector_store %arg37[%c0_349, %c0_350], %433 {strides = array<i32>} : memref<8x160xf32, #tpu.memory_space<vmem>>, vector<8x32xf32>,
    %c0_351 = arith.constant 0 : index
    %c0_352 = arith.constant 0 : index
    %439 = vector.load %arg28[%c0_351, %c0_352] : memref<8x32xf32, #tpu.memory_space<vmem>>, vector<8x32xf32>
    %c0_353 = arith.constant 0 : index
    %c128_354 = arith.constant 128 : index
    %440 = vector.load %arg37[%c0_353, %c128_354] : memref<8x160xf32, #tpu.memory_space<vmem>>, vector<8x32xf32>
    tpu.vector_store %arg37[%c0_353, %c128_354], %439 {strides = array<i32>} : memref<8x160xf32, #tpu.memory_space<vmem>>, vector<8x32xf32>,
    %c0_355 = arith.constant 0 : index
    %c0_356 = arith.constant 0 : index
    %441 = vector.load %arg37[%c0_355, %c0_356] : memref<8x160xf32, #tpu.memory_space<vmem>>, vector<8x160xf32>
    %c0_357 = arith.constant 0 : index
    %c0_358 = arith.constant 0 : index
    %442 = vector.load %arg6[%c0_357, %c0_358] : memref<160x32xf32, #tpu.memory_space<vmem>>, vector<160x32xf32>
    %cst_359 = arith.constant dense<0.000000e+00> : vector<8x32xf32>
    %443 = tpu.matmul %441, %442, %cst_359 {dimension_numbers = #tpu.dot_dimension_numbers<[1], [0], [0], [1], [0, 0, 1, 1], [], []>} : vector<8x160xf32>, vector<160x32xf32>, vector<8x32xf32> -> vector<8x32xf32>
    %c0_360 = arith.constant 0 : index
    %c0_361 = arith.constant 0 : index
    %444 = vector.load %arg7[%c0_360, %c0_361] : memref<1x32xf32, #tpu.memory_space<vmem>>, vector<1x32xf32>
    %445 = vector.broadcast %444 : vector<1x32xf32> to vector<8x32xf32>
    %446 = arith.addf %443, %445 : vector<8x32xf32>
    %c0_362 = arith.constant 0 : index
    %c0_363 = arith.constant 0 : index
    %447 = vector.load %arg28[%c0_362, %c0_363] : memref<8x32xf32, #tpu.memory_space<vmem>>, vector<8x32xf32>
    %c0_364 = arith.constant 0 : index
    %c0_365 = arith.constant 0 : index
    %448 = vector.load %arg33[%c0_364, %c0_365] : memref<8x32xf32, #tpu.memory_space<vmem>>, vector<8x32xf32>
    %cst_366 = arith.constant 0.967216074 : f32
    %449 = vector.broadcast %cst_366 : f32 to vector<8x32xf32>
    %450 = arith.mulf %449, %448 : vector<8x32xf32>
    %cst_367 = arith.constant 3.278390e-02 : f32
    %451 = vector.broadcast %cst_367 : f32 to vector<8x32xf32>
    %452 = arith.mulf %451, %447 : vector<8x32xf32>
    %453 = arith.addf %450, %452 : vector<8x32xf32>
    %c0_368 = arith.constant 0 : index
    %c0_369 = arith.constant 0 : index
    %454 = vector.load %arg34[%c0_368, %c0_369] : memref<8x32xf32, #tpu.memory_space<vmem>>, vector<8x32xf32>
    %cst_370 = arith.constant 0.996672213 : f32
    %455 = vector.broadcast %cst_370 : f32 to vector<8x32xf32>
    %456 = arith.mulf %455, %454 : vector<8x32xf32>
    %cst_371 = arith.constant 0.0033277839 : f32
    %457 = vector.broadcast %cst_371 : f32 to vector<8x32xf32>
    %458 = arith.mulf %457, %447 : vector<8x32xf32>
    %459 = arith.addf %456, %458 : vector<8x32xf32>
    %cst_372 = arith.constant 1.800000e+00 : f32
    %460 = vector.broadcast %cst_372 : f32 to vector<8x32xf32>
    %461 = arith.mulf %460, %453 : vector<8x32xf32>
    %cst_373 = arith.constant 0.00999999977 : f32
    %462 = vector.broadcast %cst_373 : f32 to vector<8x32xf32>
    %463 = arith.addf %462, %461 : vector<8x32xf32>
    %cst_374 = arith.constant 9.000000e+00 : f32
    %464 = vector.broadcast %cst_374 : f32 to vector<8x32xf32>
    %465 = arith.mulf %464, %459 : vector<8x32xf32>
    %466 = arith.addf %463, %465 : vector<8x32xf32>
    %c0_375 = arith.constant 0 : index
    %c0_376 = arith.constant 0 : index
    %467 = vector.load %arg25[%c0_375, %c0_376] : memref<8x32xf32, #tpu.memory_space<vmem>>, vector<8x32xf32>
    %cst_377 = arith.constant 0.951229453 : f32
    %468 = vector.broadcast %cst_377 : f32 to vector<8x32xf32>
    %469 = arith.mulf %467, %468 : vector<8x32xf32>
    %cst_378 = arith.constant 0.0487705767 : f32
    %470 = vector.broadcast %cst_378 : f32 to vector<8x32xf32>
    %471 = arith.mulf %470, %446 : vector<8x32xf32>
    %472 = arith.addf %469, %471 : vector<8x32xf32>
    %473 = arith.mulf %466, %447 : vector<8x32xf32>
    %cst_379 = arith.constant 1.000000e+00 : f32
    %474 = vector.broadcast %cst_379 : f32 to vector<8x32xf32>
    %475 = arith.mulf %473, %474 : vector<8x32xf32>
    %476 = arith.subf %472, %475 : vector<8x32xf32>
    %477 = arith.subf %476, %466 : vector<8x32xf32>
    %cst_380 = arith.constant 0.000000e+00 : f32
    %478 = vector.broadcast %cst_380 : f32 to vector<8x32xf32>
    %479 = arith.cmpf ogt, %477, %478 : vector<8x32xf32>
    %480 = arith.extui %479 : vector<8x32xi1> to vector<8x32xi32>
    %481 = arith.sitofp %480 : vector<8x32xi32> to vector<8x32xf32>
    %c0_381 = arith.constant 0 : index
    %c0_382 = arith.constant 0 : index
    %482 = vector.load %arg25[%c0_381, %c0_382] : memref<8x32xf32, #tpu.memory_space<vmem>>, vector<8x32xf32>
    tpu.vector_store %arg25[%c0_381, %c0_382], %476 {strides = array<i32>} : memref<8x32xf32, #tpu.memory_space<vmem>>, vector<8x32xf32>,
    %c0_383 = arith.constant 0 : index
    %c0_384 = arith.constant 0 : index
    %483 = vector.load %arg28[%c0_383, %c0_384] : memref<8x32xf32, #tpu.memory_space<vmem>>, vector<8x32xf32>
    tpu.vector_store %arg28[%c0_383, %c0_384], %481 {strides = array<i32>} : memref<8x32xf32, #tpu.memory_space<vmem>>, vector<8x32xf32>,
    %c0_385 = arith.constant 0 : index
    %c0_386 = arith.constant 0 : index
    %484 = vector.load %arg33[%c0_385, %c0_386] : memref<8x32xf32, #tpu.memory_space<vmem>>, vector<8x32xf32>
    tpu.vector_store %arg33[%c0_385, %c0_386], %453 {strides = array<i32>} : memref<8x32xf32, #tpu.memory_space<vmem>>, vector<8x32xf32>,
    %c0_387 = arith.constant 0 : index
    %c0_388 = arith.constant 0 : index
    %485 = vector.load %arg34[%c0_387, %c0_388] : memref<8x32xf32, #tpu.memory_space<vmem>>, vector<8x32xf32>
    tpu.vector_store %arg34[%c0_387, %c0_388], %459 {strides = array<i32>} : memref<8x32xf32, #tpu.memory_space<vmem>>, vector<8x32xf32>,
    %c0_389 = arith.constant 0 : index
    %c0_390 = arith.constant 0 : index
    %486 = vector.load %arg8[%c0_389, %c0_390] : memref<32x2xf32, #tpu.memory_space<vmem>>, vector<32x2xf32>
    %cst_391 = arith.constant dense<0.000000e+00> : vector<8x2xf32>
    %487 = tpu.matmul %476, %486, %cst_391 {dimension_numbers = #tpu.dot_dimension_numbers<[1], [0], [0], [1], [0, 0, 1, 1], [], []>} : vector<8x32xf32>, vector<32x2xf32>, vector<8x2xf32> -> vector<8x2xf32>
    %c0_392 = arith.constant 0 : index
    %c0_393 = arith.constant 0 : index
    %488 = vector.load %arg9[%c0_392, %c0_393] : memref<1x2xf32, #tpu.memory_space<vmem>>, vector<1x2xf32>
    %489 = vector.broadcast %488 : vector<1x2xf32> to vector<8x2xf32>
    %490 = arith.addf %487, %489 : vector<8x2xf32>
    %491 = arith.index_cast %c2_i32 : i32 to index
    %c0_394 = arith.constant 0 : index
    %c0_395 = arith.constant 0 : index
    %492 = vector.load %arg16[%491, %c0_394, %c0_395] : memref<8x8x512xf32, #tpu.memory_space<vmem>>, vector<1x8x2xf32>
    %493 = vector.shape_cast %492 : vector<1x8x2xf32> to vector<8x2xf32>
    %494 = vector.shape_cast %490 : vector<8x2xf32> to vector<1x8x2xf32>
    tpu.vector_store %arg16[%491, %c0_394, %c0_395], %494 {strides = array<i32>} : memref<8x8x512xf32, #tpu.memory_space<vmem>>, vector<1x8x2xf32>,
    %495 = arith.index_cast %c2_i32 : i32 to index
    %c0_396 = arith.constant 0 : index
    %c128_397 = arith.constant 128 : index
    %496 = vector.load %arg16[%495, %c0_396, %c128_397] : memref<8x8x512xf32, #tpu.memory_space<vmem>>, vector<1x8x32xf32>
    %497 = vector.shape_cast %496 : vector<1x8x32xf32> to vector<8x32xf32>
    %498 = vector.shape_cast %481 : vector<8x32xf32> to vector<1x8x32xf32>
    tpu.vector_store %arg16[%495, %c0_396, %c128_397], %498 {strides = array<i32>} : memref<8x8x512xf32, #tpu.memory_space<vmem>>, vector<1x8x32xf32>,
    %499 = arith.index_cast %c2_i32 : i32 to index
    %c0_398 = arith.constant 0 : index
    %c256_399 = arith.constant 256 : index
    %500 = vector.load %arg16[%499, %c0_398, %c256_399] : memref<8x8x512xf32, #tpu.memory_space<vmem>>, vector<1x8x32xf32>
    %501 = vector.shape_cast %500 : vector<1x8x32xf32> to vector<8x32xf32>
    %502 = vector.shape_cast %476 : vector<8x32xf32> to vector<1x8x32xf32>
    tpu.vector_store %arg16[%499, %c0_398, %c256_399], %502 {strides = array<i32>} : memref<8x8x512xf32, #tpu.memory_space<vmem>>, vector<1x8x32xf32>,
    %503 = arith.index_cast %c2_i32 : i32 to index
    %c0_400 = arith.constant 0 : index
    %c384_401 = arith.constant 384 : index
    %504 = vector.load %arg16[%503, %c0_400, %c384_401] : memref<8x8x512xf32, #tpu.memory_space<vmem>>, vector<1x8x32xf32>
    %505 = vector.shape_cast %504 : vector<1x8x32xf32> to vector<8x32xf32>
    %506 = vector.shape_cast %466 : vector<8x32xf32> to vector<1x8x32xf32>
    tpu.vector_store %arg16[%503, %c0_400, %c384_401], %506 {strides = array<i32>} : memref<8x8x512xf32, #tpu.memory_space<vmem>>, vector<1x8x32xf32>,
    %c3_i32 = arith.constant 3 : i32
    %507 = arith.index_cast %c3_i32 : i32 to index
    %c0_402 = arith.constant 0 : index
    %c0_403 = arith.constant 0 : index
    %508 = vector.load %arg1[%507, %c0_402, %c0_403] : memref<8x8x16xf32, #tpu.memory_space<vmem>>, vector<1x8x16xf32>
    %509 = vector.shape_cast %508 : vector<1x8x16xf32> to vector<8x16xf32>
    %c0_404 = arith.constant 0 : index
    %c0_405 = arith.constant 0 : index
    %510 = vector.load %arg35[%c0_404, %c0_405] : memref<8x160xf32, #tpu.memory_space<vmem>>, vector<8x16xf32>
    tpu.vector_store %arg35[%c0_404, %c0_405], %509 {strides = array<i32>} : memref<8x160xf32, #tpu.memory_space<vmem>>, vector<8x16xf32>,
    %c0_406 = arith.constant 0 : index
    %c0_407 = arith.constant 0 : index
    %511 = vector.load %arg26[%c0_406, %c0_407] : memref<8x32xf32, #tpu.memory_space<vmem>>, vector<8x32xf32>
    %c0_408 = arith.constant 0 : index
    %c128_409 = arith.constant 128 : index
    %512 = vector.load %arg35[%c0_408, %c128_409] : memref<8x160xf32, #tpu.memory_space<vmem>>, vector<8x32xf32>
    tpu.vector_store %arg35[%c0_408, %c128_409], %511 {strides = array<i32>} : memref<8x160xf32, #tpu.memory_space<vmem>>, vector<8x32xf32>,
    %c0_410 = arith.constant 0 : index
    %c0_411 = arith.constant 0 : index
    %513 = vector.load %arg35[%c0_410, %c0_411] : memref<8x160xf32, #tpu.memory_space<vmem>>, vector<8x160xf32>
    %c0_412 = arith.constant 0 : index
    %c0_413 = arith.constant 0 : index
    %514 = vector.load %arg2[%c0_412, %c0_413] : memref<160x32xf32, #tpu.memory_space<vmem>>, vector<160x32xf32>
    %cst_414 = arith.constant dense<0.000000e+00> : vector<8x32xf32>
    %515 = tpu.matmul %513, %514, %cst_414 {dimension_numbers = #tpu.dot_dimension_numbers<[1], [0], [0], [1], [0, 0, 1, 1], [], []>} : vector<8x160xf32>, vector<160x32xf32>, vector<8x32xf32> -> vector<8x32xf32>
    %c0_415 = arith.constant 0 : index
    %c0_416 = arith.constant 0 : index
    %516 = vector.load %arg3[%c0_415, %c0_416] : memref<1x32xf32, #tpu.memory_space<vmem>>, vector<1x32xf32>
    %517 = vector.broadcast %516 : vector<1x32xf32> to vector<8x32xf32>
    %518 = arith.addf %515, %517 : vector<8x32xf32>
    %c0_417 = arith.constant 0 : index
    %c0_418 = arith.constant 0 : index
    %519 = vector.load %arg26[%c0_417, %c0_418] : memref<8x32xf32, #tpu.memory_space<vmem>>, vector<8x32xf32>
    %c0_419 = arith.constant 0 : index
    %c0_420 = arith.constant 0 : index
    %520 = vector.load %arg29[%c0_419, %c0_420] : memref<8x32xf32, #tpu.memory_space<vmem>>, vector<8x32xf32>
    %cst_421 = arith.constant 0.967216074 : f32
    %521 = vector.broadcast %cst_421 : f32 to vector<8x32xf32>
    %522 = arith.mulf %521, %520 : vector<8x32xf32>
    %cst_422 = arith.constant 3.278390e-02 : f32
    %523 = vector.broadcast %cst_422 : f32 to vector<8x32xf32>
    %524 = arith.mulf %523, %519 : vector<8x32xf32>
    %525 = arith.addf %522, %524 : vector<8x32xf32>
    %c0_423 = arith.constant 0 : index
    %c0_424 = arith.constant 0 : index
    %526 = vector.load %arg30[%c0_423, %c0_424] : memref<8x32xf32, #tpu.memory_space<vmem>>, vector<8x32xf32>
    %cst_425 = arith.constant 0.996672213 : f32
    %527 = vector.broadcast %cst_425 : f32 to vector<8x32xf32>
    %528 = arith.mulf %527, %526 : vector<8x32xf32>
    %cst_426 = arith.constant 0.0033277839 : f32
    %529 = vector.broadcast %cst_426 : f32 to vector<8x32xf32>
    %530 = arith.mulf %529, %519 : vector<8x32xf32>
    %531 = arith.addf %528, %530 : vector<8x32xf32>
    %cst_427 = arith.constant 1.800000e+00 : f32
    %532 = vector.broadcast %cst_427 : f32 to vector<8x32xf32>
    %533 = arith.mulf %532, %525 : vector<8x32xf32>
    %cst_428 = arith.constant 0.00999999977 : f32
    %534 = vector.broadcast %cst_428 : f32 to vector<8x32xf32>
    %535 = arith.addf %534, %533 : vector<8x32xf32>
    %cst_429 = arith.constant 9.000000e+00 : f32
    %536 = vector.broadcast %cst_429 : f32 to vector<8x32xf32>
    %537 = arith.mulf %536, %531 : vector<8x32xf32>
    %538 = arith.addf %535, %537 : vector<8x32xf32>
    %c0_430 = arith.constant 0 : index
    %c0_431 = arith.constant 0 : index
    %539 = vector.load %arg23[%c0_430, %c0_431] : memref<8x32xf32, #tpu.memory_space<vmem>>, vector<8x32xf32>
    %cst_432 = arith.constant 0.951229453 : f32
    %540 = vector.broadcast %cst_432 : f32 to vector<8x32xf32>
    %541 = arith.mulf %539, %540 : vector<8x32xf32>
    %cst_433 = arith.constant 0.0487705767 : f32
    %542 = vector.broadcast %cst_433 : f32 to vector<8x32xf32>
    %543 = arith.mulf %542, %518 : vector<8x32xf32>
    %544 = arith.addf %541, %543 : vector<8x32xf32>
    %545 = arith.mulf %538, %519 : vector<8x32xf32>
    %cst_434 = arith.constant 1.000000e+00 : f32
    %546 = vector.broadcast %cst_434 : f32 to vector<8x32xf32>
    %547 = arith.mulf %545, %546 : vector<8x32xf32>
    %548 = arith.subf %544, %547 : vector<8x32xf32>
    %549 = arith.subf %548, %538 : vector<8x32xf32>
    %cst_435 = arith.constant 0.000000e+00 : f32
    %550 = vector.broadcast %cst_435 : f32 to vector<8x32xf32>
    %551 = arith.cmpf ogt, %549, %550 : vector<8x32xf32>
    %552 = arith.extui %551 : vector<8x32xi1> to vector<8x32xi32>
    %553 = arith.sitofp %552 : vector<8x32xi32> to vector<8x32xf32>
    %c0_436 = arith.constant 0 : index
    %c0_437 = arith.constant 0 : index
    %554 = vector.load %arg23[%c0_436, %c0_437] : memref<8x32xf32, #tpu.memory_space<vmem>>, vector<8x32xf32>
    tpu.vector_store %arg23[%c0_436, %c0_437], %548 {strides = array<i32>} : memref<8x32xf32, #tpu.memory_space<vmem>>, vector<8x32xf32>,
    %c0_438 = arith.constant 0 : index
    %c0_439 = arith.constant 0 : index
    %555 = vector.load %arg26[%c0_438, %c0_439] : memref<8x32xf32, #tpu.memory_space<vmem>>, vector<8x32xf32>
    tpu.vector_store %arg26[%c0_438, %c0_439], %553 {strides = array<i32>} : memref<8x32xf32, #tpu.memory_space<vmem>>, vector<8x32xf32>,
    %c0_440 = arith.constant 0 : index
    %c0_441 = arith.constant 0 : index
    %556 = vector.load %arg29[%c0_440, %c0_441] : memref<8x32xf32, #tpu.memory_space<vmem>>, vector<8x32xf32>
    tpu.vector_store %arg29[%c0_440, %c0_441], %525 {strides = array<i32>} : memref<8x32xf32, #tpu.memory_space<vmem>>, vector<8x32xf32>,
    %c0_442 = arith.constant 0 : index
    %c0_443 = arith.constant 0 : index
    %557 = vector.load %arg30[%c0_442, %c0_443] : memref<8x32xf32, #tpu.memory_space<vmem>>, vector<8x32xf32>
    tpu.vector_store %arg30[%c0_442, %c0_443], %531 {strides = array<i32>} : memref<8x32xf32, #tpu.memory_space<vmem>>, vector<8x32xf32>,
    %c0_444 = arith.constant 0 : index
    %c0_445 = arith.constant 0 : index
    %558 = vector.load %arg36[%c0_444, %c0_445] : memref<8x160xf32, #tpu.memory_space<vmem>>, vector<8x32xf32>
    tpu.vector_store %arg36[%c0_444, %c0_445], %553 {strides = array<i32>} : memref<8x160xf32, #tpu.memory_space<vmem>>, vector<8x32xf32>,
    %c0_446 = arith.constant 0 : index
    %c0_447 = arith.constant 0 : index
    %559 = vector.load %arg27[%c0_446, %c0_447] : memref<8x32xf32, #tpu.memory_space<vmem>>, vector<8x32xf32>
    %c0_448 = arith.constant 0 : index
    %c128_449 = arith.constant 128 : index
    %560 = vector.load %arg36[%c0_448, %c128_449] : memref<8x160xf32, #tpu.memory_space<vmem>>, vector<8x32xf32>
    tpu.vector_store %arg36[%c0_448, %c128_449], %559 {strides = array<i32>} : memref<8x160xf32, #tpu.memory_space<vmem>>, vector<8x32xf32>,
    %c0_450 = arith.constant 0 : index
    %c0_451 = arith.constant 0 : index
    %561 = vector.load %arg36[%c0_450, %c0_451] : memref<8x160xf32, #tpu.memory_space<vmem>>, vector<8x160xf32>
    %c0_452 = arith.constant 0 : index
    %c0_453 = arith.constant 0 : index
    %562 = vector.load %arg4[%c0_452, %c0_453] : memref<160x32xf32, #tpu.memory_space<vmem>>, vector<160x32xf32>
    %cst_454 = arith.constant dense<0.000000e+00> : vector<8x32xf32>
    %563 = tpu.matmul %561, %562, %cst_454 {dimension_numbers = #tpu.dot_dimension_numbers<[1], [0], [0], [1], [0, 0, 1, 1], [], []>} : vector<8x160xf32>, vector<160x32xf32>, vector<8x32xf32> -> vector<8x32xf32>
    %c0_455 = arith.constant 0 : index
    %c0_456 = arith.constant 0 : index
    %564 = vector.load %arg5[%c0_455, %c0_456] : memref<1x32xf32, #tpu.memory_space<vmem>>, vector<1x32xf32>
    %565 = vector.broadcast %564 : vector<1x32xf32> to vector<8x32xf32>
    %566 = arith.addf %563, %565 : vector<8x32xf32>
    %c0_457 = arith.constant 0 : index
    %c0_458 = arith.constant 0 : index
    %567 = vector.load %arg27[%c0_457, %c0_458] : memref<8x32xf32, #tpu.memory_space<vmem>>, vector<8x32xf32>
    %c0_459 = arith.constant 0 : index
    %c0_460 = arith.constant 0 : index
    %568 = vector.load %arg31[%c0_459, %c0_460] : memref<8x32xf32, #tpu.memory_space<vmem>>, vector<8x32xf32>
    %cst_461 = arith.constant 0.967216074 : f32
    %569 = vector.broadcast %cst_461 : f32 to vector<8x32xf32>
    %570 = arith.mulf %569, %568 : vector<8x32xf32>
    %cst_462 = arith.constant 3.278390e-02 : f32
    %571 = vector.broadcast %cst_462 : f32 to vector<8x32xf32>
    %572 = arith.mulf %571, %567 : vector<8x32xf32>
    %573 = arith.addf %570, %572 : vector<8x32xf32>
    %c0_463 = arith.constant 0 : index
    %c0_464 = arith.constant 0 : index
    %574 = vector.load %arg32[%c0_463, %c0_464] : memref<8x32xf32, #tpu.memory_space<vmem>>, vector<8x32xf32>
    %cst_465 = arith.constant 0.996672213 : f32
    %575 = vector.broadcast %cst_465 : f32 to vector<8x32xf32>
    %576 = arith.mulf %575, %574 : vector<8x32xf32>
    %cst_466 = arith.constant 0.0033277839 : f32
    %577 = vector.broadcast %cst_466 : f32 to vector<8x32xf32>
    %578 = arith.mulf %577, %567 : vector<8x32xf32>
    %579 = arith.addf %576, %578 : vector<8x32xf32>
    %cst_467 = arith.constant 1.800000e+00 : f32
    %580 = vector.broadcast %cst_467 : f32 to vector<8x32xf32>
    %581 = arith.mulf %580, %573 : vector<8x32xf32>
    %cst_468 = arith.constant 0.00999999977 : f32
    %582 = vector.broadcast %cst_468 : f32 to vector<8x32xf32>
    %583 = arith.addf %582, %581 : vector<8x32xf32>
    %cst_469 = arith.constant 9.000000e+00 : f32
    %584 = vector.broadcast %cst_469 : f32 to vector<8x32xf32>
    %585 = arith.mulf %584, %579 : vector<8x32xf32>
    %586 = arith.addf %583, %585 : vector<8x32xf32>
    %c0_470 = arith.constant 0 : index
    %c0_471 = arith.constant 0 : index
    %587 = vector.load %arg24[%c0_470, %c0_471] : memref<8x32xf32, #tpu.memory_space<vmem>>, vector<8x32xf32>
    %cst_472 = arith.constant 0.951229453 : f32
    %588 = vector.broadcast %cst_472 : f32 to vector<8x32xf32>
    %589 = arith.mulf %587, %588 : vector<8x32xf32>
    %cst_473 = arith.constant 0.0487705767 : f32
    %590 = vector.broadcast %cst_473 : f32 to vector<8x32xf32>
    %591 = arith.mulf %590, %566 : vector<8x32xf32>
    %592 = arith.addf %589, %591 : vector<8x32xf32>
    %593 = arith.mulf %586, %567 : vector<8x32xf32>
    %cst_474 = arith.constant 1.000000e+00 : f32
    %594 = vector.broadcast %cst_474 : f32 to vector<8x32xf32>
    %595 = arith.mulf %593, %594 : vector<8x32xf32>
    %596 = arith.subf %592, %595 : vector<8x32xf32>
    %597 = arith.subf %596, %586 : vector<8x32xf32>
    %cst_475 = arith.constant 0.000000e+00 : f32
    %598 = vector.broadcast %cst_475 : f32 to vector<8x32xf32>
    %599 = arith.cmpf ogt, %597, %598 : vector<8x32xf32>
    %600 = arith.extui %599 : vector<8x32xi1> to vector<8x32xi32>
    %601 = arith.sitofp %600 : vector<8x32xi32> to vector<8x32xf32>
    %c0_476 = arith.constant 0 : index
    %c0_477 = arith.constant 0 : index
    %602 = vector.load %arg24[%c0_476, %c0_477] : memref<8x32xf32, #tpu.memory_space<vmem>>, vector<8x32xf32>
    tpu.vector_store %arg24[%c0_476, %c0_477], %596 {strides = array<i32>} : memref<8x32xf32, #tpu.memory_space<vmem>>, vector<8x32xf32>,
    %c0_478 = arith.constant 0 : index
    %c0_479 = arith.constant 0 : index
    %603 = vector.load %arg27[%c0_478, %c0_479] : memref<8x32xf32, #tpu.memory_space<vmem>>, vector<8x32xf32>
    tpu.vector_store %arg27[%c0_478, %c0_479], %601 {strides = array<i32>} : memref<8x32xf32, #tpu.memory_space<vmem>>, vector<8x32xf32>,
    %c0_480 = arith.constant 0 : index
    %c0_481 = arith.constant 0 : index
    %604 = vector.load %arg31[%c0_480, %c0_481] : memref<8x32xf32, #tpu.memory_space<vmem>>, vector<8x32xf32>
    tpu.vector_store %arg31[%c0_480, %c0_481], %573 {strides = array<i32>} : memref<8x32xf32, #tpu.memory_space<vmem>>, vector<8x32xf32>,
    %c0_482 = arith.constant 0 : index
    %c0_483 = arith.constant 0 : index
    %605 = vector.load %arg32[%c0_482, %c0_483] : memref<8x32xf32, #tpu.memory_space<vmem>>, vector<8x32xf32>
    tpu.vector_store %arg32[%c0_482, %c0_483], %579 {strides = array<i32>} : memref<8x32xf32, #tpu.memory_space<vmem>>, vector<8x32xf32>,
    %c0_484 = arith.constant 0 : index
    %c0_485 = arith.constant 0 : index
    %606 = vector.load %arg37[%c0_484, %c0_485] : memref<8x160xf32, #tpu.memory_space<vmem>>, vector<8x32xf32>
    tpu.vector_store %arg37[%c0_484, %c0_485], %601 {strides = array<i32>} : memref<8x160xf32, #tpu.memory_space<vmem>>, vector<8x32xf32>,
    %c0_486 = arith.constant 0 : index
    %c0_487 = arith.constant 0 : index
    %607 = vector.load %arg28[%c0_486, %c0_487] : memref<8x32xf32, #tpu.memory_space<vmem>>, vector<8x32xf32>
    %c0_488 = arith.constant 0 : index
    %c128_489 = arith.constant 128 : index
    %608 = vector.load %arg37[%c0_488, %c128_489] : memref<8x160xf32, #tpu.memory_space<vmem>>, vector<8x32xf32>
    tpu.vector_store %arg37[%c0_488, %c128_489], %607 {strides = array<i32>} : memref<8x160xf32, #tpu.memory_space<vmem>>, vector<8x32xf32>,
    %c0_490 = arith.constant 0 : index
    %c0_491 = arith.constant 0 : index
    %609 = vector.load %arg37[%c0_490, %c0_491] : memref<8x160xf32, #tpu.memory_space<vmem>>, vector<8x160xf32>
    %c0_492 = arith.constant 0 : index
    %c0_493 = arith.constant 0 : index
    %610 = vector.load %arg6[%c0_492, %c0_493] : memref<160x32xf32, #tpu.memory_space<vmem>>, vector<160x32xf32>
    %cst_494 = arith.constant dense<0.000000e+00> : vector<8x32xf32>
    %611 = tpu.matmul %609, %610, %cst_494 {dimension_numbers = #tpu.dot_dimension_numbers<[1], [0], [0], [1], [0, 0, 1, 1], [], []>} : vector<8x160xf32>, vector<160x32xf32>, vector<8x32xf32> -> vector<8x32xf32>
    %c0_495 = arith.constant 0 : index
    %c0_496 = arith.constant 0 : index
    %612 = vector.load %arg7[%c0_495, %c0_496] : memref<1x32xf32, #tpu.memory_space<vmem>>, vector<1x32xf32>
    %613 = vector.broadcast %612 : vector<1x32xf32> to vector<8x32xf32>
    %614 = arith.addf %611, %613 : vector<8x32xf32>
    %c0_497 = arith.constant 0 : index
    %c0_498 = arith.constant 0 : index
    %615 = vector.load %arg28[%c0_497, %c0_498] : memref<8x32xf32, #tpu.memory_space<vmem>>, vector<8x32xf32>
    %c0_499 = arith.constant 0 : index
    %c0_500 = arith.constant 0 : index
    %616 = vector.load %arg33[%c0_499, %c0_500] : memref<8x32xf32, #tpu.memory_space<vmem>>, vector<8x32xf32>
    %cst_501 = arith.constant 0.967216074 : f32
    %617 = vector.broadcast %cst_501 : f32 to vector<8x32xf32>
    %618 = arith.mulf %617, %616 : vector<8x32xf32>
    %cst_502 = arith.constant 3.278390e-02 : f32
    %619 = vector.broadcast %cst_502 : f32 to vector<8x32xf32>
    %620 = arith.mulf %619, %615 : vector<8x32xf32>
    %621 = arith.addf %618, %620 : vector<8x32xf32>
    %c0_503 = arith.constant 0 : index
    %c0_504 = arith.constant 0 : index
    %622 = vector.load %arg34[%c0_503, %c0_504] : memref<8x32xf32, #tpu.memory_space<vmem>>, vector<8x32xf32>
    %cst_505 = arith.constant 0.996672213 : f32
    %623 = vector.broadcast %cst_505 : f32 to vector<8x32xf32>
    %624 = arith.mulf %623, %622 : vector<8x32xf32>
    %cst_506 = arith.constant 0.0033277839 : f32
    %625 = vector.broadcast %cst_506 : f32 to vector<8x32xf32>
    %626 = arith.mulf %625, %615 : vector<8x32xf32>
    %627 = arith.addf %624, %626 : vector<8x32xf32>
    %cst_507 = arith.constant 1.800000e+00 : f32
    %628 = vector.broadcast %cst_507 : f32 to vector<8x32xf32>
    %629 = arith.mulf %628, %621 : vector<8x32xf32>
    %cst_508 = arith.constant 0.00999999977 : f32
    %630 = vector.broadcast %cst_508 : f32 to vector<8x32xf32>
    %631 = arith.addf %630, %629 : vector<8x32xf32>
    %cst_509 = arith.constant 9.000000e+00 : f32
    %632 = vector.broadcast %cst_509 : f32 to vector<8x32xf32>
    %633 = arith.mulf %632, %627 : vector<8x32xf32>
    %634 = arith.addf %631, %633 : vector<8x32xf32>
    %c0_510 = arith.constant 0 : index
    %c0_511 = arith.constant 0 : index
    %635 = vector.load %arg25[%c0_510, %c0_511] : memref<8x32xf32, #tpu.memory_space<vmem>>, vector<8x32xf32>
    %cst_512 = arith.constant 0.951229453 : f32
    %636 = vector.broadcast %cst_512 : f32 to vector<8x32xf32>
    %637 = arith.mulf %635, %636 : vector<8x32xf32>
    %cst_513 = arith.constant 0.0487705767 : f32
    %638 = vector.broadcast %cst_513 : f32 to vector<8x32xf32>
    %639 = arith.mulf %638, %614 : vector<8x32xf32>
    %640 = arith.addf %637, %639 : vector<8x32xf32>
    %641 = arith.mulf %634, %615 : vector<8x32xf32>
    %cst_514 = arith.constant 1.000000e+00 : f32
    %642 = vector.broadcast %cst_514 : f32 to vector<8x32xf32>
    %643 = arith.mulf %641, %642 : vector<8x32xf32>
    %644 = arith.subf %640, %643 : vector<8x32xf32>
    %645 = arith.subf %644, %634 : vector<8x32xf32>
    %cst_515 = arith.constant 0.000000e+00 : f32
    %646 = vector.broadcast %cst_515 : f32 to vector<8x32xf32>
    %647 = arith.cmpf ogt, %645, %646 : vector<8x32xf32>
    %648 = arith.extui %647 : vector<8x32xi1> to vector<8x32xi32>
    %649 = arith.sitofp %648 : vector<8x32xi32> to vector<8x32xf32>
    %c0_516 = arith.constant 0 : index
    %c0_517 = arith.constant 0 : index
    %650 = vector.load %arg25[%c0_516, %c0_517] : memref<8x32xf32, #tpu.memory_space<vmem>>, vector<8x32xf32>
    tpu.vector_store %arg25[%c0_516, %c0_517], %644 {strides = array<i32>} : memref<8x32xf32, #tpu.memory_space<vmem>>, vector<8x32xf32>,
    %c0_518 = arith.constant 0 : index
    %c0_519 = arith.constant 0 : index
    %651 = vector.load %arg28[%c0_518, %c0_519] : memref<8x32xf32, #tpu.memory_space<vmem>>, vector<8x32xf32>
    tpu.vector_store %arg28[%c0_518, %c0_519], %649 {strides = array<i32>} : memref<8x32xf32, #tpu.memory_space<vmem>>, vector<8x32xf32>,
    %c0_520 = arith.constant 0 : index
    %c0_521 = arith.constant 0 : index
    %652 = vector.load %arg33[%c0_520, %c0_521] : memref<8x32xf32, #tpu.memory_space<vmem>>, vector<8x32xf32>
    tpu.vector_store %arg33[%c0_520, %c0_521], %621 {strides = array<i32>} : memref<8x32xf32, #tpu.memory_space<vmem>>, vector<8x32xf32>,
    %c0_522 = arith.constant 0 : index
    %c0_523 = arith.constant 0 : index
    %653 = vector.load %arg34[%c0_522, %c0_523] : memref<8x32xf32, #tpu.memory_space<vmem>>, vector<8x32xf32>
    tpu.vector_store %arg34[%c0_522, %c0_523], %627 {strides = array<i32>} : memref<8x32xf32, #tpu.memory_space<vmem>>, vector<8x32xf32>,
    %c0_524 = arith.constant 0 : index
    %c0_525 = arith.constant 0 : index
    %654 = vector.load %arg8[%c0_524, %c0_525] : memref<32x2xf32, #tpu.memory_space<vmem>>, vector<32x2xf32>
    %cst_526 = arith.constant dense<0.000000e+00> : vector<8x2xf32>
    %655 = tpu.matmul %644, %654, %cst_526 {dimension_numbers = #tpu.dot_dimension_numbers<[1], [0], [0], [1], [0, 0, 1, 1], [], []>} : vector<8x32xf32>, vector<32x2xf32>, vector<8x2xf32> -> vector<8x2xf32>
    %c0_527 = arith.constant 0 : index
    %c0_528 = arith.constant 0 : index
    %656 = vector.load %arg9[%c0_527, %c0_528] : memref<1x2xf32, #tpu.memory_space<vmem>>, vector<1x2xf32>
    %657 = vector.broadcast %656 : vector<1x2xf32> to vector<8x2xf32>
    %658 = arith.addf %655, %657 : vector<8x2xf32>
    %659 = arith.index_cast %c3_i32 : i32 to index
    %c0_529 = arith.constant 0 : index
    %c0_530 = arith.constant 0 : index
    %660 = vector.load %arg16[%659, %c0_529, %c0_530] : memref<8x8x512xf32, #tpu.memory_space<vmem>>, vector<1x8x2xf32>
    %661 = vector.shape_cast %660 : vector<1x8x2xf32> to vector<8x2xf32>
    %662 = vector.shape_cast %658 : vector<8x2xf32> to vector<1x8x2xf32>
    tpu.vector_store %arg16[%659, %c0_529, %c0_530], %662 {strides = array<i32>} : memref<8x8x512xf32, #tpu.memory_space<vmem>>, vector<1x8x2xf32>,
    %663 = arith.index_cast %c3_i32 : i32 to index
    %c0_531 = arith.constant 0 : index
    %c128_532 = arith.constant 128 : index
    %664 = vector.load %arg16[%663, %c0_531, %c128_532] : memref<8x8x512xf32, #tpu.memory_space<vmem>>, vector<1x8x32xf32>
    %665 = vector.shape_cast %664 : vector<1x8x32xf32> to vector<8x32xf32>
    %666 = vector.shape_cast %649 : vector<8x32xf32> to vector<1x8x32xf32>
    tpu.vector_store %arg16[%663, %c0_531, %c128_532], %666 {strides = array<i32>} : memref<8x8x512xf32, #tpu.memory_space<vmem>>, vector<1x8x32xf32>,
    %667 = arith.index_cast %c3_i32 : i32 to index
    %c0_533 = arith.constant 0 : index
    %c256_534 = arith.constant 256 : index
    %668 = vector.load %arg16[%667, %c0_533, %c256_534] : memref<8x8x512xf32, #tpu.memory_space<vmem>>, vector<1x8x32xf32>
    %669 = vector.shape_cast %668 : vector<1x8x32xf32> to vector<8x32xf32>
    %670 = vector.shape_cast %644 : vector<8x32xf32> to vector<1x8x32xf32>
    tpu.vector_store %arg16[%667, %c0_533, %c256_534], %670 {strides = array<i32>} : memref<8x8x512xf32, #tpu.memory_space<vmem>>, vector<1x8x32xf32>,
    %671 = arith.index_cast %c3_i32 : i32 to index
    %c0_535 = arith.constant 0 : index
    %c384_536 = arith.constant 384 : index
    %672 = vector.load %arg16[%671, %c0_535, %c384_536] : memref<8x8x512xf32, #tpu.memory_space<vmem>>, vector<1x8x32xf32>
    %673 = vector.shape_cast %672 : vector<1x8x32xf32> to vector<8x32xf32>
    %674 = vector.shape_cast %634 : vector<8x32xf32> to vector<1x8x32xf32>
    tpu.vector_store %arg16[%671, %c0_535, %c384_536], %674 {strides = array<i32>} : memref<8x8x512xf32, #tpu.memory_space<vmem>>, vector<1x8x32xf32>,
    %c4_i32 = arith.constant 4 : i32
    %675 = arith.index_cast %c4_i32 : i32 to index
    %c0_537 = arith.constant 0 : index
    %c0_538 = arith.constant 0 : index
    %676 = vector.load %arg1[%675, %c0_537, %c0_538] : memref<8x8x16xf32, #tpu.memory_space<vmem>>, vector<1x8x16xf32>
    %677 = vector.shape_cast %676 : vector<1x8x16xf32> to vector<8x16xf32>
    %c0_539 = arith.constant 0 : index
    %c0_540 = arith.constant 0 : index
    %678 = vector.load %arg35[%c0_539, %c0_540] : memref<8x160xf32, #tpu.memory_space<vmem>>, vector<8x16xf32>
    tpu.vector_store %arg35[%c0_539, %c0_540], %677 {strides = array<i32>} : memref<8x160xf32, #tpu.memory_space<vmem>>, vector<8x16xf32>,
    %c0_541 = arith.constant 0 : index
    %c0_542 = arith.constant 0 : index
    %679 = vector.load %arg26[%c0_541, %c0_542] : memref<8x32xf32, #tpu.memory_space<vmem>>, vector<8x32xf32>
    %c0_543 = arith.constant 0 : index
    %c128_544 = arith.constant 128 : index
    %680 = vector.load %arg35[%c0_543, %c128_544] : memref<8x160xf32, #tpu.memory_space<vmem>>, vector<8x32xf32>
    tpu.vector_store %arg35[%c0_543, %c128_544], %679 {strides = array<i32>} : memref<8x160xf32, #tpu.memory_space<vmem>>, vector<8x32xf32>,
    %c0_545 = arith.constant 0 : index
    %c0_546 = arith.constant 0 : index
    %681 = vector.load %arg35[%c0_545, %c0_546] : memref<8x160xf32, #tpu.memory_space<vmem>>, vector<8x160xf32>
    %c0_547 = arith.constant 0 : index
    %c0_548 = arith.constant 0 : index
    %682 = vector.load %arg2[%c0_547, %c0_548] : memref<160x32xf32, #tpu.memory_space<vmem>>, vector<160x32xf32>
    %cst_549 = arith.constant dense<0.000000e+00> : vector<8x32xf32>
    %683 = tpu.matmul %681, %682, %cst_549 {dimension_numbers = #tpu.dot_dimension_numbers<[1], [0], [0], [1], [0, 0, 1, 1], [], []>} : vector<8x160xf32>, vector<160x32xf32>, vector<8x32xf32> -> vector<8x32xf32>
    %c0_550 = arith.constant 0 : index
    %c0_551 = arith.constant 0 : index
    %684 = vector.load %arg3[%c0_550, %c0_551] : memref<1x32xf32, #tpu.memory_space<vmem>>, vector<1x32xf32>
    %685 = vector.broadcast %684 : vector<1x32xf32> to vector<8x32xf32>
    %686 = arith.addf %683, %685 : vector<8x32xf32>
    %c0_552 = arith.constant 0 : index
    %c0_553 = arith.constant 0 : index
    %687 = vector.load %arg26[%c0_552, %c0_553] : memref<8x32xf32, #tpu.memory_space<vmem>>, vector<8x32xf32>
    %c0_554 = arith.constant 0 : index
    %c0_555 = arith.constant 0 : index
    %688 = vector.load %arg29[%c0_554, %c0_555] : memref<8x32xf32, #tpu.memory_space<vmem>>, vector<8x32xf32>
    %cst_556 = arith.constant 0.967216074 : f32
    %689 = vector.broadcast %cst_556 : f32 to vector<8x32xf32>
    %690 = arith.mulf %689, %688 : vector<8x32xf32>
    %cst_557 = arith.constant 3.278390e-02 : f32
    %691 = vector.broadcast %cst_557 : f32 to vector<8x32xf32>
    %692 = arith.mulf %691, %687 : vector<8x32xf32>
    %693 = arith.addf %690, %692 : vector<8x32xf32>
    %c0_558 = arith.constant 0 : index
    %c0_559 = arith.constant 0 : index
    %694 = vector.load %arg30[%c0_558, %c0_559] : memref<8x32xf32, #tpu.memory_space<vmem>>, vector<8x32xf32>
    %cst_560 = arith.constant 0.996672213 : f32
    %695 = vector.broadcast %cst_560 : f32 to vector<8x32xf32>
    %696 = arith.mulf %695, %694 : vector<8x32xf32>
    %cst_561 = arith.constant 0.0033277839 : f32
    %697 = vector.broadcast %cst_561 : f32 to vector<8x32xf32>
    %698 = arith.mulf %697, %687 : vector<8x32xf32>
    %699 = arith.addf %696, %698 : vector<8x32xf32>
    %cst_562 = arith.constant 1.800000e+00 : f32
    %700 = vector.broadcast %cst_562 : f32 to vector<8x32xf32>
    %701 = arith.mulf %700, %693 : vector<8x32xf32>
    %cst_563 = arith.constant 0.00999999977 : f32
    %702 = vector.broadcast %cst_563 : f32 to vector<8x32xf32>
    %703 = arith.addf %702, %701 : vector<8x32xf32>
    %cst_564 = arith.constant 9.000000e+00 : f32
    %704 = vector.broadcast %cst_564 : f32 to vector<8x32xf32>
    %705 = arith.mulf %704, %699 : vector<8x32xf32>
    %706 = arith.addf %703, %705 : vector<8x32xf32>
    %c0_565 = arith.constant 0 : index
    %c0_566 = arith.constant 0 : index
    %707 = vector.load %arg23[%c0_565, %c0_566] : memref<8x32xf32, #tpu.memory_space<vmem>>, vector<8x32xf32>
    %cst_567 = arith.constant 0.951229453 : f32
    %708 = vector.broadcast %cst_567 : f32 to vector<8x32xf32>
    %709 = arith.mulf %707, %708 : vector<8x32xf32>
    %cst_568 = arith.constant 0.0487705767 : f32
    %710 = vector.broadcast %cst_568 : f32 to vector<8x32xf32>
    %711 = arith.mulf %710, %686 : vector<8x32xf32>
    %712 = arith.addf %709, %711 : vector<8x32xf32>
    %713 = arith.mulf %706, %687 : vector<8x32xf32>
    %cst_569 = arith.constant 1.000000e+00 : f32
    %714 = vector.broadcast %cst_569 : f32 to vector<8x32xf32>
    %715 = arith.mulf %713, %714 : vector<8x32xf32>
    %716 = arith.subf %712, %715 : vector<8x32xf32>
    %717 = arith.subf %716, %706 : vector<8x32xf32>
    %cst_570 = arith.constant 0.000000e+00 : f32
    %718 = vector.broadcast %cst_570 : f32 to vector<8x32xf32>
    %719 = arith.cmpf ogt, %717, %718 : vector<8x32xf32>
    %720 = arith.extui %719 : vector<8x32xi1> to vector<8x32xi32>
    %721 = arith.sitofp %720 : vector<8x32xi32> to vector<8x32xf32>
    %c0_571 = arith.constant 0 : index
    %c0_572 = arith.constant 0 : index
    %722 = vector.load %arg23[%c0_571, %c0_572] : memref<8x32xf32, #tpu.memory_space<vmem>>, vector<8x32xf32>
    tpu.vector_store %arg23[%c0_571, %c0_572], %716 {strides = array<i32>} : memref<8x32xf32, #tpu.memory_space<vmem>>, vector<8x32xf32>,
    %c0_573 = arith.constant 0 : index
    %c0_574 = arith.constant 0 : index
    %723 = vector.load %arg26[%c0_573, %c0_574] : memref<8x32xf32, #tpu.memory_space<vmem>>, vector<8x32xf32>
    tpu.vector_store %arg26[%c0_573, %c0_574], %721 {strides = array<i32>} : memref<8x32xf32, #tpu.memory_space<vmem>>, vector<8x32xf32>,
    %c0_575 = arith.constant 0 : index
    %c0_576 = arith.constant 0 : index
    %724 = vector.load %arg29[%c0_575, %c0_576] : memref<8x32xf32, #tpu.memory_space<vmem>>, vector<8x32xf32>
    tpu.vector_store %arg29[%c0_575, %c0_576], %693 {strides = array<i32>} : memref<8x32xf32, #tpu.memory_space<vmem>>, vector<8x32xf32>,
    %c0_577 = arith.constant 0 : index
    %c0_578 = arith.constant 0 : index
    %725 = vector.load %arg30[%c0_577, %c0_578] : memref<8x32xf32, #tpu.memory_space<vmem>>, vector<8x32xf32>
    tpu.vector_store %arg30[%c0_577, %c0_578], %699 {strides = array<i32>} : memref<8x32xf32, #tpu.memory_space<vmem>>, vector<8x32xf32>,
    %c0_579 = arith.constant 0 : index
    %c0_580 = arith.constant 0 : index
    %726 = vector.load %arg36[%c0_579, %c0_580] : memref<8x160xf32, #tpu.memory_space<vmem>>, vector<8x32xf32>
    tpu.vector_store %arg36[%c0_579, %c0_580], %721 {strides = array<i32>} : memref<8x160xf32, #tpu.memory_space<vmem>>, vector<8x32xf32>,
    %c0_581 = arith.constant 0 : index
    %c0_582 = arith.constant 0 : index
    %727 = vector.load %arg27[%c0_581, %c0_582] : memref<8x32xf32, #tpu.memory_space<vmem>>, vector<8x32xf32>
    %c0_583 = arith.constant 0 : index
    %c128_584 = arith.constant 128 : index
    %728 = vector.load %arg36[%c0_583, %c128_584] : memref<8x160xf32, #tpu.memory_space<vmem>>, vector<8x32xf32>
    tpu.vector_store %arg36[%c0_583, %c128_584], %727 {strides = array<i32>} : memref<8x160xf32, #tpu.memory_space<vmem>>, vector<8x32xf32>,
    %c0_585 = arith.constant 0 : index
    %c0_586 = arith.constant 0 : index
    %729 = vector.load %arg36[%c0_585, %c0_586] : memref<8x160xf32, #tpu.memory_space<vmem>>, vector<8x160xf32>
    %c0_587 = arith.constant 0 : index
    %c0_588 = arith.constant 0 : index
    %730 = vector.load %arg4[%c0_587, %c0_588] : memref<160x32xf32, #tpu.memory_space<vmem>>, vector<160x32xf32>
    %cst_589 = arith.constant dense<0.000000e+00> : vector<8x32xf32>
    %731 = tpu.matmul %729, %730, %cst_589 {dimension_numbers = #tpu.dot_dimension_numbers<[1], [0], [0], [1], [0, 0, 1, 1], [], []>} : vector<8x160xf32>, vector<160x32xf32>, vector<8x32xf32> -> vector<8x32xf32>
    %c0_590 = arith.constant 0 : index
    %c0_591 = arith.constant 0 : index
    %732 = vector.load %arg5[%c0_590, %c0_591] : memref<1x32xf32, #tpu.memory_space<vmem>>, vector<1x32xf32>
    %733 = vector.broadcast %732 : vector<1x32xf32> to vector<8x32xf32>
    %734 = arith.addf %731, %733 : vector<8x32xf32>
    %c0_592 = arith.constant 0 : index
    %c0_593 = arith.constant 0 : index
    %735 = vector.load %arg27[%c0_592, %c0_593] : memref<8x32xf32, #tpu.memory_space<vmem>>, vector<8x32xf32>
    %c0_594 = arith.constant 0 : index
    %c0_595 = arith.constant 0 : index
    %736 = vector.load %arg31[%c0_594, %c0_595] : memref<8x32xf32, #tpu.memory_space<vmem>>, vector<8x32xf32>
    %cst_596 = arith.constant 0.967216074 : f32
    %737 = vector.broadcast %cst_596 : f32 to vector<8x32xf32>
    %738 = arith.mulf %737, %736 : vector<8x32xf32>
    %cst_597 = arith.constant 3.278390e-02 : f32
    %739 = vector.broadcast %cst_597 : f32 to vector<8x32xf32>
    %740 = arith.mulf %739, %735 : vector<8x32xf32>
    %741 = arith.addf %738, %740 : vector<8x32xf32>
    %c0_598 = arith.constant 0 : index
    %c0_599 = arith.constant 0 : index
    %742 = vector.load %arg32[%c0_598, %c0_599] : memref<8x32xf32, #tpu.memory_space<vmem>>, vector<8x32xf32>
    %cst_600 = arith.constant 0.996672213 : f32
    %743 = vector.broadcast %cst_600 : f32 to vector<8x32xf32>
    %744 = arith.mulf %743, %742 : vector<8x32xf32>
    %cst_601 = arith.constant 0.0033277839 : f32
    %745 = vector.broadcast %cst_601 : f32 to vector<8x32xf32>
    %746 = arith.mulf %745, %735 : vector<8x32xf32>
    %747 = arith.addf %744, %746 : vector<8x32xf32>
    %cst_602 = arith.constant 1.800000e+00 : f32
    %748 = vector.broadcast %cst_602 : f32 to vector<8x32xf32>
    %749 = arith.mulf %748, %741 : vector<8x32xf32>
    %cst_603 = arith.constant 0.00999999977 : f32
    %750 = vector.broadcast %cst_603 : f32 to vector<8x32xf32>
    %751 = arith.addf %750, %749 : vector<8x32xf32>
    %cst_604 = arith.constant 9.000000e+00 : f32
    %752 = vector.broadcast %cst_604 : f32 to vector<8x32xf32>
    %753 = arith.mulf %752, %747 : vector<8x32xf32>
    %754 = arith.addf %751, %753 : vector<8x32xf32>
    %c0_605 = arith.constant 0 : index
    %c0_606 = arith.constant 0 : index
    %755 = vector.load %arg24[%c0_605, %c0_606] : memref<8x32xf32, #tpu.memory_space<vmem>>, vector<8x32xf32>
    %cst_607 = arith.constant 0.951229453 : f32
    %756 = vector.broadcast %cst_607 : f32 to vector<8x32xf32>
    %757 = arith.mulf %755, %756 : vector<8x32xf32>
    %cst_608 = arith.constant 0.0487705767 : f32
    %758 = vector.broadcast %cst_608 : f32 to vector<8x32xf32>
    %759 = arith.mulf %758, %734 : vector<8x32xf32>
    %760 = arith.addf %757, %759 : vector<8x32xf32>
    %761 = arith.mulf %754, %735 : vector<8x32xf32>
    %cst_609 = arith.constant 1.000000e+00 : f32
    %762 = vector.broadcast %cst_609 : f32 to vector<8x32xf32>
    %763 = arith.mulf %761, %762 : vector<8x32xf32>
    %764 = arith.subf %760, %763 : vector<8x32xf32>
    %765 = arith.subf %764, %754 : vector<8x32xf32>
    %cst_610 = arith.constant 0.000000e+00 : f32
    %766 = vector.broadcast %cst_610 : f32 to vector<8x32xf32>
    %767 = arith.cmpf ogt, %765, %766 : vector<8x32xf32>
    %768 = arith.extui %767 : vector<8x32xi1> to vector<8x32xi32>
    %769 = arith.sitofp %768 : vector<8x32xi32> to vector<8x32xf32>
    %c0_611 = arith.constant 0 : index
    %c0_612 = arith.constant 0 : index
    %770 = vector.load %arg24[%c0_611, %c0_612] : memref<8x32xf32, #tpu.memory_space<vmem>>, vector<8x32xf32>
    tpu.vector_store %arg24[%c0_611, %c0_612], %764 {strides = array<i32>} : memref<8x32xf32, #tpu.memory_space<vmem>>, vector<8x32xf32>,
    %c0_613 = arith.constant 0 : index
    %c0_614 = arith.constant 0 : index
    %771 = vector.load %arg27[%c0_613, %c0_614] : memref<8x32xf32, #tpu.memory_space<vmem>>, vector<8x32xf32>
    tpu.vector_store %arg27[%c0_613, %c0_614], %769 {strides = array<i32>} : memref<8x32xf32, #tpu.memory_space<vmem>>, vector<8x32xf32>,
    %c0_615 = arith.constant 0 : index
    %c0_616 = arith.constant 0 : index
    %772 = vector.load %arg31[%c0_615, %c0_616] : memref<8x32xf32, #tpu.memory_space<vmem>>, vector<8x32xf32>
    tpu.vector_store %arg31[%c0_615, %c0_616], %741 {strides = array<i32>} : memref<8x32xf32, #tpu.memory_space<vmem>>, vector<8x32xf32>,
    %c0_617 = arith.constant 0 : index
    %c0_618 = arith.constant 0 : index
    %773 = vector.load %arg32[%c0_617, %c0_618] : memref<8x32xf32, #tpu.memory_space<vmem>>, vector<8x32xf32>
    tpu.vector_store %arg32[%c0_617, %c0_618], %747 {strides = array<i32>} : memref<8x32xf32, #tpu.memory_space<vmem>>, vector<8x32xf32>,
    %c0_619 = arith.constant 0 : index
    %c0_620 = arith.constant 0 : index
    %774 = vector.load %arg37[%c0_619, %c0_620] : memref<8x160xf32, #tpu.memory_space<vmem>>, vector<8x32xf32>
    tpu.vector_store %arg37[%c0_619, %c0_620], %769 {strides = array<i32>} : memref<8x160xf32, #tpu.memory_space<vmem>>, vector<8x32xf32>,
    %c0_621 = arith.constant 0 : index
    %c0_622 = arith.constant 0 : index
    %775 = vector.load %arg28[%c0_621, %c0_622] : memref<8x32xf32, #tpu.memory_space<vmem>>, vector<8x32xf32>
    %c0_623 = arith.constant 0 : index
    %c128_624 = arith.constant 128 : index
    %776 = vector.load %arg37[%c0_623, %c128_624] : memref<8x160xf32, #tpu.memory_space<vmem>>, vector<8x32xf32>
    tpu.vector_store %arg37[%c0_623, %c128_624], %775 {strides = array<i32>} : memref<8x160xf32, #tpu.memory_space<vmem>>, vector<8x32xf32>,
    %c0_625 = arith.constant 0 : index
    %c0_626 = arith.constant 0 : index
    %777 = vector.load %arg37[%c0_625, %c0_626] : memref<8x160xf32, #tpu.memory_space<vmem>>, vector<8x160xf32>
    %c0_627 = arith.constant 0 : index
    %c0_628 = arith.constant 0 : index
    %778 = vector.load %arg6[%c0_627, %c0_628] : memref<160x32xf32, #tpu.memory_space<vmem>>, vector<160x32xf32>
    %cst_629 = arith.constant dense<0.000000e+00> : vector<8x32xf32>
    %779 = tpu.matmul %777, %778, %cst_629 {dimension_numbers = #tpu.dot_dimension_numbers<[1], [0], [0], [1], [0, 0, 1, 1], [], []>} : vector<8x160xf32>, vector<160x32xf32>, vector<8x32xf32> -> vector<8x32xf32>
    %c0_630 = arith.constant 0 : index
    %c0_631 = arith.constant 0 : index
    %780 = vector.load %arg7[%c0_630, %c0_631] : memref<1x32xf32, #tpu.memory_space<vmem>>, vector<1x32xf32>
    %781 = vector.broadcast %780 : vector<1x32xf32> to vector<8x32xf32>
    %782 = arith.addf %779, %781 : vector<8x32xf32>
    %c0_632 = arith.constant 0 : index
    %c0_633 = arith.constant 0 : index
    %783 = vector.load %arg28[%c0_632, %c0_633] : memref<8x32xf32, #tpu.memory_space<vmem>>, vector<8x32xf32>
    %c0_634 = arith.constant 0 : index
    %c0_635 = arith.constant 0 : index
    %784 = vector.load %arg33[%c0_634, %c0_635] : memref<8x32xf32, #tpu.memory_space<vmem>>, vector<8x32xf32>
    %cst_636 = arith.constant 0.967216074 : f32
    %785 = vector.broadcast %cst_636 : f32 to vector<8x32xf32>
    %786 = arith.mulf %785, %784 : vector<8x32xf32>
    %cst_637 = arith.constant 3.278390e-02 : f32
    %787 = vector.broadcast %cst_637 : f32 to vector<8x32xf32>
    %788 = arith.mulf %787, %783 : vector<8x32xf32>
    %789 = arith.addf %786, %788 : vector<8x32xf32>
    %c0_638 = arith.constant 0 : index
    %c0_639 = arith.constant 0 : index
    %790 = vector.load %arg34[%c0_638, %c0_639] : memref<8x32xf32, #tpu.memory_space<vmem>>, vector<8x32xf32>
    %cst_640 = arith.constant 0.996672213 : f32
    %791 = vector.broadcast %cst_640 : f32 to vector<8x32xf32>
    %792 = arith.mulf %791, %790 : vector<8x32xf32>
    %cst_641 = arith.constant 0.0033277839 : f32
    %793 = vector.broadcast %cst_641 : f32 to vector<8x32xf32>
    %794 = arith.mulf %793, %783 : vector<8x32xf32>
    %795 = arith.addf %792, %794 : vector<8x32xf32>
    %cst_642 = arith.constant 1.800000e+00 : f32
    %796 = vector.broadcast %cst_642 : f32 to vector<8x32xf32>
    %797 = arith.mulf %796, %789 : vector<8x32xf32>
    %cst_643 = arith.constant 0.00999999977 : f32
    %798 = vector.broadcast %cst_643 : f32 to vector<8x32xf32>
    %799 = arith.addf %798, %797 : vector<8x32xf32>
    %cst_644 = arith.constant 9.000000e+00 : f32
    %800 = vector.broadcast %cst_644 : f32 to vector<8x32xf32>
    %801 = arith.mulf %800, %795 : vector<8x32xf32>
    %802 = arith.addf %799, %801 : vector<8x32xf32>
    %c0_645 = arith.constant 0 : index
    %c0_646 = arith.constant 0 : index
    %803 = vector.load %arg25[%c0_645, %c0_646] : memref<8x32xf32, #tpu.memory_space<vmem>>, vector<8x32xf32>
    %cst_647 = arith.constant 0.951229453 : f32
    %804 = vector.broadcast %cst_647 : f32 to vector<8x32xf32>
    %805 = arith.mulf %803, %804 : vector<8x32xf32>
    %cst_648 = arith.constant 0.0487705767 : f32
    %806 = vector.broadcast %cst_648 : f32 to vector<8x32xf32>
    %807 = arith.mulf %806, %782 : vector<8x32xf32>
    %808 = arith.addf %805, %807 : vector<8x32xf32>
    %809 = arith.mulf %802, %783 : vector<8x32xf32>
    %cst_649 = arith.constant 1.000000e+00 : f32
    %810 = vector.broadcast %cst_649 : f32 to vector<8x32xf32>
    %811 = arith.mulf %809, %810 : vector<8x32xf32>
    %812 = arith.subf %808, %811 : vector<8x32xf32>
    %813 = arith.subf %812, %802 : vector<8x32xf32>
    %cst_650 = arith.constant 0.000000e+00 : f32
    %814 = vector.broadcast %cst_650 : f32 to vector<8x32xf32>
    %815 = arith.cmpf ogt, %813, %814 : vector<8x32xf32>
    %816 = arith.extui %815 : vector<8x32xi1> to vector<8x32xi32>
    %817 = arith.sitofp %816 : vector<8x32xi32> to vector<8x32xf32>
    %c0_651 = arith.constant 0 : index
    %c0_652 = arith.constant 0 : index
    %818 = vector.load %arg25[%c0_651, %c0_652] : memref<8x32xf32, #tpu.memory_space<vmem>>, vector<8x32xf32>
    tpu.vector_store %arg25[%c0_651, %c0_652], %812 {strides = array<i32>} : memref<8x32xf32, #tpu.memory_space<vmem>>, vector<8x32xf32>,
    %c0_653 = arith.constant 0 : index
    %c0_654 = arith.constant 0 : index
    %819 = vector.load %arg28[%c0_653, %c0_654] : memref<8x32xf32, #tpu.memory_space<vmem>>, vector<8x32xf32>
    tpu.vector_store %arg28[%c0_653, %c0_654], %817 {strides = array<i32>} : memref<8x32xf32, #tpu.memory_space<vmem>>, vector<8x32xf32>,
    %c0_655 = arith.constant 0 : index
    %c0_656 = arith.constant 0 : index
    %820 = vector.load %arg33[%c0_655, %c0_656] : memref<8x32xf32, #tpu.memory_space<vmem>>, vector<8x32xf32>
    tpu.vector_store %arg33[%c0_655, %c0_656], %789 {strides = array<i32>} : memref<8x32xf32, #tpu.memory_space<vmem>>, vector<8x32xf32>,
    %c0_657 = arith.constant 0 : index
    %c0_658 = arith.constant 0 : index
    %821 = vector.load %arg34[%c0_657, %c0_658] : memref<8x32xf32, #tpu.memory_space<vmem>>, vector<8x32xf32>
    tpu.vector_store %arg34[%c0_657, %c0_658], %795 {strides = array<i32>} : memref<8x32xf32, #tpu.memory_space<vmem>>, vector<8x32xf32>,
    %c0_659 = arith.constant 0 : index
    %c0_660 = arith.constant 0 : index
    %822 = vector.load %arg8[%c0_659, %c0_660] : memref<32x2xf32, #tpu.memory_space<vmem>>, vector<32x2xf32>
    %cst_661 = arith.constant dense<0.000000e+00> : vector<8x2xf32>
    %823 = tpu.matmul %812, %822, %cst_661 {dimension_numbers = #tpu.dot_dimension_numbers<[1], [0], [0], [1], [0, 0, 1, 1], [], []>} : vector<8x32xf32>, vector<32x2xf32>, vector<8x2xf32> -> vector<8x2xf32>
    %c0_662 = arith.constant 0 : index
    %c0_663 = arith.constant 0 : index
    %824 = vector.load %arg9[%c0_662, %c0_663] : memref<1x2xf32, #tpu.memory_space<vmem>>, vector<1x2xf32>
    %825 = vector.broadcast %824 : vector<1x2xf32> to vector<8x2xf32>
    %826 = arith.addf %823, %825 : vector<8x2xf32>
    %827 = arith.index_cast %c4_i32 : i32 to index
    %c0_664 = arith.constant 0 : index
    %c0_665 = arith.constant 0 : index
    %828 = vector.load %arg16[%827, %c0_664, %c0_665] : memref<8x8x512xf32, #tpu.memory_space<vmem>>, vector<1x8x2xf32>
    %829 = vector.shape_cast %828 : vector<1x8x2xf32> to vector<8x2xf32>
    %830 = vector.shape_cast %826 : vector<8x2xf32> to vector<1x8x2xf32>
    tpu.vector_store %arg16[%827, %c0_664, %c0_665], %830 {strides = array<i32>} : memref<8x8x512xf32, #tpu.memory_space<vmem>>, vector<1x8x2xf32>,
    %831 = arith.index_cast %c4_i32 : i32 to index
    %c0_666 = arith.constant 0 : index
    %c128_667 = arith.constant 128 : index
    %832 = vector.load %arg16[%831, %c0_666, %c128_667] : memref<8x8x512xf32, #tpu.memory_space<vmem>>, vector<1x8x32xf32>
    %833 = vector.shape_cast %832 : vector<1x8x32xf32> to vector<8x32xf32>
    %834 = vector.shape_cast %817 : vector<8x32xf32> to vector<1x8x32xf32>
    tpu.vector_store %arg16[%831, %c0_666, %c128_667], %834 {strides = array<i32>} : memref<8x8x512xf32, #tpu.memory_space<vmem>>, vector<1x8x32xf32>,
    %835 = arith.index_cast %c4_i32 : i32 to index
    %c0_668 = arith.constant 0 : index
    %c256_669 = arith.constant 256 : index
    %836 = vector.load %arg16[%835, %c0_668, %c256_669] : memref<8x8x512xf32, #tpu.memory_space<vmem>>, vector<1x8x32xf32>
    %837 = vector.shape_cast %836 : vector<1x8x32xf32> to vector<8x32xf32>
    %838 = vector.shape_cast %812 : vector<8x32xf32> to vector<1x8x32xf32>
    tpu.vector_store %arg16[%835, %c0_668, %c256_669], %838 {strides = array<i32>} : memref<8x8x512xf32, #tpu.memory_space<vmem>>, vector<1x8x32xf32>,
    %839 = arith.index_cast %c4_i32 : i32 to index
    %c0_670 = arith.constant 0 : index
    %c384_671 = arith.constant 384 : index
    %840 = vector.load %arg16[%839, %c0_670, %c384_671] : memref<8x8x512xf32, #tpu.memory_space<vmem>>, vector<1x8x32xf32>
    %841 = vector.shape_cast %840 : vector<1x8x32xf32> to vector<8x32xf32>
    %842 = vector.shape_cast %802 : vector<8x32xf32> to vector<1x8x32xf32>
    tpu.vector_store %arg16[%839, %c0_670, %c384_671], %842 {strides = array<i32>} : memref<8x8x512xf32, #tpu.memory_space<vmem>>, vector<1x8x32xf32>,
    %c5_i32 = arith.constant 5 : i32
    %843 = arith.index_cast %c5_i32 : i32 to index
    %c0_672 = arith.constant 0 : index
    %c0_673 = arith.constant 0 : index
    %844 = vector.load %arg1[%843, %c0_672, %c0_673] : memref<8x8x16xf32, #tpu.memory_space<vmem>>, vector<1x8x16xf32>
    %845 = vector.shape_cast %844 : vector<1x8x16xf32> to vector<8x16xf32>
    %c0_674 = arith.constant 0 : index
    %c0_675 = arith.constant 0 : index
    %846 = vector.load %arg35[%c0_674, %c0_675] : memref<8x160xf32, #tpu.memory_space<vmem>>, vector<8x16xf32>
    tpu.vector_store %arg35[%c0_674, %c0_675], %845 {strides = array<i32>} : memref<8x160xf32, #tpu.memory_space<vmem>>, vector<8x16xf32>,
    %c0_676 = arith.constant 0 : index
    %c0_677 = arith.constant 0 : index
    %847 = vector.load %arg26[%c0_676, %c0_677] : memref<8x32xf32, #tpu.memory_space<vmem>>, vector<8x32xf32>
    %c0_678 = arith.constant 0 : index
    %c128_679 = arith.constant 128 : index
    %848 = vector.load %arg35[%c0_678, %c128_679] : memref<8x160xf32, #tpu.memory_space<vmem>>, vector<8x32xf32>
    tpu.vector_store %arg35[%c0_678, %c128_679], %847 {strides = array<i32>} : memref<8x160xf32, #tpu.memory_space<vmem>>, vector<8x32xf32>,
    %c0_680 = arith.constant 0 : index
    %c0_681 = arith.constant 0 : index
    %849 = vector.load %arg35[%c0_680, %c0_681] : memref<8x160xf32, #tpu.memory_space<vmem>>, vector<8x160xf32>
    %c0_682 = arith.constant 0 : index
    %c0_683 = arith.constant 0 : index
    %850 = vector.load %arg2[%c0_682, %c0_683] : memref<160x32xf32, #tpu.memory_space<vmem>>, vector<160x32xf32>
    %cst_684 = arith.constant dense<0.000000e+00> : vector<8x32xf32>
    %851 = tpu.matmul %849, %850, %cst_684 {dimension_numbers = #tpu.dot_dimension_numbers<[1], [0], [0], [1], [0, 0, 1, 1], [], []>} : vector<8x160xf32>, vector<160x32xf32>, vector<8x32xf32> -> vector<8x32xf32>
    %c0_685 = arith.constant 0 : index
    %c0_686 = arith.constant 0 : index
    %852 = vector.load %arg3[%c0_685, %c0_686] : memref<1x32xf32, #tpu.memory_space<vmem>>, vector<1x32xf32>
    %853 = vector.broadcast %852 : vector<1x32xf32> to vector<8x32xf32>
    %854 = arith.addf %851, %853 : vector<8x32xf32>
    %c0_687 = arith.constant 0 : index
    %c0_688 = arith.constant 0 : index
    %855 = vector.load %arg26[%c0_687, %c0_688] : memref<8x32xf32, #tpu.memory_space<vmem>>, vector<8x32xf32>
    %c0_689 = arith.constant 0 : index
    %c0_690 = arith.constant 0 : index
    %856 = vector.load %arg29[%c0_689, %c0_690] : memref<8x32xf32, #tpu.memory_space<vmem>>, vector<8x32xf32>
    %cst_691 = arith.constant 0.967216074 : f32
    %857 = vector.broadcast %cst_691 : f32 to vector<8x32xf32>
    %858 = arith.mulf %857, %856 : vector<8x32xf32>
    %cst_692 = arith.constant 3.278390e-02 : f32
    %859 = vector.broadcast %cst_692 : f32 to vector<8x32xf32>
    %860 = arith.mulf %859, %855 : vector<8x32xf32>
    %861 = arith.addf %858, %860 : vector<8x32xf32>
    %c0_693 = arith.constant 0 : index
    %c0_694 = arith.constant 0 : index
    %862 = vector.load %arg30[%c0_693, %c0_694] : memref<8x32xf32, #tpu.memory_space<vmem>>, vector<8x32xf32>
    %cst_695 = arith.constant 0.996672213 : f32
    %863 = vector.broadcast %cst_695 : f32 to vector<8x32xf32>
    %864 = arith.mulf %863, %862 : vector<8x32xf32>
    %cst_696 = arith.constant 0.0033277839 : f32
    %865 = vector.broadcast %cst_696 : f32 to vector<8x32xf32>
    %866 = arith.mulf %865, %855 : vector<8x32xf32>
    %867 = arith.addf %864, %866 : vector<8x32xf32>
    %cst_697 = arith.constant 1.800000e+00 : f32
    %868 = vector.broadcast %cst_697 : f32 to vector<8x32xf32>
    %869 = arith.mulf %868, %861 : vector<8x32xf32>
    %cst_698 = arith.constant 0.00999999977 : f32
    %870 = vector.broadcast %cst_698 : f32 to vector<8x32xf32>
    %871 = arith.addf %870, %869 : vector<8x32xf32>
    %cst_699 = arith.constant 9.000000e+00 : f32
    %872 = vector.broadcast %cst_699 : f32 to vector<8x32xf32>
    %873 = arith.mulf %872, %867 : vector<8x32xf32>
    %874 = arith.addf %871, %873 : vector<8x32xf32>
    %c0_700 = arith.constant 0 : index
    %c0_701 = arith.constant 0 : index
    %875 = vector.load %arg23[%c0_700, %c0_701] : memref<8x32xf32, #tpu.memory_space<vmem>>, vector<8x32xf32>
    %cst_702 = arith.constant 0.951229453 : f32
    %876 = vector.broadcast %cst_702 : f32 to vector<8x32xf32>
    %877 = arith.mulf %875, %876 : vector<8x32xf32>
    %cst_703 = arith.constant 0.0487705767 : f32
    %878 = vector.broadcast %cst_703 : f32 to vector<8x32xf32>
    %879 = arith.mulf %878, %854 : vector<8x32xf32>
    %880 = arith.addf %877, %879 : vector<8x32xf32>
    %881 = arith.mulf %874, %855 : vector<8x32xf32>
    %cst_704 = arith.constant 1.000000e+00 : f32
    %882 = vector.broadcast %cst_704 : f32 to vector<8x32xf32>
    %883 = arith.mulf %881, %882 : vector<8x32xf32>
    %884 = arith.subf %880, %883 : vector<8x32xf32>
    %885 = arith.subf %884, %874 : vector<8x32xf32>
    %cst_705 = arith.constant 0.000000e+00 : f32
    %886 = vector.broadcast %cst_705 : f32 to vector<8x32xf32>
    %887 = arith.cmpf ogt, %885, %886 : vector<8x32xf32>
    %888 = arith.extui %887 : vector<8x32xi1> to vector<8x32xi32>
    %889 = arith.sitofp %888 : vector<8x32xi32> to vector<8x32xf32>
    %c0_706 = arith.constant 0 : index
    %c0_707 = arith.constant 0 : index
    %890 = vector.load %arg23[%c0_706, %c0_707] : memref<8x32xf32, #tpu.memory_space<vmem>>, vector<8x32xf32>
    tpu.vector_store %arg23[%c0_706, %c0_707], %884 {strides = array<i32>} : memref<8x32xf32, #tpu.memory_space<vmem>>, vector<8x32xf32>,
    %c0_708 = arith.constant 0 : index
    %c0_709 = arith.constant 0 : index
    %891 = vector.load %arg26[%c0_708, %c0_709] : memref<8x32xf32, #tpu.memory_space<vmem>>, vector<8x32xf32>
    tpu.vector_store %arg26[%c0_708, %c0_709], %889 {strides = array<i32>} : memref<8x32xf32, #tpu.memory_space<vmem>>, vector<8x32xf32>,
    %c0_710 = arith.constant 0 : index
    %c0_711 = arith.constant 0 : index
    %892 = vector.load %arg29[%c0_710, %c0_711] : memref<8x32xf32, #tpu.memory_space<vmem>>, vector<8x32xf32>
    tpu.vector_store %arg29[%c0_710, %c0_711], %861 {strides = array<i32>} : memref<8x32xf32, #tpu.memory_space<vmem>>, vector<8x32xf32>,
    %c0_712 = arith.constant 0 : index
    %c0_713 = arith.constant 0 : index
    %893 = vector.load %arg30[%c0_712, %c0_713] : memref<8x32xf32, #tpu.memory_space<vmem>>, vector<8x32xf32>
    tpu.vector_store %arg30[%c0_712, %c0_713], %867 {strides = array<i32>} : memref<8x32xf32, #tpu.memory_space<vmem>>, vector<8x32xf32>,
    %c0_714 = arith.constant 0 : index
    %c0_715 = arith.constant 0 : index
    %894 = vector.load %arg36[%c0_714, %c0_715] : memref<8x160xf32, #tpu.memory_space<vmem>>, vector<8x32xf32>
    tpu.vector_store %arg36[%c0_714, %c0_715], %889 {strides = array<i32>} : memref<8x160xf32, #tpu.memory_space<vmem>>, vector<8x32xf32>,
    %c0_716 = arith.constant 0 : index
    %c0_717 = arith.constant 0 : index
    %895 = vector.load %arg27[%c0_716, %c0_717] : memref<8x32xf32, #tpu.memory_space<vmem>>, vector<8x32xf32>
    %c0_718 = arith.constant 0 : index
    %c128_719 = arith.constant 128 : index
    %896 = vector.load %arg36[%c0_718, %c128_719] : memref<8x160xf32, #tpu.memory_space<vmem>>, vector<8x32xf32>
    tpu.vector_store %arg36[%c0_718, %c128_719], %895 {strides = array<i32>} : memref<8x160xf32, #tpu.memory_space<vmem>>, vector<8x32xf32>,
    %c0_720 = arith.constant 0 : index
    %c0_721 = arith.constant 0 : index
    %897 = vector.load %arg36[%c0_720, %c0_721] : memref<8x160xf32, #tpu.memory_space<vmem>>, vector<8x160xf32>
    %c0_722 = arith.constant 0 : index
    %c0_723 = arith.constant 0 : index
    %898 = vector.load %arg4[%c0_722, %c0_723] : memref<160x32xf32, #tpu.memory_space<vmem>>, vector<160x32xf32>
    %cst_724 = arith.constant dense<0.000000e+00> : vector<8x32xf32>
    %899 = tpu.matmul %897, %898, %cst_724 {dimension_numbers = #tpu.dot_dimension_numbers<[1], [0], [0], [1], [0, 0, 1, 1], [], []>} : vector<8x160xf32>, vector<160x32xf32>, vector<8x32xf32> -> vector<8x32xf32>
    %c0_725 = arith.constant 0 : index
    %c0_726 = arith.constant 0 : index
    %900 = vector.load %arg5[%c0_725, %c0_726] : memref<1x32xf32, #tpu.memory_space<vmem>>, vector<1x32xf32>
    %901 = vector.broadcast %900 : vector<1x32xf32> to vector<8x32xf32>
    %902 = arith.addf %899, %901 : vector<8x32xf32>
    %c0_727 = arith.constant 0 : index
    %c0_728 = arith.constant 0 : index
    %903 = vector.load %arg27[%c0_727, %c0_728] : memref<8x32xf32, #tpu.memory_space<vmem>>, vector<8x32xf32>
    %c0_729 = arith.constant 0 : index
    %c0_730 = arith.constant 0 : index
    %904 = vector.load %arg31[%c0_729, %c0_730] : memref<8x32xf32, #tpu.memory_space<vmem>>, vector<8x32xf32>
    %cst_731 = arith.constant 0.967216074 : f32
    %905 = vector.broadcast %cst_731 : f32 to vector<8x32xf32>
    %906 = arith.mulf %905, %904 : vector<8x32xf32>
    %cst_732 = arith.constant 3.278390e-02 : f32
    %907 = vector.broadcast %cst_732 : f32 to vector<8x32xf32>
    %908 = arith.mulf %907, %903 : vector<8x32xf32>
    %909 = arith.addf %906, %908 : vector<8x32xf32>
    %c0_733 = arith.constant 0 : index
    %c0_734 = arith.constant 0 : index
    %910 = vector.load %arg32[%c0_733, %c0_734] : memref<8x32xf32, #tpu.memory_space<vmem>>, vector<8x32xf32>
    %cst_735 = arith.constant 0.996672213 : f32
    %911 = vector.broadcast %cst_735 : f32 to vector<8x32xf32>
    %912 = arith.mulf %911, %910 : vector<8x32xf32>
    %cst_736 = arith.constant 0.0033277839 : f32
    %913 = vector.broadcast %cst_736 : f32 to vector<8x32xf32>
    %914 = arith.mulf %913, %903 : vector<8x32xf32>
    %915 = arith.addf %912, %914 : vector<8x32xf32>
    %cst_737 = arith.constant 1.800000e+00 : f32
    %916 = vector.broadcast %cst_737 : f32 to vector<8x32xf32>
    %917 = arith.mulf %916, %909 : vector<8x32xf32>
    %cst_738 = arith.constant 0.00999999977 : f32
    %918 = vector.broadcast %cst_738 : f32 to vector<8x32xf32>
    %919 = arith.addf %918, %917 : vector<8x32xf32>
    %cst_739 = arith.constant 9.000000e+00 : f32
    %920 = vector.broadcast %cst_739 : f32 to vector<8x32xf32>
    %921 = arith.mulf %920, %915 : vector<8x32xf32>
    %922 = arith.addf %919, %921 : vector<8x32xf32>
    %c0_740 = arith.constant 0 : index
    %c0_741 = arith.constant 0 : index
    %923 = vector.load %arg24[%c0_740, %c0_741] : memref<8x32xf32, #tpu.memory_space<vmem>>, vector<8x32xf32>
    %cst_742 = arith.constant 0.951229453 : f32
    %924 = vector.broadcast %cst_742 : f32 to vector<8x32xf32>
    %925 = arith.mulf %923, %924 : vector<8x32xf32>
    %cst_743 = arith.constant 0.0487705767 : f32
    %926 = vector.broadcast %cst_743 : f32 to vector<8x32xf32>
    %927 = arith.mulf %926, %902 : vector<8x32xf32>
    %928 = arith.addf %925, %927 : vector<8x32xf32>
    %929 = arith.mulf %922, %903 : vector<8x32xf32>
    %cst_744 = arith.constant 1.000000e+00 : f32
    %930 = vector.broadcast %cst_744 : f32 to vector<8x32xf32>
    %931 = arith.mulf %929, %930 : vector<8x32xf32>
    %932 = arith.subf %928, %931 : vector<8x32xf32>
    %933 = arith.subf %932, %922 : vector<8x32xf32>
    %cst_745 = arith.constant 0.000000e+00 : f32
    %934 = vector.broadcast %cst_745 : f32 to vector<8x32xf32>
    %935 = arith.cmpf ogt, %933, %934 : vector<8x32xf32>
    %936 = arith.extui %935 : vector<8x32xi1> to vector<8x32xi32>
    %937 = arith.sitofp %936 : vector<8x32xi32> to vector<8x32xf32>
    %c0_746 = arith.constant 0 : index
    %c0_747 = arith.constant 0 : index
    %938 = vector.load %arg24[%c0_746, %c0_747] : memref<8x32xf32, #tpu.memory_space<vmem>>, vector<8x32xf32>
    tpu.vector_store %arg24[%c0_746, %c0_747], %932 {strides = array<i32>} : memref<8x32xf32, #tpu.memory_space<vmem>>, vector<8x32xf32>,
    %c0_748 = arith.constant 0 : index
    %c0_749 = arith.constant 0 : index
    %939 = vector.load %arg27[%c0_748, %c0_749] : memref<8x32xf32, #tpu.memory_space<vmem>>, vector<8x32xf32>
    tpu.vector_store %arg27[%c0_748, %c0_749], %937 {strides = array<i32>} : memref<8x32xf32, #tpu.memory_space<vmem>>, vector<8x32xf32>,
    %c0_750 = arith.constant 0 : index
    %c0_751 = arith.constant 0 : index
    %940 = vector.load %arg31[%c0_750, %c0_751] : memref<8x32xf32, #tpu.memory_space<vmem>>, vector<8x32xf32>
    tpu.vector_store %arg31[%c0_750, %c0_751], %909 {strides = array<i32>} : memref<8x32xf32, #tpu.memory_space<vmem>>, vector<8x32xf32>,
    %c0_752 = arith.constant 0 : index
    %c0_753 = arith.constant 0 : index
    %941 = vector.load %arg32[%c0_752, %c0_753] : memref<8x32xf32, #tpu.memory_space<vmem>>, vector<8x32xf32>
    tpu.vector_store %arg32[%c0_752, %c0_753], %915 {strides = array<i32>} : memref<8x32xf32, #tpu.memory_space<vmem>>, vector<8x32xf32>,
    %c0_754 = arith.constant 0 : index
    %c0_755 = arith.constant 0 : index
    %942 = vector.load %arg37[%c0_754, %c0_755] : memref<8x160xf32, #tpu.memory_space<vmem>>, vector<8x32xf32>
    tpu.vector_store %arg37[%c0_754, %c0_755], %937 {strides = array<i32>} : memref<8x160xf32, #tpu.memory_space<vmem>>, vector<8x32xf32>,
    %c0_756 = arith.constant 0 : index
    %c0_757 = arith.constant 0 : index
    %943 = vector.load %arg28[%c0_756, %c0_757] : memref<8x32xf32, #tpu.memory_space<vmem>>, vector<8x32xf32>
    %c0_758 = arith.constant 0 : index
    %c128_759 = arith.constant 128 : index
    %944 = vector.load %arg37[%c0_758, %c128_759] : memref<8x160xf32, #tpu.memory_space<vmem>>, vector<8x32xf32>
    tpu.vector_store %arg37[%c0_758, %c128_759], %943 {strides = array<i32>} : memref<8x160xf32, #tpu.memory_space<vmem>>, vector<8x32xf32>,
    %c0_760 = arith.constant 0 : index
    %c0_761 = arith.constant 0 : index
    %945 = vector.load %arg37[%c0_760, %c0_761] : memref<8x160xf32, #tpu.memory_space<vmem>>, vector<8x160xf32>
    %c0_762 = arith.constant 0 : index
    %c0_763 = arith.constant 0 : index
    %946 = vector.load %arg6[%c0_762, %c0_763] : memref<160x32xf32, #tpu.memory_space<vmem>>, vector<160x32xf32>
    %cst_764 = arith.constant dense<0.000000e+00> : vector<8x32xf32>
    %947 = tpu.matmul %945, %946, %cst_764 {dimension_numbers = #tpu.dot_dimension_numbers<[1], [0], [0], [1], [0, 0, 1, 1], [], []>} : vector<8x160xf32>, vector<160x32xf32>, vector<8x32xf32> -> vector<8x32xf32>
    %c0_765 = arith.constant 0 : index
    %c0_766 = arith.constant 0 : index
    %948 = vector.load %arg7[%c0_765, %c0_766] : memref<1x32xf32, #tpu.memory_space<vmem>>, vector<1x32xf32>
    %949 = vector.broadcast %948 : vector<1x32xf32> to vector<8x32xf32>
    %950 = arith.addf %947, %949 : vector<8x32xf32>
    %c0_767 = arith.constant 0 : index
    %c0_768 = arith.constant 0 : index
    %951 = vector.load %arg28[%c0_767, %c0_768] : memref<8x32xf32, #tpu.memory_space<vmem>>, vector<8x32xf32>
    %c0_769 = arith.constant 0 : index
    %c0_770 = arith.constant 0 : index
    %952 = vector.load %arg33[%c0_769, %c0_770] : memref<8x32xf32, #tpu.memory_space<vmem>>, vector<8x32xf32>
    %cst_771 = arith.constant 0.967216074 : f32
    %953 = vector.broadcast %cst_771 : f32 to vector<8x32xf32>
    %954 = arith.mulf %953, %952 : vector<8x32xf32>
    %cst_772 = arith.constant 3.278390e-02 : f32
    %955 = vector.broadcast %cst_772 : f32 to vector<8x32xf32>
    %956 = arith.mulf %955, %951 : vector<8x32xf32>
    %957 = arith.addf %954, %956 : vector<8x32xf32>
    %c0_773 = arith.constant 0 : index
    %c0_774 = arith.constant 0 : index
    %958 = vector.load %arg34[%c0_773, %c0_774] : memref<8x32xf32, #tpu.memory_space<vmem>>, vector<8x32xf32>
    %cst_775 = arith.constant 0.996672213 : f32
    %959 = vector.broadcast %cst_775 : f32 to vector<8x32xf32>
    %960 = arith.mulf %959, %958 : vector<8x32xf32>
    %cst_776 = arith.constant 0.0033277839 : f32
    %961 = vector.broadcast %cst_776 : f32 to vector<8x32xf32>
    %962 = arith.mulf %961, %951 : vector<8x32xf32>
    %963 = arith.addf %960, %962 : vector<8x32xf32>
    %cst_777 = arith.constant 1.800000e+00 : f32
    %964 = vector.broadcast %cst_777 : f32 to vector<8x32xf32>
    %965 = arith.mulf %964, %957 : vector<8x32xf32>
    %cst_778 = arith.constant 0.00999999977 : f32
    %966 = vector.broadcast %cst_778 : f32 to vector<8x32xf32>
    %967 = arith.addf %966, %965 : vector<8x32xf32>
    %cst_779 = arith.constant 9.000000e+00 : f32
    %968 = vector.broadcast %cst_779 : f32 to vector<8x32xf32>
    %969 = arith.mulf %968, %963 : vector<8x32xf32>
    %970 = arith.addf %967, %969 : vector<8x32xf32>
    %c0_780 = arith.constant 0 : index
    %c0_781 = arith.constant 0 : index
    %971 = vector.load %arg25[%c0_780, %c0_781] : memref<8x32xf32, #tpu.memory_space<vmem>>, vector<8x32xf32>
    %cst_782 = arith.constant 0.951229453 : f32
    %972 = vector.broadcast %cst_782 : f32 to vector<8x32xf32>
    %973 = arith.mulf %971, %972 : vector<8x32xf32>
    %cst_783 = arith.constant 0.0487705767 : f32
    %974 = vector.broadcast %cst_783 : f32 to vector<8x32xf32>
    %975 = arith.mulf %974, %950 : vector<8x32xf32>
    %976 = arith.addf %973, %975 : vector<8x32xf32>
    %977 = arith.mulf %970, %951 : vector<8x32xf32>
    %cst_784 = arith.constant 1.000000e+00 : f32
    %978 = vector.broadcast %cst_784 : f32 to vector<8x32xf32>
    %979 = arith.mulf %977, %978 : vector<8x32xf32>
    %980 = arith.subf %976, %979 : vector<8x32xf32>
    %981 = arith.subf %980, %970 : vector<8x32xf32>
    %cst_785 = arith.constant 0.000000e+00 : f32
    %982 = vector.broadcast %cst_785 : f32 to vector<8x32xf32>
    %983 = arith.cmpf ogt, %981, %982 : vector<8x32xf32>
    %984 = arith.extui %983 : vector<8x32xi1> to vector<8x32xi32>
    %985 = arith.sitofp %984 : vector<8x32xi32> to vector<8x32xf32>
    %c0_786 = arith.constant 0 : index
    %c0_787 = arith.constant 0 : index
    %986 = vector.load %arg25[%c0_786, %c0_787] : memref<8x32xf32, #tpu.memory_space<vmem>>, vector<8x32xf32>
    tpu.vector_store %arg25[%c0_786, %c0_787], %980 {strides = array<i32>} : memref<8x32xf32, #tpu.memory_space<vmem>>, vector<8x32xf32>,
    %c0_788 = arith.constant 0 : index
    %c0_789 = arith.constant 0 : index
    %987 = vector.load %arg28[%c0_788, %c0_789] : memref<8x32xf32, #tpu.memory_space<vmem>>, vector<8x32xf32>
    tpu.vector_store %arg28[%c0_788, %c0_789], %985 {strides = array<i32>} : memref<8x32xf32, #tpu.memory_space<vmem>>, vector<8x32xf32>,
    %c0_790 = arith.constant 0 : index
    %c0_791 = arith.constant 0 : index
    %988 = vector.load %arg33[%c0_790, %c0_791] : memref<8x32xf32, #tpu.memory_space<vmem>>, vector<8x32xf32>
    tpu.vector_store %arg33[%c0_790, %c0_791], %957 {strides = array<i32>} : memref<8x32xf32, #tpu.memory_space<vmem>>, vector<8x32xf32>,
    %c0_792 = arith.constant 0 : index
    %c0_793 = arith.constant 0 : index
    %989 = vector.load %arg34[%c0_792, %c0_793] : memref<8x32xf32, #tpu.memory_space<vmem>>, vector<8x32xf32>
    tpu.vector_store %arg34[%c0_792, %c0_793], %963 {strides = array<i32>} : memref<8x32xf32, #tpu.memory_space<vmem>>, vector<8x32xf32>,
    %c0_794 = arith.constant 0 : index
    %c0_795 = arith.constant 0 : index
    %990 = vector.load %arg8[%c0_794, %c0_795] : memref<32x2xf32, #tpu.memory_space<vmem>>, vector<32x2xf32>
    %cst_796 = arith.constant dense<0.000000e+00> : vector<8x2xf32>
    %991 = tpu.matmul %980, %990, %cst_796 {dimension_numbers = #tpu.dot_dimension_numbers<[1], [0], [0], [1], [0, 0, 1, 1], [], []>} : vector<8x32xf32>, vector<32x2xf32>, vector<8x2xf32> -> vector<8x2xf32>
    %c0_797 = arith.constant 0 : index
    %c0_798 = arith.constant 0 : index
    %992 = vector.load %arg9[%c0_797, %c0_798] : memref<1x2xf32, #tpu.memory_space<vmem>>, vector<1x2xf32>
    %993 = vector.broadcast %992 : vector<1x2xf32> to vector<8x2xf32>
    %994 = arith.addf %991, %993 : vector<8x2xf32>
    %995 = arith.index_cast %c5_i32 : i32 to index
    %c0_799 = arith.constant 0 : index
    %c0_800 = arith.constant 0 : index
    %996 = vector.load %arg16[%995, %c0_799, %c0_800] : memref<8x8x512xf32, #tpu.memory_space<vmem>>, vector<1x8x2xf32>
    %997 = vector.shape_cast %996 : vector<1x8x2xf32> to vector<8x2xf32>
    %998 = vector.shape_cast %994 : vector<8x2xf32> to vector<1x8x2xf32>
    tpu.vector_store %arg16[%995, %c0_799, %c0_800], %998 {strides = array<i32>} : memref<8x8x512xf32, #tpu.memory_space<vmem>>, vector<1x8x2xf32>,
    %999 = arith.index_cast %c5_i32 : i32 to index
    %c0_801 = arith.constant 0 : index
    %c128_802 = arith.constant 128 : index
    %1000 = vector.load %arg16[%999, %c0_801, %c128_802] : memref<8x8x512xf32, #tpu.memory_space<vmem>>, vector<1x8x32xf32>
    %1001 = vector.shape_cast %1000 : vector<1x8x32xf32> to vector<8x32xf32>
    %1002 = vector.shape_cast %985 : vector<8x32xf32> to vector<1x8x32xf32>
    tpu.vector_store %arg16[%999, %c0_801, %c128_802], %1002 {strides = array<i32>} : memref<8x8x512xf32, #tpu.memory_space<vmem>>, vector<1x8x32xf32>,
    %1003 = arith.index_cast %c5_i32 : i32 to index
    %c0_803 = arith.constant 0 : index
    %c256_804 = arith.constant 256 : index
    %1004 = vector.load %arg16[%1003, %c0_803, %c256_804] : memref<8x8x512xf32, #tpu.memory_space<vmem>>, vector<1x8x32xf32>
    %1005 = vector.shape_cast %1004 : vector<1x8x32xf32> to vector<8x32xf32>
    %1006 = vector.shape_cast %980 : vector<8x32xf32> to vector<1x8x32xf32>
    tpu.vector_store %arg16[%1003, %c0_803, %c256_804], %1006 {strides = array<i32>} : memref<8x8x512xf32, #tpu.memory_space<vmem>>, vector<1x8x32xf32>,
    %1007 = arith.index_cast %c5_i32 : i32 to index
    %c0_805 = arith.constant 0 : index
    %c384_806 = arith.constant 384 : index
    %1008 = vector.load %arg16[%1007, %c0_805, %c384_806] : memref<8x8x512xf32, #tpu.memory_space<vmem>>, vector<1x8x32xf32>
    %1009 = vector.shape_cast %1008 : vector<1x8x32xf32> to vector<8x32xf32>
    %1010 = vector.shape_cast %970 : vector<8x32xf32> to vector<1x8x32xf32>
    tpu.vector_store %arg16[%1007, %c0_805, %c384_806], %1010 {strides = array<i32>} : memref<8x8x512xf32, #tpu.memory_space<vmem>>, vector<1x8x32xf32>,
    %c6_i32 = arith.constant 6 : i32
    %1011 = arith.index_cast %c6_i32 : i32 to index
    %c0_807 = arith.constant 0 : index
    %c0_808 = arith.constant 0 : index
    %1012 = vector.load %arg1[%1011, %c0_807, %c0_808] : memref<8x8x16xf32, #tpu.memory_space<vmem>>, vector<1x8x16xf32>
    %1013 = vector.shape_cast %1012 : vector<1x8x16xf32> to vector<8x16xf32>
    %c0_809 = arith.constant 0 : index
    %c0_810 = arith.constant 0 : index
    %1014 = vector.load %arg35[%c0_809, %c0_810] : memref<8x160xf32, #tpu.memory_space<vmem>>, vector<8x16xf32>
    tpu.vector_store %arg35[%c0_809, %c0_810], %1013 {strides = array<i32>} : memref<8x160xf32, #tpu.memory_space<vmem>>, vector<8x16xf32>,
    %c0_811 = arith.constant 0 : index
    %c0_812 = arith.constant 0 : index
    %1015 = vector.load %arg26[%c0_811, %c0_812] : memref<8x32xf32, #tpu.memory_space<vmem>>, vector<8x32xf32>
    %c0_813 = arith.constant 0 : index
    %c128_814 = arith.constant 128 : index
    %1016 = vector.load %arg35[%c0_813, %c128_814] : memref<8x160xf32, #tpu.memory_space<vmem>>, vector<8x32xf32>
    tpu.vector_store %arg35[%c0_813, %c128_814], %1015 {strides = array<i32>} : memref<8x160xf32, #tpu.memory_space<vmem>>, vector<8x32xf32>,
    %c0_815 = arith.constant 0 : index
    %c0_816 = arith.constant 0 : index
    %1017 = vector.load %arg35[%c0_815, %c0_816] : memref<8x160xf32, #tpu.memory_space<vmem>>, vector<8x160xf32>
    %c0_817 = arith.constant 0 : index
    %c0_818 = arith.constant 0 : index
    %1018 = vector.load %arg2[%c0_817, %c0_818] : memref<160x32xf32, #tpu.memory_space<vmem>>, vector<160x32xf32>
    %cst_819 = arith.constant dense<0.000000e+00> : vector<8x32xf32>
    %1019 = tpu.matmul %1017, %1018, %cst_819 {dimension_numbers = #tpu.dot_dimension_numbers<[1], [0], [0], [1], [0, 0, 1, 1], [], []>} : vector<8x160xf32>, vector<160x32xf32>, vector<8x32xf32> -> vector<8x32xf32>
    %c0_820 = arith.constant 0 : index
    %c0_821 = arith.constant 0 : index
    %1020 = vector.load %arg3[%c0_820, %c0_821] : memref<1x32xf32, #tpu.memory_space<vmem>>, vector<1x32xf32>
    %1021 = vector.broadcast %1020 : vector<1x32xf32> to vector<8x32xf32>
    %1022 = arith.addf %1019, %1021 : vector<8x32xf32>
    %c0_822 = arith.constant 0 : index
    %c0_823 = arith.constant 0 : index
    %1023 = vector.load %arg26[%c0_822, %c0_823] : memref<8x32xf32, #tpu.memory_space<vmem>>, vector<8x32xf32>
    %c0_824 = arith.constant 0 : index
    %c0_825 = arith.constant 0 : index
    %1024 = vector.load %arg29[%c0_824, %c0_825] : memref<8x32xf32, #tpu.memory_space<vmem>>, vector<8x32xf32>
    %cst_826 = arith.constant 0.967216074 : f32
    %1025 = vector.broadcast %cst_826 : f32 to vector<8x32xf32>
    %1026 = arith.mulf %1025, %1024 : vector<8x32xf32>
    %cst_827 = arith.constant 3.278390e-02 : f32
    %1027 = vector.broadcast %cst_827 : f32 to vector<8x32xf32>
    %1028 = arith.mulf %1027, %1023 : vector<8x32xf32>
    %1029 = arith.addf %1026, %1028 : vector<8x32xf32>
    %c0_828 = arith.constant 0 : index
    %c0_829 = arith.constant 0 : index
    %1030 = vector.load %arg30[%c0_828, %c0_829] : memref<8x32xf32, #tpu.memory_space<vmem>>, vector<8x32xf32>
    %cst_830 = arith.constant 0.996672213 : f32
    %1031 = vector.broadcast %cst_830 : f32 to vector<8x32xf32>
    %1032 = arith.mulf %1031, %1030 : vector<8x32xf32>
    %cst_831 = arith.constant 0.0033277839 : f32
    %1033 = vector.broadcast %cst_831 : f32 to vector<8x32xf32>
    %1034 = arith.mulf %1033, %1023 : vector<8x32xf32>
    %1035 = arith.addf %1032, %1034 : vector<8x32xf32>
    %cst_832 = arith.constant 1.800000e+00 : f32
    %1036 = vector.broadcast %cst_832 : f32 to vector<8x32xf32>
    %1037 = arith.mulf %1036, %1029 : vector<8x32xf32>
    %cst_833 = arith.constant 0.00999999977 : f32
    %1038 = vector.broadcast %cst_833 : f32 to vector<8x32xf32>
    %1039 = arith.addf %1038, %1037 : vector<8x32xf32>
    %cst_834 = arith.constant 9.000000e+00 : f32
    %1040 = vector.broadcast %cst_834 : f32 to vector<8x32xf32>
    %1041 = arith.mulf %1040, %1035 : vector<8x32xf32>
    %1042 = arith.addf %1039, %1041 : vector<8x32xf32>
    %c0_835 = arith.constant 0 : index
    %c0_836 = arith.constant 0 : index
    %1043 = vector.load %arg23[%c0_835, %c0_836] : memref<8x32xf32, #tpu.memory_space<vmem>>, vector<8x32xf32>
    %cst_837 = arith.constant 0.951229453 : f32
    %1044 = vector.broadcast %cst_837 : f32 to vector<8x32xf32>
    %1045 = arith.mulf %1043, %1044 : vector<8x32xf32>
    %cst_838 = arith.constant 0.0487705767 : f32
    %1046 = vector.broadcast %cst_838 : f32 to vector<8x32xf32>
    %1047 = arith.mulf %1046, %1022 : vector<8x32xf32>
    %1048 = arith.addf %1045, %1047 : vector<8x32xf32>
    %1049 = arith.mulf %1042, %1023 : vector<8x32xf32>
    %cst_839 = arith.constant 1.000000e+00 : f32
    %1050 = vector.broadcast %cst_839 : f32 to vector<8x32xf32>
    %1051 = arith.mulf %1049, %1050 : vector<8x32xf32>
    %1052 = arith.subf %1048, %1051 : vector<8x32xf32>
    %1053 = arith.subf %1052, %1042 : vector<8x32xf32>
    %cst_840 = arith.constant 0.000000e+00 : f32
    %1054 = vector.broadcast %cst_840 : f32 to vector<8x32xf32>
    %1055 = arith.cmpf ogt, %1053, %1054 : vector<8x32xf32>
    %1056 = arith.extui %1055 : vector<8x32xi1> to vector<8x32xi32>
    %1057 = arith.sitofp %1056 : vector<8x32xi32> to vector<8x32xf32>
    %c0_841 = arith.constant 0 : index
    %c0_842 = arith.constant 0 : index
    %1058 = vector.load %arg23[%c0_841, %c0_842] : memref<8x32xf32, #tpu.memory_space<vmem>>, vector<8x32xf32>
    tpu.vector_store %arg23[%c0_841, %c0_842], %1052 {strides = array<i32>} : memref<8x32xf32, #tpu.memory_space<vmem>>, vector<8x32xf32>,
    %c0_843 = arith.constant 0 : index
    %c0_844 = arith.constant 0 : index
    %1059 = vector.load %arg26[%c0_843, %c0_844] : memref<8x32xf32, #tpu.memory_space<vmem>>, vector<8x32xf32>
    tpu.vector_store %arg26[%c0_843, %c0_844], %1057 {strides = array<i32>} : memref<8x32xf32, #tpu.memory_space<vmem>>, vector<8x32xf32>,
    %c0_845 = arith.constant 0 : index
    %c0_846 = arith.constant 0 : index
    %1060 = vector.load %arg29[%c0_845, %c0_846] : memref<8x32xf32, #tpu.memory_space<vmem>>, vector<8x32xf32>
    tpu.vector_store %arg29[%c0_845, %c0_846], %1029 {strides = array<i32>} : memref<8x32xf32, #tpu.memory_space<vmem>>, vector<8x32xf32>,
    %c0_847 = arith.constant 0 : index
    %c0_848 = arith.constant 0 : index
    %1061 = vector.load %arg30[%c0_847, %c0_848] : memref<8x32xf32, #tpu.memory_space<vmem>>, vector<8x32xf32>
    tpu.vector_store %arg30[%c0_847, %c0_848], %1035 {strides = array<i32>} : memref<8x32xf32, #tpu.memory_space<vmem>>, vector<8x32xf32>,
    %c0_849 = arith.constant 0 : index
    %c0_850 = arith.constant 0 : index
    %1062 = vector.load %arg36[%c0_849, %c0_850] : memref<8x160xf32, #tpu.memory_space<vmem>>, vector<8x32xf32>
    tpu.vector_store %arg36[%c0_849, %c0_850], %1057 {strides = array<i32>} : memref<8x160xf32, #tpu.memory_space<vmem>>, vector<8x32xf32>,
    %c0_851 = arith.constant 0 : index
    %c0_852 = arith.constant 0 : index
    %1063 = vector.load %arg27[%c0_851, %c0_852] : memref<8x32xf32, #tpu.memory_space<vmem>>, vector<8x32xf32>
    %c0_853 = arith.constant 0 : index
    %c128_854 = arith.constant 128 : index
    %1064 = vector.load %arg36[%c0_853, %c128_854] : memref<8x160xf32, #tpu.memory_space<vmem>>, vector<8x32xf32>
    tpu.vector_store %arg36[%c0_853, %c128_854], %1063 {strides = array<i32>} : memref<8x160xf32, #tpu.memory_space<vmem>>, vector<8x32xf32>,
    %c0_855 = arith.constant 0 : index
    %c0_856 = arith.constant 0 : index
    %1065 = vector.load %arg36[%c0_855, %c0_856] : memref<8x160xf32, #tpu.memory_space<vmem>>, vector<8x160xf32>
    %c0_857 = arith.constant 0 : index
    %c0_858 = arith.constant 0 : index
    %1066 = vector.load %arg4[%c0_857, %c0_858] : memref<160x32xf32, #tpu.memory_space<vmem>>, vector<160x32xf32>
    %cst_859 = arith.constant dense<0.000000e+00> : vector<8x32xf32>
    %1067 = tpu.matmul %1065, %1066, %cst_859 {dimension_numbers = #tpu.dot_dimension_numbers<[1], [0], [0], [1], [0, 0, 1, 1], [], []>} : vector<8x160xf32>, vector<160x32xf32>, vector<8x32xf32> -> vector<8x32xf32>
    %c0_860 = arith.constant 0 : index
    %c0_861 = arith.constant 0 : index
    %1068 = vector.load %arg5[%c0_860, %c0_861] : memref<1x32xf32, #tpu.memory_space<vmem>>, vector<1x32xf32>
    %1069 = vector.broadcast %1068 : vector<1x32xf32> to vector<8x32xf32>
    %1070 = arith.addf %1067, %1069 : vector<8x32xf32>
    %c0_862 = arith.constant 0 : index
    %c0_863 = arith.constant 0 : index
    %1071 = vector.load %arg27[%c0_862, %c0_863] : memref<8x32xf32, #tpu.memory_space<vmem>>, vector<8x32xf32>
    %c0_864 = arith.constant 0 : index
    %c0_865 = arith.constant 0 : index
    %1072 = vector.load %arg31[%c0_864, %c0_865] : memref<8x32xf32, #tpu.memory_space<vmem>>, vector<8x32xf32>
    %cst_866 = arith.constant 0.967216074 : f32
    %1073 = vector.broadcast %cst_866 : f32 to vector<8x32xf32>
    %1074 = arith.mulf %1073, %1072 : vector<8x32xf32>
    %cst_867 = arith.constant 3.278390e-02 : f32
    %1075 = vector.broadcast %cst_867 : f32 to vector<8x32xf32>
    %1076 = arith.mulf %1075, %1071 : vector<8x32xf32>
    %1077 = arith.addf %1074, %1076 : vector<8x32xf32>
    %c0_868 = arith.constant 0 : index
    %c0_869 = arith.constant 0 : index
    %1078 = vector.load %arg32[%c0_868, %c0_869] : memref<8x32xf32, #tpu.memory_space<vmem>>, vector<8x32xf32>
    %cst_870 = arith.constant 0.996672213 : f32
    %1079 = vector.broadcast %cst_870 : f32 to vector<8x32xf32>
    %1080 = arith.mulf %1079, %1078 : vector<8x32xf32>
    %cst_871 = arith.constant 0.0033277839 : f32
    %1081 = vector.broadcast %cst_871 : f32 to vector<8x32xf32>
    %1082 = arith.mulf %1081, %1071 : vector<8x32xf32>
    %1083 = arith.addf %1080, %1082 : vector<8x32xf32>
    %cst_872 = arith.constant 1.800000e+00 : f32
    %1084 = vector.broadcast %cst_872 : f32 to vector<8x32xf32>
    %1085 = arith.mulf %1084, %1077 : vector<8x32xf32>
    %cst_873 = arith.constant 0.00999999977 : f32
    %1086 = vector.broadcast %cst_873 : f32 to vector<8x32xf32>
    %1087 = arith.addf %1086, %1085 : vector<8x32xf32>
    %cst_874 = arith.constant 9.000000e+00 : f32
    %1088 = vector.broadcast %cst_874 : f32 to vector<8x32xf32>
    %1089 = arith.mulf %1088, %1083 : vector<8x32xf32>
    %1090 = arith.addf %1087, %1089 : vector<8x32xf32>
    %c0_875 = arith.constant 0 : index
    %c0_876 = arith.constant 0 : index
    %1091 = vector.load %arg24[%c0_875, %c0_876] : memref<8x32xf32, #tpu.memory_space<vmem>>, vector<8x32xf32>
    %cst_877 = arith.constant 0.951229453 : f32
    %1092 = vector.broadcast %cst_877 : f32 to vector<8x32xf32>
    %1093 = arith.mulf %1091, %1092 : vector<8x32xf32>
    %cst_878 = arith.constant 0.0487705767 : f32
    %1094 = vector.broadcast %cst_878 : f32 to vector<8x32xf32>
    %1095 = arith.mulf %1094, %1070 : vector<8x32xf32>
    %1096 = arith.addf %1093, %1095 : vector<8x32xf32>
    %1097 = arith.mulf %1090, %1071 : vector<8x32xf32>
    %cst_879 = arith.constant 1.000000e+00 : f32
    %1098 = vector.broadcast %cst_879 : f32 to vector<8x32xf32>
    %1099 = arith.mulf %1097, %1098 : vector<8x32xf32>
    %1100 = arith.subf %1096, %1099 : vector<8x32xf32>
    %1101 = arith.subf %1100, %1090 : vector<8x32xf32>
    %cst_880 = arith.constant 0.000000e+00 : f32
    %1102 = vector.broadcast %cst_880 : f32 to vector<8x32xf32>
    %1103 = arith.cmpf ogt, %1101, %1102 : vector<8x32xf32>
    %1104 = arith.extui %1103 : vector<8x32xi1> to vector<8x32xi32>
    %1105 = arith.sitofp %1104 : vector<8x32xi32> to vector<8x32xf32>
    %c0_881 = arith.constant 0 : index
    %c0_882 = arith.constant 0 : index
    %1106 = vector.load %arg24[%c0_881, %c0_882] : memref<8x32xf32, #tpu.memory_space<vmem>>, vector<8x32xf32>
    tpu.vector_store %arg24[%c0_881, %c0_882], %1100 {strides = array<i32>} : memref<8x32xf32, #tpu.memory_space<vmem>>, vector<8x32xf32>,
    %c0_883 = arith.constant 0 : index
    %c0_884 = arith.constant 0 : index
    %1107 = vector.load %arg27[%c0_883, %c0_884] : memref<8x32xf32, #tpu.memory_space<vmem>>, vector<8x32xf32>
    tpu.vector_store %arg27[%c0_883, %c0_884], %1105 {strides = array<i32>} : memref<8x32xf32, #tpu.memory_space<vmem>>, vector<8x32xf32>,
    %c0_885 = arith.constant 0 : index
    %c0_886 = arith.constant 0 : index
    %1108 = vector.load %arg31[%c0_885, %c0_886] : memref<8x32xf32, #tpu.memory_space<vmem>>, vector<8x32xf32>
    tpu.vector_store %arg31[%c0_885, %c0_886], %1077 {strides = array<i32>} : memref<8x32xf32, #tpu.memory_space<vmem>>, vector<8x32xf32>,
    %c0_887 = arith.constant 0 : index
    %c0_888 = arith.constant 0 : index
    %1109 = vector.load %arg32[%c0_887, %c0_888] : memref<8x32xf32, #tpu.memory_space<vmem>>, vector<8x32xf32>
    tpu.vector_store %arg32[%c0_887, %c0_888], %1083 {strides = array<i32>} : memref<8x32xf32, #tpu.memory_space<vmem>>, vector<8x32xf32>,
    %c0_889 = arith.constant 0 : index
    %c0_890 = arith.constant 0 : index
    %1110 = vector.load %arg37[%c0_889, %c0_890] : memref<8x160xf32, #tpu.memory_space<vmem>>, vector<8x32xf32>
    tpu.vector_store %arg37[%c0_889, %c0_890], %1105 {strides = array<i32>} : memref<8x160xf32, #tpu.memory_space<vmem>>, vector<8x32xf32>,
    %c0_891 = arith.constant 0 : index
    %c0_892 = arith.constant 0 : index
    %1111 = vector.load %arg28[%c0_891, %c0_892] : memref<8x32xf32, #tpu.memory_space<vmem>>, vector<8x32xf32>
    %c0_893 = arith.constant 0 : index
    %c128_894 = arith.constant 128 : index
    %1112 = vector.load %arg37[%c0_893, %c128_894] : memref<8x160xf32, #tpu.memory_space<vmem>>, vector<8x32xf32>
    tpu.vector_store %arg37[%c0_893, %c128_894], %1111 {strides = array<i32>} : memref<8x160xf32, #tpu.memory_space<vmem>>, vector<8x32xf32>,
    %c0_895 = arith.constant 0 : index
    %c0_896 = arith.constant 0 : index
    %1113 = vector.load %arg37[%c0_895, %c0_896] : memref<8x160xf32, #tpu.memory_space<vmem>>, vector<8x160xf32>
    %c0_897 = arith.constant 0 : index
    %c0_898 = arith.constant 0 : index
    %1114 = vector.load %arg6[%c0_897, %c0_898] : memref<160x32xf32, #tpu.memory_space<vmem>>, vector<160x32xf32>
    %cst_899 = arith.constant dense<0.000000e+00> : vector<8x32xf32>
    %1115 = tpu.matmul %1113, %1114, %cst_899 {dimension_numbers = #tpu.dot_dimension_numbers<[1], [0], [0], [1], [0, 0, 1, 1], [], []>} : vector<8x160xf32>, vector<160x32xf32>, vector<8x32xf32> -> vector<8x32xf32>
    %c0_900 = arith.constant 0 : index
    %c0_901 = arith.constant 0 : index
    %1116 = vector.load %arg7[%c0_900, %c0_901] : memref<1x32xf32, #tpu.memory_space<vmem>>, vector<1x32xf32>
    %1117 = vector.broadcast %1116 : vector<1x32xf32> to vector<8x32xf32>
    %1118 = arith.addf %1115, %1117 : vector<8x32xf32>
    %c0_902 = arith.constant 0 : index
    %c0_903 = arith.constant 0 : index
    %1119 = vector.load %arg28[%c0_902, %c0_903] : memref<8x32xf32, #tpu.memory_space<vmem>>, vector<8x32xf32>
    %c0_904 = arith.constant 0 : index
    %c0_905 = arith.constant 0 : index
    %1120 = vector.load %arg33[%c0_904, %c0_905] : memref<8x32xf32, #tpu.memory_space<vmem>>, vector<8x32xf32>
    %cst_906 = arith.constant 0.967216074 : f32
    %1121 = vector.broadcast %cst_906 : f32 to vector<8x32xf32>
    %1122 = arith.mulf %1121, %1120 : vector<8x32xf32>
    %cst_907 = arith.constant 3.278390e-02 : f32
    %1123 = vector.broadcast %cst_907 : f32 to vector<8x32xf32>
    %1124 = arith.mulf %1123, %1119 : vector<8x32xf32>
    %1125 = arith.addf %1122, %1124 : vector<8x32xf32>
    %c0_908 = arith.constant 0 : index
    %c0_909 = arith.constant 0 : index
    %1126 = vector.load %arg34[%c0_908, %c0_909] : memref<8x32xf32, #tpu.memory_space<vmem>>, vector<8x32xf32>
    %cst_910 = arith.constant 0.996672213 : f32
    %1127 = vector.broadcast %cst_910 : f32 to vector<8x32xf32>
    %1128 = arith.mulf %1127, %1126 : vector<8x32xf32>
    %cst_911 = arith.constant 0.0033277839 : f32
    %1129 = vector.broadcast %cst_911 : f32 to vector<8x32xf32>
    %1130 = arith.mulf %1129, %1119 : vector<8x32xf32>
    %1131 = arith.addf %1128, %1130 : vector<8x32xf32>
    %cst_912 = arith.constant 1.800000e+00 : f32
    %1132 = vector.broadcast %cst_912 : f32 to vector<8x32xf32>
    %1133 = arith.mulf %1132, %1125 : vector<8x32xf32>
    %cst_913 = arith.constant 0.00999999977 : f32
    %1134 = vector.broadcast %cst_913 : f32 to vector<8x32xf32>
    %1135 = arith.addf %1134, %1133 : vector<8x32xf32>
    %cst_914 = arith.constant 9.000000e+00 : f32
    %1136 = vector.broadcast %cst_914 : f32 to vector<8x32xf32>
    %1137 = arith.mulf %1136, %1131 : vector<8x32xf32>
    %1138 = arith.addf %1135, %1137 : vector<8x32xf32>
    %c0_915 = arith.constant 0 : index
    %c0_916 = arith.constant 0 : index
    %1139 = vector.load %arg25[%c0_915, %c0_916] : memref<8x32xf32, #tpu.memory_space<vmem>>, vector<8x32xf32>
    %cst_917 = arith.constant 0.951229453 : f32
    %1140 = vector.broadcast %cst_917 : f32 to vector<8x32xf32>
    %1141 = arith.mulf %1139, %1140 : vector<8x32xf32>
    %cst_918 = arith.constant 0.0487705767 : f32
    %1142 = vector.broadcast %cst_918 : f32 to vector<8x32xf32>
    %1143 = arith.mulf %1142, %1118 : vector<8x32xf32>
    %1144 = arith.addf %1141, %1143 : vector<8x32xf32>
    %1145 = arith.mulf %1138, %1119 : vector<8x32xf32>
    %cst_919 = arith.constant 1.000000e+00 : f32
    %1146 = vector.broadcast %cst_919 : f32 to vector<8x32xf32>
    %1147 = arith.mulf %1145, %1146 : vector<8x32xf32>
    %1148 = arith.subf %1144, %1147 : vector<8x32xf32>
    %1149 = arith.subf %1148, %1138 : vector<8x32xf32>
    %cst_920 = arith.constant 0.000000e+00 : f32
    %1150 = vector.broadcast %cst_920 : f32 to vector<8x32xf32>
    %1151 = arith.cmpf ogt, %1149, %1150 : vector<8x32xf32>
    %1152 = arith.extui %1151 : vector<8x32xi1> to vector<8x32xi32>
    %1153 = arith.sitofp %1152 : vector<8x32xi32> to vector<8x32xf32>
    %c0_921 = arith.constant 0 : index
    %c0_922 = arith.constant 0 : index
    %1154 = vector.load %arg25[%c0_921, %c0_922] : memref<8x32xf32, #tpu.memory_space<vmem>>, vector<8x32xf32>
    tpu.vector_store %arg25[%c0_921, %c0_922], %1148 {strides = array<i32>} : memref<8x32xf32, #tpu.memory_space<vmem>>, vector<8x32xf32>,
    %c0_923 = arith.constant 0 : index
    %c0_924 = arith.constant 0 : index
    %1155 = vector.load %arg28[%c0_923, %c0_924] : memref<8x32xf32, #tpu.memory_space<vmem>>, vector<8x32xf32>
    tpu.vector_store %arg28[%c0_923, %c0_924], %1153 {strides = array<i32>} : memref<8x32xf32, #tpu.memory_space<vmem>>, vector<8x32xf32>,
    %c0_925 = arith.constant 0 : index
    %c0_926 = arith.constant 0 : index
    %1156 = vector.load %arg33[%c0_925, %c0_926] : memref<8x32xf32, #tpu.memory_space<vmem>>, vector<8x32xf32>
    tpu.vector_store %arg33[%c0_925, %c0_926], %1125 {strides = array<i32>} : memref<8x32xf32, #tpu.memory_space<vmem>>, vector<8x32xf32>,
    %c0_927 = arith.constant 0 : index
    %c0_928 = arith.constant 0 : index
    %1157 = vector.load %arg34[%c0_927, %c0_928] : memref<8x32xf32, #tpu.memory_space<vmem>>, vector<8x32xf32>
    tpu.vector_store %arg34[%c0_927, %c0_928], %1131 {strides = array<i32>} : memref<8x32xf32, #tpu.memory_space<vmem>>, vector<8x32xf32>,
    %c0_929 = arith.constant 0 : index
    %c0_930 = arith.constant 0 : index
    %1158 = vector.load %arg8[%c0_929, %c0_930] : memref<32x2xf32, #tpu.memory_space<vmem>>, vector<32x2xf32>
    %cst_931 = arith.constant dense<0.000000e+00> : vector<8x2xf32>
    %1159 = tpu.matmul %1148, %1158, %cst_931 {dimension_numbers = #tpu.dot_dimension_numbers<[1], [0], [0], [1], [0, 0, 1, 1], [], []>} : vector<8x32xf32>, vector<32x2xf32>, vector<8x2xf32> -> vector<8x2xf32>
    %c0_932 = arith.constant 0 : index
    %c0_933 = arith.constant 0 : index
    %1160 = vector.load %arg9[%c0_932, %c0_933] : memref<1x2xf32, #tpu.memory_space<vmem>>, vector<1x2xf32>
    %1161 = vector.broadcast %1160 : vector<1x2xf32> to vector<8x2xf32>
    %1162 = arith.addf %1159, %1161 : vector<8x2xf32>
    %1163 = arith.index_cast %c6_i32 : i32 to index
    %c0_934 = arith.constant 0 : index
    %c0_935 = arith.constant 0 : index
    %1164 = vector.load %arg16[%1163, %c0_934, %c0_935] : memref<8x8x512xf32, #tpu.memory_space<vmem>>, vector<1x8x2xf32>
    %1165 = vector.shape_cast %1164 : vector<1x8x2xf32> to vector<8x2xf32>
    %1166 = vector.shape_cast %1162 : vector<8x2xf32> to vector<1x8x2xf32>
    tpu.vector_store %arg16[%1163, %c0_934, %c0_935], %1166 {strides = array<i32>} : memref<8x8x512xf32, #tpu.memory_space<vmem>>, vector<1x8x2xf32>,
    %1167 = arith.index_cast %c6_i32 : i32 to index
    %c0_936 = arith.constant 0 : index
    %c128_937 = arith.constant 128 : index
    %1168 = vector.load %arg16[%1167, %c0_936, %c128_937] : memref<8x8x512xf32, #tpu.memory_space<vmem>>, vector<1x8x32xf32>
    %1169 = vector.shape_cast %1168 : vector<1x8x32xf32> to vector<8x32xf32>
    %1170 = vector.shape_cast %1153 : vector<8x32xf32> to vector<1x8x32xf32>
    tpu.vector_store %arg16[%1167, %c0_936, %c128_937], %1170 {strides = array<i32>} : memref<8x8x512xf32, #tpu.memory_space<vmem>>, vector<1x8x32xf32>,
    %1171 = arith.index_cast %c6_i32 : i32 to index
    %c0_938 = arith.constant 0 : index
    %c256_939 = arith.constant 256 : index
    %1172 = vector.load %arg16[%1171, %c0_938, %c256_939] : memref<8x8x512xf32, #tpu.memory_space<vmem>>, vector<1x8x32xf32>
    %1173 = vector.shape_cast %1172 : vector<1x8x32xf32> to vector<8x32xf32>
    %1174 = vector.shape_cast %1148 : vector<8x32xf32> to vector<1x8x32xf32>
    tpu.vector_store %arg16[%1171, %c0_938, %c256_939], %1174 {strides = array<i32>} : memref<8x8x512xf32, #tpu.memory_space<vmem>>, vector<1x8x32xf32>,
    %1175 = arith.index_cast %c6_i32 : i32 to index
    %c0_940 = arith.constant 0 : index
    %c384_941 = arith.constant 384 : index
    %1176 = vector.load %arg16[%1175, %c0_940, %c384_941] : memref<8x8x512xf32, #tpu.memory_space<vmem>>, vector<1x8x32xf32>
    %1177 = vector.shape_cast %1176 : vector<1x8x32xf32> to vector<8x32xf32>
    %1178 = vector.shape_cast %1138 : vector<8x32xf32> to vector<1x8x32xf32>
    tpu.vector_store %arg16[%1175, %c0_940, %c384_941], %1178 {strides = array<i32>} : memref<8x8x512xf32, #tpu.memory_space<vmem>>, vector<1x8x32xf32>,
    %c7_i32 = arith.constant 7 : i32
    %1179 = arith.index_cast %c7_i32 : i32 to index
    %c0_942 = arith.constant 0 : index
    %c0_943 = arith.constant 0 : index
    %1180 = vector.load %arg1[%1179, %c0_942, %c0_943] : memref<8x8x16xf32, #tpu.memory_space<vmem>>, vector<1x8x16xf32>
    %1181 = vector.shape_cast %1180 : vector<1x8x16xf32> to vector<8x16xf32>
    %c0_944 = arith.constant 0 : index
    %c0_945 = arith.constant 0 : index
    %1182 = vector.load %arg35[%c0_944, %c0_945] : memref<8x160xf32, #tpu.memory_space<vmem>>, vector<8x16xf32>
    tpu.vector_store %arg35[%c0_944, %c0_945], %1181 {strides = array<i32>} : memref<8x160xf32, #tpu.memory_space<vmem>>, vector<8x16xf32>,
    %c0_946 = arith.constant 0 : index
    %c0_947 = arith.constant 0 : index
    %1183 = vector.load %arg26[%c0_946, %c0_947] : memref<8x32xf32, #tpu.memory_space<vmem>>, vector<8x32xf32>
    %c0_948 = arith.constant 0 : index
    %c128_949 = arith.constant 128 : index
    %1184 = vector.load %arg35[%c0_948, %c128_949] : memref<8x160xf32, #tpu.memory_space<vmem>>, vector<8x32xf32>
    tpu.vector_store %arg35[%c0_948, %c128_949], %1183 {strides = array<i32>} : memref<8x160xf32, #tpu.memory_space<vmem>>, vector<8x32xf32>,
    %c0_950 = arith.constant 0 : index
    %c0_951 = arith.constant 0 : index
    %1185 = vector.load %arg35[%c0_950, %c0_951] : memref<8x160xf32, #tpu.memory_space<vmem>>, vector<8x160xf32>
    %c0_952 = arith.constant 0 : index
    %c0_953 = arith.constant 0 : index
    %1186 = vector.load %arg2[%c0_952, %c0_953] : memref<160x32xf32, #tpu.memory_space<vmem>>, vector<160x32xf32>
    %cst_954 = arith.constant dense<0.000000e+00> : vector<8x32xf32>
    %1187 = tpu.matmul %1185, %1186, %cst_954 {dimension_numbers = #tpu.dot_dimension_numbers<[1], [0], [0], [1], [0, 0, 1, 1], [], []>} : vector<8x160xf32>, vector<160x32xf32>, vector<8x32xf32> -> vector<8x32xf32>
    %c0_955 = arith.constant 0 : index
    %c0_956 = arith.constant 0 : index
    %1188 = vector.load %arg3[%c0_955, %c0_956] : memref<1x32xf32, #tpu.memory_space<vmem>>, vector<1x32xf32>
    %1189 = vector.broadcast %1188 : vector<1x32xf32> to vector<8x32xf32>
    %1190 = arith.addf %1187, %1189 : vector<8x32xf32>
    %c0_957 = arith.constant 0 : index
    %c0_958 = arith.constant 0 : index
    %1191 = vector.load %arg26[%c0_957, %c0_958] : memref<8x32xf32, #tpu.memory_space<vmem>>, vector<8x32xf32>
    %c0_959 = arith.constant 0 : index
    %c0_960 = arith.constant 0 : index
    %1192 = vector.load %arg29[%c0_959, %c0_960] : memref<8x32xf32, #tpu.memory_space<vmem>>, vector<8x32xf32>
    %cst_961 = arith.constant 0.967216074 : f32
    %1193 = vector.broadcast %cst_961 : f32 to vector<8x32xf32>
    %1194 = arith.mulf %1193, %1192 : vector<8x32xf32>
    %cst_962 = arith.constant 3.278390e-02 : f32
    %1195 = vector.broadcast %cst_962 : f32 to vector<8x32xf32>
    %1196 = arith.mulf %1195, %1191 : vector<8x32xf32>
    %1197 = arith.addf %1194, %1196 : vector<8x32xf32>
    %c0_963 = arith.constant 0 : index
    %c0_964 = arith.constant 0 : index
    %1198 = vector.load %arg30[%c0_963, %c0_964] : memref<8x32xf32, #tpu.memory_space<vmem>>, vector<8x32xf32>
    %cst_965 = arith.constant 0.996672213 : f32
    %1199 = vector.broadcast %cst_965 : f32 to vector<8x32xf32>
    %1200 = arith.mulf %1199, %1198 : vector<8x32xf32>
    %cst_966 = arith.constant 0.0033277839 : f32
    %1201 = vector.broadcast %cst_966 : f32 to vector<8x32xf32>
    %1202 = arith.mulf %1201, %1191 : vector<8x32xf32>
    %1203 = arith.addf %1200, %1202 : vector<8x32xf32>
    %cst_967 = arith.constant 1.800000e+00 : f32
    %1204 = vector.broadcast %cst_967 : f32 to vector<8x32xf32>
    %1205 = arith.mulf %1204, %1197 : vector<8x32xf32>
    %cst_968 = arith.constant 0.00999999977 : f32
    %1206 = vector.broadcast %cst_968 : f32 to vector<8x32xf32>
    %1207 = arith.addf %1206, %1205 : vector<8x32xf32>
    %cst_969 = arith.constant 9.000000e+00 : f32
    %1208 = vector.broadcast %cst_969 : f32 to vector<8x32xf32>
    %1209 = arith.mulf %1208, %1203 : vector<8x32xf32>
    %1210 = arith.addf %1207, %1209 : vector<8x32xf32>
    %c0_970 = arith.constant 0 : index
    %c0_971 = arith.constant 0 : index
    %1211 = vector.load %arg23[%c0_970, %c0_971] : memref<8x32xf32, #tpu.memory_space<vmem>>, vector<8x32xf32>
    %cst_972 = arith.constant 0.951229453 : f32
    %1212 = vector.broadcast %cst_972 : f32 to vector<8x32xf32>
    %1213 = arith.mulf %1211, %1212 : vector<8x32xf32>
    %cst_973 = arith.constant 0.0487705767 : f32
    %1214 = vector.broadcast %cst_973 : f32 to vector<8x32xf32>
    %1215 = arith.mulf %1214, %1190 : vector<8x32xf32>
    %1216 = arith.addf %1213, %1215 : vector<8x32xf32>
    %1217 = arith.mulf %1210, %1191 : vector<8x32xf32>
    %cst_974 = arith.constant 1.000000e+00 : f32
    %1218 = vector.broadcast %cst_974 : f32 to vector<8x32xf32>
    %1219 = arith.mulf %1217, %1218 : vector<8x32xf32>
    %1220 = arith.subf %1216, %1219 : vector<8x32xf32>
    %1221 = arith.subf %1220, %1210 : vector<8x32xf32>
    %cst_975 = arith.constant 0.000000e+00 : f32
    %1222 = vector.broadcast %cst_975 : f32 to vector<8x32xf32>
    %1223 = arith.cmpf ogt, %1221, %1222 : vector<8x32xf32>
    %1224 = arith.extui %1223 : vector<8x32xi1> to vector<8x32xi32>
    %1225 = arith.sitofp %1224 : vector<8x32xi32> to vector<8x32xf32>
    %c0_976 = arith.constant 0 : index
    %c0_977 = arith.constant 0 : index
    %1226 = vector.load %arg23[%c0_976, %c0_977] : memref<8x32xf32, #tpu.memory_space<vmem>>, vector<8x32xf32>
    tpu.vector_store %arg23[%c0_976, %c0_977], %1220 {strides = array<i32>} : memref<8x32xf32, #tpu.memory_space<vmem>>, vector<8x32xf32>,
    %c0_978 = arith.constant 0 : index
    %c0_979 = arith.constant 0 : index
    %1227 = vector.load %arg26[%c0_978, %c0_979] : memref<8x32xf32, #tpu.memory_space<vmem>>, vector<8x32xf32>
    tpu.vector_store %arg26[%c0_978, %c0_979], %1225 {strides = array<i32>} : memref<8x32xf32, #tpu.memory_space<vmem>>, vector<8x32xf32>,
    %c0_980 = arith.constant 0 : index
    %c0_981 = arith.constant 0 : index
    %1228 = vector.load %arg29[%c0_980, %c0_981] : memref<8x32xf32, #tpu.memory_space<vmem>>, vector<8x32xf32>
    tpu.vector_store %arg29[%c0_980, %c0_981], %1197 {strides = array<i32>} : memref<8x32xf32, #tpu.memory_space<vmem>>, vector<8x32xf32>,
    %c0_982 = arith.constant 0 : index
    %c0_983 = arith.constant 0 : index
    %1229 = vector.load %arg30[%c0_982, %c0_983] : memref<8x32xf32, #tpu.memory_space<vmem>>, vector<8x32xf32>
    tpu.vector_store %arg30[%c0_982, %c0_983], %1203 {strides = array<i32>} : memref<8x32xf32, #tpu.memory_space<vmem>>, vector<8x32xf32>,
    %c0_984 = arith.constant 0 : index
    %c0_985 = arith.constant 0 : index
    %1230 = vector.load %arg36[%c0_984, %c0_985] : memref<8x160xf32, #tpu.memory_space<vmem>>, vector<8x32xf32>
    tpu.vector_store %arg36[%c0_984, %c0_985], %1225 {strides = array<i32>} : memref<8x160xf32, #tpu.memory_space<vmem>>, vector<8x32xf32>,
    %c0_986 = arith.constant 0 : index
    %c0_987 = arith.constant 0 : index
    %1231 = vector.load %arg27[%c0_986, %c0_987] : memref<8x32xf32, #tpu.memory_space<vmem>>, vector<8x32xf32>
    %c0_988 = arith.constant 0 : index
    %c128_989 = arith.constant 128 : index
    %1232 = vector.load %arg36[%c0_988, %c128_989] : memref<8x160xf32, #tpu.memory_space<vmem>>, vector<8x32xf32>
    tpu.vector_store %arg36[%c0_988, %c128_989], %1231 {strides = array<i32>} : memref<8x160xf32, #tpu.memory_space<vmem>>, vector<8x32xf32>,
    %c0_990 = arith.constant 0 : index
    %c0_991 = arith.constant 0 : index
    %1233 = vector.load %arg36[%c0_990, %c0_991] : memref<8x160xf32, #tpu.memory_space<vmem>>, vector<8x160xf32>
    %c0_992 = arith.constant 0 : index
    %c0_993 = arith.constant 0 : index
    %1234 = vector.load %arg4[%c0_992, %c0_993] : memref<160x32xf32, #tpu.memory_space<vmem>>, vector<160x32xf32>
    %cst_994 = arith.constant dense<0.000000e+00> : vector<8x32xf32>
    %1235 = tpu.matmul %1233, %1234, %cst_994 {dimension_numbers = #tpu.dot_dimension_numbers<[1], [0], [0], [1], [0, 0, 1, 1], [], []>} : vector<8x160xf32>, vector<160x32xf32>, vector<8x32xf32> -> vector<8x32xf32>
    %c0_995 = arith.constant 0 : index
    %c0_996 = arith.constant 0 : index
    %1236 = vector.load %arg5[%c0_995, %c0_996] : memref<1x32xf32, #tpu.memory_space<vmem>>, vector<1x32xf32>
    %1237 = vector.broadcast %1236 : vector<1x32xf32> to vector<8x32xf32>
    %1238 = arith.addf %1235, %1237 : vector<8x32xf32>
    %c0_997 = arith.constant 0 : index
    %c0_998 = arith.constant 0 : index
    %1239 = vector.load %arg27[%c0_997, %c0_998] : memref<8x32xf32, #tpu.memory_space<vmem>>, vector<8x32xf32>
    %c0_999 = arith.constant 0 : index
    %c0_1000 = arith.constant 0 : index
    %1240 = vector.load %arg31[%c0_999, %c0_1000] : memref<8x32xf32, #tpu.memory_space<vmem>>, vector<8x32xf32>
    %cst_1001 = arith.constant 0.967216074 : f32
    %1241 = vector.broadcast %cst_1001 : f32 to vector<8x32xf32>
    %1242 = arith.mulf %1241, %1240 : vector<8x32xf32>
    %cst_1002 = arith.constant 3.278390e-02 : f32
    %1243 = vector.broadcast %cst_1002 : f32 to vector<8x32xf32>
    %1244 = arith.mulf %1243, %1239 : vector<8x32xf32>
    %1245 = arith.addf %1242, %1244 : vector<8x32xf32>
    %c0_1003 = arith.constant 0 : index
    %c0_1004 = arith.constant 0 : index
    %1246 = vector.load %arg32[%c0_1003, %c0_1004] : memref<8x32xf32, #tpu.memory_space<vmem>>, vector<8x32xf32>
    %cst_1005 = arith.constant 0.996672213 : f32
    %1247 = vector.broadcast %cst_1005 : f32 to vector<8x32xf32>
    %1248 = arith.mulf %1247, %1246 : vector<8x32xf32>
    %cst_1006 = arith.constant 0.0033277839 : f32
    %1249 = vector.broadcast %cst_1006 : f32 to vector<8x32xf32>
    %1250 = arith.mulf %1249, %1239 : vector<8x32xf32>
    %1251 = arith.addf %1248, %1250 : vector<8x32xf32>
    %cst_1007 = arith.constant 1.800000e+00 : f32
    %1252 = vector.broadcast %cst_1007 : f32 to vector<8x32xf32>
    %1253 = arith.mulf %1252, %1245 : vector<8x32xf32>
    %cst_1008 = arith.constant 0.00999999977 : f32
    %1254 = vector.broadcast %cst_1008 : f32 to vector<8x32xf32>
    %1255 = arith.addf %1254, %1253 : vector<8x32xf32>
    %cst_1009 = arith.constant 9.000000e+00 : f32
    %1256 = vector.broadcast %cst_1009 : f32 to vector<8x32xf32>
    %1257 = arith.mulf %1256, %1251 : vector<8x32xf32>
    %1258 = arith.addf %1255, %1257 : vector<8x32xf32>
    %c0_1010 = arith.constant 0 : index
    %c0_1011 = arith.constant 0 : index
    %1259 = vector.load %arg24[%c0_1010, %c0_1011] : memref<8x32xf32, #tpu.memory_space<vmem>>, vector<8x32xf32>
    %cst_1012 = arith.constant 0.951229453 : f32
    %1260 = vector.broadcast %cst_1012 : f32 to vector<8x32xf32>
    %1261 = arith.mulf %1259, %1260 : vector<8x32xf32>
    %cst_1013 = arith.constant 0.0487705767 : f32
    %1262 = vector.broadcast %cst_1013 : f32 to vector<8x32xf32>
    %1263 = arith.mulf %1262, %1238 : vector<8x32xf32>
    %1264 = arith.addf %1261, %1263 : vector<8x32xf32>
    %1265 = arith.mulf %1258, %1239 : vector<8x32xf32>
    %cst_1014 = arith.constant 1.000000e+00 : f32
    %1266 = vector.broadcast %cst_1014 : f32 to vector<8x32xf32>
    %1267 = arith.mulf %1265, %1266 : vector<8x32xf32>
    %1268 = arith.subf %1264, %1267 : vector<8x32xf32>
    %1269 = arith.subf %1268, %1258 : vector<8x32xf32>
    %cst_1015 = arith.constant 0.000000e+00 : f32
    %1270 = vector.broadcast %cst_1015 : f32 to vector<8x32xf32>
    %1271 = arith.cmpf ogt, %1269, %1270 : vector<8x32xf32>
    %1272 = arith.extui %1271 : vector<8x32xi1> to vector<8x32xi32>
    %1273 = arith.sitofp %1272 : vector<8x32xi32> to vector<8x32xf32>
    %c0_1016 = arith.constant 0 : index
    %c0_1017 = arith.constant 0 : index
    %1274 = vector.load %arg24[%c0_1016, %c0_1017] : memref<8x32xf32, #tpu.memory_space<vmem>>, vector<8x32xf32>
    tpu.vector_store %arg24[%c0_1016, %c0_1017], %1268 {strides = array<i32>} : memref<8x32xf32, #tpu.memory_space<vmem>>, vector<8x32xf32>,
    %c0_1018 = arith.constant 0 : index
    %c0_1019 = arith.constant 0 : index
    %1275 = vector.load %arg27[%c0_1018, %c0_1019] : memref<8x32xf32, #tpu.memory_space<vmem>>, vector<8x32xf32>
    tpu.vector_store %arg27[%c0_1018, %c0_1019], %1273 {strides = array<i32>} : memref<8x32xf32, #tpu.memory_space<vmem>>, vector<8x32xf32>,
    %c0_1020 = arith.constant 0 : index
    %c0_1021 = arith.constant 0 : index
    %1276 = vector.load %arg31[%c0_1020, %c0_1021] : memref<8x32xf32, #tpu.memory_space<vmem>>, vector<8x32xf32>
    tpu.vector_store %arg31[%c0_1020, %c0_1021], %1245 {strides = array<i32>} : memref<8x32xf32, #tpu.memory_space<vmem>>, vector<8x32xf32>,
    %c0_1022 = arith.constant 0 : index
    %c0_1023 = arith.constant 0 : index
    %1277 = vector.load %arg32[%c0_1022, %c0_1023] : memref<8x32xf32, #tpu.memory_space<vmem>>, vector<8x32xf32>
    tpu.vector_store %arg32[%c0_1022, %c0_1023], %1251 {strides = array<i32>} : memref<8x32xf32, #tpu.memory_space<vmem>>, vector<8x32xf32>,
    %c0_1024 = arith.constant 0 : index
    %c0_1025 = arith.constant 0 : index
    %1278 = vector.load %arg37[%c0_1024, %c0_1025] : memref<8x160xf32, #tpu.memory_space<vmem>>, vector<8x32xf32>
    tpu.vector_store %arg37[%c0_1024, %c0_1025], %1273 {strides = array<i32>} : memref<8x160xf32, #tpu.memory_space<vmem>>, vector<8x32xf32>,
    %c0_1026 = arith.constant 0 : index
    %c0_1027 = arith.constant 0 : index
    %1279 = vector.load %arg28[%c0_1026, %c0_1027] : memref<8x32xf32, #tpu.memory_space<vmem>>, vector<8x32xf32>
    %c0_1028 = arith.constant 0 : index
    %c128_1029 = arith.constant 128 : index
    %1280 = vector.load %arg37[%c0_1028, %c128_1029] : memref<8x160xf32, #tpu.memory_space<vmem>>, vector<8x32xf32>
    tpu.vector_store %arg37[%c0_1028, %c128_1029], %1279 {strides = array<i32>} : memref<8x160xf32, #tpu.memory_space<vmem>>, vector<8x32xf32>,
    %c0_1030 = arith.constant 0 : index
    %c0_1031 = arith.constant 0 : index
    %1281 = vector.load %arg37[%c0_1030, %c0_1031] : memref<8x160xf32, #tpu.memory_space<vmem>>, vector<8x160xf32>
    %c0_1032 = arith.constant 0 : index
    %c0_1033 = arith.constant 0 : index
    %1282 = vector.load %arg6[%c0_1032, %c0_1033] : memref<160x32xf32, #tpu.memory_space<vmem>>, vector<160x32xf32>
    %cst_1034 = arith.constant dense<0.000000e+00> : vector<8x32xf32>
    %1283 = tpu.matmul %1281, %1282, %cst_1034 {dimension_numbers = #tpu.dot_dimension_numbers<[1], [0], [0], [1], [0, 0, 1, 1], [], []>} : vector<8x160xf32>, vector<160x32xf32>, vector<8x32xf32> -> vector<8x32xf32>
    %c0_1035 = arith.constant 0 : index
    %c0_1036 = arith.constant 0 : index
    %1284 = vector.load %arg7[%c0_1035, %c0_1036] : memref<1x32xf32, #tpu.memory_space<vmem>>, vector<1x32xf32>
    %1285 = vector.broadcast %1284 : vector<1x32xf32> to vector<8x32xf32>
    %1286 = arith.addf %1283, %1285 : vector<8x32xf32>
    %c0_1037 = arith.constant 0 : index
    %c0_1038 = arith.constant 0 : index
    %1287 = vector.load %arg28[%c0_1037, %c0_1038] : memref<8x32xf32, #tpu.memory_space<vmem>>, vector<8x32xf32>
    %c0_1039 = arith.constant 0 : index
    %c0_1040 = arith.constant 0 : index
    %1288 = vector.load %arg33[%c0_1039, %c0_1040] : memref<8x32xf32, #tpu.memory_space<vmem>>, vector<8x32xf32>
    %cst_1041 = arith.constant 0.967216074 : f32
    %1289 = vector.broadcast %cst_1041 : f32 to vector<8x32xf32>
    %1290 = arith.mulf %1289, %1288 : vector<8x32xf32>
    %cst_1042 = arith.constant 3.278390e-02 : f32
    %1291 = vector.broadcast %cst_1042 : f32 to vector<8x32xf32>
    %1292 = arith.mulf %1291, %1287 : vector<8x32xf32>
    %1293 = arith.addf %1290, %1292 : vector<8x32xf32>
    %c0_1043 = arith.constant 0 : index
    %c0_1044 = arith.constant 0 : index
    %1294 = vector.load %arg34[%c0_1043, %c0_1044] : memref<8x32xf32, #tpu.memory_space<vmem>>, vector<8x32xf32>
    %cst_1045 = arith.constant 0.996672213 : f32
    %1295 = vector.broadcast %cst_1045 : f32 to vector<8x32xf32>
    %1296 = arith.mulf %1295, %1294 : vector<8x32xf32>
    %cst_1046 = arith.constant 0.0033277839 : f32
    %1297 = vector.broadcast %cst_1046 : f32 to vector<8x32xf32>
    %1298 = arith.mulf %1297, %1287 : vector<8x32xf32>
    %1299 = arith.addf %1296, %1298 : vector<8x32xf32>
    %cst_1047 = arith.constant 1.800000e+00 : f32
    %1300 = vector.broadcast %cst_1047 : f32 to vector<8x32xf32>
    %1301 = arith.mulf %1300, %1293 : vector<8x32xf32>
    %cst_1048 = arith.constant 0.00999999977 : f32
    %1302 = vector.broadcast %cst_1048 : f32 to vector<8x32xf32>
    %1303 = arith.addf %1302, %1301 : vector<8x32xf32>
    %cst_1049 = arith.constant 9.000000e+00 : f32
    %1304 = vector.broadcast %cst_1049 : f32 to vector<8x32xf32>
    %1305 = arith.mulf %1304, %1299 : vector<8x32xf32>
    %1306 = arith.addf %1303, %1305 : vector<8x32xf32>
    %c0_1050 = arith.constant 0 : index
    %c0_1051 = arith.constant 0 : index
    %1307 = vector.load %arg25[%c0_1050, %c0_1051] : memref<8x32xf32, #tpu.memory_space<vmem>>, vector<8x32xf32>
    %cst_1052 = arith.constant 0.951229453 : f32
    %1308 = vector.broadcast %cst_1052 : f32 to vector<8x32xf32>
    %1309 = arith.mulf %1307, %1308 : vector<8x32xf32>
    %cst_1053 = arith.constant 0.0487705767 : f32
    %1310 = vector.broadcast %cst_1053 : f32 to vector<8x32xf32>
    %1311 = arith.mulf %1310, %1286 : vector<8x32xf32>
    %1312 = arith.addf %1309, %1311 : vector<8x32xf32>
    %1313 = arith.mulf %1306, %1287 : vector<8x32xf32>
    %cst_1054 = arith.constant 1.000000e+00 : f32
    %1314 = vector.broadcast %cst_1054 : f32 to vector<8x32xf32>
    %1315 = arith.mulf %1313, %1314 : vector<8x32xf32>
    %1316 = arith.subf %1312, %1315 : vector<8x32xf32>
    %1317 = arith.subf %1316, %1306 : vector<8x32xf32>
    %cst_1055 = arith.constant 0.000000e+00 : f32
    %1318 = vector.broadcast %cst_1055 : f32 to vector<8x32xf32>
    %1319 = arith.cmpf ogt, %1317, %1318 : vector<8x32xf32>
    %1320 = arith.extui %1319 : vector<8x32xi1> to vector<8x32xi32>
    %1321 = arith.sitofp %1320 : vector<8x32xi32> to vector<8x32xf32>
    %c0_1056 = arith.constant 0 : index
    %c0_1057 = arith.constant 0 : index
    %1322 = vector.load %arg25[%c0_1056, %c0_1057] : memref<8x32xf32, #tpu.memory_space<vmem>>, vector<8x32xf32>
    tpu.vector_store %arg25[%c0_1056, %c0_1057], %1316 {strides = array<i32>} : memref<8x32xf32, #tpu.memory_space<vmem>>, vector<8x32xf32>,
    %c0_1058 = arith.constant 0 : index
    %c0_1059 = arith.constant 0 : index
    %1323 = vector.load %arg28[%c0_1058, %c0_1059] : memref<8x32xf32, #tpu.memory_space<vmem>>, vector<8x32xf32>
    tpu.vector_store %arg28[%c0_1058, %c0_1059], %1321 {strides = array<i32>} : memref<8x32xf32, #tpu.memory_space<vmem>>, vector<8x32xf32>,
    %c0_1060 = arith.constant 0 : index
    %c0_1061 = arith.constant 0 : index
    %1324 = vector.load %arg33[%c0_1060, %c0_1061] : memref<8x32xf32, #tpu.memory_space<vmem>>, vector<8x32xf32>
    tpu.vector_store %arg33[%c0_1060, %c0_1061], %1293 {strides = array<i32>} : memref<8x32xf32, #tpu.memory_space<vmem>>, vector<8x32xf32>,
    %c0_1062 = arith.constant 0 : index
    %c0_1063 = arith.constant 0 : index
    %1325 = vector.load %arg34[%c0_1062, %c0_1063] : memref<8x32xf32, #tpu.memory_space<vmem>>, vector<8x32xf32>
    tpu.vector_store %arg34[%c0_1062, %c0_1063], %1299 {strides = array<i32>} : memref<8x32xf32, #tpu.memory_space<vmem>>, vector<8x32xf32>,
    %c0_1064 = arith.constant 0 : index
    %c0_1065 = arith.constant 0 : index
    %1326 = vector.load %arg8[%c0_1064, %c0_1065] : memref<32x2xf32, #tpu.memory_space<vmem>>, vector<32x2xf32>
    %cst_1066 = arith.constant dense<0.000000e+00> : vector<8x2xf32>
    %1327 = tpu.matmul %1316, %1326, %cst_1066 {dimension_numbers = #tpu.dot_dimension_numbers<[1], [0], [0], [1], [0, 0, 1, 1], [], []>} : vector<8x32xf32>, vector<32x2xf32>, vector<8x2xf32> -> vector<8x2xf32>
    %c0_1067 = arith.constant 0 : index
    %c0_1068 = arith.constant 0 : index
    %1328 = vector.load %arg9[%c0_1067, %c0_1068] : memref<1x2xf32, #tpu.memory_space<vmem>>, vector<1x2xf32>
    %1329 = vector.broadcast %1328 : vector<1x2xf32> to vector<8x2xf32>
    %1330 = arith.addf %1327, %1329 : vector<8x2xf32>
    %1331 = arith.index_cast %c7_i32 : i32 to index
    %c0_1069 = arith.constant 0 : index
    %c0_1070 = arith.constant 0 : index
    %1332 = vector.load %arg16[%1331, %c0_1069, %c0_1070] : memref<8x8x512xf32, #tpu.memory_space<vmem>>, vector<1x8x2xf32>
    %1333 = vector.shape_cast %1332 : vector<1x8x2xf32> to vector<8x2xf32>
    %1334 = vector.shape_cast %1330 : vector<8x2xf32> to vector<1x8x2xf32>
    tpu.vector_store %arg16[%1331, %c0_1069, %c0_1070], %1334 {strides = array<i32>} : memref<8x8x512xf32, #tpu.memory_space<vmem>>, vector<1x8x2xf32>,
    %1335 = arith.index_cast %c7_i32 : i32 to index
    %c0_1071 = arith.constant 0 : index
    %c128_1072 = arith.constant 128 : index
    %1336 = vector.load %arg16[%1335, %c0_1071, %c128_1072] : memref<8x8x512xf32, #tpu.memory_space<vmem>>, vector<1x8x32xf32>
    %1337 = vector.shape_cast %1336 : vector<1x8x32xf32> to vector<8x32xf32>
    %1338 = vector.shape_cast %1321 : vector<8x32xf32> to vector<1x8x32xf32>
    tpu.vector_store %arg16[%1335, %c0_1071, %c128_1072], %1338 {strides = array<i32>} : memref<8x8x512xf32, #tpu.memory_space<vmem>>, vector<1x8x32xf32>,
    %1339 = arith.index_cast %c7_i32 : i32 to index
    %c0_1073 = arith.constant 0 : index
    %c256_1074 = arith.constant 256 : index
    %1340 = vector.load %arg16[%1339, %c0_1073, %c256_1074] : memref<8x8x512xf32, #tpu.memory_space<vmem>>, vector<1x8x32xf32>
    %1341 = vector.shape_cast %1340 : vector<1x8x32xf32> to vector<8x32xf32>
    %1342 = vector.shape_cast %1316 : vector<8x32xf32> to vector<1x8x32xf32>
    tpu.vector_store %arg16[%1339, %c0_1073, %c256_1074], %1342 {strides = array<i32>} : memref<8x8x512xf32, #tpu.memory_space<vmem>>, vector<1x8x32xf32>,
    %1343 = arith.index_cast %c7_i32 : i32 to index
    %c0_1075 = arith.constant 0 : index
    %c384_1076 = arith.constant 384 : index
    %1344 = vector.load %arg16[%1343, %c0_1075, %c384_1076] : memref<8x8x512xf32, #tpu.memory_space<vmem>>, vector<1x8x32xf32>
    %1345 = vector.shape_cast %1344 : vector<1x8x32xf32> to vector<8x32xf32>
    %1346 = vector.shape_cast %1306 : vector<8x32xf32> to vector<1x8x32xf32>
    tpu.vector_store %arg16[%1343, %c0_1075, %c384_1076], %1346 {strides = array<i32>} : memref<8x8x512xf32, #tpu.memory_space<vmem>>, vector<1x8x32xf32>,
    %c8_i32 = arith.constant 8 : i32
    %c0_i32_1077 = arith.constant 0 : i32
    %1347 = arith.cmpi eq, %arg0, %c0_i32_1077 : i32
    %1348 = arith.extui %1347 : i1 to i32
    %c0_i32_1078 = arith.constant 0 : i32
    %1349 = arith.cmpi ne, %1348, %c0_i32_1078 : i32
    scf.if %1349 {
      %c0_1079 = arith.constant 0 : index
      %c0_1080 = arith.constant 0 : index
      %1350 = vector.load %arg23[%c0_1079, %c0_1080] : memref<8x32xf32, #tpu.memory_space<vmem>>, vector<8x32xf32>
      %c0_1081 = arith.constant 0 : index
      %c0_1082 = arith.constant 0 : index
      %1351 = vector.load %arg17[%c0_1081, %c0_1082] : memref<8x32xf32, #tpu.memory_space<vmem>>, vector<8x32xf32>
      tpu.vector_store %arg17[%c0_1081, %c0_1082], %1350 {strides = array<i32>} : memref<8x32xf32, #tpu.memory_space<vmem>>, vector<8x32xf32>,
      %c0_1083 = arith.constant 0 : index
      %c0_1084 = arith.constant 0 : index
      %1352 = vector.load %arg24[%c0_1083, %c0_1084] : memref<8x32xf32, #tpu.memory_space<vmem>>, vector<8x32xf32>
      %c0_1085 = arith.constant 0 : index
      %c0_1086 = arith.constant 0 : index
      %1353 = vector.load %arg18[%c0_1085, %c0_1086] : memref<8x32xf32, #tpu.memory_space<vmem>>, vector<8x32xf32>
      tpu.vector_store %arg18[%c0_1085, %c0_1086], %1352 {strides = array<i32>} : memref<8x32xf32, #tpu.memory_space<vmem>>, vector<8x32xf32>,
      %c0_1087 = arith.constant 0 : index
      %c0_1088 = arith.constant 0 : index
      %1354 = vector.load %arg25[%c0_1087, %c0_1088] : memref<8x32xf32, #tpu.memory_space<vmem>>, vector<8x32xf32>
      %c0_1089 = arith.constant 0 : index
      %c0_1090 = arith.constant 0 : index
      %1355 = vector.load %arg19[%c0_1089, %c0_1090] : memref<8x32xf32, #tpu.memory_space<vmem>>, vector<8x32xf32>
      tpu.vector_store %arg19[%c0_1089, %c0_1090], %1354 {strides = array<i32>} : memref<8x32xf32, #tpu.memory_space<vmem>>, vector<8x32xf32>,
      %c0_1091 = arith.constant 0 : index
      %c0_1092 = arith.constant 0 : index
      %1356 = vector.load %arg26[%c0_1091, %c0_1092] : memref<8x32xf32, #tpu.memory_space<vmem>>, vector<8x32xf32>
      %c0_1093 = arith.constant 0 : index
      %c0_1094 = arith.constant 0 : index
      %1357 = vector.load %arg20[%c0_1093, %c0_1094] : memref<8x32xf32, #tpu.memory_space<vmem>>, vector<8x32xf32>
      tpu.vector_store %arg20[%c0_1093, %c0_1094], %1356 {strides = array<i32>} : memref<8x32xf32, #tpu.memory_space<vmem>>, vector<8x32xf32>,
      %c0_1095 = arith.constant 0 : index
      %c0_1096 = arith.constant 0 : index
      %1358 = vector.load %arg27[%c0_1095, %c0_1096] : memref<8x32xf32, #tpu.memory_space<vmem>>, vector<8x32xf32>
      %c0_1097 = arith.constant 0 : index
      %c0_1098 = arith.constant 0 : index
      %1359 = vector.load %arg21[%c0_1097, %c0_1098] : memref<8x32xf32, #tpu.memory_space<vmem>>, vector<8x32xf32>
      tpu.vector_store %arg21[%c0_1097, %c0_1098], %1358 {strides = array<i32>} : memref<8x32xf32, #tpu.memory_space<vmem>>, vector<8x32xf32>,
      %c0_1099 = arith.constant 0 : index
      %c0_1100 = arith.constant 0 : index
      %1360 = vector.load %arg28[%c0_1099, %c0_1100] : memref<8x32xf32, #tpu.memory_space<vmem>>, vector<8x32xf32>
      %c0_1101 = arith.constant 0 : index
      %c0_1102 = arith.constant 0 : index
      %1361 = vector.load %arg22[%c0_1101, %c0_1102] : memref<8x32xf32, #tpu.memory_space<vmem>>, vector<8x32xf32>
      tpu.vector_store %arg22[%c0_1101, %c0_1102], %1360 {strides = array<i32>} : memref<8x32xf32, #tpu.memory_space<vmem>>, vector<8x32xf32>,
    } else {
    }
    return
  }
  func.func @transform_0(%arg0: i32) -> (i32, i32, i32) {
    %c0_i32 = arith.constant 0 : i32
    %c0_i32_0 = arith.constant 0 : i32
    %c0_i32_1 = arith.constant 0 : i32
    return %arg0, %c0_i32, %c0_i32_0 : i32, i32, i32
  }
  func.func @transform_1(%arg0: i32) -> (i32, i32) {
    %c0_i32 = arith.constant 0 : i32
    %c0_i32_0 = arith.constant 0 : i32
    %c0_i32_1 = arith.constant 0 : i32
    return %c0_i32, %c0_i32_0 : i32, i32
  }
  func.func @transform_2(%arg0: i32) -> (i32, i32) {
    %c0_i32 = arith.constant 0 : i32
    %c0_i32_0 = arith.constant 0 : i32
    %c0_i32_1 = arith.constant 0 : i32
    return %c0_i32, %c0_i32_0 : i32, i32
  }
  func.func @transform_3(%arg0: i32) -> (i32, i32) {
    %c0_i32 = arith.constant 0 : i32
    %c0_i32_0 = arith.constant 0 : i32
    %c0_i32_1 = arith.constant 0 : i32
    return %c0_i32, %c0_i32_0 : i32, i32
  }
  func.func @transform_4(%arg0: i32) -> (i32, i32) {
    %c0_i32 = arith.constant 0 : i32
    %c0_i32_0 = arith.constant 0 : i32
    %c0_i32_1 = arith.constant 0 : i32
    return %c0_i32, %c0_i32_0 : i32, i32
  }
  func.func @transform_5(%arg0: i32) -> (i32, i32) {
    %c0_i32 = arith.constant 0 : i32
    %c0_i32_0 = arith.constant 0 : i32
    %c0_i32_1 = arith.constant 0 : i32
    return %c0_i32, %c0_i32_0 : i32, i32
  }
  func.func @transform_6(%arg0: i32) -> (i32, i32) {
    %c0_i32 = arith.constant 0 : i32
    %c0_i32_0 = arith.constant 0 : i32
    %c0_i32_1 = arith.constant 0 : i32
    return %c0_i32, %c0_i32_0 : i32, i32
  }
  func.func @transform_7(%arg0: i32) -> (i32, i32) {
    %c0_i32 = arith.constant 0 : i32
    %c0_i32_0 = arith.constant 0 : i32
    %c0_i32_1 = arith.constant 0 : i32
    return %c0_i32, %c0_i32_0 : i32, i32
  }
  func.func @transform_8(%arg0: i32) -> (i32, i32) {
    %c0_i32 = arith.constant 0 : i32
    %c0_i32_0 = arith.constant 0 : i32
    %c0_i32_1 = arith.constant 0 : i32
    return %c0_i32, %c0_i32_0 : i32, i32
  }
  func.func @transform_9(%arg0: i32) -> (i32, i32) {
    %c0_i32 = arith.constant 0 : i32
    %c0_i32_0 = arith.constant 0 : i32
    %c0_i32_1 = arith.constant 0 : i32
    return %c0_i32, %c0_i32_0 : i32, i32
  }
  func.func @transform_10(%arg0: i32) -> (i32, i32) {
    %c0_i32 = arith.constant 0 : i32
    %c0_i32_0 = arith.constant 0 : i32
    %c0_i32_1 = arith.constant 0 : i32
    return %c0_i32, %c0_i32_0 : i32, i32
  }
  func.func @transform_11(%arg0: i32) -> (i32, i32) {
    %c0_i32 = arith.constant 0 : i32
    %c0_i32_0 = arith.constant 0 : i32
    %c0_i32_1 = arith.constant 0 : i32
    return %c0_i32, %c0_i32_0 : i32, i32
  }
  func.func @transform_12(%arg0: i32) -> (i32, i32) {
    %c0_i32 = arith.constant 0 : i32
    %c0_i32_0 = arith.constant 0 : i32
    %c0_i32_1 = arith.constant 0 : i32
    return %c0_i32, %c0_i32_0 : i32, i32
  }
  func.func @transform_13(%arg0: i32) -> (i32, i32) {
    %c0_i32 = arith.constant 0 : i32
    %c0_i32_0 = arith.constant 0 : i32
    %c0_i32_1 = arith.constant 0 : i32
    return %c0_i32, %c0_i32_0 : i32, i32
  }
  func.func @transform_14(%arg0: i32) -> (i32, i32) {
    %c0_i32 = arith.constant 0 : i32
    %c0_i32_0 = arith.constant 0 : i32
    %c0_i32_1 = arith.constant 0 : i32
    return %c0_i32, %c0_i32_0 : i32, i32
  }
  func.func @transform_15(%arg0: i32) -> (i32, i32, i32) {
    %c0_i32 = arith.constant 0 : i32
    %c0_i32_0 = arith.constant 0 : i32
    %c0_i32_1 = arith.constant 0 : i32
    return %arg0, %c0_i32, %c0_i32_0 : i32, i32, i32
  }
  func.func @transform_16(%arg0: i32) -> (i32, i32) {
    %c0_i32 = arith.constant 0 : i32
    %c0_i32_0 = arith.constant 0 : i32
    %c0_i32_1 = arith.constant 0 : i32
    return %c0_i32, %c0_i32_0 : i32, i32
  }
  func.func @transform_17(%arg0: i32) -> (i32, i32) {
    %c0_i32 = arith.constant 0 : i32
    %c0_i32_0 = arith.constant 0 : i32
    %c0_i32_1 = arith.constant 0 : i32
    return %c0_i32, %c0_i32_0 : i32, i32
  }
  func.func @transform_18(%arg0: i32) -> (i32, i32) {
    %c0_i32 = arith.constant 0 : i32
    %c0_i32_0 = arith.constant 0 : i32
    %c0_i32_1 = arith.constant 0 : i32
    return %c0_i32, %c0_i32_0 : i32, i32
  }
  func.func @transform_19(%arg0: i32) -> (i32, i32) {
    %c0_i32 = arith.constant 0 : i32
    %c0_i32_0 = arith.constant 0 : i32
    %c0_i32_1 = arith.constant 0 : i32
    return %c0_i32, %c0_i32_0 : i32, i32
  }
  func.func @transform_20(%arg0: i32) -> (i32, i32) {
    %c0_i32 = arith.constant 0 : i32
    %c0_i32_0 = arith.constant 0 : i32
    %c0_i32_1 = arith.constant 0 : i32
    return %c0_i32, %c0_i32_0 : i32, i32
  }
  func.func @transform_21(%arg0: i32) -> (i32, i32) {
    %c0_i32 = arith.constant 0 : i32
    %c0_i32_0 = arith.constant 0 : i32
    %c0_i32_1 = arith.constant 0 : i32
    return %c0_i32, %c0_i32_0 : i32, i32
  }
}

</mosaic_0001>

<bundles_post_ra>
// kernel: tpu_custom_call.1
= control target key start
LH: loop header
LB: loop body
LE: loop exit
PB: predicated region body
PF: predicated region fallthrough
CT: control target
= control target key end

     0   :  { %s7685_s0 = inlined_call_operand.vmem [shape: f32[8,8,16], index: 0, kind: input, shape index: {}]   ;;  %s7686_s1 = inlined_call_operand.vmem [shape: f32[160,32], index: 1, kind: input, shape index: {}]   ;;  %s7687_s2 = inlined_call_operand.vmem [shape: f32[1,32], index: 2, kind: input, shape index: {}]   ;;  %s7688_s3 = inlined_call_operand.vmem [shape: f32[160,32], index: 3, kind: input, shape index: {}]   ;;  %s7689_s4 = inlined_call_operand.vmem [shape: f32[1,32], index: 4, kind: input, shape index: {}]   ;;  %s7690_s5 = inlined_call_operand.vmem [shape: f32[160,32], index: 5, kind: input, shape index: {}]   ;;  %s7691_s6 = inlined_call_operand.vmem [shape: f32[1,32], index: 6, kind: input, shape index: {}]   ;;  %s7692_s7 = inlined_call_operand.vmem [shape: f32[32,2], index: 7, kind: input, shape index: {}]   ;;  %s7693_s8 = inlined_call_operand.vmem [shape: f32[1,2], index: 8, kind: input, shape index: {}]   ;;  %s7694_s9 = inlined_call_operand.vmem [shape: f32[8,32], index: 9, kind: input, shape index: {}]   ;;  %s7695_s10 = inlined_call_operand.vmem [shape: f32[8,32], index: 10, kind: input, shape index: {}]   ;;  %s7696_s11 = inlined_call_operand.vmem [shape: f32[8,32], index: 11, kind: input, shape index: {}]   ;;  %s7697_s12 = inlined_call_operand.vmem [shape: f32[8,32], index: 12, kind: input, shape index: {}]   ;;  %s7698_s13 = inlined_call_operand.vmem [shape: f32[8,32], index: 13, kind: input, shape index: {}]   ;;  %s7699_s14 = inlined_call_operand.vmem [shape: f32[8,32], index: 14, kind: input, shape index: {}]   ;;  %s7700_s15 = inlined_call_operand.hbm [shape: f32[8,8,512], index: 15, kind: output, shape index: {0}]   ;;  %s7701_s16 = inlined_call_operand.hbm [shape: f32[8,32], index: 16, kind: output, shape index: {1}]   ;;  %s7702_s17 = inlined_call_operand.hbm [shape: f32[8,32], index: 17, kind: output, shape index: {2}]   ;;  %s7703_s18 = inlined_call_operand.hbm [shape: f32[8,32], index: 18, kind: output, shape index: {3}]   ;;  %s7704_s19 = inlined_call_operand.hbm [shape: f32[8,32], index: 19, kind: output, shape index: {4}]   ;;  %s7705_s20 = inlined_call_operand.hbm [shape: f32[8,32], index: 20, kind: output, shape index: {5}]   ;;  %s7706_s21 = inlined_call_operand.hbm [shape: f32[8,32], index: 21, kind: output, shape index: {6}]  }
   0x1   :  { %7713 = sst [smem:[#allocation32_spill]] %s7685_s0 }
   0x2   :  { %7714 = sst [smem:[#allocation33_spill]] %s7686_s1 }
   0x3   :  { %7715 = sst [smem:[#allocation34_spill]] %s7687_s2 }
   0x4   :  { %7716 = sst [smem:[#allocation35_spill]] %s7688_s3 }
   0x5   :  { %7717 = sst [smem:[#allocation36_spill]] %s7689_s4 }
   0x6   :  { %7718 = sst [smem:[#allocation37_spill]] %s7690_s5 }
   0x7   :  { %27 = vsyncpa [#allocation18], 0 }
   0x8   :  { %28 = vsyncpa [#allocation20], 0 }
   0x9   :  { %29 = vsyncpa [#allocation23], 0  ;;  %s7719_s26 = sld [smem:[#allocation33_spill]]  ;;  %vm66_vm0 = vcmask 261120   ;;  %v5265_v3 = vmov 0.0|0.0   ;;  %v5266_v6 = vmov 0.0  }
   0xa   :  { %4322 = vmatprep.subr.bf16.mxu0 %v5265_v3  ;;  %85 = vst.msk [vmem:[#allocation14 + $0x8] sm:$0xff] %vm66_vm0, %v5266_v6  ;;  %84 = vst [vmem:[#allocation14] sm:$0xff] %v5266_v6  ;;  %4352 = vmatprep.subr.bf16.mxu1 %v5265_v3  ;;  %v5267_v7 = vmov 0.01   ;;  %vm91_vm1 = vcmask 130048   ;;  %v72_v12 = vld [vmem:[%s7697_s12] sm:$0xff] }
   0xb   :  { %86 = vst [vmem:[#allocation15] sm:$0xff] %v5266_v6  ;;  %87 = vst.msk [vmem:[#allocation15 + $0x8] sm:$0xff] %vm66_vm0, %v5266_v6  ;;  %s7720_s0 = sld [smem:[#allocation32_spill]]  ;;  %s7721_s5 = sld [smem:[#allocation35_spill]]  ;;  %v65_v24 = vld [vmem:[%s7694_s9] sm:$0xff] }
   0xc   :  { %88 = vst [vmem:[#allocation16] sm:$0xff] %v5266_v6  ;;  %89 = vst.msk [vmem:[#allocation16 + $0x8] sm:$0xff] %vm66_vm0, %v5266_v6 }
   0xd   :  { %78 = vst.msk [vmem:[#allocation8] sm:$0xff] %vm66_vm0, %v5267_v7  ;;  %79 = vst.msk [vmem:[#allocation9] sm:$0xff] %vm66_vm0, %v5267_v7 }
   0xe   :  { %80 = vst.msk [vmem:[#allocation10] sm:$0xff] %vm66_vm0, %v5267_v7  ;;  %81 = vst.msk [vmem:[#allocation11] sm:$0xff] %vm66_vm0, %v5267_v7 }
   0xf   :  { %v98_v0 = vld [vmem:[%s7719_s26] sm:$0xff]  ;;  %v99_v1 = vld [vmem:[%s7719_s26 + $0x8] sm:$0xff]  ;;  %v100_v2 = vld [vmem:[%s7719_s26 + $0x10] sm:$0xff]  ;;  %82 = vst.msk [vmem:[#allocation12] sm:$0xff] %vm66_vm0, %v5267_v7 }
  0x10   :  { %v5398_v4 = vpack.c.bf16 %v99_v1, %v98_v0  ;;  %v101_v5 = vld [vmem:[%s7719_s26 + $0x18] sm:$0xff]  ;;  %83 = vst.msk [vmem:[#allocation13] sm:$0xff] %vm66_vm0, %v5267_v7  ;;  %v102_v9 = vld [vmem:[%s7719_s26 + $0x20] sm:$0xff]  ;;  %v103_v10 = vld [vmem:[%s7719_s26 + $0x28] sm:$0xff] }
  0x11   :  { %v5420_v8 = vpack.c.bf16 %v101_v5, %v100_v2  ;;  %v104_v11 = vld [vmem:[%s7719_s26 + $0x30] sm:$0xff]  ;;  %v5436_v13 = vpack.c.bf16 %v103_v10, %v102_v9  ;;  %v105_v14 = vld [vmem:[%s7719_s26 + $0x38] sm:$0xff]  ;;  %73 = vst.msk [vmem:[#allocation5] sm:$0xff] %vm66_vm0, %v72_v12  ;;  %v90_v15 = vld [vmem:[%s7720_s0] sm:$0xff] }
  0x12   :  { %4324 = vmatpush1.bf16.msra.mxu0 %v5398_v4  ;;  %v230_v16 = vld [vmem:[%s7721_s5] sm:$0xff]  ;;  %92 = vst.msk [vmem:[#allocation14] sm:$0xff] %vm91_vm1, %v90_v15  ;;  %v231_v17 = vld [vmem:[%s7721_s5 + $0x8] sm:$0xff]  ;;  %v232_v18 = vld [vmem:[%s7721_s5 + $0x10] sm:$0xff]  ;;  %v5462_v21 = vpack.c.bf16 %v105_v14, %v104_v11 }
  0x13   :  { %4325 = vmatprep.subr.bf16.mxu0 %v5265_v3  ;;  %v233_v19 = vld [vmem:[%s7721_s5 + $0x18] sm:$0xff]  ;;  %v5459_v20 = vpack.c.bf16 %v231_v17, %v230_v16  ;;  %v106_v22 = vld [vmem:[%s7719_s26 + $0x40] sm:$0xff] }
  0x14   :  { %v5468_v23 = vpack.c.bf16 %v233_v19, %v232_v18 }
  0x15   :  { %4354 = vmatpush1.bf16.msra.mxu1 %v5459_v20 }
  0x16   :  { %4327 = vmatpush1.bf16.msra.mxu0 %v5420_v8 }
  0x17   :  { %4328 = vmatprep.subr.bf16.mxu0 %v5265_v3 }
  0x1a   :  { %4330 = vmatpush1.bf16.msra.mxu0 %v5436_v13 }
  0x1b   :  { %30 = vsyncpa [#allocation26], 0  ;;  %4331 = vmatprep.subr.bf16.mxu0 %v5265_v3  ;;  %v107_v25 = vld [vmem:[%s7719_s26 + $0x48] sm:$0xff]  ;;  %4355 = vmatprep.subr.bf16.mxu1 %v5265_v3  ;;  %v234_v26 = vld [vmem:[%s7721_s5 + $0x20] sm:$0xff]  ;;  %67 = vst.msk [vmem:[#allocation2] sm:$0xff] %vm66_vm0, %v65_v24  ;;  %s7722_s12 = sld [smem:[#allocation37_spill]] }
  0x1c   :  { %v235_v27 = vld [vmem:[%s7721_s5 + $0x28] sm:$0xff]  ;;  %v5488_v29 = vld [vmem:[#allocation5] sm:$0xff]  ;;  %v5491_v30 = vpack.c.bf16 %v107_v25, %v106_v22  ;;  %v96_v31 = vld [vmem:[#allocation14] sm:$0xff]  ;;  %4357 = vmatpush1.bf16.msra.mxu1 %v5468_v23  ;;  %s7723_s25 = sld [smem:[#allocation34_spill]]  ;;  %vm5268_vm4 = vmmov 0   ;;  %vm573_vm6 = vcmask 15360  }
  0x1d   :  { %v4110_v28 = vld [vmem:[%s7720_s0 + $0x8] sm:$0xff]  ;;  %95 = vst.msk [vmem:[#allocation14 + $0x8] sm:$0xff] %vm66_vm0, %v5488_v29  ;;  %v5496_v32 = vpack.c.bf16 %v235_v27, %v234_v26  ;;  %v108_v33 = vld [vmem:[%s7719_s26 + $0x50] sm:$0xff]  ;;  %v109_v34 = vld [vmem:[%s7719_s26 + $0x58] sm:$0xff]  ;;  %4358 = vmatprep.subr.bf16.mxu1 %v5265_v3  ;;  %v201_v57 = vmul.f32 0.0327839, %v5488_v29 }
  0x1e   :  { %4333 = vmatpush1.bf16.msra.mxu0 %v5462_v21  ;;  %580 = vst.msk [vmem:[#allocation14] sm:$0xff] %vm91_vm1, %v4110_v28  ;;  %v236_v35 = vld [vmem:[%s7721_s5 + $0x30] sm:$0xff]  ;;  %v237_v36 = vld [vmem:[%s7721_s5 + $0x38] sm:$0xff]  ;;  %v5514_v37 = vpack.c.bf16 %v109_v34, %v108_v33  ;;  %v110_v38 = vld [vmem:[%s7719_s26 + $0x60] sm:$0xff]  ;;  %v205_v61 = vmul.f32 0.003327784, %v5488_v29 }
  0x1f   :  { %4334 = vmatprep.subr.bf16.mxu0 %v5265_v3  ;;  %v111_v39 = vld [vmem:[%s7719_s26 + $0x68] sm:$0xff]  ;;  %v5525_v40 = vpack.c.bf16 %v237_v36, %v236_v35  ;;  %v238_v41 = vld [vmem:[%s7721_s5 + $0x40] sm:$0xff]  ;;  %v112_v45 = vld [vmem:[%s7719_s26 + $0x70] sm:$0xff]  ;;  %s5270_s3 = smov [#allocation22]  }
  0x20   :  { %4360 = vmatpush1.bf16.msra.mxu1 %v5496_v32  ;;  %v239_v42 = vld [vmem:[%s7721_s5 + $0x48] sm:$0xff]  ;;  %v5534_v44 = vpack.c.bf16 %v111_v39, %v110_v38  ;;  %v113_v46 = vld [vmem:[%s7719_s26 + $0x78] sm:$0xff]  ;;  %v114_v49 = vld [vmem:[%s7719_s26 + $0x80] sm:$0xff]  ;;  %s4040_s28 = sshll.u32 %s5270_s3, 4  ;;  %s4041_s28 = int_to_ptr.vmem [resolvable:$true] %s4040_s28 }
  0x21   :  { %4361 = vmatprep.subr.bf16.mxu1 %v5265_v3  ;;  %v5545_v47 = vpack.c.bf16 %v239_v42, %v238_v41  ;;  %v5549_v48 = vpack.c.bf16 %v113_v46, %v112_v45  ;;  %v115_v50 = vld [vmem:[%s7719_s26 + $0x88] sm:$0xff]  ;;  %v116_v52 = vld [vmem:[%s7719_s26 + $0x90] sm:$0xff]  ;;  %v117_v53 = vld [vmem:[%s7719_s26 + $0x98] sm:$0xff] }
  0x22   :  { %4336 = vmatpush1.bf16.msra.mxu0 %v5491_v30  ;;  %v5561_v51 = vpack.c.bf16 %v115_v50, %v114_v49  ;;  %v5571_v54 = vpack.c.bf16 %v117_v53, %v116_v52  ;;  %v199_v55 = vld [vmem:[#allocation8] sm:$0xff]  ;;  %v203_v58 = vld [vmem:[#allocation9] sm:$0xff]  ;;  %v242_v10 = vld [vmem:[%s7721_s5 + $0x60] sm:$0xff] }
  0x23   :  { %4337 = vmatprep.subr.bf16.mxu0 %v5265_v3  ;;  %v200_v56 = vmul.f32 0.9672161, %v199_v55  ;;  %v204_v60 = vmul.f32 0.9966722, %v203_v58  ;;  %v240_v0 = vld [vmem:[%s7721_s5 + $0x50] sm:$0xff]  ;;  %v241_v1 = vld [vmem:[%s7721_s5 + $0x58] sm:$0xff] }
  0x24   :  { %v97_v43 = vld [vmem:[#allocation14 + $0x8] sm:$0xff]  ;;  %4363 = vmatpush1.bf16.msra.mxu1 %v5525_v40  ;;  %v5585_v2 = vpack.c.bf16 %v241_v1, %v240_v0  ;;  %v74_v12 = vld [vmem:[%s7698_s13] sm:$0xff]  ;;  %v244_v15 = vld [vmem:[%s7721_s5 + $0x70] sm:$0xff]  ;;  %s7724_s13 = sld [smem:[#allocation36_spill]] }
  0x25   :  { %4100 = vmatprep.mubr.msk.f32.mxu0 %vm66_vm0, %v97_v43  ;;  %4364 = vmatprep.subr.bf16.mxu1 %v5265_v3  ;;  %v202_v59 = vadd.f32 %v201_v57, %v200_v56  ;;  %v206_v62 = vadd.f32 %v205_v61, %v204_v60  ;;  %v243_v11 = vld [vmem:[%s7721_s5 + $0x68] sm:$0xff]  ;;  %75 = vst.msk [vmem:[#allocation6] sm:$0xff] %vm66_vm0, %v74_v12  ;;  %v245_v16 = vld [vmem:[%s7721_s5 + $0x78] sm:$0xff]  ;;  %v246_v18 = vld [vmem:[%s7721_s5 + $0x80] sm:$0xff] }
  0x26   :  { %4339 = vmatpush1.bf16.msra.mxu0 %v5514_v37  ;;  %v5601_v14 = vpack.c.bf16 %v243_v11, %v242_v10  ;;  %v5612_v17 = vpack.c.bf16 %v245_v16, %v244_v15  ;;  %v247_v19 = vld [vmem:[%s7721_s5 + $0x88] sm:$0xff]  ;;  %v248_v25 = vld [vmem:[%s7721_s5 + $0x90] sm:$0xff]  ;;  %v249_v26 = vld [vmem:[%s7721_s5 + $0x98] sm:$0xff] }
  0x27   :  { %4340 = vmatprep.subr.bf16.mxu0 %v5265_v3  ;;  %v207_v63 = vmul.f32 1.8, %v202_v59  ;;  %223 = vst.msk [vmem:[#allocation8] sm:$0xff] %vm66_vm0, %v202_v59  ;;  %v209_v7 = vmul.f32 9.0, %v206_v62  ;;  %224 = vst.msk [vmem:[#allocation9] sm:$0xff] %vm66_vm0, %v206_v62  ;;  %v5624_v24 = vpack.c.bf16 %v247_v19, %v246_v18  ;;  %v5635_v27 = vpack.c.bf16 %v249_v26, %v248_v25  ;;  %v363_v33 = vld [vmem:[%s7722_s12 + $0x8] sm:$0xff] }
  0x28   :  { %4366 = vmatpush1.bf16.msra.mxu1 %v5545_v47  ;;  %v364_v34 = vld [vmem:[%s7722_s12 + $0x10] sm:$0xff]  ;;  %v365_v36 = vld [vmem:[%s7722_s12 + $0x18] sm:$0xff]  ;;  %v68_v39 = vld [vmem:[%s7695_s10] sm:$0xff] }
  0x29   :  { %4367 = vmatprep.subr.bf16.mxu1 %v5265_v3  ;;  %v208_v5 = vadd.f32 0.01, %v207_v63  ;;  %v5656_v38 = vpack.c.bf16 %v365_v36, %v364_v34  ;;  %v366_v41 = vld [vmem:[%s7722_s12 + $0x20] sm:$0xff]  ;;  %v367_v42 = vld [vmem:[%s7722_s12 + $0x28] sm:$0xff]  ;;  %69 = vst.msk [vmem:[#allocation3] sm:$0xff] %vm66_vm0, %v68_v39  ;;  %v368_v45 = vld [vmem:[%s7722_s12 + $0x30] sm:$0xff] }
  0x2a   :  { %4342 = vmatpush1.bf16.msra.mxu0 %v5534_v44  ;;  %v5670_v43 = vpack.c.bf16 %v367_v42, %v366_v41  ;;  %v369_v46 = vld [vmem:[%s7722_s12 + $0x38] sm:$0xff]  ;;  %v370_v50 = vld [vmem:[%s7722_s12 + $0x40] sm:$0xff]  ;;  %v371_v52 = vld [vmem:[%s7722_s12 + $0x48] sm:$0xff] }
  0x2b   :  { %4343 = vmatprep.subr.bf16.mxu0 %v5265_v3  ;;  %v5589_v9 = vadd.f32 %v209_v7, %v208_v5  ;;  %v5680_v49 = vpack.c.bf16 %v369_v46, %v368_v45  ;;  %v5690_v53 = vpack.c.bf16 %v371_v52, %v370_v50  ;;  %v5698_v55 = vld [vmem:[%s7723_s25] ss:$0 sm:$0xff]  ;;  %v335_v39 = vld [vmem:[#allocation11] sm:$0xff]  ;;  %v372_v52 = vld [vmem:[%s7722_s12 + $0x50] sm:$0xff] }
  0x2c   :  { %4369 = vmatpush1.bf16.msra.mxu1 %v5585_v2  ;;  %v5622_v22 = vld [vmem:[#allocation6] sm:$0xff]  ;;  %v336_v42 = vmul.f32 0.9966722, %v335_v39 }
  0x2d   :  { %4370 = vmatprep.subr.bf16.mxu1 %v5265_v3  ;;  %227 = vst.msk [vmem:[#allocation15 + $0x8] sm:$0xff] %vm66_vm0, %v5622_v22  ;;  %v211_v56 = vld [vmem:[#allocation2] sm:$0xff]  ;;  %v215_v62 = vmul.f32 %v5589_v9, %v5488_v29  ;;  %v333_v36 = vmul.f32 0.0327839, %v5622_v22  ;;  %v337_v45 = vmul.f32 0.003327784, %v5622_v22 }
  0x2e   :  { %4345 = vmatpush1.bf16.msra.mxu0 %v5549_v48  ;;  %v212_v59 = vmul.f32 0.95122945, %v211_v56  ;;  %v686_v7 = vld [vmem:[#allocation8] sm:$0xff]  ;;  %v690_v10 = vld [vmem:[#allocation9] sm:$0xff] }
  0x2f   :  { %4346 = vmatprep.subr.bf16.mxu0 %v5265_v3  ;;  %v687_v11 = vmul.f32 0.9672161, %v686_v7  ;;  %v691_v12 = vmul.f32 0.9966722, %v690_v10  ;;  %v338_v46 = vadd.f32 %v337_v45, %v336_v42  ;;  %v373_v56 = vld [vmem:[%s7722_s12 + $0x58] sm:$0xff]  ;;  %v378_v10 = vld [vmem:[%s7722_s12 + $0x80] sm:$0xff] }
  0x30   :  { %4372 = vmatpush1.bf16.msra.mxu1 %v5601_v14 }
  0x31   :  { %4373 = vmatprep.subr.bf16.mxu1 %v5265_v3  ;;  %356 = vst.msk [vmem:[#allocation11] sm:$0xff] %vm66_vm0, %v338_v46 }
  0x32   :  { %4348 = vmatpush1.bf16.msra.mxu0 %v5561_v51 }
  0x33   :  { %4349 = vmatprep.subr.bf16.mxu0 %v5265_v3 }
  0x34   :  { %4375 = vmatpush1.bf16.msra.mxu1 %v5612_v17  ;;  %v229_v28 = vld [vmem:[#allocation15 + $0x8] sm:$0xff] }
  0x35   :  { %4376 = vmatprep.subr.bf16.mxu1 %v5265_v3  ;;  %4103 = vmatprep.mubr.msk.f32.mxu1 %vm66_vm0, %v229_v28 }
  0x36   :  { %4351 = vmatpush1.bf16.msra.mxu0 %v5571_v54 }
  0x37   :  { %4382 = vmatprep.subr.bf16.mxu0 %v5265_v3 }
  0x38   :  { %4378 = vmatpush1.bf16.msra.mxu1 %v5624_v24 }
  0x39   :  { %193 = vmatmul.mubr.f32.vlgmr.msra.gmra.mrb[0].mxu0 %v96_v31  ;;  %4379 = vmatprep.subr.bf16.mxu1 %v5265_v3  ;;  %v362_v31 = vld [vmem:[%s7722_s12] sm:$0xff] }
  0x3a   :  { %v5650_v35 = vpack.c.bf16 %v363_v33, %v362_v31  ;;  %v331_v33 = vld [vmem:[#allocation10] sm:$0xff] }
  0x3b   :  { %v332_v34 = vmul.f32 0.9672161, %v331_v33 }
  0x3c   :  { %4381 = vmatpush1.bf16.msra.mxu1 %v5635_v27  ;;  %4384 = vmatpush1.bf16.msra.mxu0 %v5650_v35 }
  0x3d   :  { %4412 = vmatprep.subr.bf16.mxu1 %v5265_v3  ;;  %4385 = vmatprep.subr.bf16.mxu0 %v5265_v3  ;;  %v334_v41 = vadd.f32 %v333_v36, %v332_v34 }
  0x3f   :  { %v339_v50 = vmul.f32 1.8, %v334_v41  ;;  %355 = vst.msk [vmem:[#allocation10] sm:$0xff] %vm66_vm0, %v334_v41 }
  0x40   :  { %4387 = vmatpush1.bf16.msra.mxu0 %v5656_v38 }
  0x41   :  { %4388 = vmatprep.subr.bf16.mxu0 %v5265_v3 }
  0x44   :  { %4390 = vmatpush1.bf16.msra.mxu0 %v5670_v43 }
  0x45   :  { %4391 = vmatprep.subr.bf16.mxu0 %v5265_v3 }
  0x48   :  { %4393 = vmatpush1.bf16.msra.mxu0 %v5680_v49 }
  0x49   :  { %4394 = vmatprep.subr.bf16.mxu0 %v5265_v3 }
  0x4c   :  { %4396 = vmatpush1.bf16.msra.mxu0 %v5690_v53 }
  0x4d   :  { %4397 = vmatprep.subr.bf16.mxu0 %v5265_v3 }
 0x10c   :  { %v194_v57 = vpop.f32.mrb[0].mxu0 }
 0x10d   :  { %v195_v58 = vadd.f32 %v5698_v55, %v194_v57  ;;  %v196_v60 = vpop.f32.mrb[1].mxu0  ;;  %v5727_v57 = vpack.c.bf16 %v373_v56, %v372_v52  ;;  %v818_v56 = vld [vmem:[#allocation10] sm:$0xff] }
 0x10f   :  { %v213_v61 = vmul.f32 0.048770577, %v195_v58  ;;  %v340_v58 = vadd.f32 0.01, %v339_v50  ;;  %4399 = vmatpush1.bf16.msra.mxu0 %v5727_v57 }
 0x110   :  { %4400 = vmatprep.subr.bf16.mxu0 %v5265_v3 }
 0x111   :  { %v214_v63 = vadd.f32 %v213_v61, %v212_v59  ;;  %v341_v59 = vmul.f32 9.0, %v338_v46  ;;  %v374_v61 = vld [vmem:[%s7722_s12 + $0x60] sm:$0xff] }
 0x113   :  { %v216_v0 = vsub.f32 %v214_v63, %v215_v62  ;;  %v342_v60 = vadd.f32 %v341_v59, %v340_v58  ;;  %v375_v62 = vld [vmem:[%s7722_s12 + $0x68] sm:$0xff]  ;;  %v76_v63 = vld [vmem:[%s7699_s14] sm:$0xff]  ;;  %v819_v59 = vmul.f32 0.9672161, %v818_v56 }
 0x114   :  { %77 = vst.msk [vmem:[#allocation7] sm:$0xff] %vm66_vm0, %v76_v63  ;;  %v822_v58 = vld [vmem:[#allocation11] sm:$0xff] }
 0x115   :  { %v217_v1 = vsub.f32 %v216_v0, %v5589_v9  ;;  %221 = vst.msk [vmem:[#allocation2] sm:$0xff] %vm66_vm0, %v216_v0  ;;  %v5741_v0 = vpack.c.bf16 %v375_v62, %v374_v61  ;;  %v347_v42 = vmul.f32 %v342_v60, %v5622_v22  ;;  %v823_v61 = vmul.f32 0.9966722, %v822_v58 }
 0x117   :  { %vm218_vm2 = vcmp.gt.f32.partialorder %v217_v1, 0.0  ;;  %4402 = vmatpush1.bf16.msra.mxu0 %v5741_v0  ;;  %v376_v1 = vld [vmem:[%s7722_s12 + $0x70] sm:$0xff] }
 0x118   :  { %v4101_v5 = vsel %vm218_vm2, 1.0, %v5266_v6  ;;  %4403 = vmatprep.subr.bf16.mxu0 %v5265_v3 }
 0x119   :  { %222 = vst.msk [vmem:[#allocation5] sm:$0xff] %vm66_vm0, %v4101_v5  ;;  %225 = vst.msk [vmem:[#allocation15] sm:$0xff] %vm66_vm0, %v4101_v5  ;;  %v377_v5 = vld [vmem:[%s7722_s12 + $0x78] sm:$0xff] }
 0x11a   :  { %v5752_v7 = vpack.c.bf16 %v377_v5, %v376_v1 }
 0x11c   :  { %4405 = vmatpush1.bf16.msra.mxu0 %v5752_v7 }
 0x11d   :  { %4406 = vmatprep.subr.bf16.mxu0 %v5265_v3 }
 0x120   :  { %v228_v15 = vld [vmem:[#allocation15] sm:$0xff]  ;;  %v5708_v16 = vld [vmem:[#allocation5] sm:$0xff] }
 0x121   :  { %325 = vmatmul.mubr.f32.vlgmr.msra.gmra.mrb[0].mxu1 %v228_v15  ;;  %582 = vst.msk [vmem:[#allocation14 + $0x8] sm:$0xff] %vm66_vm0, %v5708_v16  ;;  %v688_v29 = vmul.f32 0.0327839, %v5708_v16  ;;  %v692_v9 = vmul.f32 0.003327784, %v5708_v16 }
 0x122   :  { %4242 = vmatprep.mubr.msk.f32.mxu1 %vm5268_vm4, %v5266_v6 }
 0x123   :  { %v689_v18 = vadd.f32 %v688_v29, %v687_v11  ;;  %v693_v19 = vadd.f32 %v692_v9, %v691_v12  ;;  %v379_v11 = vld [vmem:[%s7722_s12 + $0x88] sm:$0xff]  ;;  %v380_v29 = vld [vmem:[%s7722_s12 + $0x90] sm:$0xff]  ;;  %v381_v9 = vld [vmem:[%s7722_s12 + $0x98] sm:$0xff] }
 0x124   :  { %v5762_v12 = vld [vmem:[#allocation7] sm:$0xff]  ;;  %v5764_v15 = vpack.c.bf16 %v379_v11, %v378_v10 }
 0x125   :  { %v694_v25 = vmul.f32 1.8, %v689_v18  ;;  %710 = vst.msk [vmem:[#allocation8] sm:$0xff] %vm66_vm0, %v689_v18  ;;  %711 = vst.msk [vmem:[#allocation9] sm:$0xff] %vm66_vm0, %v693_v19  ;;  %v696_v28 = vmul.f32 9.0, %v693_v19  ;;  %v5775_v18 = vpack.c.bf16 %v381_v9, %v380_v29 }
 0x126   :  { %359 = vst.msk [vmem:[#allocation16 + $0x8] sm:$0xff] %vm66_vm0, %v5762_v12  ;;  %4408 = vmatpush1.bf16.msra.mxu0 %v5764_v15 }
 0x127   :  { %v695_v26 = vadd.f32 0.01, %v694_v25  ;;  %4409 = vmatprep.subr.bf16.mxu0 %v5265_v3  ;;  %v70_v25 = vld [vmem:[%s7696_s11] sm:$0xff] }
 0x128   :  { %71 = vst.msk [vmem:[#allocation4] sm:$0xff] %vm66_vm0, %v70_v25 }
 0x129   :  { %v5716_v31 = vadd.f32 %v696_v28, %v695_v26  ;;  %v5788_v26 = vld [vmem:[%s7724_s13] ss:$0 sm:$0xff]  ;;  %v343_v28 = vld [vmem:[#allocation3] sm:$0xff] }
 0x12a   :  { %4411 = vmatpush1.bf16.msra.mxu0 %v5775_v18  ;;  %v344_v36 = vmul.f32 0.95122945, %v343_v28 }
 0x12b   :  { %4448 = vmatprep.subr.bf16.mxu0 %v5265_v3 }
 0x12d   :  { %v361_v19 = vld [vmem:[#allocation16 + $0x8] sm:$0xff] }
 0x12e   :  { %4106 = vmatprep.mubr.msk.f32.mxu0 %vm66_vm0, %v361_v19 }
 0x1f4   :  { %v326_v33 = vpop.f32.mrb[0].mxu1 }
 0x1f5   :  { %v327_v34 = vadd.f32 %v5788_v26, %v326_v33  ;;  %v328_v39 = vpop.f32.mrb[1].mxu1 }
 0x1f6   :  { %v492_v39 = vld [vmem:[%s7692_s7 + $0x18] sm:$0xff] }
 0x1f7   :  { %v345_v41 = vmul.f32 0.048770577, %v327_v34 }
 0x1f9   :  { %v346_v45 = vadd.f32 %v345_v41, %v344_v36  ;;  %v491_v36 = vld [vmem:[%s7692_s7 + $0x10] sm:$0xff] }
 0x1fb   :  { %v348_v46 = vsub.f32 %v346_v45, %v347_v42  ;;  %v5847_v42 = vpack.c.bf16 %v492_v39, %v491_v36  ;;  %v583_v45 = vld [vmem:[#allocation14] sm:$0xff] }
 0x1fd   :  { %v349_v50 = vsub.f32 %v348_v46, %v342_v60  ;;  %353 = vst.msk [vmem:[#allocation3] sm:$0xff] %vm66_vm0, %v348_v46  ;;  %v4122_v46 = vld [vmem:[%s7720_s0 + $0x10] sm:$0xff] }
 0x1fe   :  { %1067 = vst.msk [vmem:[#allocation14] sm:$0xff] %vm91_vm1, %v4122_v46 }
 0x1ff   :  { %vm350_vm3 = vcmp.gt.f32.partialorder %v349_v50, 0.0  ;;  %v5861_v50 = vld [vmem:[%s7691_s6] ss:$0 sm:$0xff] }
 0x200   :  { %v4104_v52 = vsel %vm350_vm3, 1.0, %v5266_v6 }
 0x201   :  { %354 = vst.msk [vmem:[#allocation6] sm:$0xff] %vm66_vm0, %v4104_v52  ;;  %357 = vst.msk [vmem:[#allocation16] sm:$0xff] %vm66_vm0, %v4104_v52  ;;  %v475_v52 = vld [vmem:[#allocation4] sm:$0xff] }
 0x204   :  { %v830_v46 = vld [vmem:[#allocation3] sm:$0xff] }
 0x208   :  { %v360_v62 = vld [vmem:[#allocation16] sm:$0xff] }
 0x209   :  { %v5796_v63 = vld [vmem:[#allocation6] sm:$0xff]  ;;  %457 = vmatmul.mubr.f32.vlgmr.msra.gmra.mrb[2].mxu0 %v360_v62 }
 0x20a   :  { %714 = vst.msk [vmem:[#allocation15 + $0x8] sm:$0xff] %vm66_vm0, %v5796_v63  ;;  %v820_v22 = vmul.f32 0.0327839, %v5796_v63  ;;  %v824_v60 = vmul.f32 0.003327784, %v5796_v63  ;;  %4450 = vmatpush1.bf16.msra.mxu0 %v5459_v20  ;;  %v463_v20 = vld [vmem:[#allocation12] sm:$0xff] }
 0x20b   :  { %4451 = vmatprep.subr.bf16.mxu0 %v5265_v3 }
 0x20c   :  { %v821_v1 = vadd.f32 %v820_v22, %v819_v59  ;;  %v825_v5 = vadd.f32 %v824_v60, %v823_v61  ;;  %v476_v59 = vmul.f32 0.95122945, %v475_v52 }
 0x20e   :  { %v826_v10 = vmul.f32 1.8, %v821_v1  ;;  %842 = vst.msk [vmem:[#allocation10] sm:$0xff] %vm66_vm0, %v821_v1  ;;  %843 = vst.msk [vmem:[#allocation11] sm:$0xff] %vm66_vm0, %v825_v5  ;;  %4453 = vmatpush1.bf16.msra.mxu0 %v5468_v23  ;;  %v828_v29 = vmul.f32 9.0, %v825_v5 }
 0x20f   :  { %4454 = vmatprep.subr.bf16.mxu0 %v5265_v3  ;;  %v464_v23 = vmul.f32 0.9672161, %v463_v20 }
 0x210   :  { %v827_v11 = vadd.f32 0.01, %v826_v10  ;;  %v584_v10 = vld [vmem:[#allocation14 + $0x8] sm:$0xff] }
 0x211   :  { %v716_v9 = vld [vmem:[#allocation15 + $0x8] sm:$0xff] }
 0x212   :  { %4115 = vmatprep.mubr.msk.f32.mxu0 %vm66_vm0, %v716_v9  ;;  %v5809_v19 = vadd.f32 %v828_v29, %v827_v11  ;;  %4456 = vmatpush1.bf16.msra.mxu0 %v5496_v32  ;;  %v465_v32 = vmul.f32 0.0327839, %v5762_v12 }
 0x213   :  { %4457 = vmatprep.subr.bf16.mxu0 %v5265_v3 }
 0x216   :  { %4459 = vmatpush1.bf16.msra.mxu0 %v5525_v40  ;;  %v467_v40 = vld [vmem:[#allocation13] sm:$0xff] }
 0x217   :  { %4460 = vmatprep.subr.bf16.mxu0 %v5265_v3 }
 0x21a   :  { %4462 = vmatpush1.bf16.msra.mxu0 %v5545_v47  ;;  %v466_v47 = vadd.f32 %v465_v32, %v464_v23 }
 0x21b   :  { %4463 = vmatprep.subr.bf16.mxu0 %v5265_v3 }
 0x21c   :  { %v471_v25 = vmul.f32 1.8, %v466_v47  ;;  %487 = vst.msk [vmem:[#allocation12] sm:$0xff] %vm66_vm0, %v466_v47 }
 0x21e   :  { %4465 = vmatpush1.bf16.msra.mxu0 %v5585_v2  ;;  %v468_v2 = vmul.f32 0.9966722, %v467_v40  ;;  %v472_v33 = vadd.f32 0.01, %v471_v25 }
 0x21f   :  { %4466 = vmatprep.subr.bf16.mxu0 %v5265_v3 }
 0x222   :  { %4468 = vmatpush1.bf16.msra.mxu0 %v5601_v14  ;;  %v469_v14 = vmul.f32 0.003327784, %v5762_v12 }
 0x223   :  { %4469 = vmatprep.subr.bf16.mxu0 %v5265_v3 }
 0x226   :  { %4471 = vmatpush1.bf16.msra.mxu0 %v5612_v17  ;;  %v489_v17 = vld [vmem:[%s7692_s7] sm:$0xff] }
 0x227   :  { %4472 = vmatprep.subr.bf16.mxu0 %v5265_v3 }
 0x22a   :  { %4474 = vmatpush1.bf16.msra.mxu0 %v5624_v24  ;;  %v490_v24 = vld [vmem:[%s7692_s7 + $0x8] sm:$0xff] }
 0x22b   :  { %4475 = vmatprep.subr.bf16.mxu0 %v5265_v3  ;;  %v5836_v28 = vpack.c.bf16 %v490_v24, %v489_v17 }
 0x22d   :  { %4414 = vmatpush3.bf16.msra.mxu1 %v5836_v28 }
 0x22e   :  { %4477 = vmatpush1.bf16.msra.mxu0 %v5635_v27  ;;  %v470_v27 = vadd.f32 %v469_v14, %v468_v2  ;;  %4415 = vmatprep.subr.bf16.mxu1 %v5265_v3 }
 0x22f   :  { %4508 = vmatprep.subr.bf16.mxu0 %v5265_v3 }
 0x230   :  { %v473_v34 = vmul.f32 9.0, %v470_v27  ;;  %488 = vst.msk [vmem:[#allocation13] sm:$0xff] %vm66_vm0, %v470_v27 }
 0x231   :  { %4417 = vmatpush3.bf16.msra.mxu1 %v5847_v42 }
 0x232   :  { %v474_v41 = vadd.f32 %v473_v34, %v472_v33  ;;  %4418 = vmatprep.subr.bf16.mxu1 %v5265_v3 }
 0x234   :  { %577 = vst.msk [vmem:[#allocation17 + $0x18] sm:$0xff] %vm66_vm0, %v474_v41  ;;  %v479_v22 = vmul.f32 %v474_v41, %v5762_v12  ;;  %v950_v12 = vld [vmem:[#allocation12] sm:$0xff] }
 0x237   :  { %v954_v29 = vld [vmem:[#allocation13] sm:$0xff] }
 0x238   :  { %v955_v9 = vmul.f32 0.9966722, %v954_v29 }
 0x2dc   :  { %v458_v56 = vpop.f32.mrb[2].mxu0 }
 0x2dd   :  { %v459_v58 = vadd.f32 %v5861_v50, %v458_v56  ;;  %v460_v61 = vpop.f32.mrb[3].mxu0 }
 0x2df   :  { %v477_v62 = vmul.f32 0.048770577, %v459_v58  ;;  %v831_v58 = vmul.f32 0.95122945, %v830_v46 }
 0x2e1   :  { %v478_v60 = vadd.f32 %v477_v62, %v476_v59  ;;  %v834_v62 = vmul.f32 %v5809_v19, %v5796_v63 }
 0x2e3   :  { %v480_v1 = vsub.f32 %v478_v60, %v479_v22 }
 0x2e5   :  { %v481_v5 = vsub.f32 %v480_v1, %v474_v41  ;;  %485 = vst.msk [vmem:[#allocation4] sm:$0xff] %vm66_vm0, %v480_v1  ;;  %576 = vst.msk [vmem:[#allocation17 + $0x10] sm:$0xff] %vm66_vm0, %v480_v1  ;;  %4243 = vmatmul.mubr.msk.f32.vlgmr.msra.gmra.mrb[2].mxu1 %vm66_vm0, %v480_v1  ;;  %v1309_v1 = vld [vmem:[#allocation11] sm:$0xff] }
 0x2e6   :  { %4420 = vmatpush1.bf16.msra.mxu1 %v5398_v4  ;;  %4112 = vmatprep.mubr.msk.f32.mxu1 %vm66_vm0, %v584_v10  ;;  %v951_v4 = vmul.f32 0.9672161, %v950_v12 }
 0x2e7   :  { %vm482_vm5 = vcmp.gt.f32.partialorder %v481_v5, 0.0  ;;  %4421 = vmatprep.subr.bf16.mxu1 %v5265_v3 }
 0x2e8   :  { %v4107_v11 = vsel %vm482_vm5, 1.0, %v5266_v6 }
 0x2e9   :  { %486 = vst.msk [vmem:[#allocation7] sm:$0xff] %vm66_vm0, %v4107_v11  ;;  %575 = vst.msk [vmem:[#allocation17 + $0x8] sm:$0xff] %vm66_vm0, %v4107_v11 }
 0x2ea   :  { %4423 = vmatpush1.bf16.msra.mxu1 %v5420_v8 }
 0x2eb   :  { %4424 = vmatprep.subr.bf16.mxu1 %v5265_v3 }
 0x2ee   :  { %4426 = vmatpush1.bf16.msra.mxu1 %v5436_v13 }
 0x2ef   :  { %4427 = vmatprep.subr.bf16.mxu1 %v5265_v3 }
 0x2f0   :  { %v5878_v20 = vld [vmem:[#allocation7] sm:$0xff] }
 0x2f1   :  { %846 = vst.msk [vmem:[#allocation16 + $0x8] sm:$0xff] %vm66_vm0, %v5878_v20  ;;  %v952_v23 = vmul.f32 0.0327839, %v5878_v20  ;;  %v956_v32 = vmul.f32 0.003327784, %v5878_v20 }
 0x2f2   :  { %4429 = vmatpush1.bf16.msra.mxu1 %v5462_v21 }
 0x2f3   :  { %4430 = vmatprep.subr.bf16.mxu1 %v5265_v3  ;;  %v953_v8 = vadd.f32 %v952_v23, %v951_v4  ;;  %v957_v40 = vadd.f32 %v956_v32, %v955_v9 }
 0x2f5   :  { %v958_v13 = vmul.f32 1.8, %v953_v8  ;;  %974 = vst.msk [vmem:[#allocation12] sm:$0xff] %vm66_vm0, %v953_v8  ;;  %975 = vst.msk [vmem:[#allocation13] sm:$0xff] %vm66_vm0, %v957_v40  ;;  %v960_v2 = vmul.f32 9.0, %v957_v40 }
 0x2f6   :  { %4432 = vmatpush1.bf16.msra.mxu1 %v5491_v30  ;;  %v5928_v30 = vld [vmem:[%s7693_s8] ss:$0 sm:$0xff] }
 0x2f7   :  { %4433 = vmatprep.subr.bf16.mxu1 %v5265_v3  ;;  %v959_v47 = vadd.f32 0.01, %v958_v13  ;;  %v5975_v13 = vld [vmem:[#allocation14] sm:$0xff] }
 0x2f8   :  { %v848_v21 = vld [vmem:[#allocation16 + $0x8] sm:$0xff] }
 0x2f9   :  { %v5890_v14 = vadd.f32 %v960_v2, %v959_v47  ;;  %v4134_v47 = vld [vmem:[%s7720_s0 + $0x18] sm:$0xff] }
 0x2fa   :  { %4435 = vmatpush1.bf16.msra.mxu1 %v5514_v37  ;;  %1554 = vst.msk [vmem:[#allocation14] sm:$0xff] %vm91_vm1, %v4134_v47 }
 0x2fb   :  { %4436 = vmatprep.subr.bf16.mxu1 %v5265_v3  ;;  %1064 = vst.msk [vmem:[#allocation17 + $0x38] sm:$0xff] %vm66_vm0, %v5890_v14 }
 0x2fe   :  { %4438 = vmatpush1.bf16.msra.mxu1 %v5534_v44 }
 0x2ff   :  { %4439 = vmatprep.subr.bf16.mxu1 %v5265_v3 }
 0x302   :  { %4441 = vmatpush1.bf16.msra.mxu1 %v5549_v48 }
 0x303   :  { %4442 = vmatprep.subr.bf16.mxu1 %v5265_v3 }
 0x306   :  { %4444 = vmatpush1.bf16.msra.mxu1 %v5561_v51 }
 0x307   :  { %4445 = vmatprep.subr.bf16.mxu1 %v5265_v3 }
 0x30a   :  { %4447 = vmatpush1.bf16.msra.mxu1 %v5571_v54  ;;  %v698_v54 = vld [vmem:[#allocation2] sm:$0xff] }
 0x30b   :  { %4478 = vmatprep.subr.bf16.mxu1 %v5265_v3 }
 0x30d   :  { %680 = vmatmul.mubr.f32.vlgmr.msra.gmra.mrb[4].mxu1 %v583_v45 }
 0x30e   :  { %4118 = vmatprep.mubr.msk.f32.mxu1 %vm66_vm0, %v848_v21  ;;  %4480 = vmatpush1.bf16.msra.mxu1 %v5650_v35  ;;  %v962_v21 = vld [vmem:[#allocation4] sm:$0xff] }
 0x30f   :  { %4481 = vmatprep.subr.bf16.mxu1 %v5265_v3 }
 0x312   :  { %4483 = vmatpush1.bf16.msra.mxu1 %v5656_v38 }
 0x313   :  { %4484 = vmatprep.subr.bf16.mxu1 %v5265_v3 }
 0x316   :  { %4486 = vmatpush1.bf16.msra.mxu1 %v5670_v43  ;;  %v699_v43 = vmul.f32 0.95122945, %v698_v54  ;;  %v1072_v54 = vld [vmem:[%s7719_s26] sm:$0xff] }
 0x317   :  { %4487 = vmatprep.subr.bf16.mxu1 %v5265_v3 }
 0x31a   :  { %4489 = vmatpush1.bf16.msra.mxu1 %v5680_v49 }
 0x31b   :  { %4490 = vmatprep.subr.bf16.mxu1 %v5265_v3 }
 0x31e   :  { %4492 = vmatpush1.bf16.msra.mxu1 %v5690_v53 }
 0x31f   :  { %4493 = vmatprep.subr.bf16.mxu1 %v5265_v3 }
 0x322   :  { %4495 = vmatpush1.bf16.msra.mxu1 %v5727_v57  ;;  %v702_v57 = vmul.f32 %v5716_v31, %v5708_v16 }
 0x323   :  { %4496 = vmatprep.subr.bf16.mxu1 %v5265_v3 }
 0x326   :  { %4498 = vmatpush1.bf16.msra.mxu1 %v5741_v0 }
 0x327   :  { %4499 = vmatprep.subr.bf16.mxu1 %v5265_v3 }
 0x32a   :  { %4501 = vmatpush1.bf16.msra.mxu1 %v5752_v7 }
 0x32b   :  { %4502 = vmatprep.subr.bf16.mxu1 %v5265_v3 }
 0x32e   :  { %4504 = vmatpush1.bf16.msra.mxu1 %v5764_v15 }
 0x32f   :  { %4505 = vmatprep.subr.bf16.mxu1 %v5265_v3 }
 0x332   :  { %4507 = vmatpush1.bf16.msra.mxu1 %v5775_v18  ;;  %v1177_v18 = vld [vmem:[#allocation9] sm:$0xff] }
 0x333   :  { %4544 = vmatprep.subr.bf16.mxu1 %v5265_v3 }
 0x3b8   :  { %v569_v37 = vpop.f32.mrb[2].mxu1 }
 0x3b9   :  { %v570_v44 = vadd.f32 %v5928_v30, %v569_v37  ;;  %v4244_v48 = vpop.f32.mrb[3].mxu1 }
 0x3ba   :  { %v963_v48 = vmul.f32 0.95122945, %v962_v21  ;;  %v1205_v21 = vld [vmem:[%s7721_s5 + $0x8] sm:$0xff] }
 0x3bb   :  { %574 = vst.msk [vmem:[#allocation17] sm:$0xff] %vm573_vm6, %v570_v44 }
 0x3e0   :  { %v681_v51 = vpop.f32.mrb[4].mxu1 }
 0x3e1   :  { %v682_v35 = vadd.f32 %v5698_v55, %v681_v51  ;;  %v683_v38 = vpop.f32.mrb[5].mxu1  ;;  %v1173_v55 = vld [vmem:[#allocation8] sm:$0xff] }
 0x3e2   :  { %v1174_v27 = vmul.f32 0.9672161, %v1173_v55 }
 0x3e3   :  { %v700_v49 = vmul.f32 0.048770577, %v682_v35  ;;  %v1073_v35 = vld [vmem:[%s7719_s26 + $0x8] sm:$0xff] }
 0x3e5   :  { %v701_v53 = vadd.f32 %v700_v49, %v699_v43  ;;  %v966_v43 = vmul.f32 %v5890_v14, %v5878_v20  ;;  %v5990_v49 = vpack.c.bf16 %v1073_v35, %v1072_v54  ;;  %v1209_v54 = vld [vmem:[%s7721_s5 + $0x28] sm:$0xff] }
 0x3e7   :  { %v703_v0 = vsub.f32 %v701_v53, %v702_v57  ;;  %v1075_v57 = vld [vmem:[%s7719_s26 + $0x18] sm:$0xff] }
 0x3e9   :  { %v704_v7 = vsub.f32 %v703_v0, %v5716_v31  ;;  %708 = vst.msk [vmem:[#allocation2] sm:$0xff] %vm66_vm0, %v703_v0  ;;  %v1178_v31 = vmul.f32 0.9966722, %v1177_v18 }
 0x3eb   :  { %vm705_vm7 = vcmp.gt.f32.partialorder %v704_v7, 0.0 }
 0x3ec   :  { %v4113_v15 = vsel %vm705_vm7, 1.0, %v5266_v6 }
 0x3ed   :  { %709 = vst.msk [vmem:[#allocation5] sm:$0xff] %vm66_vm0, %v4113_v15  ;;  %712 = vst.msk [vmem:[#allocation15] sm:$0xff] %vm66_vm0, %v4113_v15  ;;  %v1077_v15 = vld [vmem:[%s7719_s26 + $0x28] sm:$0xff] }
 0x3f4   :  { %v715_v17 = vld [vmem:[#allocation15] sm:$0xff]  ;;  %v5940_v24 = vld [vmem:[#allocation5] sm:$0xff] }
 0x3f5   :  { %812 = vmatmul.mubr.f32.vlgmr.msra.gmra.mrb[4].mxu0 %v715_v17  ;;  %1069 = vst.msk [vmem:[#allocation14 + $0x8] sm:$0xff] %vm66_vm0, %v5940_v24  ;;  %v1175_v16 = vmul.f32 0.0327839, %v5940_v24  ;;  %v1179_v25 = vmul.f32 0.003327784, %v5940_v24  ;;  %v1078_v17 = vld [vmem:[%s7719_s26 + $0x30] sm:$0xff] }
 0x3f6   :  { %4510 = vmatpush3.bf16.msra.mxu0 %v5836_v28  ;;  %4253 = vmatprep.mubr.msk.f32.mxu0 %vm5268_vm4, %v5266_v6 }
 0x3f7   :  { %4511 = vmatprep.subr.bf16.mxu0 %v5265_v3  ;;  %v1176_v33 = vadd.f32 %v1175_v16, %v1174_v27  ;;  %v1180_v34 = vadd.f32 %v1179_v25, %v1178_v31  ;;  %v1079_v27 = vld [vmem:[%s7719_s26 + $0x38] sm:$0xff]  ;;  %v1437_v16 = vld [vmem:[#allocation12] sm:$0xff] }
 0x3f8   :  { %v6027_v31 = vpack.c.bf16 %v1079_v27, %v1078_v17  ;;  %v1441_v25 = vld [vmem:[#allocation13] sm:$0xff]  ;;  %v1217_v17 = vld [vmem:[%s7721_s5 + $0x68] sm:$0xff] }
 0x3f9   :  { %v1181_v36 = vmul.f32 1.8, %v1176_v33  ;;  %1197 = vst.msk [vmem:[#allocation8] sm:$0xff] %vm66_vm0, %v1176_v33  ;;  %1198 = vst.msk [vmem:[#allocation9] sm:$0xff] %vm66_vm0, %v1180_v34  ;;  %v1183_v41 = vmul.f32 9.0, %v1180_v34  ;;  %v1080_v33 = vld [vmem:[%s7719_s26 + $0x40] sm:$0xff] }
 0x3fa   :  { %4513 = vmatpush3.bf16.msra.mxu0 %v5847_v42  ;;  %v1081_v34 = vld [vmem:[%s7719_s26 + $0x48] sm:$0xff] }
 0x3fb   :  { %4514 = vmatprep.subr.bf16.mxu0 %v5265_v3  ;;  %v1182_v39 = vadd.f32 0.01, %v1181_v36 }
 0x3fc   :  { %v1071_v20 = vld [vmem:[#allocation14 + $0x8] sm:$0xff] }
 0x3fd   :  { %v5954_v45 = vadd.f32 %v1183_v41, %v1182_v39  ;;  %v1438_v39 = vmul.f32 0.9672161, %v1437_v16  ;;  %v1218_v16 = vld [vmem:[%s7721_s5 + $0x70] sm:$0xff] }
 0x4c8   :  { %v813_v28 = vpop.f32.mrb[4].mxu0 }
 0x4c9   :  { %v814_v52 = vadd.f32 %v5788_v26, %v813_v28  ;;  %v815_v56 = vpop.f32.mrb[5].mxu0  ;;  %v1305_v26 = vld [vmem:[#allocation10] sm:$0xff]  ;;  %v1442_v28 = vmul.f32 0.9966722, %v1441_v25  ;;  %v1219_v25 = vld [vmem:[%s7721_s5 + $0x78] sm:$0xff] }
 0x4ca   :  { %v1306_v11 = vmul.f32 0.9672161, %v1305_v26  ;;  %v1082_v56 = vld [vmem:[%s7719_s26 + $0x50] sm:$0xff] }
 0x4cb   :  { %v832_v59 = vmul.f32 0.048770577, %v814_v52  ;;  %v6043_v52 = vpack.c.bf16 %v1081_v34, %v1080_v33  ;;  %v6182_v33 = vpack.c.bf16 %v1219_v25, %v1218_v16  ;;  %v1220_v34 = vld [vmem:[%s7721_s5 + $0x80] sm:$0xff]  ;;  %v1660_v16 = vld [vmem:[#allocation8] sm:$0xff]  ;;  %v1664_v25 = vld [vmem:[#allocation9] sm:$0xff] }
 0x4cd   :  { %v833_v61 = vadd.f32 %v832_v59, %v831_v58  ;;  %v1083_v58 = vld [vmem:[%s7719_s26 + $0x58] sm:$0xff] }
 0x4cf   :  { %v835_v22 = vsub.f32 %v833_v61, %v834_v62 }
 0x4d1   :  { %v836_v42 = vsub.f32 %v835_v22, %v5809_v19  ;;  %840 = vst.msk [vmem:[#allocation3] sm:$0xff] %vm66_vm0, %v835_v22  ;;  %v1310_v19 = vmul.f32 0.9966722, %v1309_v1  ;;  %v6055_v22 = vpack.c.bf16 %v1083_v58, %v1082_v56  ;;  %v1336_v58 = vld [vmem:[%s7722_s12] sm:$0xff] }
 0x4d3   :  { %vm837_vm8 = vcmp.gt.f32.partialorder %v836_v42, 0.0  ;;  %v1084_v42 = vld [vmem:[%s7719_s26 + $0x60] sm:$0xff] }
 0x4d4   :  { %v4116_v60 = vsel %vm837_vm8, 1.0, %v5266_v6 }
 0x4d5   :  { %841 = vst.msk [vmem:[#allocation6] sm:$0xff] %vm66_vm0, %v4116_v60  ;;  %844 = vst.msk [vmem:[#allocation16] sm:$0xff] %vm66_vm0, %v4116_v60  ;;  %v1085_v60 = vld [vmem:[%s7719_s26 + $0x68] sm:$0xff] }
 0x4dc   :  { %v847_v5 = vld [vmem:[#allocation16] sm:$0xff] }
 0x4dd   :  { %v5964_v10 = vld [vmem:[#allocation6] sm:$0xff]  ;;  %944 = vmatmul.mubr.f32.vlgmr.msra.gmra.mrb[6].mxu1 %v847_v5 }
 0x4de   :  { %1201 = vst.msk [vmem:[#allocation15 + $0x8] sm:$0xff] %vm66_vm0, %v5964_v10  ;;  %v1307_v63 = vmul.f32 0.0327839, %v5964_v10  ;;  %v1311_v12 = vmul.f32 0.003327784, %v5964_v10 }
 0x4e0   :  { %v1308_v29 = vadd.f32 %v1307_v63, %v1306_v11  ;;  %v1312_v4 = vadd.f32 %v1311_v12, %v1310_v19  ;;  %v6067_v11 = vpack.c.bf16 %v1085_v60, %v1084_v42  ;;  %v1086_v63 = vld [vmem:[%s7719_s26 + $0x70] sm:$0xff]  ;;  %v1087_v19 = vld [vmem:[%s7719_s26 + $0x78] sm:$0xff] }
 0x4e1   :  { %v6079_v12 = vpack.c.bf16 %v1087_v19, %v1086_v63  ;;  %v1339_v42 = vld [vmem:[%s7722_s12 + $0x18] sm:$0xff]  ;;  %v1342_v19 = vld [vmem:[%s7722_s12 + $0x30] sm:$0xff] }
 0x4e2   :  { %v1313_v9 = vmul.f32 1.8, %v1308_v29  ;;  %1329 = vst.msk [vmem:[#allocation10] sm:$0xff] %vm66_vm0, %v1308_v29  ;;  %1330 = vst.msk [vmem:[#allocation11] sm:$0xff] %vm66_vm0, %v1312_v4  ;;  %v1315_v32 = vmul.f32 9.0, %v1312_v4  ;;  %v1088_v29 = vld [vmem:[%s7719_s26 + $0x80] sm:$0xff] }
 0x4e3   :  { %v1089_v4 = vld [vmem:[%s7719_s26 + $0x88] sm:$0xff] }
 0x4e4   :  { %v1314_v23 = vadd.f32 0.01, %v1313_v9  ;;  %v6089_v9 = vpack.c.bf16 %v1089_v4, %v1088_v29  ;;  %v1343_v29 = vld [vmem:[%s7722_s12 + $0x38] sm:$0xff] }
 0x4e5   :  { %v1203_v8 = vld [vmem:[#allocation15 + $0x8] sm:$0xff]  ;;  %v6241_v4 = vpack.c.bf16 %v1343_v29, %v1342_v19  ;;  %v1346_v19 = vld [vmem:[%s7722_s12 + $0x50] sm:$0xff] }
 0x4e6   :  { %4127 = vmatprep.mubr.msk.f32.mxu1 %vm66_vm0, %v1203_v8  ;;  %v5973_v40 = vadd.f32 %v1315_v32, %v1314_v23  ;;  %v1090_v23 = vld [vmem:[%s7719_s26 + $0x90] sm:$0xff]  ;;  %v1091_v32 = vld [vmem:[%s7719_s26 + $0x98] sm:$0xff] }
 0x4e7   :  { %v6099_v8 = vpack.c.bf16 %v1091_v32, %v1090_v23  ;;  %v1344_v23 = vld [vmem:[%s7722_s12 + $0x40] sm:$0xff]  ;;  %v1345_v32 = vld [vmem:[%s7722_s12 + $0x48] sm:$0xff]  ;;  %v1347_v29 = vld [vmem:[%s7722_s12 + $0x58] sm:$0xff] }
 0x5b0   :  { %v945_v2 = vpop.f32.mrb[6].mxu1 }
 0x5b1   :  { %v946_v37 = vadd.f32 %v5861_v50, %v945_v2  ;;  %v947_v44 = vpop.f32.mrb[7].mxu1  ;;  %v1074_v50 = vld [vmem:[%s7719_s26 + $0x10] sm:$0xff]  ;;  %v1204_v2 = vld [vmem:[%s7721_s5] sm:$0xff] }
 0x5b2   :  { %v6004_v7 = vpack.c.bf16 %v1075_v57, %v1074_v50  ;;  %v6115_v44 = vpack.c.bf16 %v1205_v21, %v1204_v2  ;;  %v1212_v50 = vld [vmem:[%s7721_s5 + $0x40] sm:$0xff]  ;;  %v1213_v57 = vld [vmem:[%s7721_s5 + $0x48] sm:$0xff] }
 0x5b3   :  { %v964_v51 = vmul.f32 0.048770577, %v946_v37  ;;  %v1206_v37 = vld [vmem:[%s7721_s5 + $0x10] sm:$0xff] }
 0x5b4   :  { %4546 = vmatpush1.bf16.msra.mxu1 %v6115_v44 }
 0x5b5   :  { %v965_v38 = vadd.f32 %v964_v51, %v963_v48  ;;  %4547 = vmatprep.subr.bf16.mxu1 %v5265_v3  ;;  %v1208_v51 = vld [vmem:[%s7721_s5 + $0x20] sm:$0xff] }
 0x5b6   :  { %v6131_v35 = vpack.c.bf16 %v1209_v54, %v1208_v51  ;;  %v1185_v54 = vld [vmem:[#allocation2] sm:$0xff] }
 0x5b7   :  { %v967_v53 = vsub.f32 %v965_v38, %v966_v43  ;;  %v1210_v38 = vld [vmem:[%s7721_s5 + $0x30] sm:$0xff]  ;;  %v1211_v43 = vld [vmem:[%s7721_s5 + $0x38] sm:$0xff] }
 0x5b9   :  { %v968_v0 = vsub.f32 %v967_v53, %v5890_v14  ;;  %972 = vst.msk [vmem:[#allocation4] sm:$0xff] %vm66_vm0, %v967_v53  ;;  %1063 = vst.msk [vmem:[#allocation17 + $0x30] sm:$0xff] %vm66_vm0, %v967_v53  ;;  %4254 = vmatmul.mubr.msk.f32.vlgmr.msra.gmra.mrb[6].mxu0 %vm66_vm0, %v967_v53  ;;  %v1076_v14 = vld [vmem:[%s7719_s26 + $0x20] sm:$0xff]  ;;  %v6141_v53 = vpack.c.bf16 %v1211_v43, %v1210_v38 }
 0x5ba   :  { %4516 = vmatpush1.bf16.msra.mxu0 %v5990_v49  ;;  %4124 = vmatprep.mubr.msk.f32.mxu0 %vm66_vm0, %v1071_v20  ;;  %v6017_v18 = vpack.c.bf16 %v1077_v15, %v1076_v14  ;;  %v1214_v20 = vld [vmem:[%s7721_s5 + $0x50] sm:$0xff]  ;;  %v1215_v14 = vld [vmem:[%s7721_s5 + $0x58] sm:$0xff] }
 0x5bb   :  { %vm969_vm9 = vcmp.gt.f32.partialorder %v968_v0, 0.0  ;;  %4517 = vmatprep.subr.bf16.mxu0 %v5265_v3  ;;  %v6151_v0 = vpack.c.bf16 %v1213_v57, %v1212_v50  ;;  %v6162_v15 = vpack.c.bf16 %v1215_v14, %v1214_v20  ;;  %v1186_v50 = vmul.f32 0.95122945, %v1185_v54 }
 0x5bc   :  { %v4119_v55 = vsel %vm969_vm9, 1.0, %v5266_v6  ;;  %v1189_v14 = vmul.f32 %v5954_v45, %v5940_v24 }
 0x5bd   :  { %973 = vst.msk [vmem:[#allocation7] sm:$0xff] %vm66_vm0, %v4119_v55  ;;  %1062 = vst.msk [vmem:[#allocation17 + $0x28] sm:$0xff] %vm66_vm0, %v4119_v55  ;;  %v1216_v55 = vld [vmem:[%s7721_s5 + $0x60] sm:$0xff] }
 0x5be   :  { %4519 = vmatpush1.bf16.msra.mxu0 %v6004_v7  ;;  %v6172_v27 = vpack.c.bf16 %v1217_v17, %v1216_v55 }
 0x5bf   :  { %4520 = vmatprep.subr.bf16.mxu0 %v5265_v3 }
 0x5c2   :  { %4522 = vmatpush1.bf16.msra.mxu0 %v6017_v18 }
 0x5c3   :  { %4523 = vmatprep.subr.bf16.mxu0 %v5265_v3 }
 0x5c4   :  { %v6036_v36 = vld [vmem:[#allocation7] sm:$0xff] }
 0x5c5   :  { %1333 = vst.msk [vmem:[#allocation16 + $0x8] sm:$0xff] %vm66_vm0, %v6036_v36  ;;  %v1439_v41 = vmul.f32 0.0327839, %v6036_v36  ;;  %v1443_v46 = vmul.f32 0.003327784, %v6036_v36 }
 0x5c6   :  { %4525 = vmatpush1.bf16.msra.mxu0 %v6027_v31 }
 0x5c7   :  { %4526 = vmatprep.subr.bf16.mxu0 %v5265_v3  ;;  %v1440_v59 = vadd.f32 %v1439_v41, %v1438_v39  ;;  %v1444_v61 = vadd.f32 %v1443_v46, %v1442_v28  ;;  %v1221_v39 = vld [vmem:[%s7721_s5 + $0x88] sm:$0xff]  ;;  %v1222_v28 = vld [vmem:[%s7721_s5 + $0x90] sm:$0xff]  ;;  %v1223_v46 = vld [vmem:[%s7721_s5 + $0x98] sm:$0xff] }
 0x5c8   :  { %v6192_v41 = vpack.c.bf16 %v1221_v39, %v1220_v34  ;;  %v6201_v56 = vpack.c.bf16 %v1223_v46, %v1222_v28  ;;  %v1661_v28 = vmul.f32 0.9672161, %v1660_v16 }
 0x5c9   :  { %v1445_v62 = vmul.f32 1.8, %v1440_v59  ;;  %1461 = vst.msk [vmem:[#allocation12] sm:$0xff] %vm66_vm0, %v1440_v59  ;;  %1462 = vst.msk [vmem:[#allocation13] sm:$0xff] %vm66_vm0, %v1444_v61  ;;  %v1447_v1 = vmul.f32 9.0, %v1444_v61  ;;  %v1337_v59 = vld [vmem:[%s7722_s12 + $0x8] sm:$0xff] }
 0x5ca   :  { %4528 = vmatpush1.bf16.msra.mxu0 %v6043_v52  ;;  %v1338_v61 = vld [vmem:[%s7722_s12 + $0x10] sm:$0xff] }
 0x5cb   :  { %4529 = vmatprep.subr.bf16.mxu0 %v5265_v3  ;;  %v1446_v26 = vadd.f32 0.01, %v1445_v62  ;;  %v6215_v62 = vpack.c.bf16 %v1337_v59, %v1336_v58  ;;  %v6221_v60 = vpack.c.bf16 %v1339_v42, %v1338_v61 }
 0x5cc   :  { %v1335_v47 = vld [vmem:[#allocation16 + $0x8] sm:$0xff] }
 0x5cd   :  { %v6064_v5 = vadd.f32 %v1447_v1, %v1446_v26  ;;  %v1340_v26 = vld [vmem:[%s7722_s12 + $0x20] sm:$0xff]  ;;  %v1341_v1 = vld [vmem:[%s7722_s12 + $0x28] sm:$0xff] }
 0x5ce   :  { %4531 = vmatpush1.bf16.msra.mxu0 %v6055_v22  ;;  %v6231_v63 = vpack.c.bf16 %v1341_v1, %v1340_v26 }
 0x5cf   :  { %4532 = vmatprep.subr.bf16.mxu0 %v5265_v3  ;;  %1551 = vst.msk [vmem:[#allocation17 + $0x58] sm:$0xff] %vm66_vm0, %v6064_v5 }
 0x5d2   :  { %4534 = vmatpush1.bf16.msra.mxu0 %v6067_v11 }
 0x5d3   :  { %4535 = vmatprep.subr.bf16.mxu0 %v5265_v3 }
 0x5d6   :  { %4537 = vmatpush1.bf16.msra.mxu0 %v6079_v12 }
 0x5d7   :  { %4538 = vmatprep.subr.bf16.mxu0 %v5265_v3 }
 0x5da   :  { %4540 = vmatpush1.bf16.msra.mxu0 %v6089_v9 }
 0x5db   :  { %4541 = vmatprep.subr.bf16.mxu0 %v5265_v3 }
 0x5de   :  { %4543 = vmatpush1.bf16.msra.mxu0 %v6099_v8 }
 0x5df   :  { %4574 = vmatprep.subr.bf16.mxu0 %v5265_v3 }
 0x5e1   :  { %1167 = vmatmul.mubr.f32.vlgmr.msra.gmra.mrb[8].mxu0 %v5975_v13  ;;  %v1207_v13 = vld [vmem:[%s7721_s5 + $0x18] sm:$0xff] }
 0x5e2   :  { %4130 = vmatprep.mubr.msk.f32.mxu0 %vm66_vm0, %v1335_v47  ;;  %v6121_v48 = vpack.c.bf16 %v1207_v13, %v1206_v37  ;;  %4576 = vmatpush1.bf16.msra.mxu0 %v6215_v62  ;;  %v6251_v47 = vpack.c.bf16 %v1345_v32, %v1344_v23  ;;  %v6261_v13 = vld [vmem:[%s7723_s25] ss:$0 sm:$0xff]  ;;  %v6289_v23 = vpack.c.bf16 %v1347_v29, %v1346_v19 }
 0x5e3   :  { %4577 = vmatprep.subr.bf16.mxu0 %v5265_v3  ;;  %v1348_v32 = vld [vmem:[%s7722_s12 + $0x60] sm:$0xff] }
 0x5e4   :  { %4549 = vmatpush1.bf16.msra.mxu1 %v6121_v48 }
 0x5e5   :  { %4550 = vmatprep.subr.bf16.mxu1 %v5265_v3 }
 0x5e6   :  { %4579 = vmatpush1.bf16.msra.mxu0 %v6221_v60 }
 0x5e7   :  { %4580 = vmatprep.subr.bf16.mxu0 %v5265_v3 }
 0x5e8   :  { %4552 = vmatpush1.bf16.msra.mxu1 %v6131_v35 }
 0x5e9   :  { %4553 = vmatprep.subr.bf16.mxu1 %v5265_v3 }
 0x5ea   :  { %4582 = vmatpush1.bf16.msra.mxu0 %v6231_v63 }
 0x5eb   :  { %4583 = vmatprep.subr.bf16.mxu0 %v5265_v3 }
 0x5ec   :  { %4555 = vmatpush1.bf16.msra.mxu1 %v6141_v53 }
 0x5ed   :  { %4556 = vmatprep.subr.bf16.mxu1 %v5265_v3 }
 0x5ee   :  { %4585 = vmatpush1.bf16.msra.mxu0 %v6241_v4 }
 0x5ef   :  { %4586 = vmatprep.subr.bf16.mxu0 %v5265_v3 }
 0x5f0   :  { %4558 = vmatpush1.bf16.msra.mxu1 %v6151_v0 }
 0x5f1   :  { %4559 = vmatprep.subr.bf16.mxu1 %v5265_v3 }
 0x5f2   :  { %4588 = vmatpush1.bf16.msra.mxu0 %v6251_v47 }
 0x5f3   :  { %4589 = vmatprep.subr.bf16.mxu0 %v5265_v3 }
 0x5f4   :  { %4561 = vmatpush1.bf16.msra.mxu1 %v6162_v15 }
 0x5f5   :  { %4562 = vmatprep.subr.bf16.mxu1 %v5265_v3 }
 0x5f6   :  { %4591 = vmatpush1.bf16.msra.mxu0 %v6289_v23 }
 0x5f7   :  { %4592 = vmatprep.subr.bf16.mxu0 %v5265_v3 }
 0x5f8   :  { %4564 = vmatpush1.bf16.msra.mxu1 %v6172_v27 }
 0x5f9   :  { %4565 = vmatprep.subr.bf16.mxu1 %v5265_v3 }
 0x5fc   :  { %4567 = vmatpush1.bf16.msra.mxu1 %v6182_v33 }
 0x5fd   :  { %4568 = vmatprep.subr.bf16.mxu1 %v5265_v3 }
 0x600   :  { %4570 = vmatpush1.bf16.msra.mxu1 %v6192_v41 }
 0x601   :  { %4571 = vmatprep.subr.bf16.mxu1 %v5265_v3 }
 0x604   :  { %4573 = vmatpush1.bf16.msra.mxu1 %v6201_v56 }
 0x605   :  { %4604 = vmatprep.subr.bf16.mxu1 %v5265_v3 }
 0x68c   :  { %v1056_v2 = vpop.f32.mrb[6].mxu0 }
 0x68d   :  { %v1057_v21 = vadd.f32 %v5928_v30, %v1056_v2  ;;  %v4255_v37 = vpop.f32.mrb[7].mxu0  ;;  %v1349_v2 = vld [vmem:[%s7722_s12 + $0x68] sm:$0xff] }
 0x68e   :  { %v1350_v37 = vld [vmem:[%s7722_s12 + $0x70] sm:$0xff] }
 0x68f   :  { %1061 = vst.msk [vmem:[#allocation17 + $0x20] sm:$0xff] %vm573_vm6, %v1057_v21  ;;  %v6299_v21 = vpack.c.bf16 %v1349_v2, %v1348_v32 }
 0x691   :  { %4594 = vmatpush1.bf16.msra.mxu0 %v6299_v21 }
 0x692   :  { %4595 = vmatprep.subr.bf16.mxu0 %v5265_v3 }
 0x6b4   :  { %v1168_v51 = vpop.f32.mrb[8].mxu0 }
 0x6b5   :  { %v1169_v38 = vadd.f32 %v6261_v13, %v1168_v51  ;;  %v1170_v43 = vpop.f32.mrb[9].mxu0  ;;  %v1351_v51 = vld [vmem:[%s7722_s12 + $0x78] sm:$0xff] }
 0x6b6   :  { %v6309_v54 = vpack.c.bf16 %v1351_v51, %v1350_v37  ;;  %v1353_v43 = vld [vmem:[%s7722_s12 + $0x88] sm:$0xff] }
 0x6b7   :  { %v1187_v57 = vmul.f32 0.048770577, %v1169_v38  ;;  %v1352_v38 = vld [vmem:[%s7722_s12 + $0x80] sm:$0xff] }
 0x6b8   :  { %4597 = vmatpush1.bf16.msra.mxu0 %v6309_v54 }
 0x6b9   :  { %v1188_v20 = vadd.f32 %v1187_v57, %v1186_v50  ;;  %4598 = vmatprep.subr.bf16.mxu0 %v5265_v3  ;;  %v6319_v50 = vpack.c.bf16 %v1353_v43, %v1352_v38  ;;  %v1354_v57 = vld [vmem:[%s7722_s12 + $0x90] sm:$0xff] }
 0x6bb   :  { %v1190_v30 = vsub.f32 %v1188_v20, %v1189_v14  ;;  %v1355_v20 = vld [vmem:[%s7722_s12 + $0x98] sm:$0xff] }
 0x6bc   :  { %4600 = vmatpush1.bf16.msra.mxu0 %v6319_v50  ;;  %v6328_v14 = vpack.c.bf16 %v1355_v20, %v1354_v57 }
 0x6bd   :  { %v1191_v55 = vsub.f32 %v1190_v30, %v5954_v45  ;;  %1195 = vst.msk [vmem:[#allocation2] sm:$0xff] %vm66_vm0, %v1190_v30  ;;  %v1665_v45 = vmul.f32 0.9966722, %v1664_v25  ;;  %4601 = vmatprep.subr.bf16.mxu0 %v5265_v3  ;;  %v6336_v30 = vld [vmem:[%s7724_s13] ss:$0 sm:$0xff] }
 0x6bf   :  { %vm1192_vm10 = vcmp.gt.f32.partialorder %v1191_v55, 0.0 }
 0x6c0   :  { %v4125_v17 = vsel %vm1192_vm10, 1.0, %v5266_v6  ;;  %4603 = vmatpush1.bf16.msra.mxu0 %v6328_v14 }
 0x6c1   :  { %1196 = vst.msk [vmem:[#allocation5] sm:$0xff] %vm66_vm0, %v4125_v17  ;;  %1199 = vst.msk [vmem:[#allocation15] sm:$0xff] %vm66_vm0, %v4125_v17  ;;  %4640 = vmatprep.subr.bf16.mxu0 %v5265_v3  ;;  %v1317_v17 = vld [vmem:[#allocation3] sm:$0xff] }
 0x6c8   :  { %v1202_v34 = vld [vmem:[#allocation15] sm:$0xff]  ;;  %v6271_v39 = vld [vmem:[#allocation5] sm:$0xff] }
 0x6c9   :  { %1299 = vmatmul.mubr.f32.vlgmr.msra.gmra.mrb[8].mxu1 %v1202_v34  ;;  %1556 = vst.msk [vmem:[#allocation14 + $0x8] sm:$0xff] %vm66_vm0, %v6271_v39  ;;  %v1662_v24 = vmul.f32 0.0327839, %v6271_v39  ;;  %v1666_v46 = vmul.f32 0.003327784, %v6271_v39 }
 0x6ca   :  { %4264 = vmatprep.mubr.msk.f32.mxu1 %vm5268_vm4, %v5266_v6  ;;  %v1318_v34 = vmul.f32 0.95122945, %v1317_v17 }
 0x6cb   :  { %v1663_v58 = vadd.f32 %v1662_v24, %v1661_v28  ;;  %v1667_v59 = vadd.f32 %v1666_v46, %v1665_v45  ;;  %v1321_v45 = vmul.f32 %v5973_v40, %v5964_v10 }
 0x6cd   :  { %v1668_v61 = vmul.f32 1.8, %v1663_v58  ;;  %1684 = vst.msk [vmem:[#allocation8] sm:$0xff] %vm66_vm0, %v1663_v58  ;;  %1685 = vst.msk [vmem:[#allocation9] sm:$0xff] %vm66_vm0, %v1667_v59  ;;  %v1670_v26 = vmul.f32 9.0, %v1667_v59 }
 0x6cf   :  { %v1669_v42 = vadd.f32 0.01, %v1668_v61  ;;  %v1792_v61 = vld [vmem:[#allocation10] sm:$0xff] }
 0x6d0   :  { %v1793_v29 = vmul.f32 0.9672161, %v1792_v61 }
 0x6d1   :  { %v6281_v1 = vadd.f32 %v1670_v26, %v1669_v42  ;;  %v1796_v42 = vld [vmem:[#allocation11] sm:$0xff] }
 0x79c   :  { %v1300_v55 = vpop.f32.mrb[8].mxu1 }
 0x79d   :  { %v1301_v16 = vadd.f32 %v6336_v30, %v1300_v55  ;;  %v1302_v25 = vpop.f32.mrb[9].mxu1  ;;  %v1449_v55 = vld [vmem:[#allocation4] sm:$0xff] }
 0x79e   :  { %v1450_v25 = vmul.f32 0.95122945, %v1449_v55 }
 0x79f   :  { %v1319_v28 = vmul.f32 0.048770577, %v1301_v16 }
 0x7a1   :  { %v1320_v24 = vadd.f32 %v1319_v28, %v1318_v34 }
 0x7a3   :  { %v1322_v46 = vsub.f32 %v1320_v24, %v1321_v45  ;;  %v1453_v24 = vmul.f32 %v6064_v5, %v6036_v36  ;;  %v1924_v36 = vld [vmem:[#allocation12] sm:$0xff] }
 0x7a4   :  { %v1925_v61 = vmul.f32 0.9672161, %v1924_v36 }
 0x7a5   :  { %v1323_v58 = vsub.f32 %v1322_v46, %v5973_v40  ;;  %1327 = vst.msk [vmem:[#allocation3] sm:$0xff] %vm66_vm0, %v1322_v46  ;;  %v1797_v40 = vmul.f32 0.9966722, %v1796_v42 }
 0x7a7   :  { %vm1324_vm11 = vcmp.gt.f32.partialorder %v1323_v58, 0.0  ;;  %v1558_v58 = vld [vmem:[#allocation14 + $0x8] sm:$0xff] }
 0x7a8   :  { %v4128_v59 = vsel %vm1324_vm11, 1.0, %v5266_v6 }
 0x7a9   :  { %1328 = vst.msk [vmem:[#allocation6] sm:$0xff] %vm66_vm0, %v4128_v59  ;;  %1331 = vst.msk [vmem:[#allocation16] sm:$0xff] %vm66_vm0, %v4128_v59 }
 0x7b0   :  { %v1334_v26 = vld [vmem:[#allocation16] sm:$0xff] }
 0x7b1   :  { %v6346_v19 = vld [vmem:[#allocation6] sm:$0xff]  ;;  %1431 = vmatmul.mubr.f32.vlgmr.msra.gmra.mrb[10].mxu0 %v1334_v26 }
 0x7b2   :  { %1688 = vst.msk [vmem:[#allocation15 + $0x8] sm:$0xff] %vm66_vm0, %v6346_v19  ;;  %v1794_v10 = vmul.f32 0.0327839, %v6346_v19  ;;  %v1798_v32 = vmul.f32 0.003327784, %v6346_v19  ;;  %4642 = vmatpush1.bf16.msra.mxu0 %v6115_v44  ;;  %v1463_v44 = vld [vmem:[%s7692_s7] sm:$0xff] }
 0x7b3   :  { %4643 = vmatprep.subr.bf16.mxu0 %v5265_v3 }
 0x7b4   :  { %v1795_v2 = vadd.f32 %v1794_v10, %v1793_v29  ;;  %v1799_v37 = vadd.f32 %v1798_v32, %v1797_v40 }
 0x7b6   :  { %v1800_v51 = vmul.f32 1.8, %v1795_v2  ;;  %1816 = vst.msk [vmem:[#allocation10] sm:$0xff] %vm66_vm0, %v1795_v2  ;;  %1817 = vst.msk [vmem:[#allocation11] sm:$0xff] %vm66_vm0, %v1799_v37  ;;  %4645 = vmatpush1.bf16.msra.mxu0 %v6121_v48  ;;  %v1802_v43 = vmul.f32 9.0, %v1799_v37  ;;  %v1464_v48 = vld [vmem:[%s7692_s7 + $0x8] sm:$0xff] }
 0x7b7   :  { %4646 = vmatprep.subr.bf16.mxu0 %v5265_v3 }
 0x7b8   :  { %v1801_v38 = vadd.f32 0.01, %v1800_v51 }
 0x7b9   :  { %v1690_v57 = vld [vmem:[#allocation15 + $0x8] sm:$0xff] }
 0x7ba   :  { %4139 = vmatprep.mubr.msk.f32.mxu0 %vm66_vm0, %v1690_v57  ;;  %v6359_v20 = vadd.f32 %v1802_v43, %v1801_v38  ;;  %4648 = vmatpush1.bf16.msra.mxu0 %v6131_v35  ;;  %v6383_v35 = vpack.c.bf16 %v1464_v48, %v1463_v44 }
 0x7bb   :  { %4649 = vmatprep.subr.bf16.mxu0 %v5265_v3 }
 0x7bc   :  { %4606 = vmatpush3.bf16.msra.mxu1 %v6383_v35 }
 0x7bd   :  { %4607 = vmatprep.subr.bf16.mxu1 %v5265_v3 }
 0x7be   :  { %4651 = vmatpush1.bf16.msra.mxu0 %v6141_v53  ;;  %v1465_v53 = vld [vmem:[%s7692_s7 + $0x10] sm:$0xff] }
 0x7bf   :  { %4652 = vmatprep.subr.bf16.mxu0 %v5265_v3 }
 0x7c2   :  { %4654 = vmatpush1.bf16.msra.mxu0 %v6151_v0  ;;  %v1466_v0 = vld [vmem:[%s7692_s7 + $0x18] sm:$0xff] }
 0x7c3   :  { %4655 = vmatprep.subr.bf16.mxu0 %v5265_v3 }
 0x7c6   :  { %4657 = vmatpush1.bf16.msra.mxu0 %v6162_v15  ;;  %v6393_v15 = vpack.c.bf16 %v1466_v0, %v1465_v53 }
 0x7c7   :  { %4658 = vmatprep.subr.bf16.mxu0 %v5265_v3 }
 0x7c8   :  { %4609 = vmatpush3.bf16.msra.mxu1 %v6393_v15 }
 0x7c9   :  { %4610 = vmatprep.subr.bf16.mxu1 %v5265_v3 }
 0x7ca   :  { %4660 = vmatpush1.bf16.msra.mxu0 %v6172_v27  ;;  %v1557_v27 = vld [vmem:[#allocation14] sm:$0xff] }
 0x7cb   :  { %4661 = vmatprep.subr.bf16.mxu0 %v5265_v3 }
 0x7ce   :  { %4663 = vmatpush1.bf16.msra.mxu0 %v6182_v33  ;;  %v4146_v33 = vld [vmem:[%s7720_s0 + $0x20] sm:$0xff] }
 0x7cf   :  { %4664 = vmatprep.subr.bf16.mxu0 %v5265_v3  ;;  %2041 = vst.msk [vmem:[#allocation14] sm:$0xff] %vm91_vm1, %v4146_v33  ;;  %v1804_v33 = vld [vmem:[#allocation3] sm:$0xff] }
 0x7d2   :  { %4666 = vmatpush1.bf16.msra.mxu0 %v6192_v41  ;;  %v6404_v41 = vld [vmem:[%s7691_s6] ss:$0 sm:$0xff] }
 0x7d3   :  { %4667 = vmatprep.subr.bf16.mxu0 %v5265_v3 }
 0x7d6   :  { %4669 = vmatpush1.bf16.msra.mxu0 %v6201_v56 }
 0x7d7   :  { %4700 = vmatprep.subr.bf16.mxu0 %v5265_v3 }
 0x884   :  { %v1432_v56 = vpop.f32.mrb[10].mxu0 }
 0x885   :  { %v1433_v17 = vadd.f32 %v6404_v41, %v1432_v56  ;;  %v1434_v16 = vpop.f32.mrb[11].mxu0 }
 0x887   :  { %v1451_v34 = vmul.f32 0.048770577, %v1433_v17  ;;  %v1805_v17 = vmul.f32 0.95122945, %v1804_v33 }
 0x889   :  { %v1452_v28 = vadd.f32 %v1451_v34, %v1450_v25  ;;  %v1808_v34 = vmul.f32 %v6359_v20, %v6346_v19 }
 0x88b   :  { %v1454_v45 = vsub.f32 %v1452_v28, %v1453_v24 }
 0x88d   :  { %v1455_v46 = vsub.f32 %v1454_v45, %v6064_v5  ;;  %1459 = vst.msk [vmem:[#allocation4] sm:$0xff] %vm66_vm0, %v1454_v45  ;;  %1550 = vst.msk [vmem:[#allocation17 + $0x50] sm:$0xff] %vm66_vm0, %v1454_v45  ;;  %4265 = vmatmul.mubr.msk.f32.vlgmr.msra.gmra.mrb[10].mxu1 %vm66_vm0, %v1454_v45  ;;  %v1928_v5 = vld [vmem:[#allocation13] sm:$0xff]  ;;  %v2283_v45 = vld [vmem:[#allocation11] sm:$0xff] }
 0x88e   :  { %4612 = vmatpush1.bf16.msra.mxu1 %v5990_v49  ;;  %4136 = vmatprep.mubr.msk.f32.mxu1 %vm66_vm0, %v1558_v58  ;;  %v1929_v26 = vmul.f32 0.9966722, %v1928_v5 }
 0x88f   :  { %vm1456_vm12 = vcmp.gt.f32.partialorder %v1455_v46, 0.0  ;;  %4613 = vmatprep.subr.bf16.mxu1 %v5265_v3 }
 0x890   :  { %v4131_v59 = vsel %vm1456_vm12, 1.0, %v5266_v6 }
 0x891   :  { %1460 = vst.msk [vmem:[#allocation7] sm:$0xff] %vm66_vm0, %v4131_v59  ;;  %1549 = vst.msk [vmem:[#allocation17 + $0x48] sm:$0xff] %vm66_vm0, %v4131_v59 }
 0x892   :  { %4615 = vmatpush1.bf16.msra.mxu1 %v6004_v7 }
 0x893   :  { %4616 = vmatprep.subr.bf16.mxu1 %v5265_v3 }
 0x896   :  { %4618 = vmatpush1.bf16.msra.mxu1 %v6017_v18 }
 0x897   :  { %4619 = vmatprep.subr.bf16.mxu1 %v5265_v3 }
 0x898   :  { %v6423_v49 = vld [vmem:[#allocation7] sm:$0xff] }
 0x899   :  { %1820 = vst.msk [vmem:[#allocation16 + $0x8] sm:$0xff] %vm66_vm0, %v6423_v49  ;;  %v1926_v42 = vmul.f32 0.0327839, %v6423_v49  ;;  %v1930_v29 = vmul.f32 0.003327784, %v6423_v49 }
 0x89a   :  { %4621 = vmatpush1.bf16.msra.mxu1 %v6027_v31 }
 0x89b   :  { %4622 = vmatprep.subr.bf16.mxu1 %v5265_v3  ;;  %v1927_v7 = vadd.f32 %v1926_v42, %v1925_v61  ;;  %v1931_v18 = vadd.f32 %v1930_v29, %v1929_v26 }
 0x89d   :  { %v1932_v10 = vmul.f32 1.8, %v1927_v7  ;;  %1948 = vst.msk [vmem:[#allocation12] sm:$0xff] %vm66_vm0, %v1927_v7  ;;  %1949 = vst.msk [vmem:[#allocation13] sm:$0xff] %vm66_vm0, %v1931_v18  ;;  %v1934_v32 = vmul.f32 9.0, %v1931_v18 }
 0x89e   :  { %4624 = vmatpush1.bf16.msra.mxu1 %v6043_v52  ;;  %v6473_v52 = vld [vmem:[%s7693_s8] ss:$0 sm:$0xff] }
 0x89f   :  { %4625 = vmatprep.subr.bf16.mxu1 %v5265_v3  ;;  %v1933_v40 = vadd.f32 0.01, %v1932_v10  ;;  %v6520_v10 = vld [vmem:[#allocation14] sm:$0xff] }
 0x8a0   :  { %v1822_v31 = vld [vmem:[#allocation16 + $0x8] sm:$0xff] }
 0x8a1   :  { %v6435_v2 = vadd.f32 %v1934_v32, %v1933_v40  ;;  %v4158_v40 = vld [vmem:[%s7720_s0 + $0x28] sm:$0xff] }
 0x8a2   :  { %4627 = vmatpush1.bf16.msra.mxu1 %v6055_v22  ;;  %2528 = vst.msk [vmem:[#allocation14] sm:$0xff] %vm91_vm1, %v4158_v40 }
 0x8a3   :  { %4628 = vmatprep.subr.bf16.mxu1 %v5265_v3  ;;  %2038 = vst.msk [vmem:[#allocation17 + $0x78] sm:$0xff] %vm66_vm0, %v6435_v2 }
 0x8a6   :  { %4630 = vmatpush1.bf16.msra.mxu1 %v6067_v11 }
 0x8a7   :  { %4631 = vmatprep.subr.bf16.mxu1 %v5265_v3 }
 0x8aa   :  { %4633 = vmatpush1.bf16.msra.mxu1 %v6079_v12 }
 0x8ab   :  { %4634 = vmatprep.subr.bf16.mxu1 %v5265_v3 }
 0x8ae   :  { %4636 = vmatpush1.bf16.msra.mxu1 %v6089_v9 }
 0x8af   :  { %4637 = vmatprep.subr.bf16.mxu1 %v5265_v3 }
 0x8b2   :  { %4639 = vmatpush1.bf16.msra.mxu1 %v6099_v8  ;;  %v1672_v8 = vld [vmem:[#allocation2] sm:$0xff] }
 0x8b3   :  { %4670 = vmatprep.subr.bf16.mxu1 %v5265_v3 }
 0x8b5   :  { %1654 = vmatmul.mubr.f32.vlgmr.msra.gmra.mrb[12].mxu1 %v1557_v27 }
 0x8b6   :  { %4142 = vmatprep.mubr.msk.f32.mxu1 %vm66_vm0, %v1822_v31  ;;  %4672 = vmatpush1.bf16.msra.mxu1 %v6215_v62  ;;  %v1936_v31 = vld [vmem:[#allocation4] sm:$0xff] }
 0x8b7   :  { %4673 = vmatprep.subr.bf16.mxu1 %v5265_v3 }
 0x8ba   :  { %4675 = vmatpush1.bf16.msra.mxu1 %v6221_v60 }
 0x8bb   :  { %4676 = vmatprep.subr.bf16.mxu1 %v5265_v3 }
 0x8be   :  { %4678 = vmatpush1.bf16.msra.mxu1 %v6231_v63  ;;  %v1673_v63 = vmul.f32 0.95122945, %v1672_v8  ;;  %v2046_v8 = vld [vmem:[%s7719_s26] sm:$0xff] }
 0x8bf   :  { %4679 = vmatprep.subr.bf16.mxu1 %v5265_v3 }
 0x8c2   :  { %4681 = vmatpush1.bf16.msra.mxu1 %v6241_v4 }
 0x8c3   :  { %4682 = vmatprep.subr.bf16.mxu1 %v5265_v3 }
 0x8c6   :  { %4684 = vmatpush1.bf16.msra.mxu1 %v6251_v47 }
 0x8c7   :  { %4685 = vmatprep.subr.bf16.mxu1 %v5265_v3 }
 0x8ca   :  { %4687 = vmatpush1.bf16.msra.mxu1 %v6289_v23  ;;  %v1676_v23 = vmul.f32 %v6281_v1, %v6271_v39 }
 0x8cb   :  { %4688 = vmatprep.subr.bf16.mxu1 %v5265_v3 }
 0x8ce   :  { %4690 = vmatpush1.bf16.msra.mxu1 %v6299_v21 }
 0x8cf   :  { %4691 = vmatprep.subr.bf16.mxu1 %v5265_v3 }
 0x8d2   :  { %4693 = vmatpush1.bf16.msra.mxu1 %v6309_v54 }
 0x8d3   :  { %4694 = vmatprep.subr.bf16.mxu1 %v5265_v3 }
 0x8d6   :  { %4696 = vmatpush1.bf16.msra.mxu1 %v6319_v50 }
 0x8d7   :  { %4697 = vmatprep.subr.bf16.mxu1 %v5265_v3 }
 0x8da   :  { %4699 = vmatpush1.bf16.msra.mxu1 %v6328_v14  ;;  %v2151_v14 = vld [vmem:[#allocation9] sm:$0xff] }
 0x8db   :  { %4736 = vmatprep.subr.bf16.mxu1 %v5265_v3 }
 0x960   :  { %v1543_v22 = vpop.f32.mrb[10].mxu1 }
 0x961   :  { %v1544_v11 = vadd.f32 %v6473_v52, %v1543_v22  ;;  %v4266_v12 = vpop.f32.mrb[11].mxu1 }
 0x962   :  { %v1937_v12 = vmul.f32 0.95122945, %v1936_v31  ;;  %v2179_v31 = vld [vmem:[%s7721_s5 + $0x8] sm:$0xff] }
 0x963   :  { %1548 = vst.msk [vmem:[#allocation17 + $0x40] sm:$0xff] %vm573_vm6, %v1544_v11 }
 0x988   :  { %v1655_v9 = vpop.f32.mrb[12].mxu1 }
 0x989   :  { %v1656_v62 = vadd.f32 %v6261_v13, %v1655_v9  ;;  %v1657_v60 = vpop.f32.mrb[13].mxu1  ;;  %v2147_v13 = vld [vmem:[#allocation8] sm:$0xff] }
 0x98a   :  { %v2148_v38 = vmul.f32 0.9672161, %v2147_v13 }
 0x98b   :  { %v1674_v4 = vmul.f32 0.048770577, %v1656_v62  ;;  %v2047_v62 = vld [vmem:[%s7719_s26 + $0x8] sm:$0xff] }
 0x98d   :  { %v1675_v47 = vadd.f32 %v1674_v4, %v1673_v63  ;;  %v1940_v63 = vmul.f32 %v6435_v2, %v6423_v49  ;;  %v6535_v4 = vpack.c.bf16 %v2047_v62, %v2046_v8  ;;  %v2183_v8 = vld [vmem:[%s7721_s5 + $0x28] sm:$0xff] }
 0x98f   :  { %v1677_v21 = vsub.f32 %v1675_v47, %v1676_v23  ;;  %v2049_v23 = vld [vmem:[%s7719_s26 + $0x18] sm:$0xff] }
 0x991   :  { %v1678_v54 = vsub.f32 %v1677_v21, %v6281_v1  ;;  %1682 = vst.msk [vmem:[#allocation2] sm:$0xff] %vm66_vm0, %v1677_v21  ;;  %v2152_v1 = vmul.f32 0.9966722, %v2151_v14 }
 0x993   :  { %vm1679_vm13 = vcmp.gt.f32.partialorder %v1678_v54, 0.0 }
 0x994   :  { %v4137_v50 = vsel %vm1679_vm13, 1.0, %v5266_v6 }
 0x995   :  { %1683 = vst.msk [vmem:[#allocation5] sm:$0xff] %vm66_vm0, %v4137_v50  ;;  %1686 = vst.msk [vmem:[#allocation15] sm:$0xff] %vm66_vm0, %v4137_v50  ;;  %v2051_v50 = vld [vmem:[%s7719_s26 + $0x28] sm:$0xff] }
 0x99c   :  { %v1689_v37 = vld [vmem:[#allocation15] sm:$0xff]  ;;  %v6485_v51 = vld [vmem:[#allocation5] sm:$0xff] }
 0x99d   :  { %1786 = vmatmul.mubr.f32.vlgmr.msra.gmra.mrb[12].mxu0 %v1689_v37  ;;  %2043 = vst.msk [vmem:[#allocation14 + $0x8] sm:$0xff] %vm66_vm0, %v6485_v51  ;;  %v2149_v39 = vmul.f32 0.0327839, %v6485_v51  ;;  %v2153_v43 = vmul.f32 0.003327784, %v6485_v51  ;;  %v2052_v37 = vld [vmem:[%s7719_s26 + $0x30] sm:$0xff] }
 0x99e   :  { %4702 = vmatpush3.bf16.msra.mxu0 %v6383_v35  ;;  %4275 = vmatprep.mubr.msk.f32.mxu0 %vm5268_vm4, %v5266_v6 }
 0x99f   :  { %4703 = vmatprep.subr.bf16.mxu0 %v5265_v3  ;;  %v2150_v57 = vadd.f32 %v2149_v39, %v2148_v38  ;;  %v2154_v44 = vadd.f32 %v2153_v43, %v2152_v1  ;;  %v2053_v38 = vld [vmem:[%s7719_s26 + $0x38] sm:$0xff]  ;;  %v2411_v39 = vld [vmem:[#allocation12] sm:$0xff] }
 0x9a0   :  { %v6572_v1 = vpack.c.bf16 %v2053_v38, %v2052_v37  ;;  %v2415_v43 = vld [vmem:[#allocation13] sm:$0xff]  ;;  %v2191_v37 = vld [vmem:[%s7721_s5 + $0x68] sm:$0xff] }
 0x9a1   :  { %v2155_v48 = vmul.f32 1.8, %v2150_v57  ;;  %2171 = vst.msk [vmem:[#allocation8] sm:$0xff] %vm66_vm0, %v2150_v57  ;;  %2172 = vst.msk [vmem:[#allocation9] sm:$0xff] %vm66_vm0, %v2154_v44  ;;  %v2157_v0 = vmul.f32 9.0, %v2154_v44  ;;  %v2054_v57 = vld [vmem:[%s7719_s26 + $0x40] sm:$0xff] }
 0x9a2   :  { %4705 = vmatpush3.bf16.msra.mxu0 %v6393_v15  ;;  %v2055_v44 = vld [vmem:[%s7719_s26 + $0x48] sm:$0xff] }
 0x9a3   :  { %4706 = vmatprep.subr.bf16.mxu0 %v5265_v3  ;;  %v2156_v53 = vadd.f32 0.01, %v2155_v48 }
 0x9a4   :  { %v2045_v49 = vld [vmem:[#allocation14 + $0x8] sm:$0xff] }
 0x9a5   :  { %v6499_v27 = vadd.f32 %v2157_v0, %v2156_v53  ;;  %v2412_v53 = vmul.f32 0.9672161, %v2411_v39  ;;  %v2192_v39 = vld [vmem:[%s7721_s5 + $0x70] sm:$0xff] }
 0xa70   :  { %v1787_v35 = vpop.f32.mrb[12].mxu0 }
 0xa71   :  { %v1788_v56 = vadd.f32 %v6336_v30, %v1787_v35  ;;  %v1789_v55 = vpop.f32.mrb[13].mxu0  ;;  %v2279_v30 = vld [vmem:[#allocation10] sm:$0xff]  ;;  %v2416_v35 = vmul.f32 0.9966722, %v2415_v43  ;;  %v2193_v43 = vld [vmem:[%s7721_s5 + $0x78] sm:$0xff] }
 0xa72   :  { %v2280_v59 = vmul.f32 0.9672161, %v2279_v30  ;;  %v2056_v55 = vld [vmem:[%s7719_s26 + $0x50] sm:$0xff] }
 0xa73   :  { %v1806_v16 = vmul.f32 0.048770577, %v1788_v56  ;;  %v6588_v56 = vpack.c.bf16 %v2055_v44, %v2054_v57  ;;  %v6727_v57 = vpack.c.bf16 %v2193_v43, %v2192_v39  ;;  %v2194_v44 = vld [vmem:[%s7721_s5 + $0x80] sm:$0xff]  ;;  %v2634_v39 = vld [vmem:[#allocation8] sm:$0xff]  ;;  %v2638_v43 = vld [vmem:[#allocation9] sm:$0xff] }
 0xa75   :  { %v1807_v25 = vadd.f32 %v1806_v16, %v1805_v17  ;;  %v2057_v17 = vld [vmem:[%s7719_s26 + $0x58] sm:$0xff] }
 0xa77   :  { %v1809_v28 = vsub.f32 %v1807_v25, %v1808_v34 }
 0xa79   :  { %v1810_v15 = vsub.f32 %v1809_v28, %v6359_v20  ;;  %1814 = vst.msk [vmem:[#allocation3] sm:$0xff] %vm66_vm0, %v1809_v28  ;;  %v2284_v20 = vmul.f32 0.9966722, %v2283_v45  ;;  %v6600_v28 = vpack.c.bf16 %v2057_v17, %v2056_v55  ;;  %v2310_v17 = vld [vmem:[%s7722_s12] sm:$0xff] }
 0xa7b   :  { %vm1811_vm14 = vcmp.gt.f32.partialorder %v1810_v15, 0.0  ;;  %v2058_v15 = vld [vmem:[%s7719_s26 + $0x60] sm:$0xff] }
 0xa7c   :  { %v4140_v24 = vsel %vm1811_vm14, 1.0, %v5266_v6 }
 0xa7d   :  { %1815 = vst.msk [vmem:[#allocation6] sm:$0xff] %vm66_vm0, %v4140_v24  ;;  %1818 = vst.msk [vmem:[#allocation16] sm:$0xff] %vm66_vm0, %v4140_v24  ;;  %v2059_v24 = vld [vmem:[%s7719_s26 + $0x68] sm:$0xff] }
 0xa84   :  { %v1821_v46 = vld [vmem:[#allocation16] sm:$0xff] }
 0xa85   :  { %v6509_v58 = vld [vmem:[#allocation6] sm:$0xff]  ;;  %1918 = vmatmul.mubr.f32.vlgmr.msra.gmra.mrb[14].mxu1 %v1821_v46 }
 0xa86   :  { %2175 = vst.msk [vmem:[#allocation15 + $0x8] sm:$0xff] %vm66_vm0, %v6509_v58  ;;  %v2281_v19 = vmul.f32 0.0327839, %v6509_v58  ;;  %v2285_v36 = vmul.f32 0.003327784, %v6509_v58 }
 0xa88   :  { %v2282_v5 = vadd.f32 %v2281_v19, %v2280_v59  ;;  %v2286_v61 = vadd.f32 %v2285_v36, %v2284_v20  ;;  %v6612_v59 = vpack.c.bf16 %v2059_v24, %v2058_v15  ;;  %v2060_v19 = vld [vmem:[%s7719_s26 + $0x70] sm:$0xff]  ;;  %v2061_v20 = vld [vmem:[%s7719_s26 + $0x78] sm:$0xff] }
 0xa89   :  { %v6624_v36 = vpack.c.bf16 %v2061_v20, %v2060_v19  ;;  %v2313_v15 = vld [vmem:[%s7722_s12 + $0x18] sm:$0xff]  ;;  %v2316_v20 = vld [vmem:[%s7722_s12 + $0x30] sm:$0xff] }
 0xa8a   :  { %v2287_v42 = vmul.f32 1.8, %v2282_v5  ;;  %2303 = vst.msk [vmem:[#allocation10] sm:$0xff] %vm66_vm0, %v2282_v5  ;;  %2304 = vst.msk [vmem:[#allocation11] sm:$0xff] %vm66_vm0, %v2286_v61  ;;  %v2289_v29 = vmul.f32 9.0, %v2286_v61  ;;  %v2062_v5 = vld [vmem:[%s7719_s26 + $0x80] sm:$0xff] }
 0xa8b   :  { %v2063_v61 = vld [vmem:[%s7719_s26 + $0x88] sm:$0xff] }
 0xa8c   :  { %v2288_v26 = vadd.f32 0.01, %v2287_v42  ;;  %v6634_v42 = vpack.c.bf16 %v2063_v61, %v2062_v5  ;;  %v2317_v5 = vld [vmem:[%s7722_s12 + $0x38] sm:$0xff] }
 0xa8d   :  { %v2177_v7 = vld [vmem:[#allocation15 + $0x8] sm:$0xff]  ;;  %v6786_v61 = vpack.c.bf16 %v2317_v5, %v2316_v20  ;;  %v2320_v20 = vld [vmem:[%s7722_s12 + $0x50] sm:$0xff] }
 0xa8e   :  { %4151 = vmatprep.mubr.msk.f32.mxu1 %vm66_vm0, %v2177_v7  ;;  %v6518_v18 = vadd.f32 %v2289_v29, %v2288_v26  ;;  %v2064_v26 = vld [vmem:[%s7719_s26 + $0x90] sm:$0xff]  ;;  %v2065_v29 = vld [vmem:[%s7719_s26 + $0x98] sm:$0xff] }
 0xa8f   :  { %v6644_v7 = vpack.c.bf16 %v2065_v29, %v2064_v26  ;;  %v2318_v26 = vld [vmem:[%s7722_s12 + $0x40] sm:$0xff]  ;;  %v2319_v29 = vld [vmem:[%s7722_s12 + $0x48] sm:$0xff]  ;;  %v2321_v5 = vld [vmem:[%s7722_s12 + $0x58] sm:$0xff] }
 0xb58   :  { %v1919_v32 = vpop.f32.mrb[14].mxu1 }
 0xb59   :  { %v1920_v22 = vadd.f32 %v6404_v41, %v1919_v32  ;;  %v1921_v11 = vpop.f32.mrb[15].mxu1  ;;  %v2048_v41 = vld [vmem:[%s7719_s26 + $0x10] sm:$0xff]  ;;  %v2178_v32 = vld [vmem:[%s7721_s5] sm:$0xff] }
 0xb5a   :  { %v6549_v54 = vpack.c.bf16 %v2049_v23, %v2048_v41  ;;  %v6660_v11 = vpack.c.bf16 %v2179_v31, %v2178_v32  ;;  %v2186_v41 = vld [vmem:[%s7721_s5 + $0x40] sm:$0xff]  ;;  %v2187_v23 = vld [vmem:[%s7721_s5 + $0x48] sm:$0xff] }
 0xb5b   :  { %v1938_v9 = vmul.f32 0.048770577, %v1920_v22  ;;  %v2180_v22 = vld [vmem:[%s7721_s5 + $0x10] sm:$0xff] }
 0xb5c   :  { %4738 = vmatpush1.bf16.msra.mxu1 %v6660_v11 }
 0xb5d   :  { %v1939_v60 = vadd.f32 %v1938_v9, %v1937_v12  ;;  %4739 = vmatprep.subr.bf16.mxu1 %v5265_v3  ;;  %v2182_v9 = vld [vmem:[%s7721_s5 + $0x20] sm:$0xff] }
 0xb5e   :  { %v6676_v62 = vpack.c.bf16 %v2183_v8, %v2182_v9  ;;  %v2159_v8 = vld [vmem:[#allocation2] sm:$0xff] }
 0xb5f   :  { %v1941_v47 = vsub.f32 %v1939_v60, %v1940_v63  ;;  %v2184_v60 = vld [vmem:[%s7721_s5 + $0x30] sm:$0xff]  ;;  %v2185_v63 = vld [vmem:[%s7721_s5 + $0x38] sm:$0xff] }
 0xb61   :  { %v1942_v21 = vsub.f32 %v1941_v47, %v6435_v2  ;;  %1946 = vst.msk [vmem:[#allocation4] sm:$0xff] %vm66_vm0, %v1941_v47  ;;  %2037 = vst.msk [vmem:[#allocation17 + $0x70] sm:$0xff] %vm66_vm0, %v1941_v47  ;;  %4276 = vmatmul.mubr.msk.f32.vlgmr.msra.gmra.mrb[14].mxu0 %vm66_vm0, %v1941_v47  ;;  %v2050_v2 = vld [vmem:[%s7719_s26 + $0x20] sm:$0xff]  ;;  %v6686_v47 = vpack.c.bf16 %v2185_v63, %v2184_v60 }
 0xb62   :  { %4708 = vmatpush1.bf16.msra.mxu0 %v6535_v4  ;;  %4148 = vmatprep.mubr.msk.f32.mxu0 %vm66_vm0, %v2045_v49  ;;  %v6562_v14 = vpack.c.bf16 %v2051_v50, %v2050_v2  ;;  %v2188_v49 = vld [vmem:[%s7721_s5 + $0x50] sm:$0xff]  ;;  %v2189_v2 = vld [vmem:[%s7721_s5 + $0x58] sm:$0xff] }
 0xb63   :  { %vm1943_vm15 = vcmp.gt.f32.partialorder %v1942_v21, 0.0  ;;  %4709 = vmatprep.subr.bf16.mxu0 %v5265_v3  ;;  %v6696_v21 = vpack.c.bf16 %v2187_v23, %v2186_v41  ;;  %v6707_v50 = vpack.c.bf16 %v2189_v2, %v2188_v49  ;;  %v2160_v41 = vmul.f32 0.95122945, %v2159_v8 }
 0xb64   :  { %v4143_v13 = vsel %vm1943_vm15, 1.0, %v5266_v6  ;;  %v2163_v2 = vmul.f32 %v6499_v27, %v6485_v51 }
 0xb65   :  { %1947 = vst.msk [vmem:[#allocation7] sm:$0xff] %vm66_vm0, %v4143_v13  ;;  %2036 = vst.msk [vmem:[#allocation17 + $0x68] sm:$0xff] %vm66_vm0, %v4143_v13  ;;  %v2190_v13 = vld [vmem:[%s7721_s5 + $0x60] sm:$0xff] }
 0xb66   :  { %4711 = vmatpush1.bf16.msra.mxu0 %v6549_v54  ;;  %v6717_v38 = vpack.c.bf16 %v2191_v37, %v2190_v13 }
 0xb67   :  { %4712 = vmatprep.subr.bf16.mxu0 %v5265_v3 }
 0xb6a   :  { %4714 = vmatpush1.bf16.msra.mxu0 %v6562_v14 }
 0xb6b   :  { %4715 = vmatprep.subr.bf16.mxu0 %v5265_v3 }
 0xb6c   :  { %v6581_v48 = vld [vmem:[#allocation7] sm:$0xff] }
 0xb6d   :  { %2307 = vst.msk [vmem:[#allocation16 + $0x8] sm:$0xff] %vm66_vm0, %v6581_v48  ;;  %v2413_v0 = vmul.f32 0.0327839, %v6581_v48  ;;  %v2417_v33 = vmul.f32 0.003327784, %v6581_v48 }
 0xb6e   :  { %4717 = vmatpush1.bf16.msra.mxu0 %v6572_v1 }
 0xb6f   :  { %4718 = vmatprep.subr.bf16.mxu0 %v5265_v3  ;;  %v2414_v16 = vadd.f32 %v2413_v0, %v2412_v53  ;;  %v2418_v25 = vadd.f32 %v2417_v33, %v2416_v35  ;;  %v2195_v53 = vld [vmem:[%s7721_s5 + $0x88] sm:$0xff]  ;;  %v2196_v35 = vld [vmem:[%s7721_s5 + $0x90] sm:$0xff]  ;;  %v2197_v33 = vld [vmem:[%s7721_s5 + $0x98] sm:$0xff] }
 0xb70   :  { %v6737_v0 = vpack.c.bf16 %v2195_v53, %v2194_v44  ;;  %v6746_v55 = vpack.c.bf16 %v2197_v33, %v2196_v35  ;;  %v2635_v35 = vmul.f32 0.9672161, %v2634_v39 }
 0xb71   :  { %v2419_v34 = vmul.f32 1.8, %v2414_v16  ;;  %2435 = vst.msk [vmem:[#allocation12] sm:$0xff] %vm66_vm0, %v2414_v16  ;;  %2436 = vst.msk [vmem:[#allocation13] sm:$0xff] %vm66_vm0, %v2418_v25  ;;  %v2421_v45 = vmul.f32 9.0, %v2418_v25  ;;  %v2311_v16 = vld [vmem:[%s7722_s12 + $0x8] sm:$0xff] }
 0xb72   :  { %4720 = vmatpush1.bf16.msra.mxu0 %v6588_v56  ;;  %v2312_v25 = vld [vmem:[%s7722_s12 + $0x10] sm:$0xff] }
 0xb73   :  { %4721 = vmatprep.subr.bf16.mxu0 %v5265_v3  ;;  %v2420_v30 = vadd.f32 0.01, %v2419_v34  ;;  %v6760_v34 = vpack.c.bf16 %v2311_v16, %v2310_v17  ;;  %v6766_v24 = vpack.c.bf16 %v2313_v15, %v2312_v25 }
 0xb74   :  { %v2309_v40 = vld [vmem:[#allocation16 + $0x8] sm:$0xff] }
 0xb75   :  { %v6609_v46 = vadd.f32 %v2421_v45, %v2420_v30  ;;  %v2314_v30 = vld [vmem:[%s7722_s12 + $0x20] sm:$0xff]  ;;  %v2315_v45 = vld [vmem:[%s7722_s12 + $0x28] sm:$0xff] }
 0xb76   :  { %4723 = vmatpush1.bf16.msra.mxu0 %v6600_v28  ;;  %v6776_v19 = vpack.c.bf16 %v2315_v45, %v2314_v30 }
 0xb77   :  { %4724 = vmatprep.subr.bf16.mxu0 %v5265_v3  ;;  %2525 = vst.msk [vmem:[#allocation17 + $0x98] sm:$0xff] %vm66_vm0, %v6609_v46 }
 0xb7a   :  { %4726 = vmatpush1.bf16.msra.mxu0 %v6612_v59 }
 0xb7b   :  { %4727 = vmatprep.subr.bf16.mxu0 %v5265_v3 }
 0xb7e   :  { %4729 = vmatpush1.bf16.msra.mxu0 %v6624_v36 }
 0xb7f   :  { %4730 = vmatprep.subr.bf16.mxu0 %v5265_v3 }
 0xb82   :  { %4732 = vmatpush1.bf16.msra.mxu0 %v6634_v42 }
 0xb83   :  { %4733 = vmatprep.subr.bf16.mxu0 %v5265_v3 }
 0xb86   :  { %4735 = vmatpush1.bf16.msra.mxu0 %v6644_v7 }
 0xb87   :  { %4766 = vmatprep.subr.bf16.mxu0 %v5265_v3 }
 0xb89   :  { %2141 = vmatmul.mubr.f32.vlgmr.msra.gmra.mrb[16].mxu0 %v6520_v10  ;;  %v2181_v10 = vld [vmem:[%s7721_s5 + $0x18] sm:$0xff] }
 0xb8a   :  { %4154 = vmatprep.mubr.msk.f32.mxu0 %vm66_vm0, %v2309_v40  ;;  %v6666_v12 = vpack.c.bf16 %v2181_v10, %v2180_v22  ;;  %4768 = vmatpush1.bf16.msra.mxu0 %v6760_v34  ;;  %v6796_v40 = vpack.c.bf16 %v2319_v29, %v2318_v26  ;;  %v6806_v10 = vld [vmem:[%s7723_s25] ss:$0 sm:$0xff]  ;;  %v6834_v26 = vpack.c.bf16 %v2321_v5, %v2320_v20 }
 0xb8b   :  { %4769 = vmatprep.subr.bf16.mxu0 %v5265_v3  ;;  %v2322_v29 = vld [vmem:[%s7722_s12 + $0x60] sm:$0xff] }
 0xb8c   :  { %4741 = vmatpush1.bf16.msra.mxu1 %v6666_v12 }
 0xb8d   :  { %4742 = vmatprep.subr.bf16.mxu1 %v5265_v3 }
 0xb8e   :  { %4771 = vmatpush1.bf16.msra.mxu0 %v6766_v24 }
 0xb8f   :  { %4772 = vmatprep.subr.bf16.mxu0 %v5265_v3 }
 0xb90   :  { %4744 = vmatpush1.bf16.msra.mxu1 %v6676_v62 }
 0xb91   :  { %4745 = vmatprep.subr.bf16.mxu1 %v5265_v3 }
 0xb92   :  { %4774 = vmatpush1.bf16.msra.mxu0 %v6776_v19 }
 0xb93   :  { %4775 = vmatprep.subr.bf16.mxu0 %v5265_v3 }
 0xb94   :  { %4747 = vmatpush1.bf16.msra.mxu1 %v6686_v47 }
 0xb95   :  { %4748 = vmatprep.subr.bf16.mxu1 %v5265_v3 }
 0xb96   :  { %4777 = vmatpush1.bf16.msra.mxu0 %v6786_v61 }
 0xb97   :  { %4778 = vmatprep.subr.bf16.mxu0 %v5265_v3 }
 0xb98   :  { %4750 = vmatpush1.bf16.msra.mxu1 %v6696_v21 }
 0xb99   :  { %4751 = vmatprep.subr.bf16.mxu1 %v5265_v3 }
 0xb9a   :  { %4780 = vmatpush1.bf16.msra.mxu0 %v6796_v40 }
 0xb9b   :  { %4781 = vmatprep.subr.bf16.mxu0 %v5265_v3 }
 0xb9c   :  { %4753 = vmatpush1.bf16.msra.mxu1 %v6707_v50 }
 0xb9d   :  { %4754 = vmatprep.subr.bf16.mxu1 %v5265_v3 }
 0xb9e   :  { %4783 = vmatpush1.bf16.msra.mxu0 %v6834_v26 }
 0xb9f   :  { %4784 = vmatprep.subr.bf16.mxu0 %v5265_v3 }
 0xba0   :  { %4756 = vmatpush1.bf16.msra.mxu1 %v6717_v38 }
 0xba1   :  { %4757 = vmatprep.subr.bf16.mxu1 %v5265_v3 }
 0xba4   :  { %4759 = vmatpush1.bf16.msra.mxu1 %v6727_v57 }
 0xba5   :  { %4760 = vmatprep.subr.bf16.mxu1 %v5265_v3 }
 0xba8   :  { %4762 = vmatpush1.bf16.msra.mxu1 %v6737_v0 }
 0xba9   :  { %4763 = vmatprep.subr.bf16.mxu1 %v5265_v3 }
 0xbac   :  { %4765 = vmatpush1.bf16.msra.mxu1 %v6746_v55 }
 0xbad   :  { %4796 = vmatprep.subr.bf16.mxu1 %v5265_v3 }
 0xc34   :  { %v2030_v32 = vpop.f32.mrb[14].mxu0 }
 0xc35   :  { %v2031_v31 = vadd.f32 %v6473_v52, %v2030_v32  ;;  %v4277_v22 = vpop.f32.mrb[15].mxu0  ;;  %v2323_v32 = vld [vmem:[%s7722_s12 + $0x68] sm:$0xff] }
 0xc36   :  { %v2324_v22 = vld [vmem:[%s7722_s12 + $0x70] sm:$0xff] }
 0xc37   :  { %2035 = vst.msk [vmem:[#allocation17 + $0x60] sm:$0xff] %vm573_vm6, %v2031_v31  ;;  %v6844_v31 = vpack.c.bf16 %v2323_v32, %v2322_v29 }
 0xc39   :  { %4786 = vmatpush1.bf16.msra.mxu0 %v6844_v31 }
 0xc3a   :  { %4787 = vmatprep.subr.bf16.mxu0 %v5265_v3 }
 0xc5c   :  { %v2142_v9 = vpop.f32.mrb[16].mxu0 }
 0xc5d   :  { %v2143_v60 = vadd.f32 %v6806_v10, %v2142_v9  ;;  %v2144_v63 = vpop.f32.mrb[17].mxu0  ;;  %v2325_v9 = vld [vmem:[%s7722_s12 + $0x78] sm:$0xff] }
 0xc5e   :  { %v6854_v8 = vpack.c.bf16 %v2325_v9, %v2324_v22  ;;  %v2327_v63 = vld [vmem:[%s7722_s12 + $0x88] sm:$0xff] }
 0xc5f   :  { %v2161_v23 = vmul.f32 0.048770577, %v2143_v60  ;;  %v2326_v60 = vld [vmem:[%s7722_s12 + $0x80] sm:$0xff] }
 0xc60   :  { %4789 = vmatpush1.bf16.msra.mxu0 %v6854_v8 }
 0xc61   :  { %v2162_v49 = vadd.f32 %v2161_v23, %v2160_v41  ;;  %4790 = vmatprep.subr.bf16.mxu0 %v5265_v3  ;;  %v6864_v41 = vpack.c.bf16 %v2327_v63, %v2326_v60  ;;  %v2328_v23 = vld [vmem:[%s7722_s12 + $0x90] sm:$0xff] }
 0xc63   :  { %v2164_v52 = vsub.f32 %v2162_v49, %v2163_v2  ;;  %v2329_v49 = vld [vmem:[%s7722_s12 + $0x98] sm:$0xff] }
 0xc64   :  { %4792 = vmatpush1.bf16.msra.mxu0 %v6864_v41  ;;  %v6873_v2 = vpack.c.bf16 %v2329_v49, %v2328_v23 }
 0xc65   :  { %v2165_v13 = vsub.f32 %v2164_v52, %v6499_v27  ;;  %2169 = vst.msk [vmem:[#allocation2] sm:$0xff] %vm66_vm0, %v2164_v52  ;;  %v2639_v27 = vmul.f32 0.9966722, %v2638_v43  ;;  %4793 = vmatprep.subr.bf16.mxu0 %v5265_v3  ;;  %v6881_v52 = vld [vmem:[%s7724_s13] ss:$0 sm:$0xff] }
 0xc67   :  { %vm2166_vm2 = vcmp.gt.f32.partialorder %v2165_v13, 0.0 }
 0xc68   :  { %v4149_v37 = vsel %vm2166_vm2, 1.0, %v5266_v6  ;;  %4795 = vmatpush1.bf16.msra.mxu0 %v6873_v2 }
 0xc69   :  { %2170 = vst.msk [vmem:[#allocation5] sm:$0xff] %vm66_vm0, %v4149_v37  ;;  %2173 = vst.msk [vmem:[#allocation15] sm:$0xff] %vm66_vm0, %v4149_v37  ;;  %4832 = vmatprep.subr.bf16.mxu0 %v5265_v3  ;;  %v2291_v37 = vld [vmem:[#allocation3] sm:$0xff] }
 0xc70   :  { %v2176_v44 = vld [vmem:[#allocation15] sm:$0xff]  ;;  %v6816_v53 = vld [vmem:[#allocation5] sm:$0xff] }
 0xc71   :  { %2273 = vmatmul.mubr.f32.vlgmr.msra.gmra.mrb[16].mxu1 %v2176_v44  ;;  %2530 = vst.msk [vmem:[#allocation14 + $0x8] sm:$0xff] %vm66_vm0, %v6816_v53  ;;  %v2636_v51 = vmul.f32 0.0327839, %v6816_v53  ;;  %v2640_v33 = vmul.f32 0.003327784, %v6816_v53 }
 0xc72   :  { %4286 = vmatprep.mubr.msk.f32.mxu1 %vm5268_vm4, %v5266_v6  ;;  %v2292_v44 = vmul.f32 0.95122945, %v2291_v37 }
 0xc73   :  { %v2637_v17 = vadd.f32 %v2636_v51, %v2635_v35  ;;  %v2641_v16 = vadd.f32 %v2640_v33, %v2639_v27  ;;  %v2295_v27 = vmul.f32 %v6518_v18, %v6509_v58 }
 0xc75   :  { %v2642_v25 = vmul.f32 1.8, %v2637_v17  ;;  %2658 = vst.msk [vmem:[#allocation8] sm:$0xff] %vm66_vm0, %v2637_v17  ;;  %2659 = vst.msk [vmem:[#allocation9] sm:$0xff] %vm66_vm0, %v2641_v16  ;;  %v2644_v30 = vmul.f32 9.0, %v2641_v16 }
 0xc77   :  { %v2643_v15 = vadd.f32 0.01, %v2642_v25  ;;  %v2766_v25 = vld [vmem:[#allocation10] sm:$0xff] }
 0xc78   :  { %v2767_v5 = vmul.f32 0.9672161, %v2766_v25 }
 0xc79   :  { %v6826_v45 = vadd.f32 %v2644_v30, %v2643_v15  ;;  %v2770_v15 = vld [vmem:[#allocation11] sm:$0xff] }
 0xd44   :  { %v2274_v13 = vpop.f32.mrb[16].mxu1 }
 0xd45   :  { %v2275_v39 = vadd.f32 %v6881_v52, %v2274_v13  ;;  %v2276_v43 = vpop.f32.mrb[17].mxu1  ;;  %v2423_v13 = vld [vmem:[#allocation4] sm:$0xff] }
 0xd46   :  { %v2424_v43 = vmul.f32 0.95122945, %v2423_v13 }
 0xd47   :  { %v2293_v35 = vmul.f32 0.048770577, %v2275_v39 }
 0xd49   :  { %v2294_v51 = vadd.f32 %v2293_v35, %v2292_v44 }
 0xd4b   :  { %v2296_v33 = vsub.f32 %v2294_v51, %v2295_v27  ;;  %v2427_v51 = vmul.f32 %v6609_v46, %v6581_v48  ;;  %v2898_v48 = vld [vmem:[#allocation12] sm:$0xff] }
 0xd4c   :  { %v2899_v25 = vmul.f32 0.9672161, %v2898_v48 }
 0xd4d   :  { %v2297_v17 = vsub.f32 %v2296_v33, %v6518_v18  ;;  %2301 = vst.msk [vmem:[#allocation3] sm:$0xff] %vm66_vm0, %v2296_v33  ;;  %v2771_v18 = vmul.f32 0.9966722, %v2770_v15 }
 0xd4f   :  { %vm2298_vm3 = vcmp.gt.f32.partialorder %v2297_v17, 0.0  ;;  %v2532_v17 = vld [vmem:[#allocation14 + $0x8] sm:$0xff] }
 0xd50   :  { %v4152_v16 = vsel %vm2298_vm3, 1.0, %v5266_v6 }
 0xd51   :  { %2302 = vst.msk [vmem:[#allocation6] sm:$0xff] %vm66_vm0, %v4152_v16  ;;  %2305 = vst.msk [vmem:[#allocation16] sm:$0xff] %vm66_vm0, %v4152_v16 }
 0xd58   :  { %v2308_v30 = vld [vmem:[#allocation16] sm:$0xff] }
 0xd59   :  { %v6891_v20 = vld [vmem:[#allocation6] sm:$0xff]  ;;  %2405 = vmatmul.mubr.f32.vlgmr.msra.gmra.mrb[18].mxu0 %v2308_v30 }
 0xd5a   :  { %2662 = vst.msk [vmem:[#allocation15 + $0x8] sm:$0xff] %vm66_vm0, %v6891_v20  ;;  %v2768_v58 = vmul.f32 0.0327839, %v6891_v20  ;;  %v2772_v29 = vmul.f32 0.003327784, %v6891_v20  ;;  %4834 = vmatpush1.bf16.msra.mxu0 %v6660_v11  ;;  %v2437_v11 = vld [vmem:[%s7692_s7] sm:$0xff] }
 0xd5b   :  { %4835 = vmatprep.subr.bf16.mxu0 %v5265_v3 }
 0xd5c   :  { %v2769_v32 = vadd.f32 %v2768_v58, %v2767_v5  ;;  %v2773_v22 = vadd.f32 %v2772_v29, %v2771_v18 }
 0xd5e   :  { %v2774_v9 = vmul.f32 1.8, %v2769_v32  ;;  %2790 = vst.msk [vmem:[#allocation10] sm:$0xff] %vm66_vm0, %v2769_v32  ;;  %2791 = vst.msk [vmem:[#allocation11] sm:$0xff] %vm66_vm0, %v2773_v22  ;;  %4837 = vmatpush1.bf16.msra.mxu0 %v6666_v12  ;;  %v2776_v63 = vmul.f32 9.0, %v2773_v22  ;;  %v2438_v12 = vld [vmem:[%s7692_s7 + $0x8] sm:$0xff] }
 0xd5f   :  { %4838 = vmatprep.subr.bf16.mxu0 %v5265_v3 }
 0xd60   :  { %v2775_v60 = vadd.f32 0.01, %v2774_v9 }
 0xd61   :  { %v2664_v23 = vld [vmem:[#allocation15 + $0x8] sm:$0xff] }
 0xd62   :  { %4163 = vmatprep.mubr.msk.f32.mxu0 %vm66_vm0, %v2664_v23  ;;  %v6904_v49 = vadd.f32 %v2776_v63, %v2775_v60  ;;  %4840 = vmatpush1.bf16.msra.mxu0 %v6676_v62  ;;  %v6928_v62 = vpack.c.bf16 %v2438_v12, %v2437_v11 }
 0xd63   :  { %4841 = vmatprep.subr.bf16.mxu0 %v5265_v3 }
 0xd64   :  { %4798 = vmatpush3.bf16.msra.mxu1 %v6928_v62 }
 0xd65   :  { %4799 = vmatprep.subr.bf16.mxu1 %v5265_v3 }
 0xd66   :  { %4843 = vmatpush1.bf16.msra.mxu0 %v6686_v47  ;;  %v2439_v47 = vld [vmem:[%s7692_s7 + $0x10] sm:$0xff] }
 0xd67   :  { %4844 = vmatprep.subr.bf16.mxu0 %v5265_v3 }
 0xd6a   :  { %4846 = vmatpush1.bf16.msra.mxu0 %v6696_v21  ;;  %v2440_v21 = vld [vmem:[%s7692_s7 + $0x18] sm:$0xff] }
 0xd6b   :  { %4847 = vmatprep.subr.bf16.mxu0 %v5265_v3 }
 0xd6e   :  { %4849 = vmatpush1.bf16.msra.mxu0 %v6707_v50  ;;  %v6938_v50 = vpack.c.bf16 %v2440_v21, %v2439_v47 }
 0xd6f   :  { %4850 = vmatprep.subr.bf16.mxu0 %v5265_v3 }
 0xd70   :  { %4801 = vmatpush3.bf16.msra.mxu1 %v6938_v50 }
 0xd71   :  { %4802 = vmatprep.subr.bf16.mxu1 %v5265_v3 }
 0xd72   :  { %4852 = vmatpush1.bf16.msra.mxu0 %v6717_v38  ;;  %v2531_v38 = vld [vmem:[#allocation14] sm:$0xff] }
 0xd73   :  { %4853 = vmatprep.subr.bf16.mxu0 %v5265_v3 }
 0xd76   :  { %4855 = vmatpush1.bf16.msra.mxu0 %v6727_v57  ;;  %v4170_v57 = vld [vmem:[%s7720_s0 + $0x30] sm:$0xff] }
 0xd77   :  { %4856 = vmatprep.subr.bf16.mxu0 %v5265_v3  ;;  %3015 = vst.msk [vmem:[#allocation14] sm:$0xff] %vm91_vm1, %v4170_v57  ;;  %v2778_v57 = vld [vmem:[#allocation3] sm:$0xff] }
 0xd7a   :  { %4858 = vmatpush1.bf16.msra.mxu0 %v6737_v0  ;;  %v6949_v0 = vld [vmem:[%s7691_s6] ss:$0 sm:$0xff] }
 0xd7b   :  { %4859 = vmatprep.subr.bf16.mxu0 %v5265_v3 }
 0xd7e   :  { %4861 = vmatpush1.bf16.msra.mxu0 %v6746_v55 }
 0xd7f   :  { %4892 = vmatprep.subr.bf16.mxu0 %v5265_v3 }
 0xe2c   :  { %v2406_v55 = vpop.f32.mrb[18].mxu0 }
 0xe2d   :  { %v2407_v37 = vadd.f32 %v6949_v0, %v2406_v55  ;;  %v2408_v39 = vpop.f32.mrb[19].mxu0 }
 0xe2f   :  { %v2425_v44 = vmul.f32 0.048770577, %v2407_v37  ;;  %v2779_v37 = vmul.f32 0.95122945, %v2778_v57 }
 0xe31   :  { %v2426_v35 = vadd.f32 %v2425_v44, %v2424_v43  ;;  %v2782_v44 = vmul.f32 %v6904_v49, %v6891_v20 }
 0xe33   :  { %v2428_v27 = vsub.f32 %v2426_v35, %v2427_v51 }
 0xe35   :  { %v2429_v33 = vsub.f32 %v2428_v27, %v6609_v46  ;;  %2433 = vst.msk [vmem:[#allocation4] sm:$0xff] %vm66_vm0, %v2428_v27  ;;  %2524 = vst.msk [vmem:[#allocation17 + $0x90] sm:$0xff] %vm66_vm0, %v2428_v27  ;;  %4287 = vmatmul.mubr.msk.f32.vlgmr.msra.gmra.mrb[18].mxu1 %vm66_vm0, %v2428_v27  ;;  %v2902_v46 = vld [vmem:[#allocation13] sm:$0xff]  ;;  %v3257_v27 = vld [vmem:[#allocation11] sm:$0xff] }
 0xe36   :  { %4804 = vmatpush1.bf16.msra.mxu1 %v6535_v4  ;;  %4160 = vmatprep.mubr.msk.f32.mxu1 %vm66_vm0, %v2532_v17  ;;  %v2903_v30 = vmul.f32 0.9966722, %v2902_v46 }
 0xe37   :  { %vm2430_vm5 = vcmp.gt.f32.partialorder %v2429_v33, 0.0  ;;  %4805 = vmatprep.subr.bf16.mxu1 %v5265_v3 }
 0xe38   :  { %v4155_v16 = vsel %vm2430_vm5, 1.0, %v5266_v6 }
 0xe39   :  { %2434 = vst.msk [vmem:[#allocation7] sm:$0xff] %vm66_vm0, %v4155_v16  ;;  %2523 = vst.msk [vmem:[#allocation17 + $0x88] sm:$0xff] %vm66_vm0, %v4155_v16 }
 0xe3a   :  { %4807 = vmatpush1.bf16.msra.mxu1 %v6549_v54 }
 0xe3b   :  { %4808 = vmatprep.subr.bf16.mxu1 %v5265_v3 }
 0xe3e   :  { %4810 = vmatpush1.bf16.msra.mxu1 %v6562_v14 }
 0xe3f   :  { %4811 = vmatprep.subr.bf16.mxu1 %v5265_v3 }
 0xe40   :  { %v6968_v4 = vld [vmem:[#allocation7] sm:$0xff] }
 0xe41   :  { %2794 = vst.msk [vmem:[#allocation16 + $0x8] sm:$0xff] %vm66_vm0, %v6968_v4  ;;  %v2900_v15 = vmul.f32 0.0327839, %v6968_v4  ;;  %v2904_v5 = vmul.f32 0.003327784, %v6968_v4 }
 0xe42   :  { %4813 = vmatpush1.bf16.msra.mxu1 %v6572_v1 }
 0xe43   :  { %4814 = vmatprep.subr.bf16.mxu1 %v5265_v3  ;;  %v2901_v54 = vadd.f32 %v2900_v15, %v2899_v25  ;;  %v2905_v14 = vadd.f32 %v2904_v5, %v2903_v30 }
 0xe45   :  { %v2906_v58 = vmul.f32 1.8, %v2901_v54  ;;  %2922 = vst.msk [vmem:[#allocation12] sm:$0xff] %vm66_vm0, %v2901_v54  ;;  %2923 = vst.msk [vmem:[#allocation13] sm:$0xff] %vm66_vm0, %v2905_v14  ;;  %v2908_v29 = vmul.f32 9.0, %v2905_v14 }
 0xe46   :  { %4816 = vmatpush1.bf16.msra.mxu1 %v6588_v56  ;;  %v7018_v56 = vld [vmem:[%s7693_s8] ss:$0 sm:$0xff] }
 0xe47   :  { %4817 = vmatprep.subr.bf16.mxu1 %v5265_v3  ;;  %v2907_v18 = vadd.f32 0.01, %v2906_v58  ;;  %v7065_v58 = vld [vmem:[#allocation14] sm:$0xff] }
 0xe48   :  { %v2796_v1 = vld [vmem:[#allocation16 + $0x8] sm:$0xff] }
 0xe49   :  { %v6980_v32 = vadd.f32 %v2908_v29, %v2907_v18  ;;  %v4182_v18 = vld [vmem:[%s7720_s0 + $0x38] sm:$0xff] }
 0xe4a   :  { %4819 = vmatpush1.bf16.msra.mxu1 %v6600_v28  ;;  %3502 = vst.msk [vmem:[#allocation14] sm:$0xff] %vm91_vm1, %v4182_v18 }
 0xe4b   :  { %4820 = vmatprep.subr.bf16.mxu1 %v5265_v3  ;;  %3012 = vst.msk [vmem:[#allocation17 + $0xb8] sm:$0xff] %vm66_vm0, %v6980_v32 }
 0xe4e   :  { %4822 = vmatpush1.bf16.msra.mxu1 %v6612_v59 }
 0xe4f   :  { %4823 = vmatprep.subr.bf16.mxu1 %v5265_v3 }
 0xe52   :  { %4825 = vmatpush1.bf16.msra.mxu1 %v6624_v36 }
 0xe53   :  { %4826 = vmatprep.subr.bf16.mxu1 %v5265_v3 }
 0xe56   :  { %4828 = vmatpush1.bf16.msra.mxu1 %v6634_v42 }
 0xe57   :  { %4829 = vmatprep.subr.bf16.mxu1 %v5265_v3 }
 0xe5a   :  { %4831 = vmatpush1.bf16.msra.mxu1 %v6644_v7  ;;  %v2646_v7 = vld [vmem:[#allocation2] sm:$0xff] }
 0xe5b   :  { %4862 = vmatprep.subr.bf16.mxu1 %v5265_v3 }
 0xe5d   :  { %2628 = vmatmul.mubr.f32.vlgmr.msra.gmra.mrb[20].mxu1 %v2531_v38 }
 0xe5e   :  { %4166 = vmatprep.mubr.msk.f32.mxu1 %vm66_vm0, %v2796_v1  ;;  %4864 = vmatpush1.bf16.msra.mxu1 %v6760_v34  ;;  %v2910_v1 = vld [vmem:[#allocation4] sm:$0xff] }
 0xe5f   :  { %4865 = vmatprep.subr.bf16.mxu1 %v5265_v3 }
 0xe62   :  { %4867 = vmatpush1.bf16.msra.mxu1 %v6766_v24 }
 0xe63   :  { %4868 = vmatprep.subr.bf16.mxu1 %v5265_v3 }
 0xe66   :  { %4870 = vmatpush1.bf16.msra.mxu1 %v6776_v19  ;;  %v2647_v19 = vmul.f32 0.95122945, %v2646_v7  ;;  %v3020_v7 = vld [vmem:[%s7719_s26] sm:$0xff] }
 0xe67   :  { %4871 = vmatprep.subr.bf16.mxu1 %v5265_v3 }
 0xe6a   :  { %4873 = vmatpush1.bf16.msra.mxu1 %v6786_v61 }
 0xe6b   :  { %4874 = vmatprep.subr.bf16.mxu1 %v5265_v3 }
 0xe6e   :  { %4876 = vmatpush1.bf16.msra.mxu1 %v6796_v40 }
 0xe6f   :  { %4877 = vmatprep.subr.bf16.mxu1 %v5265_v3 }
 0xe72   :  { %4879 = vmatpush1.bf16.msra.mxu1 %v6834_v26  ;;  %v2650_v26 = vmul.f32 %v6826_v45, %v6816_v53 }
 0xe73   :  { %4880 = vmatprep.subr.bf16.mxu1 %v5265_v3 }
 0xe76   :  { %4882 = vmatpush1.bf16.msra.mxu1 %v6844_v31 }
 0xe77   :  { %4883 = vmatprep.subr.bf16.mxu1 %v5265_v3 }
 0xe7a   :  { %4885 = vmatpush1.bf16.msra.mxu1 %v6854_v8 }
 0xe7b   :  { %4886 = vmatprep.subr.bf16.mxu1 %v5265_v3 }
 0xe7e   :  { %4888 = vmatpush1.bf16.msra.mxu1 %v6864_v41 }
 0xe7f   :  { %4889 = vmatprep.subr.bf16.mxu1 %v5265_v3 }
 0xe82   :  { %4891 = vmatpush1.bf16.msra.mxu1 %v6873_v2  ;;  %v3125_v2 = vld [vmem:[#allocation9] sm:$0xff] }
 0xe83   :  { %4928 = vmatprep.subr.bf16.mxu1 %v5265_v3 }
 0xf08   :  { %v2517_v28 = vpop.f32.mrb[18].mxu1 }
 0xf09   :  { %v2518_v59 = vadd.f32 %v7018_v56, %v2517_v28  ;;  %v4288_v36 = vpop.f32.mrb[19].mxu1 }
 0xf0a   :  { %v2911_v36 = vmul.f32 0.95122945, %v2910_v1  ;;  %v3153_v1 = vld [vmem:[%s7721_s5 + $0x8] sm:$0xff] }
 0xf0b   :  { %2522 = vst.msk [vmem:[#allocation17 + $0x80] sm:$0xff] %vm573_vm6, %v2518_v59 }
 0xf30   :  { %v2629_v42 = vpop.f32.mrb[20].mxu1 }
 0xf31   :  { %v2630_v34 = vadd.f32 %v6806_v10, %v2629_v42  ;;  %v2631_v24 = vpop.f32.mrb[21].mxu1  ;;  %v3121_v10 = vld [vmem:[#allocation8] sm:$0xff] }
 0xf32   :  { %v3122_v60 = vmul.f32 0.9672161, %v3121_v10 }
 0xf33   :  { %v2648_v61 = vmul.f32 0.048770577, %v2630_v34  ;;  %v3021_v34 = vld [vmem:[%s7719_s26 + $0x8] sm:$0xff] }
 0xf35   :  { %v2649_v40 = vadd.f32 %v2648_v61, %v2647_v19  ;;  %v2914_v19 = vmul.f32 %v6980_v32, %v6968_v4  ;;  %v7080_v61 = vpack.c.bf16 %v3021_v34, %v3020_v7  ;;  %v3157_v7 = vld [vmem:[%s7721_s5 + $0x28] sm:$0xff] }
 0xf37   :  { %v2651_v31 = vsub.f32 %v2649_v40, %v2650_v26  ;;  %v3023_v26 = vld [vmem:[%s7719_s26 + $0x18] sm:$0xff] }
 0xf39   :  { %v2652_v8 = vsub.f32 %v2651_v31, %v6826_v45  ;;  %2656 = vst.msk [vmem:[#allocation2] sm:$0xff] %vm66_vm0, %v2651_v31  ;;  %v3126_v45 = vmul.f32 0.9966722, %v3125_v2 }
 0xf3b   :  { %vm2653_vm7 = vcmp.gt.f32.partialorder %v2652_v8, 0.0 }
 0xf3c   :  { %v4161_v41 = vsel %vm2653_vm7, 1.0, %v5266_v6 }
 0xf3d   :  { %2657 = vst.msk [vmem:[#allocation5] sm:$0xff] %vm66_vm0, %v4161_v41  ;;  %2660 = vst.msk [vmem:[#allocation15] sm:$0xff] %vm66_vm0, %v4161_v41  ;;  %v3025_v41 = vld [vmem:[%s7719_s26 + $0x28] sm:$0xff] }
 0xf44   :  { %v2663_v22 = vld [vmem:[#allocation15] sm:$0xff]  ;;  %v7030_v9 = vld [vmem:[#allocation5] sm:$0xff] }
 0xf45   :  { %2760 = vmatmul.mubr.f32.vlgmr.msra.gmra.mrb[20].mxu0 %v2663_v22  ;;  %3017 = vst.msk [vmem:[#allocation14 + $0x8] sm:$0xff] %vm66_vm0, %v7030_v9  ;;  %v3123_v53 = vmul.f32 0.0327839, %v7030_v9  ;;  %v3127_v63 = vmul.f32 0.003327784, %v7030_v9  ;;  %v3026_v22 = vld [vmem:[%s7719_s26 + $0x30] sm:$0xff] }
 0xf46   :  { %4894 = vmatpush3.bf16.msra.mxu0 %v6928_v62  ;;  %4297 = vmatprep.mubr.msk.f32.mxu0 %vm5268_vm4, %v5266_v6 }
 0xf47   :  { %4895 = vmatprep.subr.bf16.mxu0 %v5265_v3  ;;  %v3124_v23 = vadd.f32 %v3123_v53, %v3122_v60  ;;  %v3128_v11 = vadd.f32 %v3127_v63, %v3126_v45  ;;  %v3027_v60 = vld [vmem:[%s7719_s26 + $0x38] sm:$0xff]  ;;  %v3385_v53 = vld [vmem:[#allocation12] sm:$0xff] }
 0xf48   :  { %v7117_v45 = vpack.c.bf16 %v3027_v60, %v3026_v22  ;;  %v3389_v63 = vld [vmem:[#allocation13] sm:$0xff]  ;;  %v3165_v22 = vld [vmem:[%s7721_s5 + $0x68] sm:$0xff] }
 0xf49   :  { %v3129_v12 = vmul.f32 1.8, %v3124_v23  ;;  %3145 = vst.msk [vmem:[#allocation8] sm:$0xff] %vm66_vm0, %v3124_v23  ;;  %3146 = vst.msk [vmem:[#allocation9] sm:$0xff] %vm66_vm0, %v3128_v11  ;;  %v3131_v21 = vmul.f32 9.0, %v3128_v11  ;;  %v3028_v23 = vld [vmem:[%s7719_s26 + $0x40] sm:$0xff] }
 0xf4a   :  { %4897 = vmatpush3.bf16.msra.mxu0 %v6938_v50  ;;  %v3029_v11 = vld [vmem:[%s7719_s26 + $0x48] sm:$0xff] }
 0xf4b   :  { %4898 = vmatprep.subr.bf16.mxu0 %v5265_v3  ;;  %v3130_v47 = vadd.f32 0.01, %v3129_v12 }
 0xf4c   :  { %v3019_v4 = vld [vmem:[#allocation14 + $0x8] sm:$0xff] }
 0xf4d   :  { %v7044_v38 = vadd.f32 %v3131_v21, %v3130_v47  ;;  %v3386_v47 = vmul.f32 0.9672161, %v3385_v53  ;;  %v3166_v53 = vld [vmem:[%s7721_s5 + $0x70] sm:$0xff] }
0x1018   :  { %v2761_v62 = vpop.f32.mrb[20].mxu0 }
0x1019   :  { %v2762_v55 = vadd.f32 %v6881_v52, %v2761_v62  ;;  %v2763_v13 = vpop.f32.mrb[21].mxu0  ;;  %v3253_v52 = vld [vmem:[#allocation10] sm:$0xff]  ;;  %v3390_v62 = vmul.f32 0.9966722, %v3389_v63  ;;  %v3167_v63 = vld [vmem:[%s7721_s5 + $0x78] sm:$0xff] }
0x101a   :  { %v3254_v16 = vmul.f32 0.9672161, %v3253_v52  ;;  %v3030_v13 = vld [vmem:[%s7719_s26 + $0x50] sm:$0xff] }
0x101b   :  { %v2780_v39 = vmul.f32 0.048770577, %v2762_v55  ;;  %v7133_v55 = vpack.c.bf16 %v3029_v11, %v3028_v23  ;;  %v7272_v23 = vpack.c.bf16 %v3167_v63, %v3166_v53  ;;  %v3168_v11 = vld [vmem:[%s7721_s5 + $0x80] sm:$0xff]  ;;  %v3608_v53 = vld [vmem:[#allocation8] sm:$0xff]  ;;  %v3612_v63 = vld [vmem:[#allocation9] sm:$0xff] }
0x101d   :  { %v2781_v43 = vadd.f32 %v2780_v39, %v2779_v37  ;;  %v3031_v37 = vld [vmem:[%s7719_s26 + $0x58] sm:$0xff] }
0x101f   :  { %v2783_v35 = vsub.f32 %v2781_v43, %v2782_v44 }
0x1021   :  { %v2784_v50 = vsub.f32 %v2783_v35, %v6904_v49  ;;  %2788 = vst.msk [vmem:[#allocation3] sm:$0xff] %vm66_vm0, %v2783_v35  ;;  %v3258_v49 = vmul.f32 0.9966722, %v3257_v27  ;;  %v7145_v35 = vpack.c.bf16 %v3031_v37, %v3030_v13  ;;  %v3284_v37 = vld [vmem:[%s7722_s12] sm:$0xff] }
0x1023   :  { %vm2785_vm8 = vcmp.gt.f32.partialorder %v2784_v50, 0.0  ;;  %v3032_v50 = vld [vmem:[%s7719_s26 + $0x60] sm:$0xff] }
0x1024   :  { %v4164_v51 = vsel %vm2785_vm8, 1.0, %v5266_v6 }
0x1025   :  { %2789 = vst.msk [vmem:[#allocation6] sm:$0xff] %vm66_vm0, %v4164_v51  ;;  %2792 = vst.msk [vmem:[#allocation16] sm:$0xff] %vm66_vm0, %v4164_v51  ;;  %v3033_v51 = vld [vmem:[%s7719_s26 + $0x68] sm:$0xff] }
0x102c   :  { %v2795_v33 = vld [vmem:[#allocation16] sm:$0xff] }
0x102d   :  { %v7054_v17 = vld [vmem:[#allocation6] sm:$0xff]  ;;  %2892 = vmatmul.mubr.f32.vlgmr.msra.gmra.mrb[22].mxu1 %v2795_v33 }
0x102e   :  { %3149 = vst.msk [vmem:[#allocation15 + $0x8] sm:$0xff] %vm66_vm0, %v7054_v17  ;;  %v3255_v20 = vmul.f32 0.0327839, %v7054_v17  ;;  %v3259_v48 = vmul.f32 0.003327784, %v7054_v17 }
0x1030   :  { %v3256_v46 = vadd.f32 %v3255_v20, %v3254_v16  ;;  %v3260_v25 = vadd.f32 %v3259_v48, %v3258_v49  ;;  %v7157_v16 = vpack.c.bf16 %v3033_v51, %v3032_v50  ;;  %v3034_v20 = vld [vmem:[%s7719_s26 + $0x70] sm:$0xff]  ;;  %v3035_v49 = vld [vmem:[%s7719_s26 + $0x78] sm:$0xff] }
0x1031   :  { %v7169_v48 = vpack.c.bf16 %v3035_v49, %v3034_v20  ;;  %v3287_v50 = vld [vmem:[%s7722_s12 + $0x18] sm:$0xff]  ;;  %v3290_v49 = vld [vmem:[%s7722_s12 + $0x30] sm:$0xff] }
0x1032   :  { %v3261_v15 = vmul.f32 1.8, %v3256_v46  ;;  %3277 = vst.msk [vmem:[#allocation10] sm:$0xff] %vm66_vm0, %v3256_v46  ;;  %3278 = vst.msk [vmem:[#allocation11] sm:$0xff] %vm66_vm0, %v3260_v25  ;;  %v3263_v5 = vmul.f32 9.0, %v3260_v25  ;;  %v3036_v46 = vld [vmem:[%s7719_s26 + $0x80] sm:$0xff] }
0x1033   :  { %v3037_v25 = vld [vmem:[%s7719_s26 + $0x88] sm:$0xff] }
0x1034   :  { %v3262_v30 = vadd.f32 0.01, %v3261_v15  ;;  %v7179_v15 = vpack.c.bf16 %v3037_v25, %v3036_v46  ;;  %v3291_v46 = vld [vmem:[%s7722_s12 + $0x38] sm:$0xff] }
0x1035   :  { %v3151_v54 = vld [vmem:[#allocation15 + $0x8] sm:$0xff]  ;;  %v7331_v25 = vpack.c.bf16 %v3291_v46, %v3290_v49  ;;  %v3294_v49 = vld [vmem:[%s7722_s12 + $0x50] sm:$0xff] }
0x1036   :  { %4175 = vmatprep.mubr.msk.f32.mxu1 %vm66_vm0, %v3151_v54  ;;  %v7063_v14 = vadd.f32 %v3263_v5, %v3262_v30  ;;  %v3038_v30 = vld [vmem:[%s7719_s26 + $0x90] sm:$0xff]  ;;  %v3039_v5 = vld [vmem:[%s7719_s26 + $0x98] sm:$0xff] }
0x1037   :  { %v7189_v54 = vpack.c.bf16 %v3039_v5, %v3038_v30  ;;  %v3292_v30 = vld [vmem:[%s7722_s12 + $0x40] sm:$0xff]  ;;  %v3293_v5 = vld [vmem:[%s7722_s12 + $0x48] sm:$0xff]  ;;  %v3295_v46 = vld [vmem:[%s7722_s12 + $0x58] sm:$0xff] }
0x1100   :  { %v2893_v29 = vpop.f32.mrb[22].mxu1 }
0x1101   :  { %v2894_v28 = vadd.f32 %v6949_v0, %v2893_v29  ;;  %v2895_v59 = vpop.f32.mrb[23].mxu1  ;;  %v3022_v0 = vld [vmem:[%s7719_s26 + $0x10] sm:$0xff]  ;;  %v3152_v29 = vld [vmem:[%s7721_s5] sm:$0xff] }
0x1102   :  { %v7094_v8 = vpack.c.bf16 %v3023_v26, %v3022_v0  ;;  %v7205_v59 = vpack.c.bf16 %v3153_v1, %v3152_v29  ;;  %v3160_v0 = vld [vmem:[%s7721_s5 + $0x40] sm:$0xff]  ;;  %v3161_v26 = vld [vmem:[%s7721_s5 + $0x48] sm:$0xff] }
0x1103   :  { %v2912_v42 = vmul.f32 0.048770577, %v2894_v28  ;;  %v3154_v28 = vld [vmem:[%s7721_s5 + $0x10] sm:$0xff] }
0x1104   :  { %4930 = vmatpush1.bf16.msra.mxu1 %v7205_v59 }
0x1105   :  { %v2913_v24 = vadd.f32 %v2912_v42, %v2911_v36  ;;  %4931 = vmatprep.subr.bf16.mxu1 %v5265_v3  ;;  %v3156_v42 = vld [vmem:[%s7721_s5 + $0x20] sm:$0xff] }
0x1106   :  { %v7221_v34 = vpack.c.bf16 %v3157_v7, %v3156_v42  ;;  %v3133_v7 = vld [vmem:[#allocation2] sm:$0xff] }
0x1107   :  { %v2915_v40 = vsub.f32 %v2913_v24, %v2914_v19  ;;  %v3158_v24 = vld [vmem:[%s7721_s5 + $0x30] sm:$0xff]  ;;  %v3159_v19 = vld [vmem:[%s7721_s5 + $0x38] sm:$0xff] }
0x1109   :  { %v2916_v31 = vsub.f32 %v2915_v40, %v6980_v32  ;;  %2920 = vst.msk [vmem:[#allocation4] sm:$0xff] %vm66_vm0, %v2915_v40  ;;  %3011 = vst.msk [vmem:[#allocation17 + $0xb0] sm:$0xff] %vm66_vm0, %v2915_v40  ;;  %4298 = vmatmul.mubr.msk.f32.vlgmr.msra.gmra.mrb[22].mxu0 %vm66_vm0, %v2915_v40  ;;  %v3024_v32 = vld [vmem:[%s7719_s26 + $0x20] sm:$0xff]  ;;  %v7231_v40 = vpack.c.bf16 %v3159_v19, %v3158_v24 }
0x110a   :  { %4900 = vmatpush1.bf16.msra.mxu0 %v7080_v61  ;;  %4172 = vmatprep.mubr.msk.f32.mxu0 %vm66_vm0, %v3019_v4  ;;  %v7107_v2 = vpack.c.bf16 %v3025_v41, %v3024_v32  ;;  %v3162_v4 = vld [vmem:[%s7721_s5 + $0x50] sm:$0xff]  ;;  %v3163_v32 = vld [vmem:[%s7721_s5 + $0x58] sm:$0xff] }
0x110b   :  { %vm2917_vm1 = vcmp.gt.f32.partialorder %v2916_v31, 0.0  ;;  %4901 = vmatprep.subr.bf16.mxu0 %v5265_v3  ;;  %v7241_v31 = vpack.c.bf16 %v3161_v26, %v3160_v0  ;;  %v7252_v41 = vpack.c.bf16 %v3163_v32, %v3162_v4  ;;  %v3134_v0 = vmul.f32 0.95122945, %v3133_v7 }
0x110c   :  { %v4167_v10 = vsel %vm2917_vm1, 1.0, %v5266_v6  ;;  %v3137_v32 = vmul.f32 %v7044_v38, %v7030_v9 }
0x110d   :  { %2921 = vst.msk [vmem:[#allocation7] sm:$0xff] %vm66_vm0, %v4167_v10  ;;  %3010 = vst.msk [vmem:[#allocation17 + $0xa8] sm:$0xff] %vm66_vm0, %v4167_v10  ;;  %v3164_v10 = vld [vmem:[%s7721_s5 + $0x60] sm:$0xff] }
0x110e   :  { %4903 = vmatpush1.bf16.msra.mxu0 %v7094_v8  ;;  %v7262_v60 = vpack.c.bf16 %v3165_v22, %v3164_v10 }
0x110f   :  { %4904 = vmatprep.subr.bf16.mxu0 %v5265_v3 }
0x1112   :  { %4906 = vmatpush1.bf16.msra.mxu0 %v7107_v2 }
0x1113   :  { %4907 = vmatprep.subr.bf16.mxu0 %v5265_v3 }
0x1114   :  { %v7126_v12 = vld [vmem:[#allocation7] sm:$0xff] }
0x1115   :  { %3281 = vst.msk [vmem:[#allocation16 + $0x8] sm:$0xff] %vm66_vm0, %v7126_v12  ;;  %v3387_v21 = vmul.f32 0.0327839, %v7126_v12  ;;  %v3391_v57 = vmul.f32 0.003327784, %v7126_v12 }
0x1116   :  { %4909 = vmatpush1.bf16.msra.mxu0 %v7117_v45 }
0x1117   :  { %4910 = vmatprep.subr.bf16.mxu0 %v5265_v3  ;;  %v3388_v39 = vadd.f32 %v3387_v21, %v3386_v47  ;;  %v3392_v43 = vadd.f32 %v3391_v57, %v3390_v62  ;;  %v3169_v47 = vld [vmem:[%s7721_s5 + $0x88] sm:$0xff]  ;;  %v3170_v62 = vld [vmem:[%s7721_s5 + $0x90] sm:$0xff]  ;;  %v3171_v57 = vld [vmem:[%s7721_s5 + $0x98] sm:$0xff] }
0x1118   :  { %v7282_v21 = vpack.c.bf16 %v3169_v47, %v3168_v11  ;;  %v7291_v13 = vpack.c.bf16 %v3171_v57, %v3170_v62  ;;  %v3609_v62 = vmul.f32 0.9672161, %v3608_v53 }
0x1119   :  { %v3393_v44 = vmul.f32 1.8, %v3388_v39  ;;  %3409 = vst.msk [vmem:[#allocation12] sm:$0xff] %vm66_vm0, %v3388_v39  ;;  %3410 = vst.msk [vmem:[#allocation13] sm:$0xff] %vm66_vm0, %v3392_v43  ;;  %v3395_v27 = vmul.f32 9.0, %v3392_v43  ;;  %v3285_v39 = vld [vmem:[%s7722_s12 + $0x8] sm:$0xff] }
0x111a   :  { %4912 = vmatpush1.bf16.msra.mxu0 %v7133_v55  ;;  %v3286_v43 = vld [vmem:[%s7722_s12 + $0x10] sm:$0xff] }
0x111b   :  { %4913 = vmatprep.subr.bf16.mxu0 %v5265_v3  ;;  %v3394_v52 = vadd.f32 0.01, %v3393_v44  ;;  %v7305_v44 = vpack.c.bf16 %v3285_v39, %v3284_v37  ;;  %v7311_v51 = vpack.c.bf16 %v3287_v50, %v3286_v43 }
0x111c   :  { %v3283_v18 = vld [vmem:[#allocation16 + $0x8] sm:$0xff] }
0x111d   :  { %v7154_v33 = vadd.f32 %v3395_v27, %v3394_v52  ;;  %v3288_v52 = vld [vmem:[%s7722_s12 + $0x20] sm:$0xff]  ;;  %v3289_v27 = vld [vmem:[%s7722_s12 + $0x28] sm:$0xff] }
0x111e   :  { %4915 = vmatpush1.bf16.msra.mxu0 %v7145_v35  ;;  %v7321_v20 = vpack.c.bf16 %v3289_v27, %v3288_v52 }
0x111f   :  { %4916 = vmatprep.subr.bf16.mxu0 %v5265_v3  ;;  %3499 = vst.msk [vmem:[#allocation17 + $0xd8] sm:$0xff] %vm66_vm0, %v7154_v33 }
0x1122   :  { %4918 = vmatpush1.bf16.msra.mxu0 %v7157_v16 }
0x1123   :  { %4919 = vmatprep.subr.bf16.mxu0 %v5265_v3 }
0x1126   :  { %4921 = vmatpush1.bf16.msra.mxu0 %v7169_v48 }
0x1127   :  { %4922 = vmatprep.subr.bf16.mxu0 %v5265_v3 }
0x112a   :  { %4924 = vmatpush1.bf16.msra.mxu0 %v7179_v15 }
0x112b   :  { %4925 = vmatprep.subr.bf16.mxu0 %v5265_v3 }
0x112e   :  { %4927 = vmatpush1.bf16.msra.mxu0 %v7189_v54 }
0x112f   :  { %4958 = vmatprep.subr.bf16.mxu0 %v5265_v3 }
0x1131   :  { %3115 = vmatmul.mubr.f32.vlgmr.msra.gmra.mrb[24].mxu0 %v7065_v58  ;;  %v3155_v58 = vld [vmem:[%s7721_s5 + $0x18] sm:$0xff] }
0x1132   :  { %4178 = vmatprep.mubr.msk.f32.mxu0 %vm66_vm0, %v3283_v18  ;;  %v7211_v36 = vpack.c.bf16 %v3155_v58, %v3154_v28  ;;  %4960 = vmatpush1.bf16.msra.mxu0 %v7305_v44  ;;  %v7341_v18 = vpack.c.bf16 %v3293_v5, %v3292_v30  ;;  %v7351_v58 = vld [vmem:[%s7723_s25] ss:$0 sm:$0xff]  ;;  %v7379_v30 = vpack.c.bf16 %v3295_v46, %v3294_v49 }
0x1133   :  { %4961 = vmatprep.subr.bf16.mxu0 %v5265_v3  ;;  %v3296_v5 = vld [vmem:[%s7722_s12 + $0x60] sm:$0xff] }
0x1134   :  { %4933 = vmatpush1.bf16.msra.mxu1 %v7211_v36 }
0x1135   :  { %4934 = vmatprep.subr.bf16.mxu1 %v5265_v3 }
0x1136   :  { %4963 = vmatpush1.bf16.msra.mxu0 %v7311_v51 }
0x1137   :  { %4964 = vmatprep.subr.bf16.mxu0 %v5265_v3 }
0x1138   :  { %4936 = vmatpush1.bf16.msra.mxu1 %v7221_v34 }
0x1139   :  { %4937 = vmatprep.subr.bf16.mxu1 %v5265_v3 }
0x113a   :  { %4966 = vmatpush1.bf16.msra.mxu0 %v7321_v20 }
0x113b   :  { %4967 = vmatprep.subr.bf16.mxu0 %v5265_v3 }
0x113c   :  { %4939 = vmatpush1.bf16.msra.mxu1 %v7231_v40 }
0x113d   :  { %4940 = vmatprep.subr.bf16.mxu1 %v5265_v3 }
0x113e   :  { %4969 = vmatpush1.bf16.msra.mxu0 %v7331_v25 }
0x113f   :  { %4970 = vmatprep.subr.bf16.mxu0 %v5265_v3 }
0x1140   :  { %4942 = vmatpush1.bf16.msra.mxu1 %v7241_v31 }
0x1141   :  { %4943 = vmatprep.subr.bf16.mxu1 %v5265_v3 }
0x1142   :  { %4972 = vmatpush1.bf16.msra.mxu0 %v7341_v18 }
0x1143   :  { %4973 = vmatprep.subr.bf16.mxu0 %v5265_v3 }
0x1144   :  { %4945 = vmatpush1.bf16.msra.mxu1 %v7252_v41 }
0x1145   :  { %4946 = vmatprep.subr.bf16.mxu1 %v5265_v3 }
0x1146   :  { %4975 = vmatpush1.bf16.msra.mxu0 %v7379_v30 }
0x1147   :  { %4976 = vmatprep.subr.bf16.mxu0 %v5265_v3 }
0x1148   :  { %4948 = vmatpush1.bf16.msra.mxu1 %v7262_v60 }
0x1149   :  { %4949 = vmatprep.subr.bf16.mxu1 %v5265_v3 }
0x114c   :  { %4951 = vmatpush1.bf16.msra.mxu1 %v7272_v23 }
0x114d   :  { %4952 = vmatprep.subr.bf16.mxu1 %v5265_v3 }
0x1150   :  { %4954 = vmatpush1.bf16.msra.mxu1 %v7282_v21 }
0x1151   :  { %4955 = vmatprep.subr.bf16.mxu1 %v5265_v3 }
0x1154   :  { %4957 = vmatpush1.bf16.msra.mxu1 %v7291_v13 }
0x1155   :  { %4988 = vmatprep.subr.bf16.mxu1 %v5265_v3 }
0x11dc   :  { %v3004_v29 = vpop.f32.mrb[22].mxu0 }
0x11dd   :  { %v3005_v1 = vadd.f32 %v7018_v56, %v3004_v29  ;;  %v4299_v28 = vpop.f32.mrb[23].mxu0  ;;  %v3297_v29 = vld [vmem:[%s7722_s12 + $0x68] sm:$0xff] }
0x11de   :  { %v3298_v28 = vld [vmem:[%s7722_s12 + $0x70] sm:$0xff] }
0x11df   :  { %3009 = vst.msk [vmem:[#allocation17 + $0xa0] sm:$0xff] %vm573_vm6, %v3005_v1  ;;  %v7389_v1 = vpack.c.bf16 %v3297_v29, %v3296_v5 }
0x11e1   :  { %4978 = vmatpush1.bf16.msra.mxu0 %v7389_v1 }
0x11e2   :  { %4979 = vmatprep.subr.bf16.mxu0 %v5265_v3 }
0x1204   :  { %v3116_v42 = vpop.f32.mrb[24].mxu0 }
0x1205   :  { %v3117_v24 = vadd.f32 %v7351_v58, %v3116_v42  ;;  %v3118_v19 = vpop.f32.mrb[25].mxu0  ;;  %v3299_v42 = vld [vmem:[%s7722_s12 + $0x78] sm:$0xff] }
0x1206   :  { %v7399_v7 = vpack.c.bf16 %v3299_v42, %v3298_v28  ;;  %v3301_v19 = vld [vmem:[%s7722_s12 + $0x88] sm:$0xff] }
0x1207   :  { %v3135_v26 = vmul.f32 0.048770577, %v3117_v24  ;;  %v3300_v24 = vld [vmem:[%s7722_s12 + $0x80] sm:$0xff] }
0x1208   :  { %4981 = vmatpush1.bf16.msra.mxu0 %v7399_v7 }
0x1209   :  { %v3136_v4 = vadd.f32 %v3135_v26, %v3134_v0  ;;  %4982 = vmatprep.subr.bf16.mxu0 %v5265_v3  ;;  %v7409_v0 = vpack.c.bf16 %v3301_v19, %v3300_v24  ;;  %v3302_v26 = vld [vmem:[%s7722_s12 + $0x90] sm:$0xff] }
0x120b   :  { %v3138_v56 = vsub.f32 %v3136_v4, %v3137_v32  ;;  %v3303_v4 = vld [vmem:[%s7722_s12 + $0x98] sm:$0xff] }
0x120c   :  { %4984 = vmatpush1.bf16.msra.mxu0 %v7409_v0  ;;  %v7418_v32 = vpack.c.bf16 %v3303_v4, %v3302_v26 }
0x120d   :  { %v3139_v10 = vsub.f32 %v3138_v56, %v7044_v38  ;;  %3143 = vst.msk [vmem:[#allocation2] sm:$0xff] %vm66_vm0, %v3138_v56  ;;  %v3613_v38 = vmul.f32 0.9966722, %v3612_v63  ;;  %4985 = vmatprep.subr.bf16.mxu0 %v5265_v3  ;;  %v7426_v56 = vld [vmem:[%s7724_s13] ss:$0 sm:$0xff] }
0x120f   :  { %vm3140_vm9 = vcmp.gt.f32.partialorder %v3139_v10, 0.0 }
0x1210   :  { %v4173_v22 = vsel %vm3140_vm9, 1.0, %v5266_v6  ;;  %4987 = vmatpush1.bf16.msra.mxu0 %v7418_v32 }
0x1211   :  { %3144 = vst.msk [vmem:[#allocation5] sm:$0xff] %vm66_vm0, %v4173_v22  ;;  %3147 = vst.msk [vmem:[#allocation15] sm:$0xff] %vm66_vm0, %v4173_v22  ;;  %5024 = vmatprep.subr.bf16.mxu0 %v5265_v3  ;;  %v3265_v22 = vld [vmem:[#allocation3] sm:$0xff] }
0x1218   :  { %v3150_v11 = vld [vmem:[#allocation15] sm:$0xff]  ;;  %v7361_v47 = vld [vmem:[#allocation5] sm:$0xff] }
0x1219   :  { %3247 = vmatmul.mubr.f32.vlgmr.msra.gmra.mrb[24].mxu1 %v3150_v11  ;;  %3504 = vst.msk [vmem:[#allocation14 + $0x8] sm:$0xff] %vm66_vm0, %v7361_v47  ;;  %v3610_v9 = vmul.f32 0.0327839, %v7361_v47  ;;  %v3614_v57 = vmul.f32 0.003327784, %v7361_v47 }
0x121a   :  { %4308 = vmatprep.mubr.msk.f32.mxu1 %vm5268_vm4, %v5266_v6  ;;  %v3266_v11 = vmul.f32 0.95122945, %v3265_v22 }
0x121b   :  { %v3611_v37 = vadd.f32 %v3610_v9, %v3609_v62  ;;  %v3615_v39 = vadd.f32 %v3614_v57, %v3613_v38  ;;  %v3269_v38 = vmul.f32 %v7063_v14, %v7054_v17 }
0x121d   :  { %v3616_v43 = vmul.f32 1.8, %v3611_v37  ;;  %3632 = vst.msk [vmem:[#allocation8] sm:$0xff] %vm66_vm0, %v3611_v37  ;;  %3633 = vst.msk [vmem:[#allocation9] sm:$0xff] %vm66_vm0, %v3615_v39  ;;  %v3618_v52 = vmul.f32 9.0, %v3615_v39 }
0x121f   :  { %v3617_v50 = vadd.f32 0.01, %v3616_v43  ;;  %v3740_v43 = vld [vmem:[#allocation10] sm:$0xff] }
0x1220   :  { %v3741_v46 = vmul.f32 0.9672161, %v3740_v43 }
0x1221   :  { %v7371_v27 = vadd.f32 %v3618_v52, %v3617_v50  ;;  %v3744_v50 = vld [vmem:[#allocation11] sm:$0xff] }
0x12ec   :  { %v3248_v10 = vpop.f32.mrb[24].mxu1 }
0x12ed   :  { %v3249_v53 = vadd.f32 %v7426_v56, %v3248_v10  ;;  %v3250_v63 = vpop.f32.mrb[25].mxu1 }
0x12ef   :  { %v3267_v62 = vmul.f32 0.048770577, %v3249_v53 }
0x12f1   :  { %v3268_v9 = vadd.f32 %v3267_v62, %v3266_v11  ;;  %v3401_v11 = vmul.f32 %v7154_v33, %v7126_v12  ;;  %v3872_v12 = vld [vmem:[#allocation12] sm:$0xff] }
0x12f3   :  { %v3270_v57 = vsub.f32 %v3268_v9, %v3269_v38  ;;  %v3506_v38 = vld [vmem:[#allocation14 + $0x8] sm:$0xff] }
0x12f5   :  { %v3271_v37 = vsub.f32 %v3270_v57, %v7063_v14  ;;  %3275 = vst.msk [vmem:[#allocation3] sm:$0xff] %vm66_vm0, %v3270_v57  ;;  %v3745_v14 = vmul.f32 0.9966722, %v3744_v50 }
0x12f7   :  { %vm3272_vm10 = vcmp.gt.f32.partialorder %v3271_v37, 0.0  ;;  %v3873_v37 = vmul.f32 0.9672161, %v3872_v12 }
0x12f8   :  { %v4176_v39 = vsel %vm3272_vm10, 1.0, %v5266_v6 }
0x12f9   :  { %3276 = vst.msk [vmem:[#allocation6] sm:$0xff] %vm66_vm0, %v4176_v39  ;;  %3279 = vst.msk [vmem:[#allocation16] sm:$0xff] %vm66_vm0, %v4176_v39 }
0x1300   :  { %v3282_v52 = vld [vmem:[#allocation16] sm:$0xff] }
0x1301   :  { %v7436_v49 = vld [vmem:[#allocation6] sm:$0xff]  ;;  %3379 = vmatmul.mubr.f32.vlgmr.msra.gmra.mrb[26].mxu0 %v3282_v52 }
0x1302   :  { %3636 = vst.msk [vmem:[#allocation15 + $0x8] sm:$0xff] %vm66_vm0, %v7436_v49  ;;  %v3742_v17 = vmul.f32 0.0327839, %v7436_v49  ;;  %v3746_v5 = vmul.f32 0.003327784, %v7436_v49  ;;  %5026 = vmatpush1.bf16.msra.mxu0 %v7205_v59  ;;  %v3411_v59 = vld [vmem:[%s7692_s7] sm:$0xff] }
0x1303   :  { %5027 = vmatprep.subr.bf16.mxu0 %v5265_v3 }
0x1304   :  { %v3743_v29 = vadd.f32 %v3742_v17, %v3741_v46  ;;  %v3747_v28 = vadd.f32 %v3746_v5, %v3745_v14 }
0x1306   :  { %v3748_v42 = vmul.f32 1.8, %v3743_v29  ;;  %3764 = vst.msk [vmem:[#allocation10] sm:$0xff] %vm66_vm0, %v3743_v29  ;;  %3765 = vst.msk [vmem:[#allocation11] sm:$0xff] %vm66_vm0, %v3747_v28  ;;  %5029 = vmatpush1.bf16.msra.mxu0 %v7211_v36  ;;  %v3750_v19 = vmul.f32 9.0, %v3747_v28  ;;  %v3412_v36 = vld [vmem:[%s7692_s7 + $0x8] sm:$0xff] }
0x1307   :  { %5030 = vmatprep.subr.bf16.mxu0 %v5265_v3 }
0x1308   :  { %v3749_v24 = vadd.f32 0.01, %v3748_v42 }
0x1309   :  { %v3638_v26 = vld [vmem:[#allocation15 + $0x8] sm:$0xff] }
0x130a   :  { %4187 = vmatprep.mubr.msk.f32.mxu0 %vm66_vm0, %v3638_v26  ;;  %v7449_v4 = vadd.f32 %v3750_v19, %v3749_v24  ;;  %5032 = vmatpush1.bf16.msra.mxu0 %v7221_v34  ;;  %v7473_v34 = vpack.c.bf16 %v3412_v36, %v3411_v59 }
0x130b   :  { %5033 = vmatprep.subr.bf16.mxu0 %v5265_v3 }
0x130c   :  { %4990 = vmatpush3.bf16.msra.mxu1 %v7473_v34  ;;  %v3756_v59 = vmul.f32 %v7449_v4, %v7436_v49 }
0x130d   :  { %4991 = vmatprep.subr.bf16.mxu1 %v5265_v3 }
0x130e   :  { %5035 = vmatpush1.bf16.msra.mxu0 %v7231_v40  ;;  %v3413_v40 = vld [vmem:[%s7692_s7 + $0x10] sm:$0xff] }
0x130f   :  { %5036 = vmatprep.subr.bf16.mxu0 %v5265_v3 }
0x1312   :  { %5038 = vmatpush1.bf16.msra.mxu0 %v7241_v31  ;;  %v3414_v31 = vld [vmem:[%s7692_s7 + $0x18] sm:$0xff] }
0x1313   :  { %5039 = vmatprep.subr.bf16.mxu0 %v5265_v3 }
0x1316   :  { %5041 = vmatpush1.bf16.msra.mxu0 %v7252_v41  ;;  %v7483_v41 = vpack.c.bf16 %v3414_v31, %v3413_v40 }
0x1317   :  { %5042 = vmatprep.subr.bf16.mxu0 %v5265_v3 }
0x1318   :  { %4993 = vmatpush3.bf16.msra.mxu1 %v7483_v41 }
0x1319   :  { %4994 = vmatprep.subr.bf16.mxu1 %v5265_v3 }
0x131a   :  { %5044 = vmatpush1.bf16.msra.mxu0 %v7262_v60  ;;  %v7490_v60 = vld [vmem:[%s7691_s6] ss:$0 sm:$0xff] }
0x131b   :  { %5045 = vmatprep.subr.bf16.mxu0 %v5265_v3 }
0x131e   :  { %5047 = vmatpush1.bf16.msra.mxu0 %v7272_v23 }
0x131f   :  { %5048 = vmatprep.subr.bf16.mxu0 %v5265_v3 }
0x1322   :  { %5050 = vmatpush1.bf16.msra.mxu0 %v7282_v21  ;;  %v3397_v21 = vld [vmem:[#allocation4] sm:$0xff] }
0x1323   :  { %5051 = vmatprep.subr.bf16.mxu0 %v5265_v3  ;;  %v3398_v22 = vmul.f32 0.95122945, %v3397_v21 }
0x1326   :  { %5053 = vmatpush1.bf16.msra.mxu0 %v7291_v13 }
0x1327   :  { %5084 = vmatprep.subr.bf16.mxu0 %v5265_v3 }
0x13d4   :  { %v3380_v23 = vpop.f32.mrb[26].mxu0 }
0x13d5   :  { %v3381_v13 = vadd.f32 %v7490_v60, %v3380_v23  ;;  %v3382_v10 = vpop.f32.mrb[27].mxu0 }
0x13d7   :  { %v3399_v53 = vmul.f32 0.048770577, %v3381_v13 }
0x13d9   :  { %v3400_v63 = vadd.f32 %v3399_v53, %v3398_v22 }
0x13db   :  { %v3402_v62 = vsub.f32 %v3400_v63, %v3401_v11 }
0x13dd   :  { %v3403_v9 = vsub.f32 %v3402_v62, %v7154_v33  ;;  %3407 = vst.msk [vmem:[#allocation4] sm:$0xff] %vm66_vm0, %v3402_v62  ;;  %3498 = vst.msk [vmem:[#allocation17 + $0xd0] sm:$0xff] %vm66_vm0, %v3402_v62  ;;  %4309 = vmatmul.mubr.msk.f32.vlgmr.msra.gmra.mrb[26].mxu1 %vm66_vm0, %v3402_v62  ;;  %v3876_v33 = vld [vmem:[#allocation13] sm:$0xff] }
0x13de   :  { %4996 = vmatpush1.bf16.msra.mxu1 %v7080_v61  ;;  %4184 = vmatprep.mubr.msk.f32.mxu1 %vm66_vm0, %v3506_v38  ;;  %v3877_v43 = vmul.f32 0.9966722, %v3876_v33 }
0x13df   :  { %vm3404_vm11 = vcmp.gt.f32.partialorder %v3403_v9, 0.0  ;;  %4997 = vmatprep.subr.bf16.mxu1 %v5265_v3 }
0x13e0   :  { %v4179_v57 = vsel %vm3404_vm11, 1.0, %v5266_v6 }
0x13e1   :  { %3408 = vst.msk [vmem:[#allocation7] sm:$0xff] %vm66_vm0, %v4179_v57  ;;  %3497 = vst.msk [vmem:[#allocation17 + $0xc8] sm:$0xff] %vm66_vm0, %v4179_v57 }
0x13e2   :  { %4999 = vmatpush1.bf16.msra.mxu1 %v7094_v8 }
0x13e3   :  { %5000 = vmatprep.subr.bf16.mxu1 %v5265_v3 }
0x13e6   :  { %5002 = vmatpush1.bf16.msra.mxu1 %v7107_v2 }
0x13e7   :  { %5003 = vmatprep.subr.bf16.mxu1 %v5265_v3 }
0x13e8   :  { %v7509_v61 = vld [vmem:[#allocation7] sm:$0xff] }
0x13e9   :  { %3768 = vst.msk [vmem:[#allocation16 + $0x8] sm:$0xff] %vm66_vm0, %v7509_v61  ;;  %v3874_v39 = vmul.f32 0.0327839, %v7509_v61  ;;  %v3878_v50 = vmul.f32 0.003327784, %v7509_v61 }
0x13ea   :  { %5005 = vmatpush1.bf16.msra.mxu1 %v7117_v45  ;;  %v3505_v45 = vld [vmem:[#allocation14] sm:$0xff] }
0x13eb   :  { %5006 = vmatprep.subr.bf16.mxu1 %v5265_v3  ;;  %v3875_v8 = vadd.f32 %v3874_v39, %v3873_v37  ;;  %v3879_v2 = vadd.f32 %v3878_v50, %v3877_v43 }
0x13ed   :  { %v3880_v52 = vmul.f32 1.8, %v3875_v8  ;;  %3896 = vst.msk [vmem:[#allocation12] sm:$0xff] %vm66_vm0, %v3875_v8  ;;  %3897 = vst.msk [vmem:[#allocation13] sm:$0xff] %vm66_vm0, %v3879_v2  ;;  %v3882_v17 = vmul.f32 9.0, %v3879_v2 }
0x13ee   :  { %5008 = vmatpush1.bf16.msra.mxu1 %v7133_v55 }
0x13ef   :  { %5009 = vmatprep.subr.bf16.mxu1 %v5265_v3  ;;  %v3881_v46 = vadd.f32 0.01, %v3880_v52 }
0x13f0   :  { %v3770_v55 = vld [vmem:[#allocation16 + $0x8] sm:$0xff] }
0x13f1   :  { %v7521_v14 = vadd.f32 %v3882_v17, %v3881_v46 }
0x13f2   :  { %5011 = vmatpush1.bf16.msra.mxu1 %v7145_v35  ;;  %v7558_v35 = vld [vmem:[%s7693_s8] ss:$0 sm:$0xff]  ;;  %s5269_s8 = smov [#allocation19]  }
0x13f3   :  { %5012 = vmatprep.subr.bf16.mxu1 %v5265_v3  ;;  %3986 = vst.msk [vmem:[#allocation17 + $0xf8] sm:$0xff] %vm66_vm0, %v7521_v14  ;;  %v3888_v22 = vmul.f32 %v7521_v14, %v7509_v61  ;;  %s4020_s26 = sshll.u32 %s5269_s8, 4  ;;  %s4021_s26 = int_to_ptr.vmem [resolvable:$true] %s4020_s26 }
0x13f4   :  { %s5103_s29 = scalar_lea.vmem %s4021_s26, 128  ;;  %p5108_p1 = scmp.lt.s32.totalorder %s4021_s26, %s4021_s26 }
0x13f5   :  { %p5104_p0 = scmp.ne.s32.totalorder %s4021_s26, %s5103_s29  ;;  %p5109_p2 = scmp.lt.s32.totalorder %s5103_s29, %s5103_s29 }
0x13f6   :  { %5014 = vmatpush1.bf16.msra.mxu1 %v7157_v16 }
0x13f7   :  { %5015 = vmatprep.subr.bf16.mxu1 %v5265_v3  ;;  %p5110_p3 = por %p5109_p2, %p5108_p1 }
0x13f9   :  { %p5111_p4 = pnand %p5110_p3, %p5104_p0 }
0x13fa   :  { %5017 = vmatpush1.bf16.msra.mxu1 %v7169_v48 }
0x13fb   :  { %5018 = vmatprep.subr.bf16.mxu1 %v5265_v3 }
0x13fe   :  { %5020 = vmatpush1.bf16.msra.mxu1 %v7179_v15 }
0x13ff   :  { %5021 = vmatprep.subr.bf16.mxu1 %v5265_v3 }
0x1402   :  { %5023 = vmatpush1.bf16.msra.mxu1 %v7189_v54 }
0x1403   :  { %5054 = vmatprep.subr.bf16.mxu1 %v5265_v3 }
0x1405   :  { %3602 = vmatmul.mubr.f32.vlgmr.msra.gmra.mrb[28].mxu1 %v3505_v45 }
0x1406   :  { %4190 = vmatprep.mubr.msk.f32.mxu1 %vm66_vm0, %v3770_v55  ;;  %5056 = vmatpush1.bf16.msra.mxu1 %v7305_v44  ;;  %v3620_v44 = vld [vmem:[#allocation2] sm:$0xff] }
0x1407   :  { %5057 = vmatprep.subr.bf16.mxu1 %v5265_v3 }
0x140a   :  { %5059 = vmatpush1.bf16.msra.mxu1 %v7311_v51 }
0x140b   :  { %5060 = vmatprep.subr.bf16.mxu1 %v5265_v3 }
0x140e   :  { %5062 = vmatpush1.bf16.msra.mxu1 %v7321_v20 }
0x140f   :  { %5063 = vmatprep.subr.bf16.mxu1 %v5265_v3 }
0x1412   :  { %5065 = vmatpush1.bf16.msra.mxu1 %v7331_v25  ;;  %v3621_v25 = vmul.f32 0.95122945, %v3620_v44 }
0x1413   :  { %5066 = vmatprep.subr.bf16.mxu1 %v5265_v3 }
0x1416   :  { %5068 = vmatpush1.bf16.msra.mxu1 %v7341_v18 }
0x1417   :  { %5069 = vmatprep.subr.bf16.mxu1 %v5265_v3 }
0x141a   :  { %5071 = vmatpush1.bf16.msra.mxu1 %v7379_v30 }
0x141b   :  { %5072 = vmatprep.subr.bf16.mxu1 %v5265_v3 }
0x141e   :  { %5074 = vmatpush1.bf16.msra.mxu1 %v7389_v1  ;;  %v3624_v1 = vmul.f32 %v7371_v27, %v7361_v47 }
0x141f   :  { %5075 = vmatprep.subr.bf16.mxu1 %v5265_v3 }
0x1422   :  { %5077 = vmatpush1.bf16.msra.mxu1 %v7399_v7 }
0x1423   :  { %5078 = vmatprep.subr.bf16.mxu1 %v5265_v3 }
0x1426   :  { %5080 = vmatpush1.bf16.msra.mxu1 %v7409_v0 }
0x1427   :  { %5081 = vmatprep.subr.bf16.mxu1 %v5265_v3 }
0x142a   :  { %5083 = vmatpush1.bf16.msra.mxu1 %v7418_v32 }
0x14b0   :  { %v3491_v16 = vpop.f32.mrb[26].mxu1 }
0x14b1   :  { %v3492_v48 = vadd.f32 %v7558_v35, %v3491_v16  ;;  %v4310_v15 = vpop.f32.mrb[27].mxu1 }
0x14b3   :  { %3496 = vst.msk [vmem:[#allocation17 + $0xc0] sm:$0xff] %vm573_vm6, %v3492_v48 }
0x14d8   :  { %v3603_v54 = vpop.f32.mrb[28].mxu1 }
0x14d9   :  { %v3604_v51 = vadd.f32 %v7351_v58, %v3603_v54  ;;  %v3605_v20 = vpop.f32.mrb[29].mxu1 }
0x14db   :  { %v3622_v18 = vmul.f32 0.048770577, %v3604_v51 }
0x14dd   :  { %v3623_v30 = vadd.f32 %v3622_v18, %v3621_v25 }
0x14df   :  { %v3625_v7 = vsub.f32 %v3623_v30, %v3624_v1 }
0x14e1   :  { %v3626_v0 = vsub.f32 %v3625_v7, %v7371_v27  ;;  %3630 = vst.msk [vmem:[#allocation2] sm:$0xff] %vm66_vm0, %v3625_v7  ;;  %v3752_v27 = vld [vmem:[#allocation3] sm:$0xff] }
0x14e2   :  { %v3753_v24 = vmul.f32 0.95122945, %v3752_v27 }
0x14e3   :  { %vm3627_vm12 = vcmp.gt.f32.partialorder %v3626_v0, 0.0 }
0x14e4   :  { %v4185_v32 = vsel %vm3627_vm12, 1.0, %v5266_v6 }
0x14e5   :  { %3631 = vst.msk [vmem:[#allocation5] sm:$0xff] %vm66_vm0, %v4185_v32  ;;  %3634 = vst.msk [vmem:[#allocation15] sm:$0xff] %vm66_vm0, %v4185_v32 }
0x14e8   :  { %v3990_v58 = vld [vmem:[#allocation2] sm:$0xff] }
0x14e9   :  { %3991 = vst.msk [vmem:[#allocation19] sm:$0xff] %vm66_vm0, %v3990_v58 }
0x14ec   :  { %v3637_v5 = vld [vmem:[#allocation15] sm:$0xff]  ;;  %v3996_v29 = vld [vmem:[#allocation5] sm:$0xff] }
0x14ed   :  { %3734 = vmatmul.mubr.f32.vlgmr.msra.gmra.mrb[28].mxu0 %v3637_v5  ;;  %3997 = vst.msk [vmem:[#allocation24] sm:$0xff] %vm66_vm0, %v3996_v29 }
0x14ee   :  { %5086 = vmatpush3.bf16.msra.mxu0 %v7473_v34  ;;  %4319 = vmatprep.mubr.msk.f32.mxu0 %vm5268_vm4, %v5266_v6 }
0x14ef   :  { %5087 = vmatprep.subr.bf16.mxu0 %v5265_v3 }
0x14f2   :  { %5089 = vmatpush3.bf16.msra.mxu0 %v7483_v41  ;;  %v3884_v41 = vld [vmem:[#allocation4] sm:$0xff] }
0x14f3   :  { %v3885_v21 = vmul.f32 0.95122945, %v3884_v41 }
0x15c0   :  { %v3735_v47 = vpop.f32.mrb[28].mxu0 }
0x15c1   :  { %v3736_v28 = vadd.f32 %v7426_v56, %v3735_v47  ;;  %v3737_v42 = vpop.f32.mrb[29].mxu0 }
0x15c3   :  { %v3754_v19 = vmul.f32 0.048770577, %v3736_v28 }
0x15c5   :  { %v3755_v26 = vadd.f32 %v3754_v19, %v3753_v24 }
0x15c7   :  { %v3757_v36 = vsub.f32 %v3755_v26, %v3756_v59 }
0x15c9   :  { %v3758_v34 = vsub.f32 %v3757_v36, %v7449_v4  ;;  %3762 = vst.msk [vmem:[#allocation3] sm:$0xff] %vm66_vm0, %v3757_v36 }
0x15cb   :  { %vm3759_vm4 = vcmp.gt.f32.partialorder %v3758_v34, 0.0 }
0x15cc   :  { %v4188_v3 = vsel %vm3759_vm4, 1.0, %v5266_v6 }
0x15cd   :  { %3763 = vst.msk [vmem:[#allocation6] sm:$0xff] %vm66_vm0, %v4188_v3  ;;  %3766 = vst.msk [vmem:[#allocation16] sm:$0xff] %vm66_vm0, %v4188_v3 }
0x15d0   :  { %v3992_v56 = vld [vmem:[#allocation3] sm:$0xff] }
0x15d1   :  { %3993 = vst.msk [vmem:[#allocation21] sm:$0xff] %vm66_vm0, %v3992_v56 }
0x15d4   :  { %v3769_v40 = vld [vmem:[#allocation16] sm:$0xff] }
0x15d5   :  { %v3998_v31 = vld [vmem:[#allocation6] sm:$0xff]  ;;  %3866 = vmatmul.mubr.f32.vlgmr.msra.gmra.mrb[30].mxu1 %v3769_v40 }
0x15d6   :  { %3999 = vst.msk [vmem:[#allocation25] sm:$0xff] %vm66_vm0, %v3998_v31 }
0x16a8   :  { %v3867_v49 = vpop.f32.mrb[30].mxu1 }
0x16a9   :  { %v3868_v4 = vadd.f32 %v7490_v60, %v3867_v49  ;;  %v3869_v23 = vpop.f32.mrb[31].mxu1 }
0x16ab   :  { %v3886_v13 = vmul.f32 0.048770577, %v3868_v4 }
0x16ad   :  { %v3887_v10 = vadd.f32 %v3886_v13, %v3885_v21 }
0x16af   :  { %v3889_v53 = vsub.f32 %v3887_v10, %v3888_v22 }
0x16b1   :  { %v3890_v63 = vsub.f32 %v3889_v53, %v7521_v14  ;;  %3894 = vst.msk [vmem:[#allocation4] sm:$0xff] %vm66_vm0, %v3889_v53  ;;  %3985 = vst.msk [vmem:[#allocation17 + $0xf0] sm:$0xff] %vm66_vm0, %v3889_v53  ;;  %4320 = vmatmul.mubr.msk.f32.vlgmr.msra.gmra.mrb[30].mxu0 %vm66_vm0, %v3889_v53 }
0x16b3   :  { %vm3891_vm13 = vcmp.gt.f32.partialorder %v3890_v63, 0.0 }
0x16b4   :  { %v4191_v11 = vsel %vm3891_vm13, 1.0, %v5266_v6 }
0x16b5   :  { %3895 = vst.msk [vmem:[#allocation7] sm:$0xff] %vm66_vm0, %v4191_v11  ;;  %3984 = vst.msk [vmem:[#allocation17 + $0xe8] sm:$0xff] %vm66_vm0, %v4191_v11 }
0x16b8   :  { %v3994_v60 = vld [vmem:[#allocation4] sm:$0xff] }
0x16b9   :  { %3995 = vst.msk [vmem:[#allocation22] sm:$0xff] %vm66_vm0, %v3994_v60 }
0x16bc   :  { %v4000_v62 = vld [vmem:[#allocation7] sm:$0xff] }
0x16bd   :  { %4001 = vst.msk [vmem:[#allocation27] sm:$0xff] %vm66_vm0, %v4000_v62 }
0x16be   :  { %5114 = shalt.err (!%p5111_p4)
}
0x16bf   :  { %s5115_s30 = scalar_lea.hbm %s7701_s16, 128 }
0x16c0   :  { %p5116_p5 = scmp.ne.s32.totalorder %s7701_s16, %s5115_s30  ;;  %p5119_p6 = scmp.lt.u32.totalorder %s5115_s30, %s7701_s16 }
0x16c2   :  { %p5121_p7 = pnand %p5119_p6, %p5116_p5 }
0x16c4   :  { %5124 = shalt.err (!%p5121_p7)
}
0x16c5   :  { %4023 = dma.vmem_to_hbm [thread:$0]  %s4021_s26, 128, %s7701_s16, [#allocation20]  }
0x16c6   :  { %s5125_s9 = scalar_lea.vmem %s4041_s28, 128  ;;  %p5130_p9 = scmp.lt.s32.totalorder %s4041_s28, %s4041_s28 }
0x16c7   :  { %p5126_p8 = scmp.ne.s32.totalorder %s4041_s28, %s5125_s9  ;;  %p5131_p10 = scmp.lt.s32.totalorder %s5125_s9, %s5125_s9 }
0x16c9   :  { %p5132_p11 = por %p5131_p10, %p5130_p9 }
0x16cb   :  { %p5133_p12 = pnand %p5132_p11, %p5126_p8 }
0x16cd   :  { %5136 = shalt.err (!%p5133_p12)
}
0x16ce   :  { %s5137_s11 = scalar_lea.hbm %s7703_s18, 128 }
0x16cf   :  { %p5138_p13 = scmp.ne.s32.totalorder %s7703_s18, %s5137_s11  ;;  %p5141_p0 = scmp.lt.u32.totalorder %s5137_s11, %s7703_s18 }
0x16d1   :  { %p5143_p1 = pnand %p5141_p0, %p5138_p13 }
0x16d3   :  { %5146 = shalt.err (!%p5143_p1)
}
0x16d4   :  { %4043 = dma.vmem_to_hbm [thread:$0]  %s4041_s28, 128, %s7703_s18, [#allocation23]  }
0x16d5   :  { %s5271_s7 = smov [#allocation25]  }
0x16d6   :  { %s4060_s8 = sshll.u32 %s5271_s7, 4  ;;  %s4061_s8 = int_to_ptr.vmem [resolvable:$true] %s4060_s8 }
0x16d7   :  { %s5147_s26 = scalar_lea.vmem %s4061_s8, 128  ;;  %p5152_p3 = scmp.lt.s32.totalorder %s4061_s8, %s4061_s8 }
0x16d8   :  { %p5148_p2 = scmp.ne.s32.totalorder %s4061_s8, %s5147_s26  ;;  %p5153_p4 = scmp.lt.s32.totalorder %s5147_s26, %s5147_s26 }
0x16da   :  { %p5154_p5 = por %p5153_p4, %p5152_p3 }
0x16dc   :  { %p5155_p6 = pnand %p5154_p5, %p5148_p2 }
0x16de   :  { %5158 = shalt.err (!%p5155_p6)
}
0x16df   :  { %s5159_s4 = scalar_lea.hbm %s7705_s20, 128 }
0x16e0   :  { %p5160_p7 = scmp.ne.s32.totalorder %s7705_s20, %s5159_s4  ;;  %p5163_p8 = scmp.lt.u32.totalorder %s5159_s4, %s7705_s20 }
0x16e2   :  { %p5165_p9 = pnand %p5163_p8, %p5160_p7 }
0x16e4   :  { %5168 = shalt.err (!%p5165_p9)
}
0x16e5   :  { %4063 = dma.vmem_to_hbm [thread:$0]  %s4061_s8, 128, %s7705_s20, [#allocation26]  }
0x16e6   :  { %s5272_s23 = smov [#allocation21]   ;;  %s5273_s12 = smov [#allocation24]  }
0x16e7   :  { %s4030_s5 = sshll.u32 %s5272_s23, 4  ;;  %s4050_s13 = sshll.u32 %s5273_s12, 4  ;;  %s4031_s5 = int_to_ptr.vmem [resolvable:$true] %s4030_s5  ;;  %s4051_s13 = int_to_ptr.vmem [resolvable:$true] %s4050_s13 }
0x16e8   :  { %s5169_s9 = scalar_lea.vmem %s4031_s5, 128  ;;  %p5174_p11 = scmp.lt.s32.totalorder %s4031_s5, %s4031_s5 }
0x16e9   :  { %p5170_p10 = scmp.ne.s32.totalorder %s4031_s5, %s5169_s9  ;;  %p5175_p12 = scmp.lt.s32.totalorder %s5169_s9, %s5169_s9 }
0x16eb   :  { %p5176_p13 = por %p5175_p12, %p5174_p11 }
0x16ed   :  { %p5177_p0 = pnand %p5176_p13, %p5170_p10 }
0x16ef   :  { %5180 = shalt.err (!%p5177_p0)
}
0x16f0   :  { %s5181_s11 = scalar_lea.hbm %s7702_s17, 128 }
0x16f1   :  { %p5182_p1 = scmp.ne.s32.totalorder %s7702_s17, %s5181_s11  ;;  %p5185_p2 = scmp.lt.u32.totalorder %s5181_s11, %s7702_s17 }
0x16f3   :  { %p5187_p3 = pnand %p5185_p2, %p5182_p1 }
0x16f5   :  { %5190 = shalt.err (!%p5187_p3)
}
0x16f6   :  { %4033 = dma.vmem_to_hbm [thread:$0]  %s4031_s5, 128, %s7702_s17, [#allocation20]  }
0x16f7   :  { %s5191_s6 = scalar_lea.vmem %s4051_s13, 128  ;;  %p5196_p5 = scmp.lt.s32.totalorder %s4051_s13, %s4051_s13 }
0x16f8   :  { %p5192_p4 = scmp.ne.s32.totalorder %s4051_s13, %s5191_s6  ;;  %p5197_p6 = scmp.lt.s32.totalorder %s5191_s6, %s5191_s6 }
0x16fa   :  { %p5198_p7 = por %p5197_p6, %p5196_p5 }
0x16fc   :  { %p5199_p8 = pnand %p5198_p7, %p5192_p4 }
0x16fe   :  { %5202 = shalt.err (!%p5199_p8)
}
0x16ff   :  { %s5203_s26 = scalar_lea.hbm %s7704_s19, 128 }
0x1700   :  { %p5204_p9 = scmp.ne.s32.totalorder %s7704_s19, %s5203_s26  ;;  %p5207_p10 = scmp.lt.u32.totalorder %s5203_s26, %s7704_s19 }
0x1702   :  { %p5209_p11 = pnand %p5207_p10, %p5204_p9 }
0x1704   :  { %5212 = shalt.err (!%p5209_p11)
}
0x1705   :  { %4053 = dma.vmem_to_hbm [thread:$0]  %s4051_s13, 128, %s7704_s19, [#allocation23]  }
0x1706   :  { %s5274_s22 = smov [#allocation27]  }
0x1707   :  { %s4070_s18 = sshll.u32 %s5274_s22, 4  ;;  %s4071_s18 = int_to_ptr.vmem [resolvable:$true] %s4070_s18 }
0x1708   :  { %s5213_s28 = scalar_lea.vmem %s4071_s18, 128  ;;  %p5218_p13 = scmp.lt.s32.totalorder %s4071_s18, %s4071_s18 }
0x1709   :  { %p5214_p12 = scmp.ne.s32.totalorder %s4071_s18, %s5213_s28  ;;  %p5219_p0 = scmp.lt.s32.totalorder %s5213_s28, %s5213_s28 }
0x170b   :  { %p5220_p1 = por %p5219_p0, %p5218_p13 }
0x170d   :  { %p5221_p2 = pnand %p5220_p1, %p5214_p12 }
0x170f   :  { %5224 = shalt.err (!%p5221_p2)
}
0x1710   :  { %s5225_s5 = scalar_lea.hbm %s7706_s21, 128 }
0x1711   :  { %p5226_p3 = scmp.ne.s32.totalorder %s7706_s21, %s5225_s5  ;;  %p5229_p4 = scmp.lt.u32.totalorder %s5225_s5, %s7706_s21 }
0x1713   :  { %p5231_p5 = pnand %p5229_p4, %p5226_p3 }
0x1715   :  { %5234 = shalt.err (!%p5231_p5)
}
0x1716   :  { %4073 = dma.vmem_to_hbm [thread:$0]  %s4071_s18, 128, %s7706_s21, [#allocation26]  }
0x1717   :  { %s5275_s11 = smov [#allocation17]  }
0x1718   :  { %s4007_s24 = sshll.u32 %s5275_s11, 4  ;;  %s4008_s24 = int_to_ptr.vmem [resolvable:$true] %s4007_s24 }
0x1719   :  { %s5235_s2 = scalar_lea.vmem %s4008_s24, 4096  ;;  %p5240_p7 = scmp.lt.s32.totalorder %s4008_s24, %s4008_s24 }
0x171a   :  { %p5236_p6 = scmp.ne.s32.totalorder %s4008_s24, %s5235_s2  ;;  %p5241_p8 = scmp.lt.s32.totalorder %s5235_s2, %s5235_s2 }
0x171c   :  { %p5242_p9 = por %p5241_p8, %p5240_p7 }
0x171e   :  { %p5243_p10 = pnand %p5242_p9, %p5236_p6 }
0x1784   :  { %v3978_v6 = vpop.f32.mrb[30].mxu0 }
0x1785   :  { %v3979_v9 = vadd.f32 %v7558_v35, %v3978_v6  ;;  %v4321_v38 = vpop.f32.mrb[31].mxu0 }
0x1787   :  { %3983 = vst.msk [vmem:[#allocation17 + $0xe0] sm:$0xff] %vm573_vm6, %v3979_v9 }
0x1788   :  { %5246 = shalt.err (!%p5243_p10)
}
0x1789   :  { %s5247_s21 = scalar_lea.hbm %s7700_s15, 4096 }
0x178a   :  { %p5248_p11 = scmp.ne.s32.totalorder %s7700_s15, %s5247_s21  ;;  %p5251_p12 = scmp.lt.u32.totalorder %s5247_s21, %s7700_s15 }
0x178c   :  { %p5253_p13 = pnand %p5251_p12, %p5248_p11 }
0x178e   :  { %5256 = shalt.err (!%p5253_p13)
}
0x178f   :  { %s5276_s8 = smov 512   ;;  %s5277_s26 = smov 32  }
0x1790   :  { %4013 = dma.vmem_to_hbm [thread:$0]  %s4008_s24, 4096, %s7700_s15, [#allocation18], %s5276_s8, %s5276_s8, %s5277_s26  }
0x1791   :  { %5257 = dma.done.wait [#allocation18], 4096  }
0x1792   :  { %5258 = vsyncadd [#allocation18], 4294963200 }
0x1793   :  { %5259 = dma.done.wait [#allocation20], 256  }
0x1794   :  { %5260 = vsyncadd [#allocation20], 4294967040 }
0x1795   :  { %5261 = dma.done.wait [#allocation23], 256  }
0x1796   :  { %5262 = vsyncadd [#allocation23], 4294967040 }
0x1797   :  { %5263 = dma.done.wait [#allocation26], 256  }
0x1798   :  { %5264 = vsyncadd [#allocation26], 4294967040 }
0x1799   :  { %4095 = vsyncpa [#allocation18], 1 }
0x179a   :  { %4096 = vsyncpa [#allocation20], 1 }
0x179b   :  { %4097 = vsyncpa [#allocation23], 1 }
0x179c   :  { %4098 = vsyncpa [#allocation26], 1 }

</bundles_post_ra>
